<compile_context>
chip_gen: v5e
topology: v5e:2x2
jax: 0.10.0
libtpu: 0.0.40
codegen_flags: <defaults>
</compile_context>

<pallas_src>
import functools

import jax
import jax.numpy as jnp
from jax.experimental import pallas as pl
from jax.experimental.pallas import tpu as pltpu


def _round_up(x, m):
    return (x + m - 1) // m * m


def basic_block_kernel(x_ref, w1_ref, w2_ref, sb_ref, out_ref,
                       hacc_ref, hid_ref, *, true_h):
    # x_ref   : (Hp+4, Wxp, Cp)  compute-dtype input, zero-padded by 2 rows/cols
    # w1_ref  : (3, 3, Cp, Cp)   conv1 weights (HWIO, zero padded channels)
    # w2_ref  : (3, 3, Cp, Cp)   conv2 weights
    # sb_ref  : (4, Cp) f32      rows = [scale1, bias1, scale2, bias2]
    # out_ref : (TH, W, Cp)      one output row strip (lane-dense)
    # hacc_ref: (HM*WC, Cp) f32  VMEM conv1 accumulator (HM = TH+2 halo rows)
    # hid_ref : (HM, WC, Cp)     VMEM hidden activation (compute dtype),
    #                            already zero-padded for conv2
    TH, W, Cp = out_ref.shape
    HM, WC, _ = hid_ref.shape

    row0 = pl.multiple_of(pl.program_id(1) * TH, TH)

    # ---- conv1 (3x3, pad=1): 9 shifted matmuls accumulated in VMEM ----------
    # Computed over HM = TH+2 rows (1-row halo each side) and WC >= W+2 cols so
    # that, after masking, the result *is* conv2's zero-padded input.
    for kh in range(3):
        for kw in range(3):
            patch = x_ref[pl.ds(row0 + kh, HM), pl.ds(kw, WC), :]
            patch = patch.reshape(HM * WC, Cp)
            tap = jnp.dot(patch, w1_ref[kh, kw],
                          preferred_element_type=jnp.float32)
            if kh == 0 and kw == 0:
                hacc_ref[...] = tap          # first tap initialises (no memset)
            else:
                hacc_ref[...] += tap

    # ---- bn1 + relu + halo-row mask, one full aligned store -----------------
    h = hacc_ref[...]
    h = jnp.maximum(h * sb_ref[0:1, :] + sb_ref[1:2, :], 0.0)
    # flat index i*WC+j corresponds to hidden-pad row hp = row0 + i; rows with
    # hp < 1 or hp > true_h are conv2's zero padding (no div/mod needed).
    idx = jax.lax.broadcasted_iota(jnp.int32, (HM * WC, 1), 0)
    gidx = row0 * WC + idx
    row_ok = (gidx >= WC) & (gidx < (true_h + 1) * WC)
    h = jnp.where(row_ok, h, 0.0)
    hid_ref[...] = h.reshape(HM, WC, Cp).astype(hid_ref.dtype)
    # left / right zero-pad columns for conv2 (cols 0 and W+1); cols >= W+2
    # are never read by conv2.
    zcol = jnp.zeros((HM, 1, Cp), hid_ref.dtype)
    hid_ref[:, 0:1, :] = zcol
    hid_ref[:, W + 1:W + 2, :] = zcol

    # ---- conv2 (3x3, pad=1): small register accumulator for one strip -------
    acc = jnp.zeros((TH * W, Cp), jnp.float32)
    for kh in range(3):
        for kw in range(3):
            patch = hid_ref[kh:kh + TH, kw:kw + W, :].reshape(TH * W, Cp)
            acc += jnp.dot(patch, w2_ref[kh, kw],
                           preferred_element_type=jnp.float32)

    # ---- bn2 + residual add (identity = x) + relu, fused per strip ----------
    out = acc * sb_ref[2:3, :] + sb_ref[3:4, :]
    identity = x_ref[pl.ds(row0 + 2, TH), pl.ds(2, W), :].reshape(TH * W, Cp)
    out = jnp.maximum(out + identity.astype(jnp.float32), 0.0)
    out_ref[...] = out.reshape(TH, W, Cp).astype(out_ref.dtype)


@functools.partial(jax.jit, static_argnames=("compute_dtype", "row_tile"))
def basic_block(x_nchw, w1, g1, be1, m1, v1, w2, g2, be2, m2, v2,
                eps=1e-5, *, compute_dtype=jnp.bfloat16, row_tile=8):
    """x_nchw: (N, C, H, W) float32; conv weights in PyTorch OIHW layout."""
    N, Cin, H, W = x_nchw.shape
    Cout = w1.shape[0]
    assert Cin == Cout, "downsample=None requires inchannel == outchannel"

    LANE = 128
    Cp = _round_up(max(Cin, Cout), LANE)     # lane-dense channel padding
    TH = row_tile                            # output rows per grid step
    Hp = _round_up(H, TH)
    R = Hp // TH
    WC = _round_up(W + 2, 8)                 # hidden width (sublane aligned)
    Wxp = WC + 2                             # padded input width

    # NCHW -> NHWC, cast for the MXU, pad channels to Cp and spatially by 2
    # (covers conv1 pad + conv2 halo for every strip).
    x = jnp.transpose(x_nchw, (0, 2, 3, 1)).astype(compute_dtype)
    xp = jnp.zeros((N, Hp + 4, Wxp, Cp), compute_dtype)
    xp = xp.at[:, 2:2 + H, 2:2 + W, :Cin].set(x)

    def prep_w(w):
        hwio = jnp.transpose(w, (2, 3, 1, 0)).astype(compute_dtype)
        wp_ = jnp.zeros((3, 3, Cp, Cp), compute_dtype)
        return wp_.at[:, :, :hwio.shape[2], :hwio.shape[3]].set(hwio)

    w1p, w2p = prep_w(w1), prep_w(w2)

    # Fold eval-mode BN into per-channel scale/bias; zero on padded channels.
    s1 = g1 / jnp.sqrt(v1 + eps)
    s2 = g2 / jnp.sqrt(v2 + eps)
    sb = jnp.zeros((4, Cp), jnp.float32)
    sb = sb.at[0, :Cout].set(s1).at[1, :Cout].set(be1 - m1 * s1)
    sb = sb.at[2, :Cout].set(s2).at[3, :Cout].set(be2 - m2 * s2)

    kernel = functools.partial(basic_block_kernel, true_h=H)
    out = pl.pallas_call(
        kernel,
        out_shape=jax.ShapeDtypeStruct((N, Hp, W, Cp), x_nchw.dtype),
        grid_spec=pltpu.PrefetchScalarGridSpec(
            num_scalar_prefetch=0,
            grid=(N, R),
            in_specs=[
                # full padded image of batch element n; index ignores r so the
                # block stays resident across the row-strip axis.
                pl.BlockSpec((None, Hp + 4, Wxp, Cp), lambda n, r: (n, 0, 0, 0)),
                # grid-invariant weights / packed scale+bias (fetched once).
                pl.BlockSpec((3, 3, Cp, Cp), lambda n, r: (0, 0, 0, 0)),
                pl.BlockSpec((3, 3, Cp, Cp), lambda n, r: (0, 0, 0, 0)),
                pl.BlockSpec((4, Cp), lambda n, r: (0, 0)),
            ],
            out_specs=pl.BlockSpec((None, TH, W, Cp), lambda n, r: (n, r, 0, 0)),
            scratch_shapes=[
                pltpu.VMEM(((TH + 2) * WC, Cp), jnp.float32),
                pltpu.VMEM((TH + 2, WC, Cp), compute_dtype),
            ],
        ),
        compiler_params=pltpu.CompilerParams(
            dimension_semantics=("parallel", "parallel")),
    )(xp, w1p, w2p, sb)

    out = out[:, :H, :, :Cout]               # drop row / channel padding
    return jnp.transpose(out, (0, 3, 1, 2))  # back to PyTorch NCHW


def reference_basic_block(x, w1, g1, be1, m1, v1, w2, g2, be2, m2, v2,
                          eps=1e-5, compute_dtype=None):
    """Plain-JAX reference (NCHW, eval-mode BN). If compute_dtype is given,
    conv inputs and the conv1->conv2 intermediate are rounded to it (matching
    the kernel's MXU precision); accumulation stays f32."""
    def q(a):
        return a.astype(compute_dtype).astype(jnp.float32) if compute_dtype else a

    def conv3x3(inp, w):
        return jax.lax.conv_general_dilated(
            inp, w, window_strides=(1, 1), padding=((1, 1), (1, 1)),
            dimension_numbers=("NCHW", "OIHW", "NCHW"))

    def bn(inp, g, b, m, v):
        s = g / jnp.sqrt(v + eps)
        return inp * s.reshape(1, -1, 1, 1) + (b - m * s).reshape(1, -1, 1, 1)

    xq, w1q, w2q = q(x), q(w1), q(w2)
    identity = xq
    out = conv3x3(xq, w1q)
    out = jnp.maximum(bn(out, g1, be1, m1, v1), 0.0)
    out = q(out)                      # kernel stores the hidden act in bf16
    out = conv3x3(out, w2q)
    out = bn(out, g2, be2, m2, v2)
    out = out + identity
    return jnp.maximum(out, 0.0)


if __name__ == "__main__":
    key = jax.random.PRNGKey(0)
    N, C, H, W = 2, 8, 16, 16          # inchannel == outchannel, stride=1
    ks = jax.random.split(key, 11)

    x = jax.random.normal(ks[0], (N, C, H, W), jnp.float32)
    w1 = jax.random.normal(ks[1], (C, C, 3, 3), jnp.float32) * 0.1
    w2 = jax.random.normal(ks[2], (C, C, 3, 3), jnp.float32) * 0.1
    g1 = 1.0 + 0.1 * jax.random.normal(ks[3], (C,), jnp.float32)
    be1 = 0.1 * jax.random.normal(ks[4], (C,), jnp.float32)
    m1 = 0.1 * jax.random.normal(ks[5], (C,), jnp.float32)
    v1 = 1.0 + 0.1 * jax.random.uniform(ks[6], (C,), jnp.float32)
    g2 = 1.0 + 0.1 * jax.random.normal(ks[7], (C,), jnp.float32)
    be2 = 0.1 * jax.random.normal(ks[8], (C,), jnp.float32)
    m2 = 0.1 * jax.random.normal(ks[9], (C,), jnp.float32)
    v2 = 1.0 + 0.1 * jax.random.uniform(ks[10], (C,), jnp.float32)

    out = basic_block(x, w1, g1, be1, m1, v1, w2, g2, be2, m2, v2)
    out = jax.block_until_ready(out)
    assert out.shape == (N, C, H, W)

    # matched-precision reference (bf16 MXU inputs, f32 accumulation)
    ref_bf16 = reference_basic_block(x, w1, g1, be1, m1, v1,
                                     w2, g2, be2, m2, v2,
                                     compute_dtype=jnp.bfloat16)
    max_err = float(jnp.max(jnp.abs(out - ref_bf16)))
    assert jnp.allclose(out, ref_bf16, atol=1e-2, rtol=1e-2), max_err

    # loose sanity bound against the full-f32 reference (bf16 rounding only)
    ref_f32 = reference_basic_block(x, w1, g1, be1, m1, v1,
                                    w2, g2, be2, m2, v2)
    assert float(jnp.max(jnp.abs(out - ref_f32))) < 0.1

    print("KERNEL_OK")
</pallas_src>

<mosaic_0001>
module attributes {stable_mosaic.version = 11 : i64} {
  func.func @basic_block_kernel(%arg0: i32, %arg1: i32, %arg2: memref<1x20x26x128xbf16, #tpu.memory_space<vmem>>, %arg3: memref<3x3x128x128xbf16, #tpu.memory_space<vmem>>, %arg4: memref<3x3x128x128xbf16, #tpu.memory_space<vmem>>, %arg5: memref<4x128xf32, #tpu.memory_space<vmem>>, %arg6: memref<1x8x16x128xf32, #tpu.memory_space<vmem>>, %arg7: memref<240x128xf32, #tpu.memory_space<vmem>>, %arg8: memref<10x24x128xbf16, #tpu.memory_space<vmem>>) attributes {dimension_semantics = [#tpu.dimension_semantics<parallel>, #tpu.dimension_semantics<parallel>], iteration_bounds = array<i64: 2, 2>, scalar_prefetch = 0 : i64, scratch_operands = 2 : i64, tpu.core_type = #tpu.core_type<tc>, window_params = [{transform_indices = @transform_0, window_bounds = array<i64: 1, 20, 26, 128>}, {pipeline_mode = #tpu.pipeline_mode<synchronous>, transform_indices = @transform_1, window_bounds = array<i64: 3, 3, 128, 128>}, {pipeline_mode = #tpu.pipeline_mode<synchronous>, transform_indices = @transform_2, window_bounds = array<i64: 3, 3, 128, 128>}, {pipeline_mode = #tpu.pipeline_mode<synchronous>, transform_indices = @transform_3, window_bounds = array<i64: 4, 128>}, {transform_indices = @transform_4, window_bounds = array<i64: 1, 8, 16, 128>}]} {
    %c8_i32 = arith.constant 8 : i32
    %0 = arith.muli %arg1, %c8_i32 : i32
    %1 = tpu.assume_multiple %0, 8 : i32
    %c0_i32 = arith.constant 0 : i32
    %2 = arith.addi %1, %c0_i32 : i32
    %c0 = arith.constant 0 : index
    %3 = arith.index_cast %2 : i32 to index
    %c0_0 = arith.constant 0 : index
    %c0_1 = arith.constant 0 : index
    %4 = vector.load %arg2[%c0, %3, %c0_0, %c0_1] : memref<1x20x26x128xbf16, #tpu.memory_space<vmem>>, vector<1x10x24x128xbf16>
    %5 = vector.shape_cast %4 : vector<1x10x24x128xbf16> to vector<10x24x128xbf16>
    %6 = vector.shape_cast %5 : vector<10x24x128xbf16> to vector<240x128xbf16>
    %c0_2 = arith.constant 0 : index
    %c0_3 = arith.constant 0 : index
    %c0_4 = arith.constant 0 : index
    %c0_5 = arith.constant 0 : index
    %7 = vector.load %arg3[%c0_2, %c0_3, %c0_4, %c0_5] : memref<3x3x128x128xbf16, #tpu.memory_space<vmem>>, vector<1x1x128x128xbf16>
    %8 = vector.shape_cast %7 : vector<1x1x128x128xbf16> to vector<128x128xbf16>
    %cst = arith.constant dense<0.000000e+00> : vector<240x128xf32>
    %9 = tpu.matmul %6, %8, %cst {dimension_numbers = #tpu.dot_dimension_numbers<[1], [0], [0], [1], [0, 0, 1, 1], [], []>} : vector<240x128xbf16>, vector<128x128xbf16>, vector<240x128xf32> -> vector<240x128xf32>
    %c0_6 = arith.constant 0 : index
    %c0_7 = arith.constant 0 : index
    %10 = vector.load %arg7[%c0_6, %c0_7] : memref<240x128xf32, #tpu.memory_space<vmem>>, vector<240x128xf32>
    tpu.vector_store %arg7[%c0_6, %c0_7], %9 {strides = array<i32>} : memref<240x128xf32, #tpu.memory_space<vmem>>, vector<240x128xf32>,
    %c0_i32_8 = arith.constant 0 : i32
    %11 = arith.addi %1, %c0_i32_8 : i32
    %c0_9 = arith.constant 0 : index
    %12 = arith.index_cast %11 : i32 to index
    %c1 = arith.constant 1 : index
    %c0_10 = arith.constant 0 : index
    %13 = vector.load %arg2[%c0_9, %12, %c1, %c0_10] : memref<1x20x26x128xbf16, #tpu.memory_space<vmem>>, vector<1x10x24x128xbf16>
    %14 = vector.shape_cast %13 : vector<1x10x24x128xbf16> to vector<10x24x128xbf16>
    %15 = vector.shape_cast %14 : vector<10x24x128xbf16> to vector<240x128xbf16>
    %c0_11 = arith.constant 0 : index
    %c1_12 = arith.constant 1 : index
    %c0_13 = arith.constant 0 : index
    %c0_14 = arith.constant 0 : index
    %16 = vector.load %arg3[%c0_11, %c1_12, %c0_13, %c0_14] : memref<3x3x128x128xbf16, #tpu.memory_space<vmem>>, vector<1x1x128x128xbf16>
    %17 = vector.shape_cast %16 : vector<1x1x128x128xbf16> to vector<128x128xbf16>
    %cst_15 = arith.constant dense<0.000000e+00> : vector<240x128xf32>
    %18 = tpu.matmul %15, %17, %cst_15 {dimension_numbers = #tpu.dot_dimension_numbers<[1], [0], [0], [1], [0, 0, 1, 1], [], []>} : vector<240x128xbf16>, vector<128x128xbf16>, vector<240x128xf32> -> vector<240x128xf32>
    %c0_16 = arith.constant 0 : index
    %c0_17 = arith.constant 0 : index
    %19 = vector.load %arg7[%c0_16, %c0_17] : memref<240x128xf32, #tpu.memory_space<vmem>>, vector<240x128xf32>
    %20 = arith.addf %19, %18 : vector<240x128xf32>
    %c0_18 = arith.constant 0 : index
    %c0_19 = arith.constant 0 : index
    %21 = vector.load %arg7[%c0_18, %c0_19] : memref<240x128xf32, #tpu.memory_space<vmem>>, vector<240x128xf32>
    tpu.vector_store %arg7[%c0_18, %c0_19], %20 {strides = array<i32>} : memref<240x128xf32, #tpu.memory_space<vmem>>, vector<240x128xf32>,
    %c0_i32_20 = arith.constant 0 : i32
    %22 = arith.addi %1, %c0_i32_20 : i32
    %c0_21 = arith.constant 0 : index
    %23 = arith.index_cast %22 : i32 to index
    %c2 = arith.constant 2 : index
    %c0_22 = arith.constant 0 : index
    %24 = vector.load %arg2[%c0_21, %23, %c2, %c0_22] : memref<1x20x26x128xbf16, #tpu.memory_space<vmem>>, vector<1x10x24x128xbf16>
    %25 = vector.shape_cast %24 : vector<1x10x24x128xbf16> to vector<10x24x128xbf16>
    %26 = vector.shape_cast %25 : vector<10x24x128xbf16> to vector<240x128xbf16>
    %c0_23 = arith.constant 0 : index
    %c2_24 = arith.constant 2 : index
    %c0_25 = arith.constant 0 : index
    %c0_26 = arith.constant 0 : index
    %27 = vector.load %arg3[%c0_23, %c2_24, %c0_25, %c0_26] : memref<3x3x128x128xbf16, #tpu.memory_space<vmem>>, vector<1x1x128x128xbf16>
    %28 = vector.shape_cast %27 : vector<1x1x128x128xbf16> to vector<128x128xbf16>
    %cst_27 = arith.constant dense<0.000000e+00> : vector<240x128xf32>
    %29 = tpu.matmul %26, %28, %cst_27 {dimension_numbers = #tpu.dot_dimension_numbers<[1], [0], [0], [1], [0, 0, 1, 1], [], []>} : vector<240x128xbf16>, vector<128x128xbf16>, vector<240x128xf32> -> vector<240x128xf32>
    %c0_28 = arith.constant 0 : index
    %c0_29 = arith.constant 0 : index
    %30 = vector.load %arg7[%c0_28, %c0_29] : memref<240x128xf32, #tpu.memory_space<vmem>>, vector<240x128xf32>
    %31 = arith.addf %30, %29 : vector<240x128xf32>
    %c0_30 = arith.constant 0 : index
    %c0_31 = arith.constant 0 : index
    %32 = vector.load %arg7[%c0_30, %c0_31] : memref<240x128xf32, #tpu.memory_space<vmem>>, vector<240x128xf32>
    tpu.vector_store %arg7[%c0_30, %c0_31], %31 {strides = array<i32>} : memref<240x128xf32, #tpu.memory_space<vmem>>, vector<240x128xf32>,
    %c1_i32 = arith.constant 1 : i32
    %33 = arith.addi %1, %c1_i32 : i32
    %c0_32 = arith.constant 0 : index
    %34 = arith.index_cast %33 : i32 to index
    %c0_33 = arith.constant 0 : index
    %c0_34 = arith.constant 0 : index
    %35 = vector.load %arg2[%c0_32, %34, %c0_33, %c0_34] : memref<1x20x26x128xbf16, #tpu.memory_space<vmem>>, vector<1x10x24x128xbf16>
    %36 = vector.shape_cast %35 : vector<1x10x24x128xbf16> to vector<10x24x128xbf16>
    %37 = vector.shape_cast %36 : vector<10x24x128xbf16> to vector<240x128xbf16>
    %c1_35 = arith.constant 1 : index
    %c0_36 = arith.constant 0 : index
    %c0_37 = arith.constant 0 : index
    %c0_38 = arith.constant 0 : index
    %38 = vector.load %arg3[%c1_35, %c0_36, %c0_37, %c0_38] : memref<3x3x128x128xbf16, #tpu.memory_space<vmem>>, vector<1x1x128x128xbf16>
    %39 = vector.shape_cast %38 : vector<1x1x128x128xbf16> to vector<128x128xbf16>
    %cst_39 = arith.constant dense<0.000000e+00> : vector<240x128xf32>
    %40 = tpu.matmul %37, %39, %cst_39 {dimension_numbers = #tpu.dot_dimension_numbers<[1], [0], [0], [1], [0, 0, 1, 1], [], []>} : vector<240x128xbf16>, vector<128x128xbf16>, vector<240x128xf32> -> vector<240x128xf32>
    %c0_40 = arith.constant 0 : index
    %c0_41 = arith.constant 0 : index
    %41 = vector.load %arg7[%c0_40, %c0_41] : memref<240x128xf32, #tpu.memory_space<vmem>>, vector<240x128xf32>
    %42 = arith.addf %41, %40 : vector<240x128xf32>
    %c0_42 = arith.constant 0 : index
    %c0_43 = arith.constant 0 : index
    %43 = vector.load %arg7[%c0_42, %c0_43] : memref<240x128xf32, #tpu.memory_space<vmem>>, vector<240x128xf32>
    tpu.vector_store %arg7[%c0_42, %c0_43], %42 {strides = array<i32>} : memref<240x128xf32, #tpu.memory_space<vmem>>, vector<240x128xf32>,
    %c1_i32_44 = arith.constant 1 : i32
    %44 = arith.addi %1, %c1_i32_44 : i32
    %c0_45 = arith.constant 0 : index
    %45 = arith.index_cast %44 : i32 to index
    %c1_46 = arith.constant 1 : index
    %c0_47 = arith.constant 0 : index
    %46 = vector.load %arg2[%c0_45, %45, %c1_46, %c0_47] : memref<1x20x26x128xbf16, #tpu.memory_space<vmem>>, vector<1x10x24x128xbf16>
    %47 = vector.shape_cast %46 : vector<1x10x24x128xbf16> to vector<10x24x128xbf16>
    %48 = vector.shape_cast %47 : vector<10x24x128xbf16> to vector<240x128xbf16>
    %c1_48 = arith.constant 1 : index
    %c1_49 = arith.constant 1 : index
    %c0_50 = arith.constant 0 : index
    %c0_51 = arith.constant 0 : index
    %49 = vector.load %arg3[%c1_48, %c1_49, %c0_50, %c0_51] : memref<3x3x128x128xbf16, #tpu.memory_space<vmem>>, vector<1x1x128x128xbf16>
    %50 = vector.shape_cast %49 : vector<1x1x128x128xbf16> to vector<128x128xbf16>
    %cst_52 = arith.constant dense<0.000000e+00> : vector<240x128xf32>
    %51 = tpu.matmul %48, %50, %cst_52 {dimension_numbers = #tpu.dot_dimension_numbers<[1], [0], [0], [1], [0, 0, 1, 1], [], []>} : vector<240x128xbf16>, vector<128x128xbf16>, vector<240x128xf32> -> vector<240x128xf32>
    %c0_53 = arith.constant 0 : index
    %c0_54 = arith.constant 0 : index
    %52 = vector.load %arg7[%c0_53, %c0_54] : memref<240x128xf32, #tpu.memory_space<vmem>>, vector<240x128xf32>
    %53 = arith.addf %52, %51 : vector<240x128xf32>
    %c0_55 = arith.constant 0 : index
    %c0_56 = arith.constant 0 : index
    %54 = vector.load %arg7[%c0_55, %c0_56] : memref<240x128xf32, #tpu.memory_space<vmem>>, vector<240x128xf32>
    tpu.vector_store %arg7[%c0_55, %c0_56], %53 {strides = array<i32>} : memref<240x128xf32, #tpu.memory_space<vmem>>, vector<240x128xf32>,
    %c1_i32_57 = arith.constant 1 : i32
    %55 = arith.addi %1, %c1_i32_57 : i32
    %c0_58 = arith.constant 0 : index
    %56 = arith.index_cast %55 : i32 to index
    %c2_59 = arith.constant 2 : index
    %c0_60 = arith.constant 0 : index
    %57 = vector.load %arg2[%c0_58, %56, %c2_59, %c0_60] : memref<1x20x26x128xbf16, #tpu.memory_space<vmem>>, vector<1x10x24x128xbf16>
    %58 = vector.shape_cast %57 : vector<1x10x24x128xbf16> to vector<10x24x128xbf16>
    %59 = vector.shape_cast %58 : vector<10x24x128xbf16> to vector<240x128xbf16>
    %c1_61 = arith.constant 1 : index
    %c2_62 = arith.constant 2 : index
    %c0_63 = arith.constant 0 : index
    %c0_64 = arith.constant 0 : index
    %60 = vector.load %arg3[%c1_61, %c2_62, %c0_63, %c0_64] : memref<3x3x128x128xbf16, #tpu.memory_space<vmem>>, vector<1x1x128x128xbf16>
    %61 = vector.shape_cast %60 : vector<1x1x128x128xbf16> to vector<128x128xbf16>
    %cst_65 = arith.constant dense<0.000000e+00> : vector<240x128xf32>
    %62 = tpu.matmul %59, %61, %cst_65 {dimension_numbers = #tpu.dot_dimension_numbers<[1], [0], [0], [1], [0, 0, 1, 1], [], []>} : vector<240x128xbf16>, vector<128x128xbf16>, vector<240x128xf32> -> vector<240x128xf32>
    %c0_66 = arith.constant 0 : index
    %c0_67 = arith.constant 0 : index
    %63 = vector.load %arg7[%c0_66, %c0_67] : memref<240x128xf32, #tpu.memory_space<vmem>>, vector<240x128xf32>
    %64 = arith.addf %63, %62 : vector<240x128xf32>
    %c0_68 = arith.constant 0 : index
    %c0_69 = arith.constant 0 : index
    %65 = vector.load %arg7[%c0_68, %c0_69] : memref<240x128xf32, #tpu.memory_space<vmem>>, vector<240x128xf32>
    tpu.vector_store %arg7[%c0_68, %c0_69], %64 {strides = array<i32>} : memref<240x128xf32, #tpu.memory_space<vmem>>, vector<240x128xf32>,
    %c2_i32 = arith.constant 2 : i32
    %66 = arith.addi %1, %c2_i32 : i32
    %c0_70 = arith.constant 0 : index
    %67 = arith.index_cast %66 : i32 to index
    %c0_71 = arith.constant 0 : index
    %c0_72 = arith.constant 0 : index
    %68 = vector.load %arg2[%c0_70, %67, %c0_71, %c0_72] : memref<1x20x26x128xbf16, #tpu.memory_space<vmem>>, vector<1x10x24x128xbf16>
    %69 = vector.shape_cast %68 : vector<1x10x24x128xbf16> to vector<10x24x128xbf16>
    %70 = vector.shape_cast %69 : vector<10x24x128xbf16> to vector<240x128xbf16>
    %c2_73 = arith.constant 2 : index
    %c0_74 = arith.constant 0 : index
    %c0_75 = arith.constant 0 : index
    %c0_76 = arith.constant 0 : index
    %71 = vector.load %arg3[%c2_73, %c0_74, %c0_75, %c0_76] : memref<3x3x128x128xbf16, #tpu.memory_space<vmem>>, vector<1x1x128x128xbf16>
    %72 = vector.shape_cast %71 : vector<1x1x128x128xbf16> to vector<128x128xbf16>
    %cst_77 = arith.constant dense<0.000000e+00> : vector<240x128xf32>
    %73 = tpu.matmul %70, %72, %cst_77 {dimension_numbers = #tpu.dot_dimension_numbers<[1], [0], [0], [1], [0, 0, 1, 1], [], []>} : vector<240x128xbf16>, vector<128x128xbf16>, vector<240x128xf32> -> vector<240x128xf32>
    %c0_78 = arith.constant 0 : index
    %c0_79 = arith.constant 0 : index
    %74 = vector.load %arg7[%c0_78, %c0_79] : memref<240x128xf32, #tpu.memory_space<vmem>>, vector<240x128xf32>
    %75 = arith.addf %74, %73 : vector<240x128xf32>
    %c0_80 = arith.constant 0 : index
    %c0_81 = arith.constant 0 : index
    %76 = vector.load %arg7[%c0_80, %c0_81] : memref<240x128xf32, #tpu.memory_space<vmem>>, vector<240x128xf32>
    tpu.vector_store %arg7[%c0_80, %c0_81], %75 {strides = array<i32>} : memref<240x128xf32, #tpu.memory_space<vmem>>, vector<240x128xf32>,
    %c2_i32_82 = arith.constant 2 : i32
    %77 = arith.addi %1, %c2_i32_82 : i32
    %c0_83 = arith.constant 0 : index
    %78 = arith.index_cast %77 : i32 to index
    %c1_84 = arith.constant 1 : index
    %c0_85 = arith.constant 0 : index
    %79 = vector.load %arg2[%c0_83, %78, %c1_84, %c0_85] : memref<1x20x26x128xbf16, #tpu.memory_space<vmem>>, vector<1x10x24x128xbf16>
    %80 = vector.shape_cast %79 : vector<1x10x24x128xbf16> to vector<10x24x128xbf16>
    %81 = vector.shape_cast %80 : vector<10x24x128xbf16> to vector<240x128xbf16>
    %c2_86 = arith.constant 2 : index
    %c1_87 = arith.constant 1 : index
    %c0_88 = arith.constant 0 : index
    %c0_89 = arith.constant 0 : index
    %82 = vector.load %arg3[%c2_86, %c1_87, %c0_88, %c0_89] : memref<3x3x128x128xbf16, #tpu.memory_space<vmem>>, vector<1x1x128x128xbf16>
    %83 = vector.shape_cast %82 : vector<1x1x128x128xbf16> to vector<128x128xbf16>
    %cst_90 = arith.constant dense<0.000000e+00> : vector<240x128xf32>
    %84 = tpu.matmul %81, %83, %cst_90 {dimension_numbers = #tpu.dot_dimension_numbers<[1], [0], [0], [1], [0, 0, 1, 1], [], []>} : vector<240x128xbf16>, vector<128x128xbf16>, vector<240x128xf32> -> vector<240x128xf32>
    %c0_91 = arith.constant 0 : index
    %c0_92 = arith.constant 0 : index
    %85 = vector.load %arg7[%c0_91, %c0_92] : memref<240x128xf32, #tpu.memory_space<vmem>>, vector<240x128xf32>
    %86 = arith.addf %85, %84 : vector<240x128xf32>
    %c0_93 = arith.constant 0 : index
    %c0_94 = arith.constant 0 : index
    %87 = vector.load %arg7[%c0_93, %c0_94] : memref<240x128xf32, #tpu.memory_space<vmem>>, vector<240x128xf32>
    tpu.vector_store %arg7[%c0_93, %c0_94], %86 {strides = array<i32>} : memref<240x128xf32, #tpu.memory_space<vmem>>, vector<240x128xf32>,
    %c2_i32_95 = arith.constant 2 : i32
    %88 = arith.addi %1, %c2_i32_95 : i32
    %c0_96 = arith.constant 0 : index
    %89 = arith.index_cast %88 : i32 to index
    %c2_97 = arith.constant 2 : index
    %c0_98 = arith.constant 0 : index
    %90 = vector.load %arg2[%c0_96, %89, %c2_97, %c0_98] : memref<1x20x26x128xbf16, #tpu.memory_space<vmem>>, vector<1x10x24x128xbf16>
    %91 = vector.shape_cast %90 : vector<1x10x24x128xbf16> to vector<10x24x128xbf16>
    %92 = vector.shape_cast %91 : vector<10x24x128xbf16> to vector<240x128xbf16>
    %c2_99 = arith.constant 2 : index
    %c2_100 = arith.constant 2 : index
    %c0_101 = arith.constant 0 : index
    %c0_102 = arith.constant 0 : index
    %93 = vector.load %arg3[%c2_99, %c2_100, %c0_101, %c0_102] : memref<3x3x128x128xbf16, #tpu.memory_space<vmem>>, vector<1x1x128x128xbf16>
    %94 = vector.shape_cast %93 : vector<1x1x128x128xbf16> to vector<128x128xbf16>
    %cst_103 = arith.constant dense<0.000000e+00> : vector<240x128xf32>
    %95 = tpu.matmul %92, %94, %cst_103 {dimension_numbers = #tpu.dot_dimension_numbers<[1], [0], [0], [1], [0, 0, 1, 1], [], []>} : vector<240x128xbf16>, vector<128x128xbf16>, vector<240x128xf32> -> vector<240x128xf32>
    %c0_104 = arith.constant 0 : index
    %c0_105 = arith.constant 0 : index
    %96 = vector.load %arg7[%c0_104, %c0_105] : memref<240x128xf32, #tpu.memory_space<vmem>>, vector<240x128xf32>
    %97 = arith.addf %96, %95 : vector<240x128xf32>
    %c0_106 = arith.constant 0 : index
    %c0_107 = arith.constant 0 : index
    %98 = vector.load %arg7[%c0_106, %c0_107] : memref<240x128xf32, #tpu.memory_space<vmem>>, vector<240x128xf32>
    tpu.vector_store %arg7[%c0_106, %c0_107], %97 {strides = array<i32>} : memref<240x128xf32, #tpu.memory_space<vmem>>, vector<240x128xf32>,
    %c0_108 = arith.constant 0 : index
    %c0_109 = arith.constant 0 : index
    %99 = vector.load %arg7[%c0_108, %c0_109] : memref<240x128xf32, #tpu.memory_space<vmem>>, vector<240x128xf32>
    %c0_110 = arith.constant 0 : index
    %c0_111 = arith.constant 0 : index
    %100 = vector.load %arg5[%c0_110, %c0_111] : memref<4x128xf32, #tpu.memory_space<vmem>>, vector<1x128xf32>
    %101 = vector.broadcast %100 : vector<1x128xf32> to vector<240x128xf32>
    %102 = arith.mulf %99, %101 : vector<240x128xf32>
    %c1_112 = arith.constant 1 : index
    %c0_113 = arith.constant 0 : index
    %103 = vector.load %arg5[%c1_112, %c0_113] : memref<4x128xf32, #tpu.memory_space<vmem>>, vector<1x128xf32>
    %104 = vector.broadcast %103 : vector<1x128xf32> to vector<240x128xf32>
    %105 = arith.addf %102, %104 : vector<240x128xf32>
    %cst_114 = arith.constant 0.000000e+00 : f32
    %106 = vector.broadcast %cst_114 : f32 to vector<240x128xf32>
    %107 = arith.maximumf %105, %106 : vector<240x128xf32>
    %108 = tpu.iota {dimensions = array<i32: 0>} : vector<240x1xi32>
    %c24_i32 = arith.constant 24 : i32
    %109 = arith.muli %1, %c24_i32 : i32
    %110 = vector.broadcast %109 : i32 to vector<240x1xi32>
    %111 = arith.addi %110, %108 : vector<240x1xi32>
    %c24_i32_115 = arith.constant 24 : i32
    %112 = vector.broadcast %c24_i32_115 : i32 to vector<240x1xi32>
    %113 = arith.cmpi sge, %111, %112 : vector<240x1xi32>
    %c408_i32 = arith.constant 408 : i32
    %114 = vector.broadcast %c408_i32 : i32 to vector<240x1xi32>
    %115 = arith.cmpi slt, %111, %114 : vector<240x1xi32>
    %116 = arith.andi %113, %115 : vector<240x1xi1>
    %cst_116 = arith.constant 0.000000e+00 : f32
    %117 = vector.shape_cast %116 : vector<240x1xi1> to vector<240x1xi1>
    %118 = vector.broadcast %117 : vector<240x1xi1> to vector<240x128xi1>
    %119 = vector.broadcast %cst_116 : f32 to vector<240x128xf32>
    %120 = arith.select %118, %107, %119 : vector<240x128xi1>, vector<240x128xf32>
    %121 = vector.shape_cast %120 : vector<240x128xf32> to vector<10x24x128xf32>
    %122 = arith.truncf %121 : vector<10x24x128xf32> to vector<10x24x128xbf16>
    %c0_117 = arith.constant 0 : index
    %c0_118 = arith.constant 0 : index
    %c0_119 = arith.constant 0 : index
    %123 = vector.load %arg8[%c0_117, %c0_118, %c0_119] : memref<10x24x128xbf16, #tpu.memory_space<vmem>>, vector<10x24x128xbf16>
    tpu.vector_store %arg8[%c0_117, %c0_118, %c0_119], %122 {strides = array<i32>} : memref<10x24x128xbf16, #tpu.memory_space<vmem>>, vector<10x24x128xbf16>,
    %cst_120 = arith.constant 0.000000e+00 : bf16
    %124 = vector.broadcast %cst_120 : bf16 to vector<10x1x128xbf16>
    %c0_121 = arith.constant 0 : index
    %c0_122 = arith.constant 0 : index
    %c0_123 = arith.constant 0 : index
    %125 = vector.load %arg8[%c0_121, %c0_122, %c0_123] : memref<10x24x128xbf16, #tpu.memory_space<vmem>>, vector<10x1x128xbf16>
    tpu.vector_store %arg8[%c0_121, %c0_122, %c0_123], %124 {strides = array<i32>} : memref<10x24x128xbf16, #tpu.memory_space<vmem>>, vector<10x1x128xbf16>,
    %c0_124 = arith.constant 0 : index
    %c17 = arith.constant 17 : index
    %c0_125 = arith.constant 0 : index
    %126 = vector.load %arg8[%c0_124, %c17, %c0_125] : memref<10x24x128xbf16, #tpu.memory_space<vmem>>, vector<10x1x128xbf16>
    tpu.vector_store %arg8[%c0_124, %c17, %c0_125], %124 {strides = array<i32>} : memref<10x24x128xbf16, #tpu.memory_space<vmem>>, vector<10x1x128xbf16>,
    %cst_126 = arith.constant 0.000000e+00 : f32
    %127 = vector.broadcast %cst_126 : f32 to vector<128x128xf32>
    %c0_127 = arith.constant 0 : index
    %c0_128 = arith.constant 0 : index
    %c0_129 = arith.constant 0 : index
    %128 = vector.load %arg8[%c0_127, %c0_128, %c0_129] : memref<10x24x128xbf16, #tpu.memory_space<vmem>>, vector<8x16x128xbf16>
    %129 = vector.shape_cast %128 : vector<8x16x128xbf16> to vector<128x128xbf16>
    %c0_130 = arith.constant 0 : index
    %c0_131 = arith.constant 0 : index
    %c0_132 = arith.constant 0 : index
    %c0_133 = arith.constant 0 : index
    %130 = vector.load %arg4[%c0_130, %c0_131, %c0_132, %c0_133] : memref<3x3x128x128xbf16, #tpu.memory_space<vmem>>, vector<1x1x128x128xbf16>
    %131 = vector.shape_cast %130 : vector<1x1x128x128xbf16> to vector<128x128xbf16>
    %cst_134 = arith.constant dense<0.000000e+00> : vector<128x128xf32>
    %132 = tpu.matmul %129, %131, %cst_134 {dimension_numbers = #tpu.dot_dimension_numbers<[1], [0], [0], [1], [0, 0, 1, 1], [], []>} : vector<128x128xbf16>, vector<128x128xbf16>, vector<128x128xf32> -> vector<128x128xf32>
    %133 = arith.addf %127, %132 : vector<128x128xf32>
    %c0_135 = arith.constant 0 : index
    %c1_136 = arith.constant 1 : index
    %c0_137 = arith.constant 0 : index
    %134 = vector.load %arg8[%c0_135, %c1_136, %c0_137] : memref<10x24x128xbf16, #tpu.memory_space<vmem>>, vector<8x16x128xbf16>
    %135 = vector.shape_cast %134 : vector<8x16x128xbf16> to vector<128x128xbf16>
    %c0_138 = arith.constant 0 : index
    %c1_139 = arith.constant 1 : index
    %c0_140 = arith.constant 0 : index
    %c0_141 = arith.constant 0 : index
    %136 = vector.load %arg4[%c0_138, %c1_139, %c0_140, %c0_141] : memref<3x3x128x128xbf16, #tpu.memory_space<vmem>>, vector<1x1x128x128xbf16>
    %137 = vector.shape_cast %136 : vector<1x1x128x128xbf16> to vector<128x128xbf16>
    %cst_142 = arith.constant dense<0.000000e+00> : vector<128x128xf32>
    %138 = tpu.matmul %135, %137, %cst_142 {dimension_numbers = #tpu.dot_dimension_numbers<[1], [0], [0], [1], [0, 0, 1, 1], [], []>} : vector<128x128xbf16>, vector<128x128xbf16>, vector<128x128xf32> -> vector<128x128xf32>
    %139 = arith.addf %133, %138 : vector<128x128xf32>
    %c0_143 = arith.constant 0 : index
    %c2_144 = arith.constant 2 : index
    %c0_145 = arith.constant 0 : index
    %140 = vector.load %arg8[%c0_143, %c2_144, %c0_145] : memref<10x24x128xbf16, #tpu.memory_space<vmem>>, vector<8x16x128xbf16>
    %141 = vector.shape_cast %140 : vector<8x16x128xbf16> to vector<128x128xbf16>
    %c0_146 = arith.constant 0 : index
    %c2_147 = arith.constant 2 : index
    %c0_148 = arith.constant 0 : index
    %c0_149 = arith.constant 0 : index
    %142 = vector.load %arg4[%c0_146, %c2_147, %c0_148, %c0_149] : memref<3x3x128x128xbf16, #tpu.memory_space<vmem>>, vector<1x1x128x128xbf16>
    %143 = vector.shape_cast %142 : vector<1x1x128x128xbf16> to vector<128x128xbf16>
    %cst_150 = arith.constant dense<0.000000e+00> : vector<128x128xf32>
    %144 = tpu.matmul %141, %143, %cst_150 {dimension_numbers = #tpu.dot_dimension_numbers<[1], [0], [0], [1], [0, 0, 1, 1], [], []>} : vector<128x128xbf16>, vector<128x128xbf16>, vector<128x128xf32> -> vector<128x128xf32>
    %145 = arith.addf %139, %144 : vector<128x128xf32>
    %c1_151 = arith.constant 1 : index
    %c0_152 = arith.constant 0 : index
    %c0_153 = arith.constant 0 : index
    %146 = vector.load %arg8[%c1_151, %c0_152, %c0_153] : memref<10x24x128xbf16, #tpu.memory_space<vmem>>, vector<8x16x128xbf16>
    %147 = vector.shape_cast %146 : vector<8x16x128xbf16> to vector<128x128xbf16>
    %c1_154 = arith.constant 1 : index
    %c0_155 = arith.constant 0 : index
    %c0_156 = arith.constant 0 : index
    %c0_157 = arith.constant 0 : index
    %148 = vector.load %arg4[%c1_154, %c0_155, %c0_156, %c0_157] : memref<3x3x128x128xbf16, #tpu.memory_space<vmem>>, vector<1x1x128x128xbf16>
    %149 = vector.shape_cast %148 : vector<1x1x128x128xbf16> to vector<128x128xbf16>
    %cst_158 = arith.constant dense<0.000000e+00> : vector<128x128xf32>
    %150 = tpu.matmul %147, %149, %cst_158 {dimension_numbers = #tpu.dot_dimension_numbers<[1], [0], [0], [1], [0, 0, 1, 1], [], []>} : vector<128x128xbf16>, vector<128x128xbf16>, vector<128x128xf32> -> vector<128x128xf32>
    %151 = arith.addf %145, %150 : vector<128x128xf32>
    %c1_159 = arith.constant 1 : index
    %c1_160 = arith.constant 1 : index
    %c0_161 = arith.constant 0 : index
    %152 = vector.load %arg8[%c1_159, %c1_160, %c0_161] : memref<10x24x128xbf16, #tpu.memory_space<vmem>>, vector<8x16x128xbf16>
    %153 = vector.shape_cast %152 : vector<8x16x128xbf16> to vector<128x128xbf16>
    %c1_162 = arith.constant 1 : index
    %c1_163 = arith.constant 1 : index
    %c0_164 = arith.constant 0 : index
    %c0_165 = arith.constant 0 : index
    %154 = vector.load %arg4[%c1_162, %c1_163, %c0_164, %c0_165] : memref<3x3x128x128xbf16, #tpu.memory_space<vmem>>, vector<1x1x128x128xbf16>
    %155 = vector.shape_cast %154 : vector<1x1x128x128xbf16> to vector<128x128xbf16>
    %cst_166 = arith.constant dense<0.000000e+00> : vector<128x128xf32>
    %156 = tpu.matmul %153, %155, %cst_166 {dimension_numbers = #tpu.dot_dimension_numbers<[1], [0], [0], [1], [0, 0, 1, 1], [], []>} : vector<128x128xbf16>, vector<128x128xbf16>, vector<128x128xf32> -> vector<128x128xf32>
    %157 = arith.addf %151, %156 : vector<128x128xf32>
    %c1_167 = arith.constant 1 : index
    %c2_168 = arith.constant 2 : index
    %c0_169 = arith.constant 0 : index
    %158 = vector.load %arg8[%c1_167, %c2_168, %c0_169] : memref<10x24x128xbf16, #tpu.memory_space<vmem>>, vector<8x16x128xbf16>
    %159 = vector.shape_cast %158 : vector<8x16x128xbf16> to vector<128x128xbf16>
    %c1_170 = arith.constant 1 : index
    %c2_171 = arith.constant 2 : index
    %c0_172 = arith.constant 0 : index
    %c0_173 = arith.constant 0 : index
    %160 = vector.load %arg4[%c1_170, %c2_171, %c0_172, %c0_173] : memref<3x3x128x128xbf16, #tpu.memory_space<vmem>>, vector<1x1x128x128xbf16>
    %161 = vector.shape_cast %160 : vector<1x1x128x128xbf16> to vector<128x128xbf16>
    %cst_174 = arith.constant dense<0.000000e+00> : vector<128x128xf32>
    %162 = tpu.matmul %159, %161, %cst_174 {dimension_numbers = #tpu.dot_dimension_numbers<[1], [0], [0], [1], [0, 0, 1, 1], [], []>} : vector<128x128xbf16>, vector<128x128xbf16>, vector<128x128xf32> -> vector<128x128xf32>
    %163 = arith.addf %157, %162 : vector<128x128xf32>
    %c2_175 = arith.constant 2 : index
    %c0_176 = arith.constant 0 : index
    %c0_177 = arith.constant 0 : index
    %164 = vector.load %arg8[%c2_175, %c0_176, %c0_177] : memref<10x24x128xbf16, #tpu.memory_space<vmem>>, vector<8x16x128xbf16>
    %165 = vector.shape_cast %164 : vector<8x16x128xbf16> to vector<128x128xbf16>
    %c2_178 = arith.constant 2 : index
    %c0_179 = arith.constant 0 : index
    %c0_180 = arith.constant 0 : index
    %c0_181 = arith.constant 0 : index
    %166 = vector.load %arg4[%c2_178, %c0_179, %c0_180, %c0_181] : memref<3x3x128x128xbf16, #tpu.memory_space<vmem>>, vector<1x1x128x128xbf16>
    %167 = vector.shape_cast %166 : vector<1x1x128x128xbf16> to vector<128x128xbf16>
    %cst_182 = arith.constant dense<0.000000e+00> : vector<128x128xf32>
    %168 = tpu.matmul %165, %167, %cst_182 {dimension_numbers = #tpu.dot_dimension_numbers<[1], [0], [0], [1], [0, 0, 1, 1], [], []>} : vector<128x128xbf16>, vector<128x128xbf16>, vector<128x128xf32> -> vector<128x128xf32>
    %169 = arith.addf %163, %168 : vector<128x128xf32>
    %c2_183 = arith.constant 2 : index
    %c1_184 = arith.constant 1 : index
    %c0_185 = arith.constant 0 : index
    %170 = vector.load %arg8[%c2_183, %c1_184, %c0_185] : memref<10x24x128xbf16, #tpu.memory_space<vmem>>, vector<8x16x128xbf16>
    %171 = vector.shape_cast %170 : vector<8x16x128xbf16> to vector<128x128xbf16>
    %c2_186 = arith.constant 2 : index
    %c1_187 = arith.constant 1 : index
    %c0_188 = arith.constant 0 : index
    %c0_189 = arith.constant 0 : index
    %172 = vector.load %arg4[%c2_186, %c1_187, %c0_188, %c0_189] : memref<3x3x128x128xbf16, #tpu.memory_space<vmem>>, vector<1x1x128x128xbf16>
    %173 = vector.shape_cast %172 : vector<1x1x128x128xbf16> to vector<128x128xbf16>
    %cst_190 = arith.constant dense<0.000000e+00> : vector<128x128xf32>
    %174 = tpu.matmul %171, %173, %cst_190 {dimension_numbers = #tpu.dot_dimension_numbers<[1], [0], [0], [1], [0, 0, 1, 1], [], []>} : vector<128x128xbf16>, vector<128x128xbf16>, vector<128x128xf32> -> vector<128x128xf32>
    %175 = arith.addf %169, %174 : vector<128x128xf32>
    %c2_191 = arith.constant 2 : index
    %c2_192 = arith.constant 2 : index
    %c0_193 = arith.constant 0 : index
    %176 = vector.load %arg8[%c2_191, %c2_192, %c0_193] : memref<10x24x128xbf16, #tpu.memory_space<vmem>>, vector<8x16x128xbf16>
    %177 = vector.shape_cast %176 : vector<8x16x128xbf16> to vector<128x128xbf16>
    %c2_194 = arith.constant 2 : index
    %c2_195 = arith.constant 2 : index
    %c0_196 = arith.constant 0 : index
    %c0_197 = arith.constant 0 : index
    %178 = vector.load %arg4[%c2_194, %c2_195, %c0_196, %c0_197] : memref<3x3x128x128xbf16, #tpu.memory_space<vmem>>, vector<1x1x128x128xbf16>
    %179 = vector.shape_cast %178 : vector<1x1x128x128xbf16> to vector<128x128xbf16>
    %cst_198 = arith.constant dense<0.000000e+00> : vector<128x128xf32>
    %180 = tpu.matmul %177, %179, %cst_198 {dimension_numbers = #tpu.dot_dimension_numbers<[1], [0], [0], [1], [0, 0, 1, 1], [], []>} : vector<128x128xbf16>, vector<128x128xbf16>, vector<128x128xf32> -> vector<128x128xf32>
    %181 = arith.addf %175, %180 : vector<128x128xf32>
    %c2_199 = arith.constant 2 : index
    %c0_200 = arith.constant 0 : index
    %182 = vector.load %arg5[%c2_199, %c0_200] : memref<4x128xf32, #tpu.memory_space<vmem>>, vector<1x128xf32>
    %183 = vector.broadcast %182 : vector<1x128xf32> to vector<128x128xf32>
    %184 = arith.mulf %181, %183 : vector<128x128xf32>
    %c3 = arith.constant 3 : index
    %c0_201 = arith.constant 0 : index
    %185 = vector.load %arg5[%c3, %c0_201] : memref<4x128xf32, #tpu.memory_space<vmem>>, vector<1x128xf32>
    %186 = vector.broadcast %185 : vector<1x128xf32> to vector<128x128xf32>
    %187 = arith.addf %184, %186 : vector<128x128xf32>
    %c2_i32_202 = arith.constant 2 : i32
    %188 = arith.addi %1, %c2_i32_202 : i32
    %c0_203 = arith.constant 0 : index
    %189 = arith.index_cast %188 : i32 to index
    %c2_204 = arith.constant 2 : index
    %c0_205 = arith.constant 0 : index
    %190 = vector.load %arg2[%c0_203, %189, %c2_204, %c0_205] : memref<1x20x26x128xbf16, #tpu.memory_space<vmem>>, vector<1x8x16x128xbf16>
    %191 = vector.shape_cast %190 : vector<1x8x16x128xbf16> to vector<8x16x128xbf16>
    %192 = vector.shape_cast %191 : vector<8x16x128xbf16> to vector<128x128xbf16>
    %193 = arith.extf %192 : vector<128x128xbf16> to vector<128x128xf32>
    %194 = arith.addf %187, %193 : vector<128x128xf32>
    %cst_206 = arith.constant 0.000000e+00 : f32
    %195 = vector.broadcast %cst_206 : f32 to vector<128x128xf32>
    %196 = arith.maximumf %194, %195 : vector<128x128xf32>
    %197 = vector.shape_cast %196 : vector<128x128xf32> to vector<8x16x128xf32>
    %c0_207 = arith.constant 0 : index
    %c0_208 = arith.constant 0 : index
    %c0_209 = arith.constant 0 : index
    %c0_210 = arith.constant 0 : index
    %198 = vector.load %arg6[%c0_207, %c0_208, %c0_209, %c0_210] : memref<1x8x16x128xf32, #tpu.memory_space<vmem>>, vector<1x8x16x128xf32>
    %199 = vector.shape_cast %198 : vector<1x8x16x128xf32> to vector<8x16x128xf32>
    %200 = vector.shape_cast %197 : vector<8x16x128xf32> to vector<1x8x16x128xf32>
    tpu.vector_store %arg6[%c0_207, %c0_208, %c0_209, %c0_210], %200 {strides = array<i32>} : memref<1x8x16x128xf32, #tpu.memory_space<vmem>>, vector<1x8x16x128xf32>,
    return
  }
  func.func @transform_0(%arg0: i32, %arg1: i32) -> (i32, i32, i32, i32) {
    %c0_i32 = arith.constant 0 : i32
    %c0_i32_0 = arith.constant 0 : i32
    %c0_i32_1 = arith.constant 0 : i32
    %c0_i32_2 = arith.constant 0 : i32
    return %arg0, %c0_i32, %c0_i32_0, %c0_i32_1 : i32, i32, i32, i32
  }
  func.func @transform_1(%arg0: i32, %arg1: i32) -> (i32, i32, i32, i32) {
    %c0_i32 = arith.constant 0 : i32
    %c0_i32_0 = arith.constant 0 : i32
    %c0_i32_1 = arith.constant 0 : i32
    %c0_i32_2 = arith.constant 0 : i32
    %c0_i32_3 = arith.constant 0 : i32
    return %c0_i32, %c0_i32_0, %c0_i32_1, %c0_i32_2 : i32, i32, i32, i32
  }
  func.func @transform_2(%arg0: i32, %arg1: i32) -> (i32, i32, i32, i32) {
    %c0_i32 = arith.constant 0 : i32
    %c0_i32_0 = arith.constant 0 : i32
    %c0_i32_1 = arith.constant 0 : i32
    %c0_i32_2 = arith.constant 0 : i32
    %c0_i32_3 = arith.constant 0 : i32
    return %c0_i32, %c0_i32_0, %c0_i32_1, %c0_i32_2 : i32, i32, i32, i32
  }
  func.func @transform_3(%arg0: i32, %arg1: i32) -> (i32, i32) {
    %c0_i32 = arith.constant 0 : i32
    %c0_i32_0 = arith.constant 0 : i32
    %c0_i32_1 = arith.constant 0 : i32
    return %c0_i32, %c0_i32_0 : i32, i32
  }
  func.func @transform_4(%arg0: i32, %arg1: i32) -> (i32, i32, i32, i32) {
    %c0_i32 = arith.constant 0 : i32
    %c0_i32_0 = arith.constant 0 : i32
    %c0_i32_1 = arith.constant 0 : i32
    return %arg0, %arg1, %c0_i32, %c0_i32_0 : i32, i32, i32, i32
  }
}

</mosaic_0001>

<bundles_post_ra>
// kernel: basic_block.1
= control target key start
LH: loop header
LB: loop body
LE: loop exit
PB: predicated region body
PF: predicated region fallthrough
CT: control target
= control target key end

     0   :  { %s9841_s15 = smov 0   ;;  %s9843_s16 = smov 0   ;;  %s12755_s0 = inlined_call_operand.vmem [shape: bf16[2,20,26,128], index: 0, kind: input, shape index: {}]   ;;  %s12756_s1 = inlined_call_operand.vmem [shape: bf16[3,3,128,128], index: 1, kind: input, shape index: {}]   ;;  %s12757_s2 = inlined_call_operand.vmem [shape: bf16[3,3,128,128], index: 2, kind: input, shape index: {}]   ;;  %s12758_s3 = inlined_call_operand.vmem [shape: f32[4,128], index: 3, kind: input, shape index: {}]   ;;  %s12759_s4 = inlined_call_operand.vmem [shape: f32[2,16,16,128], index: 4, kind: output, shape index: {}]  }
   0x1   :  { %s9845_s17 = smov 0   ;;  %s9847_s18 = smov 0  }
   0x2   :  { %s9849_s19 = smov 0  }
   0x3 LB: > { %s23_s20 = sadd.s32 1, %s9806_s17  ;;  %s26_s21 = sadd.s32 1, %s9810_s18  ;;  %s9814_s19 = sphi %s9849_s19, %s14_s19   ;;  %s9810_s18 = sphi %s9847_s18, %s12875_s18   ;;  %s9806_s17 = sphi %s9845_s17, %s12874_s17   ;;  %s9802_s16 = sphi %s9843_s16, %s12873_s16   ;;  %s9798_s15 = sphi %s9841_s15, %s12872_s15  }
   0x4   : > { %p24_p0 = scmp.ge.s32.totalorder %s23_s20, 2  ;;  %p7959_p1 = scmp.ge.s32.totalorder %s9814_s19, 1 }
   0x5   : > { %p176_p2 = scmp.lt.s32.totalorder %s9814_s19, 5 }
   0x6   : > { %s12877_s20 = smov (%p24_p0, %s23_s20), 0  ;;  %s12879_s21 = smov (!%p24_p0, %s26_s21), %s9810_s18 }
   0x7   : > { %p177_p3 = pnand %p7959_p1, %p176_p2  ;;  %p28_p4 = scmp.ge.s32.totalorder %s12879_s21, 2 }
   0x9   : > { %s12881_s21 = smov (%p28_p4, %s12879_s21), 0  ;;  %180 = sbr.rel (%p177_p3) target bundleno = 1276 (0x4fc), region = 36 }
   0xe   : > { %v9413_v0 = vld [vmem:[%s12756_s1 + $0x38] sm:$0xff]  ;;  %p207_p5 = scmp.lt.s32.totalorder %s9802_s16, 1  ;;  %v9412_v3 = vld [vmem:[%s12756_s1 + $0x30] sm:$0xff]  ;;  %s9390_s9 = sshll.u32 %s9798_s15, 7  ;;  %v9411_v6 = vld [vmem:[%s12756_s1 + $0x28] sm:$0xff]  ;;  %vm1288_vm2 = vcmask 1042432  }
   0xf   : > { %v9421_v1 = vld [vmem:[%s12756_s1 + $0x78] sm:$0xff]  ;;  %412 = vmatpush.bf16.msra.mxu0 %v9413_v0  ;;  %v9420_v4 = vld [vmem:[%s12756_s1 + $0x70] sm:$0xff]  ;;  %v9419_v7 = vld [vmem:[%s12756_s1 + $0x68] sm:$0xff]  ;;  %vm566_vm0 = vsmask.f32 3328  ;;  %vm1289_vm3 = vcmask 1046532  }
  0x10   : > { %v9882_v2 = vld [vmem:[%s12756_s1 + $0xb8] sm:$0xff]  ;;  %1034 = vmatpush.bf16.msra.mxu1 %v9421_v1  ;;  %s12883_s16 = smov (!%p207_p5, %s9802_s16), 1  ;;  %9695 = vmatpush.bf16.msra.mxu3 %v9421_v1  ;;  %v9896_v5 = vld [vmem:[%s12756_s1 + $0xb0] sm:$0xff]  ;;  %v9913_v8 = vld [vmem:[%s12756_s1 + $0xa8] sm:$0xff]  ;;  %vm567_vm1 = vsmask.f32 7440 }
  0x11   : > { %1516 = vmatpush.bf16.msra.mxu2 %v9882_v2  ;;  %s9719_s8 = smul.u32 320, %s12883_s16  ;;  %v9410_v9 = vld [vmem:[%s12756_s1 + $0x20] sm:$0xff]  ;;  %v9409_v30 = vld [vmem:[%s12756_s1 + $0x18] sm:$0xff]  ;;  %vm9969_vm4 = vmor %vm566_vm0, %vm567_vm1  ;;  %vm5159_vm12 = vcmask 1040384   ;;  %vm5160_vm13 = vsmask.f32 256 }
  0x12   : > { %v9418_v10 = vld [vmem:[%s12756_s1 + $0x60] sm:$0xff]  ;;  %v9417_v31 = vld [vmem:[%s12756_s1 + $0x58] sm:$0xff]  ;;  %v9408_v54 = vld [vmem:[%s12756_s1 + $0x10] sm:$0xff]  ;;  %s8818_s11 = smul.u32 192, %s9798_s15  ;;  %s7961_s12 = sshll.u32 %s9798_s15, 3 }
  0x13   : > { %413 = vmatpush.bf16.msra.mxu0 %v9412_v3  ;;  %s211_s23 = scalar_lea.vmem %s12755_s0, %s9719_s8  ;;  %v9931_v18 = vld [vmem:[%s12756_s1 + $0xa0] sm:$0xff]  ;;  %v9959_v42 = vld [vmem:[%s12756_s1 + $0x98] sm:$0xff]  ;;  %v9416_v55 = vld [vmem:[%s12756_s1 + $0x50] sm:$0xff]  ;;  %p215_p6 = scmp.lt.s32.totalorder %s7961_s12, 15 }
  0x14   : > { %1035 = vmatpush.bf16.msra.mxu1 %v9420_v4  ;;  %9696 = vmatpush.bf16.msra.mxu3 %v9420_v4  ;;  %s9915_s26 = scalar_lea.vmem %s211_s23, %s9390_s9  ;;  %vm9983_vm5 = vmor %vm1288_vm2, %vm1289_vm3  ;;  %v9992_v61 = vld [vmem:[%s12756_s1 + $0x90] sm:$0xff]  ;;  %v9407_v3 = vld [vmem:[%s12756_s1 + $0x8] sm:$0xff]  ;;  %s7963_s13 = sshll.u32 %s12883_s16, 5 }
  0x15   : > { %1517 = vmatpush.bf16.msra.mxu2 %v9896_v5  ;;  %v526_v11 = vld [vmem:[%s9915_s26] sm:$0xf]  ;;  %v527_v12 = vld [vmem:[%s9915_s26 + $0x4] sm:$0xf]  ;;  %v9926_v13 = vld [vmem:[%s9915_s26 + $0x8] sm:$0xf] }
  0x16   : > { %v570_v14 = vshrl.u32 %v526_v11, 16  ;;  %v573_v15 = vshll.u32 %v526_v11, 16  ;;  %v579_v16 = vshll.u32 %v527_v12, 16  ;;  %v583_v17 = vshrl.u32 %v527_v12, 16  ;;  %v560_v19 = vld [vmem:[%s9915_s26 + $0x88] sm:$0xf]  ;;  %vm11403_vm14 = vmand %vm5159_vm12, %vm5160_vm13 }
  0x17   : > { %414 = vmatpush.bf16.msra.mxu0 %v9411_v6  ;;  %v561_v20 = vld [vmem:[%s9915_s26 + $0x8c] sm:$0x1]  ;;  %v562_v25 = vld [vmem:[%s9915_s26 + $0x90] sm:$0xf]  ;;  %v589_v26 = vshll.u32 %v9926_v13, 16  ;;  %v861_v28 = vshll.u32 %v560_v19, 16 }
  0x18   : > { %1036 = vmatpush.bf16.msra.mxu1 %v9419_v7  ;;  %9697 = vmatpush.bf16.msra.mxu3 %v9419_v7  ;;  %v572_v21 = vrot.slane %v570_v14, 4  ;;  %v575_v22 = vrot.slane %v573_v15, 5  ;;  %v9936_v23 = vrot.slane %v579_v16, 5  ;;  %v585_v24 = vrot.slane %v583_v17, 4  ;;  %v9941_v27 = vld [vmem:[%s9915_s26 + $0x94] sm:$0xf] }
  0x19   : > { %1518 = vmatpush.bf16.msra.mxu2 %v9913_v8  ;;  %v865_v29 = vshrl.u32 %v560_v19, 16  ;;  %v876_v34 = vshrl.u32 %v562_v25, 16  ;;  %v879_v35 = vshll.u32 %v562_v25, 16  ;;  %v1208_v36 = vld [vmem:[%s9915_s26] sm:$0xe]  ;;  %v9951_v37 = vrot.slane %v861_v28, 5 }
  0x1a   : > { %v576_v32 = vor.u32 %v575_v22, %v572_v21  ;;  %v586_v33 = vor.u32 %v585_v24, %v9936_v23  ;;  %v871_v39 = vshll.u32 %v561_v20, 16  ;;  %v885_v40 = vshll.u32 %v9941_v27, 16  ;;  %v1209_v41 = vld [vmem:[%s9915_s26 + $0x4] sm:$0xf]  ;;  %v9962_v45 = vld [vmem:[%s9915_s26 + $0x8] sm:$0xf] }
  0x1b   : > { %415 = vmatpush.bf16.msra.mxu0 %v9410_v9  ;;  %v867_v38 = vrot.slane %v865_v29, 4  ;;  %v878_v43 = vrot.slane %v876_v34, 4  ;;  %v881_v44 = vrot.slane %v879_v35, 5  ;;  %v9964_v47 = vrot.slane %v589_v26, 5  ;;  %v530_v0 = vld [vmem:[%s9915_s26 + $0x10] sm:$0xf] }
  0x1c   : > { %1037 = vmatpush.bf16.msra.mxu1 %v9418_v10  ;;  %9698 = vmatpush.bf16.msra.mxu3 %v9418_v10  ;;  %v577_v46 = vrot.slane %v576_v32, 4  ;;  %v587_v50 = vrot.slane %v586_v33, 4  ;;  %v8108_v52 = vrot.slane %v1208_v36, 9  ;;  %v1293_v53 = vrot.slane %v1209_v41, 5  ;;  %v564_v10 = vld [vmem:[%s9915_s26 + $0x98] sm:$0xf] }
  0x1d   : > { %1519 = vmatpush.bf16.msra.mxu2 %v9931_v18  ;;  %v868_v48 = vor.u32 %v867_v38, %v9951_v37  ;;  %v882_v51 = vor.u32 %v881_v44, %v878_v43  ;;  %v873_v57 = vrot.slane %v871_v39, 5  ;;  %v9979_v58 = vrot.slane %v885_v40, 5  ;;  %v9415_v11 = vld [vmem:[%s12756_s1 + $0x48] sm:$0xff]  ;;  %v9414_v24 = vld [vmem:[%s12756_s1 + $0x40] sm:$0xff]  ;;  %v531_v35 = vld [vmem:[%s9915_s26 + $0x14] sm:$0xf] }
  0x1e   : > { %v1296_v60 = vrot.slane %v9962_v45, 5  ;;  %v1295_v63 = vrot.slane %v1293_v53, 4  ;;  %v593_v1 = vshrl.u32 %v9926_v13, 16  ;;  %v582_v4 = vsel %vm9969_vm4, %v577_v46, %v9936_v23  ;;  %v10025_v16 = vld [vmem:[%s12756_s1 + $0x88] sm:$0xff]  ;;  %v9406_v23 = vld [vmem:[%s12756_s1] sm:$0xff]  ;;  %v9461_v38 = vld [vmem:[%s12756_s1 + $0x138] sm:$0xff] }
  0x1f   : > { %416 = vmatpush.bf16.msra.mxu0 %v9409_v30  ;;  %v869_v56 = vrot.slane %v868_v48, 4  ;;  %v883_v62 = vrot.slane %v882_v51, 4  ;;  %v592_v6 = vsel %vm9969_vm4, %v587_v50, %v9964_v47  ;;  %v889_v7 = vshrl.u32 %v9941_v27, 16  ;;  %v529_v29 = vld [vmem:[%s9915_s26 + $0xc] sm:$0x1]  ;;  %v10038_v34 = vld [vmem:[%s12756_s1 + $0x80] sm:$0xff] }
  0x20   : > { %1038 = vmatpush.bf16.msra.mxu1 %v9417_v31  ;;  %9699 = vmatpush.bf16.msra.mxu3 %v9417_v31  ;;  %v1294_v9 = vsel %vm9983_vm5, %v8108_v52, %v1293_v53  ;;  %v1297_v14 = vsel %vm9983_vm5, %v1295_v63, %v1296_v60  ;;  %v604_v15 = vshrl.u32 %v530_v0, 16  ;;  %v607_v17 = vshll.u32 %v530_v0, 16  ;;  %v565_v39 = vld [vmem:[%s9915_s26 + $0x9c] sm:$0x1]  ;;  %v9391_v41 = vld [vmem:[%s9915_s26] sm:$0xff]  ;;  %s12885_s12 = smov (!%p215_p6, %s7961_s12), 15 }
  0x21   : > { %1520 = vmatpush.bf16.msra.mxu2 %v9959_v42  ;;  %v874_v12 = vsel %vm9969_vm4, %v869_v56, %v873_v57  ;;  %v888_v13 = vsel %vm9969_vm4, %v883_v62, %v9979_v58  ;;  %v926_v19 = vunpack.c.l.b16 %v582_v4  ;;  %v927_v20 = vunpack.c.l.b16 %v592_v6  ;;  %v1212_v57 = vld [vmem:[%s9915_s26 + $0x10] sm:$0xe]  ;;  %s7962_s15 = sshll.u32 %s12885_s12, 1 }
  0x22   : > { %v1408_v21 = vunpack.c.l.b16 %v1294_v9  ;;  %v595_v22 = vrot.slane %v593_v1, 4  ;;  %v952_v25 = vunpack.c.l.b16 %v874_v12  ;;  %v953_v26 = vunpack.c.l.b16 %v888_v13  ;;  %v9460_v62 = vld [vmem:[%s12756_s1 + $0x130] sm:$0xff]  ;;  %s219_s16 = sadd.s32 %s7963_s13, %s7962_s15 }
  0x23   : > { %417 = vmatpush.bf16.msra.mxu0 %v9408_v54  ;;  %v1409_v27 = vunpack.c.l.b16 %v1297_v14  ;;  %v895_v28 = vshll.u32 %v564_v10, 16  ;;  %v606_v30 = vrot.slane %v604_v15, 4  ;;  %v609_v31 = vrot.slane %v607_v17, 5  ;;  %v1211_v54 = vld [vmem:[%s9915_s26 + $0xc] sm:$0x1]  ;;  %s7964_s25 = sshll.u32 %s219_s16, 3 }
  0x24   : > { %1039 = vmatpush.bf16.msra.mxu1 %v9416_v55  ;;  %9700 = vmatpush.bf16.msra.mxu3 %v9416_v55  ;;  %v891_v32 = vrot.slane %v889_v7, 4  ;;  %v899_v33 = vshrl.u32 %v564_v10, 16  ;;  %v956_v43 = vpack.c.b16 %v927_v20, %v926_v19  ;;  %v969_v44 = vpack.c.b16 %v953_v26, %v952_v25  ;;  %v9392_v26 = vld [vmem:[%s9915_s26 + $0xc] sm:$0xf0]  ;;  %s12610_s29 = scalar_lea.vmem %s12759_s4, %s7964_s25 }
  0x25   : > { %1521 = vmatpush.bf16.msra.mxu2 %v9992_v61  ;;  %v897_v36 = vrot.slane %v895_v28, 5  ;;  %v596_v46 = vor.u32 %v595_v22, %v9964_v47  ;;  %v599_v48 = vshll.u32 %v529_v29, 16  ;;  %v1438_v50 = vpack.c.b16 %v1409_v27, %v1408_v21  ;;  %v1213_v47 = vld [vmem:[%s9915_s26 + $0x14] sm:$0xf]  ;;  %v7974_v21 = vld [vmem:[%s9915_s26 + $0x8] sm:$0xf] }
  0x26   : > { %v901_v40 = vrot.slane %v899_v33, 4  ;;  %v610_v51 = vor.u32 %v609_v31, %v606_v30  ;;  %v613_v52 = vshll.u32 %v531_v35, 16  ;;  %v892_v53 = vor.u32 %v891_v32, %v9979_v58  ;;  %v533_v29 = vld [vmem:[%s9915_s26 + $0x1c] sm:$0x1]  ;;  %v1214_v32 = vld [vmem:[%s9915_s26 + $0x18] sm:$0xf] }
  0x27   : > { %418 = vmatpush.bf16.msra.mxu0 %v9407_v3  ;;  %v905_v56 = vshll.u32 %v565_v39, 16  ;;  %v597_v63 = vrot.slane %v596_v46, 4  ;;  %v601_v58 = vrot.slane %v599_v48, 5  ;;  %v1298_v0 = vrot.slane %v1296_v60, 4  ;;  %v1243_v48 = vld [vmem:[%s9915_s26 + $0x8c] sm:$0x1] }
  0x28   : > { %1040 = vmatpush.bf16.msra.mxu1 %v9415_v11  ;;  %9701 = vmatpush.bf16.msra.mxu3 %v9415_v11  ;;  %v902_v55 = vor.u32 %v901_v40, %v897_v36  ;;  %v1299_v1 = vrot.slane %v1211_v54, 5  ;;  %v611_v3 = vrot.slane %v610_v51, 4  ;;  %v615_v4 = vrot.slane %v613_v52, 5  ;;  %v532_v11 = vld [vmem:[%s9915_s26 + $0x18] sm:$0xf] }
  0x29   : > { %1522 = vmatpush.bf16.msra.mxu2 %v10025_v16  ;;  %v907_v7 = vrot.slane %v905_v56, 5  ;;  %v8109_v9 = vrot.slane %v1212_v57, 9  ;;  %v1303_v10 = vrot.slane %v1213_v47, 5  ;;  %v602_v12 = vsel %vm9969_vm4, %v597_v63, %v601_v58  ;;  %v10087_v51 = vld [vmem:[%s9915_s26 + $0x94] sm:$0xf] }
  0x2a   : > { %v903_v6 = vrot.slane %v902_v55, 4  ;;  %v617_v45 = vshrl.u32 %v531_v35, 16  ;;  %v1300_v60 = vsel %vm9983_vm5, %v1298_v0, %v1299_v1  ;;  %v616_v13 = vsel %vm9969_vm4, %v611_v3, %v615_v4  ;;  %v534_v57 = vld [vmem:[%s9915_s26 + $0x20] sm:$0xf]  ;;  %v535_v58 = vld [vmem:[%s9915_s26 + $0x24] sm:$0xf] }
  0x2b   : > { %419 = vmatpush.bf16.msra.mxu0 %v9406_v23  ;;  %v623_v15 = vshll.u32 %v532_v11, 16  ;;  %v627_v17 = vshrl.u32 %v532_v11, 16  ;;  %v1304_v19 = vsel %vm9983_vm5, %v8109_v9, %v1303_v10  ;;  %v928_v20 = vunpack.c.l.b16 %v602_v12  ;;  %v9459_v11 = vld [vmem:[%s12756_s1 + $0x128] sm:$0xff] }
  0x2c   : > { %1041 = vmatpush.bf16.msra.mxu1 %v9414_v24  ;;  %9702 = vmatpush.bf16.msra.mxu3 %v9414_v24  ;;  %v929_v22 = vunpack.c.l.b16 %v616_v13  ;;  %v1410_v24 = vunpack.c.l.b16 %v1300_v60  ;;  %v619_v25 = vrot.slane %v617_v45, 4  ;;  %v1411_v28 = vunpack.c.l.b16 %v1304_v19 }
  0x2d   : > { %1523 = vmatpush.bf16.msra.mxu2 %v10038_v34  ;;  %v625_v30 = vrot.slane %v623_v15, 5  ;;  %v629_v31 = vrot.slane %v627_v17, 4  ;;  %v7975_v33 = vor.u32 %v9392_v26, %v7974_v21  ;;  %v1305_v52 = vrot.slane %v1303_v10, 4 }
  0x2e   : > { %420 = vmatmul.bf16.vlgmr.msra.gmra.mxu0 %v9391_v41  ;;  %v957_v35 = vpack.c.b16 %v929_v22, %v928_v20  ;;  %v1439_v40 = vpack.c.b16 %v1411_v28, %v1410_v24  ;;  %v1383_v63 = vrot.slane %v10087_v51, 5  ;;  %v638_v3 = vshrl.u32 %v534_v57, 16  ;;  %v1217_v22 = vld [vmem:[%s9915_s26 + $0x24] sm:$0xf]  ;;  %v9393_v24 = vld [vmem:[%s9915_s26 + $0x14] sm:$0xff] }
  0x2f   : > { %2558 = vmatpush.bf16.msrb.mxu0 %v9461_v38  ;;  %1042 = vmatmul.bf16.vlgmr.msra.gmra.mxu1 %v956_v43  ;;  %v633_v38 = vshll.u32 %v533_v29, 16  ;;  %v630_v41 = vor.u32 %v629_v31, %v625_v30  ;;  %v1306_v43 = vrot.slane %v1214_v32, 5  ;;  %v651_v9 = vshrl.u32 %v535_v58, 16  ;;  %v1216_v28 = vld [vmem:[%s9915_s26 + $0x20] sm:$0xe] }
  0x30   : > { %9703 = vmatpush.bf16.msrb.mxu3 %v9882_v2  ;;  %1524 = vmatmul.bf16.vlgmr.msra.gmra.mxu2 %v1438_v50  ;;  %v893_v2 = vrot.slane %v892_v53, 4  ;;  %v1244_v50 = vld [vmem:[%s9915_s26 + $0x90] sm:$0xe]  ;;  %v640_v15 = vrot.slane %v638_v3, 4  ;;  %v1313_v29 = vrot.slane %v1217_v22, 5 }
  0x31   : > { %1107 = vmatmul.bf16.vlgmr.msra.gmra.mxu3 %v969_v44  ;;  %v1215_v44 = vld [vmem:[%s9915_s26 + $0x1c] sm:$0x1]  ;;  %v631_v53 = vrot.slane %v630_v41, 4  ;;  %v635_v54 = vrot.slane %v633_v38, 5  ;;  %v1308_v55 = vrot.slane %v1306_v43, 4  ;;  %v1307_v1 = vsel %vm9983_vm5, %v1305_v52, %v1306_v43 }
  0x32   : > { %v898_v14 = vsel %vm9969_vm4, %v893_v2, %v897_v36  ;;  %v620_v36 = vor.u32 %v619_v25, %v615_v4  ;;  %v1309_v56 = vrot.slane %v1215_v44, 5  ;;  %v641_v4 = vshll.u32 %v534_v57, 16  ;;  %v1247_v38 = vld [vmem:[%s9915_s26 + $0x9c] sm:$0x1]  ;;  %v538_v52 = vld [vmem:[%s9915_s26 + $0x30] sm:$0xf] }
  0x33   : > { %2559 = vmatpush.bf16.msrb.mxu0 %v9460_v62  ;;  %v954_v23 = vunpack.c.l.b16 %v898_v14  ;;  %v8117_v62 = vrot.slane %v1244_v50, 9  ;;  %v636_v2 = vsel %vm9969_vm4, %v631_v53, %v635_v54  ;;  %v1412_v45 = vunpack.c.l.b16 %v1307_v1  ;;  %v9453_v14 = vld [vmem:[%s12756_s1 + $0xf8] sm:$0xff]  ;;  %v1220_v22 = vld [vmem:[%s9915_s26 + $0x30] sm:$0xe] }
  0x34   : > { %9704 = vmatpush.bf16.msrb.mxu3 %v9896_v5  ;;  %v908_v5 = vsel %vm9969_vm4, %v903_v6, %v907_v7  ;;  %v1310_v6 = vsel %vm9983_vm5, %v1308_v55, %v1309_v56  ;;  %v647_v7 = vshll.u32 %v535_v58, 16  ;;  %v931_v60 = vunpack.c.l.b16 %v636_v2  ;;  %v9450_v58 = vld [vmem:[%s12756_s1 + $0xe0] sm:$0xff] }
  0x35   : > { %v955_v27 = vunpack.c.l.b16 %v908_v5  ;;  %v1413_v13 = vunpack.c.l.b16 %v1310_v6  ;;  %v643_v17 = vrot.slane %v641_v4, 5  ;;  %v653_v21 = vrot.slane %v651_v9, 4 }
  0x36   : > { %v649_v20 = vrot.slane %v647_v7, 5  ;;  %v1385_v43 = vrot.slane %v1383_v63, 4  ;;  %v1389_v51 = vrot.slane %v1247_v38, 5 }
  0x37   : > { %v970_v39 = vpack.c.b16 %v955_v27, %v954_v23  ;;  %2560 = vmatpush.bf16.msrb.mxu0 %v9459_v11  ;;  %v1246_v23 = vld [vmem:[%s9915_s26 + $0x98] sm:$0xf]  ;;  %v1440_v26 = vpack.c.b16 %v1413_v13, %v1412_v45  ;;  %v644_v27 = vor.u32 %v643_v17, %v640_v15  ;;  %v537_v11 = vld [vmem:[%s9915_s26 + $0x2c] sm:$0x1]  ;;  %v9394_v45 = vld [vmem:[%s9915_s26 + $0x20] sm:$0xff] }
  0x38   : > { %9705 = vmatpush.bf16.msrb.mxu3 %v9913_v8  ;;  %v10079_v8 = vld [vmem:[%s9915_s26 + $0x88] sm:$0xf]  ;;  %v654_v31 = vor.u32 %v653_v21, %v649_v20  ;;  %v667_v17 = vshll.u32 %v537_v11, 16  ;;  %v1219_v21 = vld [vmem:[%s9915_s26 + $0x2c] sm:$0x1] }
  0x39   : > { %v1376_v46 = vrot.slane %v10079_v8, 5  ;;  %v9467_v8 = vld [vmem:[%s12756_s1 + $0x168] sm:$0xff] }
  0x3a   : > { %v655_v44 = vrot.slane %v654_v31, 4  ;;  %v1319_v31 = vrot.slane %v1219_v21, 5 }
  0x3b   : > { %v1378_v47 = vrot.slane %v1376_v46, 4 }
  0x3c   : > { %9706 = vmatpush.bf16.msrb.mxu3 %v9931_v18  ;;  %v621_v18 = vrot.slane %v620_v36, 4  ;;  %v9452_v36 = vld [vmem:[%s12756_s1 + $0xf0] sm:$0xff] }
  0x3e   : > { %425 = vmatmul.bf16.gmra.mxu0 %v7975_v33  ;;  %v626_v0 = vsel %vm9969_vm4, %v621_v18, %v625_v30  ;;  %v10121_v33 = vld [vmem:[%s9915_s26 + $0x28] sm:$0xf] }
  0x3f   : > { %1047 = vmatmul.bf16.gmra.mxu1 %v957_v35  ;;  %v930_v12 = vunpack.c.l.b16 %v626_v0  ;;  %v1386_v35 = vrot.slane %v1246_v23, 5  ;;  %v1316_v41 = vrot.slane %v10121_v33, 5  ;;  %v9451_v18 = vld [vmem:[%s12756_s1 + $0xe8] sm:$0xff]  ;;  %v540_v23 = vld [vmem:[%s9915_s26 + $0x38] sm:$0xf] }
  0x40   : > { %9707 = vmatpush.bf16.msrb.mxu3 %v9959_v42  ;;  %1529 = vmatmul.bf16.gmra.mxu2 %v1439_v40  ;;  %v1379_v42 = vrot.slane %v1243_v48, 5  ;;  %v1315_v40 = vrot.slane %v1313_v29, 4  ;;  %v695_v38 = vshrl.u32 %v540_v23, 16 }
  0x41   : > { %1112 = vmatmul.bf16.gmra.mxu3 %v970_v39  ;;  %v958_v25 = vpack.c.b16 %v931_v60, %v930_v12  ;;  %v645_v39 = vrot.slane %v644_v27, 4  ;;  %v1388_v50 = vrot.slane %v1386_v35, 4  ;;  %v1387_v57 = vsel %vm9983_vm5, %v1385_v43, %v1386_v35  ;;  %v539_v12 = vld [vmem:[%s9915_s26 + $0x34] sm:$0xf] }
  0x42   : > { %v1380_v10 = vsel %vm9983_vm5, %v1378_v47, %v1379_v42  ;;  %v1317_v56 = vsel %vm9983_vm5, %v1315_v40, %v1316_v41  ;;  %v1436_v2 = vunpack.c.l.b16 %v1387_v57  ;;  %v685_v35 = vshrl.u32 %v539_v12, 16  ;;  %v9446_v40 = vld [vmem:[%s12756_s1 + $0xc0] sm:$0xff] }
  0x43   : > { %v1434_v5 = vunpack.c.l.b16 %v1380_v10  ;;  %v650_v54 = vsel %vm9969_vm4, %v645_v39, %v649_v20  ;;  %v1390_v42 = vsel %vm9983_vm5, %v1388_v50, %v1389_v51  ;;  %v1415_v4 = vunpack.c.l.b16 %v1317_v56  ;;  %v9448_v20 = vld [vmem:[%s12756_s1 + $0xd0] sm:$0xff] }
  0x44   : > { %9708 = vmatpush.bf16.msrb.mxu3 %v9992_v61  ;;  %v1384_v61 = vsel %vm9983_vm5, %v8117_v62, %v1383_v63  ;;  %v672_v62 = vshrl.u32 %v538_v52, 16  ;;  %v675_v63 = vshll.u32 %v538_v52, 16  ;;  %v932_v0 = vunpack.c.l.b16 %v650_v54  ;;  %v541_v52 = vld [vmem:[%s9915_s26 + $0x3c] sm:$0x1]  ;;  %v9395_v54 = vld [vmem:[%s9915_s26 + $0x2c] sm:$0xf0] }
  0x45   : > { %v1435_v19 = vunpack.c.l.b16 %v1384_v61  ;;  %v1437_v6 = vunpack.c.l.b16 %v1390_v42  ;;  %v9449_v61 = vld [vmem:[%s12756_s1 + $0xd8] sm:$0xff]  ;;  %v697_v50 = vrot.slane %v695_v38, 4  ;;  %v701_v42 = vshll.u32 %v541_v52, 16 }
  0x46   : > { %v674_v9 = vrot.slane %v672_v62, 4  ;;  %v677_v10 = vrot.slane %v675_v63, 5  ;;  %v1222_v62 = vld [vmem:[%s9915_s26 + $0x38] sm:$0xf] }
  0x47   : > { %v1451_v30 = vpack.c.b16 %v1435_v19, %v1434_v5  ;;  %v681_v19 = vshll.u32 %v539_v12, 16  ;;  %v9457_v52 = vld [vmem:[%s12756_s1 + $0x118] sm:$0xff] }
  0x48   : > { %9709 = vmatpush.bf16.msrb.mxu3 %v10025_v16  ;;  %v536_v16 = vld [vmem:[%s9915_s26 + $0x28] sm:$0xf]  ;;  %v678_v5 = vor.u32 %v677_v10, %v674_v9  ;;  %v542_v9 = vld [vmem:[%s9915_s26 + $0x40] sm:$0xf]  ;;  %v543_v10 = vld [vmem:[%s9915_s26 + $0x44] sm:$0xf] }
  0x49   : > { %v657_v32 = vshll.u32 %v536_v16, 16  ;;  %v661_v55 = vshrl.u32 %v536_v16, 16  ;;  %v1221_v16 = vld [vmem:[%s9915_s26 + $0x34] sm:$0xf]  ;;  %v683_v27 = vrot.slane %v681_v19, 5 }
  0x4a   : > { %v1323_v33 = vrot.slane %v1221_v16, 5 }
  0x4b   : > { %v659_v48 = vrot.slane %v657_v32, 5  ;;  %v663_v7 = vrot.slane %v661_v55, 4  ;;  %v8111_v32 = vrot.slane %v1220_v22, 9 }
  0x4c   : > { %9710 = vmatpush.bf16.msrb.mxu3 %v10038_v34  ;;  %v8110_v34 = vrot.slane %v1216_v28, 9  ;;  %v9458_v28 = vld [vmem:[%s12756_s1 + $0x120] sm:$0xff] }
  0x4d   : > { %v660_v47 = vsel %vm9969_vm4, %v655_v44, %v659_v48  ;;  %v664_v15 = vor.u32 %v663_v7, %v659_v48  ;;  %2561 = vmatpush.bf16.msrb.mxu0 %v9458_v28  ;;  %v1324_v43 = vsel %vm9983_vm5, %v8111_v32, %v1323_v33  ;;  %v687_v44 = vrot.slane %v685_v35, 4  ;;  %v1223_v7 = vld [vmem:[%s9915_s26 + $0x3c] sm:$0x1]  ;;  %v8220_v28 = vld [vmem:[%s9915_s26 + $0x18] sm:$0xf] }
  0x4e   : > { %430 = vmatmul.bf16.gmra.mxu0 %v9393_v24  ;;  %v1314_v53 = vsel %vm9983_vm5, %v8110_v34, %v1313_v29  ;;  %v933_v3 = vunpack.c.l.b16 %v660_v47  ;;  %v9447_v29 = vld [vmem:[%s12756_s1 + $0xc8] sm:$0xff]  ;;  %v1417_v56 = vunpack.c.l.b16 %v1324_v43  ;;  %v1329_v12 = vrot.slane %v1223_v7, 5  ;;  %v547_v7 = vld [vmem:[%s9915_s26 + $0x54] sm:$0xf] }
  0x4f   : > { %1052 = vmatmul.bf16.gmra.mxu1 %v958_v25  ;;  %v1414_v1 = vunpack.c.l.b16 %v1314_v53  ;;  %v665_v24 = vrot.slane %v664_v15, 4  ;;  %v669_v25 = vrot.slane %v667_v17, 5  ;;  %v7986_v53 = vld [vmem:[%s9915_s26 + $0x28] sm:$0xf]  ;;  %v688_v57 = vor.u32 %v687_v44, %v683_v27 }
  0x50   : > { %1879 = vmatpush.bf16.msra.mxu3 %v9453_v14  ;;  %1534 = vmatmul.bf16.gmra.mxu2 %v1440_v26  ;;  %v959_v60 = vpack.c.b16 %v933_v3, %v932_v0  ;;  %v1452_v14 = vpack.c.b16 %v1437_v6, %v1436_v2  ;;  %v679_v26 = vrot.slane %v678_v5, 4  ;;  %v7987_v63 = vor.u32 %v9395_v54, %v7986_v53  ;;  %v546_v53 = vld [vmem:[%s9915_s26 + $0x50] sm:$0xf] }
  0x51   : > { %1589 = vmatmul.bf16.vlgmr.msrb.gmra.mxu3 %v1451_v30  ;;  %v1441_v13 = vpack.c.b16 %v1415_v4, %v1414_v1  ;;  %v1318_v30 = vrot.slane %v1316_v41, 4  ;;  %v670_v34 = vsel %vm9969_vm4, %v665_v24, %v669_v25  ;;  %v9431_v1 = vld [vmem:[%s9915_s26 + $0x10] sm:$0xff]  ;;  %v1326_v3 = vrot.slane %v1222_v62, 5  ;;  %2562 = vmatpush.bf16.msrb.mxu0 %v9457_v52 }
  0x52   : > { %v684_v39 = vsel %vm9969_vm4, %v679_v26, %v683_v27  ;;  %v934_v51 = vunpack.c.l.b16 %v670_v34  ;;  %v689_v4 = vrot.slane %v688_v57, 4  ;;  %v703_v6 = vrot.slane %v701_v42, 5  ;;  %v544_v27 = vld [vmem:[%s9915_s26 + $0x48] sm:$0xf] }
  0x53   : > { %v1320_v41 = vsel %vm9983_vm5, %v1318_v30, %v1319_v31  ;;  %v1328_v11 = vrot.slane %v1326_v3, 4  ;;  %v715_v15 = vshll.u32 %v543_v10, 16  ;;  %v719_v17 = vshrl.u32 %v543_v10, 16  ;;  %v1225_v30 = vld [vmem:[%s9915_s26 + $0x44] sm:$0xf]  ;;  %v9396_v31 = vld [vmem:[%s9915_s26 + $0x34] sm:$0xff] }
  0x54   : > { %1880 = vmatpush.bf16.msra.mxu3 %v9452_v36  ;;  %v691_v36 = vshll.u32 %v540_v23, 16  ;;  %v1416_v55 = vunpack.c.l.b16 %v1320_v41  ;;  %v1226_v41 = vld [vmem:[%s9915_s26 + $0x48] sm:$0xf]  ;;  %v729_v57 = vshrl.u32 %v544_v27, 16  ;;  %v740_v42 = vshrl.u32 %v546_v53, 16 }
  0x55   : > { %v1330_v19 = vsel %vm9983_vm5, %v1328_v11, %v1329_v12  ;;  %v717_v23 = vrot.slane %v715_v15, 5  ;;  %v721_v24 = vrot.slane %v719_v17, 4  ;;  %v743_v62 = vshll.u32 %v546_v53, 16  ;;  %v9433_v11 = vld [vmem:[%s9915_s26 + $0x24] sm:$0xff]  ;;  %v1228_v15 = vld [vmem:[%s9915_s26 + $0x50] sm:$0xe] }
  0x56   : > { %v693_v48 = vrot.slane %v691_v36, 5  ;;  %v1442_v0 = vpack.c.b16 %v1417_v56, %v1416_v55  ;;  %v1419_v26 = vunpack.c.l.b16 %v1330_v19  ;;  %v725_v36 = vshll.u32 %v544_v27, 16  ;;  %v1229_v17 = vld [vmem:[%s9915_s26 + $0x54] sm:$0xf] }
  0x57   : > { %v722_v35 = vor.u32 %v721_v24, %v717_v23  ;;  %v8113_v24 = vrot.slane %v1228_v15, 9 }
  0x58   : > { %1881 = vmatpush.bf16.msra.mxu3 %v9451_v18  ;;  %v935_v18 = vunpack.c.l.b16 %v684_v39  ;;  %v698_v47 = vor.u32 %v697_v50, %v693_v48  ;;  %v1224_v39 = vld [vmem:[%s9915_s26 + $0x40] sm:$0xe] }
  0x59   : > { %v723_v44 = vrot.slane %v722_v35, 4  ;;  %v8112_v50 = vrot.slane %v1224_v39, 9  ;;  %v549_v39 = vld [vmem:[%s9915_s26 + $0x5c] sm:$0x1] }
  0x5a   : > { %v699_v2 = vrot.slane %v698_v47, 4 }
  0x5c   : > { %1882 = vmatpush.bf16.msra.mxu3 %v9450_v58  ;;  %v960_v58 = vpack.c.b16 %v935_v18, %v934_v51  ;;  %v1336_v18 = vrot.slane %v1226_v41, 5  ;;  %v9398_v41 = vld [vmem:[%s9915_s26 + $0x4c] sm:$0xf0] }
  0x5e   : > { %435 = vmatmul.bf16.gmra.mxu0 %v9394_v45  ;;  %v694_v45 = vsel %vm9969_vm4, %v689_v4, %v693_v48  ;;  %v727_v48 = vrot.slane %v725_v36, 5  ;;  %v742_v4 = vrot.slane %v740_v42, 4 }
  0x5f   : > { %1057 = vmatmul.bf16.gmra.mxu1 %v959_v60  ;;  %v704_v60 = vsel %vm9969_vm4, %v699_v2, %v703_v6  ;;  %v745_v2 = vrot.slane %v743_v62, 5  ;;  %v545_v6 = vld [vmem:[%s9915_s26 + $0x4c] sm:$0x1]  ;;  %v1231_v62 = vld [vmem:[%s9915_s26 + $0x5c] sm:$0x1] }
  0x60   : > { %1883 = vmatpush.bf16.msra.mxu3 %v9449_v61  ;;  %1539 = vmatmul.bf16.gmra.mxu2 %v1441_v13  ;;  %v1325_v61 = vrot.slane %v1323_v33, 4  ;;  %v706_v13 = vshrl.u32 %v542_v9, 16  ;;  %v937_v21 = vunpack.c.l.b16 %v704_v60  ;;  %v728_v55 = vsel %vm9969_vm4, %v723_v44, %v727_v48 }
  0x61   : > { %1594 = vmatmul.bf16.gmra.mxu3 %v1452_v14  ;;  %v709_v14 = vshll.u32 %v542_v9, 16  ;;  %v9397_v9 = vld [vmem:[%s9915_s26 + $0x40] sm:$0xff]  ;;  %v746_v60 = vor.u32 %v745_v2, %v742_v4 }
  0x62   : > { %v1327_v5 = vsel %vm9983_vm5, %v1325_v61, %v1326_v3  ;;  %v708_v22 = vrot.slane %v706_v13, 4  ;;  %v731_v3 = vrot.slane %v729_v57, 4  ;;  %v749_v13 = vshll.u32 %v547_v7, 16 }
  0x63   : > { %v711_v16 = vrot.slane %v709_v14, 5  ;;  %v1418_v25 = vunpack.c.l.b16 %v1327_v5  ;;  %v1227_v14 = vld [vmem:[%s9915_s26 + $0x4c] sm:$0x1]  ;;  %v548_v5 = vld [vmem:[%s9915_s26 + $0x58] sm:$0xf] }
  0x64   : > { %1884 = vmatpush.bf16.msra.mxu3 %v9448_v20  ;;  %v936_v20 = vunpack.c.l.b16 %v694_v45  ;;  %v732_v12 = vor.u32 %v731_v3, %v727_v48  ;;  %v735_v45 = vshll.u32 %v545_v6, 16  ;;  %v759_v27 = vshll.u32 %v548_v5, 16 }
  0x65   : > { %v712_v33 = vor.u32 %v711_v16, %v708_v22  ;;  %v1443_v38 = vpack.c.b16 %v1419_v26, %v1418_v25  ;;  %v751_v22 = vrot.slane %v749_v13, 5  ;;  %v1338_v16 = vrot.slane %v1336_v18, 4 }
  0x66   : > { %v961_v32 = vpack.c.b16 %v937_v21, %v936_v20  ;;  %v733_v19 = vrot.slane %v732_v12, 4  ;;  %v737_v20 = vrot.slane %v735_v45, 5  ;;  %v747_v21 = vrot.slane %v746_v60, 4  ;;  %v9456_v12 = vld [vmem:[%s12756_s1 + $0x110] sm:$0xff] }
  0x67   : > { %v713_v43 = vrot.slane %v712_v33, 4  ;;  %v1343_v25 = vrot.slane %v1229_v17, 5  ;;  %v753_v26 = vshrl.u32 %v547_v7, 16  ;;  %v761_v35 = vrot.slane %v759_v27, 5  ;;  %2563 = vmatpush.bf16.msrb.mxu0 %v9456_v12 }
  0x68   : > { %1885 = vmatpush.bf16.msra.mxu3 %v9447_v29  ;;  %v9432_v29 = vld [vmem:[%s9915_s26 + $0x1c] sm:$0xf0]  ;;  %v1349_v3 = vrot.slane %v1231_v62, 5 }
  0x69   : > { %v8221_v34 = vor.u32 %v9432_v29, %v8220_v28  ;;  %v718_v54 = vsel %vm9969_vm4, %v713_v43, %v717_v23  ;;  %v1339_v23 = vrot.slane %v1227_v14, 5  ;;  %v763_v28 = vshrl.u32 %v548_v5, 16 }
  0x6a   : > { %v738_v29 = vsel %vm9969_vm4, %v733_v19, %v737_v20  ;;  %v755_v33 = vrot.slane %v753_v26, 4  ;;  %v552_v20 = vld [vmem:[%s9915_s26 + $0x68] sm:$0xf] }
  0x6b   : > { %v765_v36 = vrot.slane %v763_v28, 4  ;;  %v793_v27 = vshll.u32 %v552_v20, 16 }
  0x6c   : > { %1886 = vmatpush.bf16.msra.mxu3 %v9446_v40  ;;  %v1333_v40 = vrot.slane %v1225_v30, 5  ;;  %v752_v30 = vsel %vm9969_vm4, %v747_v21, %v751_v22  ;;  %v756_v48 = vor.u32 %v755_v33, %v751_v22  ;;  %v8232_v21 = vld [vmem:[%s9915_s26 + $0x38] sm:$0xf]  ;;  %v9435_v22 = vld [vmem:[%s9915_s26 + $0x3c] sm:$0xf0] }
  0x6e   : > { %440 = vmatmul.bf16.gmra.mxu0 %v7987_v63  ;;  %v1335_v51 = vrot.slane %v1333_v40, 4  ;;  %v1334_v56 = vsel %vm9983_vm5, %v8112_v50, %v1333_v40  ;;  %v938_v63 = vunpack.c.l.b16 %v718_v54  ;;  %v7998_v40 = vld [vmem:[%s9915_s26 + $0x48] sm:$0xf]  ;;  %v766_v50 = vor.u32 %v765_v36, %v761_v35 }
  0x6f   : > { %1062 = vmatmul.bf16.gmra.mxu1 %v960_v58  ;;  %v939_v58 = vunpack.c.l.b16 %v728_v55  ;;  %v7999_v52 = vor.u32 %v9398_v41, %v7998_v40  ;;  %v9434_v55 = vld [vmem:[%s9915_s26 + $0x30] sm:$0xff]  ;;  %v757_v57 = vrot.slane %v756_v48, 4  ;;  %v1234_v36 = vld [vmem:[%s9915_s26 + $0x68] sm:$0xf] }
  0x70   : > { %1544 = vmatmul.bf16.gmra.mxu2 %v1442_v0  ;;  %v1337_v47 = vsel %vm9983_vm5, %v1335_v51, %v1336_v18  ;;  %v1420_v0 = vunpack.c.l.b16 %v1334_v56  ;;  %v769_v51 = vshll.u32 %v549_v39, 16  ;;  %v1230_v18 = vld [vmem:[%s9915_s26 + $0x58] sm:$0xf]  ;;  %v795_v39 = vrot.slane %v793_v27, 5 }
  0x71   : > { %1887 = vmatmul.bf16.vlgmr.msra.gmra.mxu3 %v9431_v1  ;;  %v1421_v1 = vunpack.c.l.b16 %v1337_v47  ;;  %v962_v10 = vpack.c.b16 %v939_v58, %v938_v63  ;;  %v1346_v56 = vrot.slane %v1230_v18, 5  ;;  %v767_v47 = vrot.slane %v766_v50, 4  ;;  %v550_v63 = vld [vmem:[%s9915_s26 + $0x60] sm:$0xf]  ;;  %v551_v58 = vld [vmem:[%s9915_s26 + $0x64] sm:$0xf] }
  0x72   : > { %v771_v42 = vrot.slane %v769_v51, 5  ;;  %v762_v4 = vsel %vm9969_vm4, %v757_v57, %v761_v35  ;;  %v774_v6 = vshrl.u32 %v550_v63, 16  ;;  %v777_v7 = vshll.u32 %v550_v63, 16 }
  0x73   : > { %v1444_v61 = vpack.c.b16 %v1421_v1, %v1420_v0  ;;  %v1345_v0 = vrot.slane %v1343_v25, 4  ;;  %v1348_v1 = vrot.slane %v1346_v56, 4  ;;  %v942_v45 = vunpack.c.l.b16 %v762_v4 }
  0x74   : > { %v772_v2 = vsel %vm9969_vm4, %v767_v47, %v771_v42  ;;  %v776_v13 = vrot.slane %v774_v6, 4  ;;  %v779_v14 = vrot.slane %v777_v7, 5  ;;  %v553_v6 = vld [vmem:[%s9915_s26 + $0x6c] sm:$0x1]  ;;  %v555_v7 = vld [vmem:[%s9915_s26 + $0x74] sm:$0xf] }
  0x75   : > { %v943_v60 = vunpack.c.l.b16 %v772_v2 }
  0x7e   : > { %445 = vmatmul.bf16.gmra.mxu0 %v9396_v31  ;;  %v1340_v31 = vsel %vm9983_vm5, %v1338_v16, %v1339_v23  ;;  %v1233_v16 = vld [vmem:[%s9915_s26 + $0x64] sm:$0xf]  ;;  %v9399_v23 = vld [vmem:[%s9915_s26 + $0x54] sm:$0xff] }
  0x7f   : > { %1067 = vmatmul.bf16.gmra.mxu1 %v961_v32  ;;  %v1344_v32 = vsel %vm9983_vm5, %v8113_v24, %v1343_v25  ;;  %v1422_v43 = vunpack.c.l.b16 %v1340_v31  ;;  %v964_v24 = vpack.c.b16 %v943_v60, %v942_v45  ;;  %v780_v25 = vor.u32 %v779_v14, %v776_v13 }
  0x80   : > { %1549 = vmatmul.bf16.gmra.mxu2 %v1443_v38  ;;  %v940_v38 = vunpack.c.l.b16 %v738_v29  ;;  %v1423_v44 = vunpack.c.l.b16 %v1344_v32  ;;  %v8233_v31 = vor.u32 %v9435_v22, %v8232_v21  ;;  %v1232_v32 = vld [vmem:[%s9915_s26 + $0x60] sm:$0xe]  ;;  %v1353_v33 = vrot.slane %v1233_v16, 5  ;;  %v1235_v21 = vld [vmem:[%s9915_s26 + $0x6c] sm:$0x1] }
  0x81   : > { %1892 = vmatmul.bf16.gmra.mxu3 %v8221_v34  ;;  %v941_v34 = vunpack.c.l.b16 %v752_v30  ;;  %v8114_v40 = vrot.slane %v1232_v32, 9  ;;  %v1236_v22 = vld [vmem:[%s9915_s26 + $0x70] sm:$0xe]  ;;  %v1237_v16 = vld [vmem:[%s9915_s26 + $0x74] sm:$0xf]  ;;  %v821_v32 = vshrl.u32 %v555_v7, 16 }
  0x82   : > { %v1445_v54 = vpack.c.b16 %v1423_v44, %v1422_v43  ;;  %v1355_v41 = vrot.slane %v1353_v33, 4  ;;  %v1356_v43 = vrot.slane %v1234_v36, 5  ;;  %v554_v44 = vld [vmem:[%s9915_s26 + $0x70] sm:$0xf] }
  0x83   : > { %v963_v53 = vpack.c.b16 %v941_v34, %v940_v38  ;;  %v781_v38 = vrot.slane %v780_v25, 4  ;;  %v808_v47 = vshrl.u32 %v554_v44, 16  ;;  %v811_v42 = vshll.u32 %v554_v44, 16  ;;  %v9455_v44 = vld [vmem:[%s12756_s1 + $0x108] sm:$0xff] }
  0x84   : > { %v1357_v57 = vsel %vm9983_vm5, %v1355_v41, %v1356_v43  ;;  %2564 = vmatpush.bf16.msrb.mxu0 %v9455_v44 }
  0x85   : > { %v810_v4 = vrot.slane %v808_v47, 4  ;;  %v813_v2 = vrot.slane %v811_v42, 5  ;;  %v9401_v42 = vld [vmem:[%s9915_s26 + $0x6c] sm:$0xf0] }
  0x8e   : > { %450 = vmatmul.bf16.gmra.mxu0 %v9397_v9  ;;  %v783_v9 = vshll.u32 %v551_v58, 16 }
  0x8f   : > { %1072 = vmatmul.bf16.gmra.mxu1 %v962_v10  ;;  %v787_v10 = vshrl.u32 %v551_v58, 16 }
  0x90   : > { %1554 = vmatmul.bf16.gmra.mxu2 %v1444_v61  ;;  %v1347_v61 = vsel %vm9983_vm5, %v1345_v0, %v1346_v56  ;;  %v785_v15 = vrot.slane %v783_v9, 5 }
  0x91   : > { %1897 = vmatmul.bf16.gmra.mxu3 %v9433_v11  ;;  %v1350_v11 = vsel %vm9983_vm5, %v1348_v1, %v1349_v3  ;;  %v789_v17 = vrot.slane %v787_v10, 4  ;;  %v1424_v5 = vunpack.c.l.b16 %v1347_v61  ;;  %v1427_v1 = vunpack.c.l.b16 %v1357_v57  ;;  %v9400_v61 = vld [vmem:[%s9915_s26 + $0x60] sm:$0xff] }
  0x92   : > { %v1425_v19 = vunpack.c.l.b16 %v1350_v11  ;;  %v786_v51 = vsel %vm9969_vm4, %v781_v38, %v785_v15 }
  0x93   : > { %v790_v26 = vor.u32 %v789_v17, %v785_v15  ;;  %v944_v63 = vunpack.c.l.b16 %v786_v51  ;;  %v9436_v15 = vld [vmem:[%s9915_s26 + $0x44] sm:$0xff]  ;;  %v803_v17 = vshll.u32 %v553_v6, 16 }
  0x94   : > { %v1446_v30 = vpack.c.b16 %v1425_v19, %v1424_v5  ;;  %v814_v5 = vor.u32 %v813_v2, %v810_v4  ;;  %v817_v19 = vshll.u32 %v555_v7, 16 }
  0x95   : > { %v791_v34 = vrot.slane %v790_v26, 4  ;;  %v805_v25 = vrot.slane %v803_v17, 5 }
  0x96   : > { %v815_v26 = vrot.slane %v814_v5, 4  ;;  %v819_v27 = vrot.slane %v817_v19, 5 }
  0x97   : > { %v796_v18 = vsel %vm9969_vm4, %v791_v34, %v795_v39 }
  0x98   : > { %v945_v58 = vunpack.c.l.b16 %v796_v18 }
  0x9a   : > { %v965_v11 = vpack.c.b16 %v945_v58, %v944_v63  ;;  %v557_v58 = vld [vmem:[%s9915_s26 + $0x7c] sm:$0x1] }
  0x9e   : > { %455 = vmatmul.bf16.gmra.mxu0 %v7999_v52  ;;  %v797_v52 = vshrl.u32 %v552_v20, 16 }
  0x9f   : > { %1077 = vmatmul.bf16.gmra.mxu1 %v963_v53  ;;  %v1354_v53 = vsel %vm9983_vm5, %v8114_v40, %v1353_v33 }
  0xa0   : > { %1559 = vmatmul.bf16.gmra.mxu2 %v1445_v54  ;;  %v1426_v0 = vunpack.c.l.b16 %v1354_v53  ;;  %v799_v3 = vrot.slane %v797_v52, 4  ;;  %v823_v52 = vrot.slane %v821_v32, 4 }
  0xa1   : > { %1902 = vmatmul.bf16.gmra.mxu3 %v9434_v55 }
  0xa2   : > { %v1447_v12 = vpack.c.b16 %v1427_v1, %v1426_v0  ;;  %v800_v45 = vor.u32 %v799_v3, %v795_v39  ;;  %v1238_v0 = vld [vmem:[%s9915_s26 + $0x78] sm:$0xf]  ;;  %v824_v1 = vor.u32 %v823_v52, %v819_v27  ;;  %v9438_v52 = vld [vmem:[%s9915_s26 + $0x5c] sm:$0xf0] }
  0xa4   : > { %v825_v5 = vrot.slane %v824_v1, 4 }
  0xab   : > { %v421_v28 = vpop.f32.mrf.mxu0 }
  0xac   : > { %v1043_v29 = vpop.f32.mrf.mxu1 }
  0xad   : > { %v1148_v35 = vadd.f32 %v1043_v29, %v421_v28  ;;  %v1358_v28 = vrot.slane %v1356_v43, 4  ;;  %v1359_v29 = vrot.slane %v1235_v21, 5  ;;  %v820_v43 = vsel %vm9969_vm4, %v815_v26, %v819_v27 }
  0xae   : > { %460 = vmatmul.bf16.gmra.mxu0 %v9399_v23  ;;  %v556_v23 = vld [vmem:[%s9915_s26 + $0x78] sm:$0xf]  ;;  %v947_v47 = vunpack.c.l.b16 %v820_v43 }
  0xaf   : > { %1082 = vmatmul.bf16.gmra.mxu1 %v964_v24  ;;  %v801_v24 = vrot.slane %v800_v45, 4  ;;  %v827_v33 = vshll.u32 %v556_v23, 16  ;;  %v1360_v51 = vsel %vm9983_vm5, %v1358_v28, %v1359_v29 }
  0xb0   : > { %1564 = vmatmul.bf16.gmra.mxu2 %v1446_v30  ;;  %v8115_v30 = vrot.slane %v1236_v22, 9 }
  0xb1   : > { %1907 = vmatmul.bf16.gmra.mxu3 %v8233_v31  ;;  %v1363_v31 = vrot.slane %v1237_v16, 5  ;;  %v806_v41 = vsel %vm9969_vm4, %v801_v24, %v805_v25  ;;  %v829_v53 = vrot.slane %v827_v33, 5  ;;  %v559_v24 = vld [vmem:[%s9915_s26 + $0x84] sm:$0xf] }
  0xb2   : > { %v946_v57 = vunpack.c.l.b16 %v806_v41 }
  0xb3   : > { %v1525_v50 = vpop.f32.mrf.mxu2  ;;  %v423_v55 = vpop.f32.mrf.mxu0  ;;  %v1364_v18 = vsel %vm9983_vm5, %v8115_v30, %v1363_v31  ;;  %v1365_v21 = vrot.slane %v1363_v31, 4  ;;  %v830_v25 = vsel %vm9969_vm4, %v825_v5, %v829_v53 }
  0xb4   : > { %v10255_v48 = vpop.f32.mrf.mxu3  ;;  %v10263_v54 = vadd.f32 %v1525_v50, %v1148_v35  ;;  %v1045_v56 = vpop.f32.mrf.mxu1  ;;  %v831_v35 = vshrl.u32 %v556_v23, 16  ;;  %v1429_v63 = vunpack.c.l.b16 %v1364_v18  ;;  %v966_v7 = vpack.c.b16 %v947_v47, %v946_v57  ;;  %v558_v23 = vld [vmem:[%s9915_s26 + $0x80] sm:$0xf]  ;;  %v8244_v18 = vld [vmem:[%s9915_s26 + $0x58] sm:$0xf] }
  0xb5   : > { %v1149_v62 = vadd.f32 %v1045_v56, %v423_v55  ;;  %v8010_v56 = vld [vmem:[%s9915_s26 + $0x68] sm:$0xf]  ;;  %v842_v31 = vshrl.u32 %v558_v23, 16  ;;  %v948_v43 = vunpack.c.l.b16 %v830_v25  ;;  %v1241_v47 = vld [vmem:[%s9915_s26 + $0x84] sm:$0xf] }
  0xb6   : > { %v833_v55 = vrot.slane %v831_v35, 4  ;;  %v8011_v6 = vor.u32 %v9401_v42, %v8010_v56 }
  0xb8   : > { %v834_v3 = vor.u32 %v833_v55, %v829_v53  ;;  %v844_v53 = vrot.slane %v842_v31, 4 }
  0xba   : > { %v835_v19 = vrot.slane %v834_v3, 4 }
  0xbb   : > { %v1527_v10 = vpop.f32.mrf.mxu2  ;;  %v426_v13 = vpop.f32.mrf.mxu0 }
  0xbc   : > { %v10269_v9 = vpop.f32.mrf.mxu3  ;;  %v10272_v60 = vadd.f32 %v1527_v10, %v1149_v62  ;;  %v1048_v14 = vpop.f32.mrf.mxu1  ;;  %v1428_v62 = vunpack.c.l.b16 %v1360_v51  ;;  %v837_v10 = vshll.u32 %v557_v58, 16 }
  0xbd   : > { %v1150_v20 = vadd.f32 %v1048_v14, %v426_v13  ;;  %v9437_v14 = vld [vmem:[%s9915_s26 + $0x50] sm:$0xff] }
  0xbe   : > { %465 = vmatmul.bf16.gmra.mxu0 %v9400_v61  ;;  %v1366_v61 = vrot.slane %v1238_v0, 5  ;;  %v1448_v13 = vpack.c.b16 %v1429_v63, %v1428_v62  ;;  %v9402_v63 = vld [vmem:[%s9915_s26 + $0x74] sm:$0xff]  ;;  %v8245_v0 = vor.u32 %v9438_v52, %v8244_v18 }
  0xbf   : > { %1087 = vmatmul.bf16.gmra.mxu1 %v965_v11 }
  0xc0   : > { %1569 = vmatmul.bf16.gmra.mxu2 %v1447_v12  ;;  %v1368_v22 = vrot.slane %v1366_v61, 4  ;;  %v1367_v29 = vsel %vm9983_vm5, %v1365_v21, %v1366_v61  ;;  %v9492_v21 = vld [vmem:[%s12756_s1 + $0x1b0] sm:$0xff] }
  0xc1   : > { %1912 = vmatmul.bf16.gmra.mxu3 %v9436_v15  ;;  %v1239_v15 = vld [vmem:[%s9915_s26 + $0x7c] sm:$0x1] }
  0xc2   : > { %v1369_v16 = vrot.slane %v1239_v15, 5 }
  0xc3   : > { %v1530_v38 = vpop.f32.mrf.mxu2  ;;  %v428_v39 = vpop.f32.mrf.mxu0 }
  0xc4   : > { %v10279_v36 = vpop.f32.mrf.mxu3  ;;  %v10281_v34 = vadd.f32 %v1530_v38, %v1150_v20  ;;  %v1050_v40 = vpop.f32.mrf.mxu1  ;;  %v839_v20 = vrot.slane %v837_v10, 5  ;;  %v1370_v30 = vsel %vm9983_vm5, %v1368_v22, %v1369_v16  ;;  %v845_v38 = vshll.u32 %v558_v23, 16 }
  0xc5   : > { %v1151_v50 = vadd.f32 %v1050_v40, %v428_v39  ;;  %v851_v39 = vshll.u32 %v559_v24, 16  ;;  %v855_v40 = vshrl.u32 %v559_v24, 16  ;;  %v1431_v51 = vunpack.c.l.b16 %v1370_v30 }
  0xc6   : > { %v840_v28 = vsel %vm9969_vm4, %v835_v19, %v839_v20  ;;  %v847_v55 = vrot.slane %v845_v38, 5  ;;  %v9469_v20 = vld [vmem:[%s12756_s1 + $0x178] sm:$0xff] }
  0xc7   : > { %v949_v44 = vunpack.c.l.b16 %v840_v28  ;;  %v853_v56 = vrot.slane %v851_v39, 5  ;;  %v857_v57 = vrot.slane %v855_v40, 4  ;;  %3037 = vmatpush.bf16.msrb.mxu1 %v9469_v20  ;;  %v8396_v20 = vld [vmem:[%s9915_s26 + $0x18] sm:$0xf] }
  0xc9   : > { %v967_v58 = vpack.c.b16 %v949_v44, %v948_v43  ;;  %v858_v10 = vor.u32 %v857_v57, %v853_v56  ;;  %v9403_v44 = vld [vmem:[%s9915_s26 + $0x80] sm:$0xff] }
  0xca   : > { %v9466_v57 = vld [vmem:[%s12756_s1 + $0x160] sm:$0xff] }
  0xcb   : > { %v1532_v2 = vpop.f32.mrf.mxu2  ;;  %v431_v12 = vpop.f32.mrf.mxu0  ;;  %v859_v15 = vrot.slane %v858_v10, 4 }
  0xcc   : > { %v10298_v4 = vpop.f32.mrf.mxu3  ;;  %v10300_v11 = vadd.f32 %v1532_v2, %v1151_v50  ;;  %v1053_v45 = vpop.f32.mrf.mxu1  ;;  %v1430_v50 = vunpack.c.l.b16 %v1367_v29 }
  0xcd   : > { %v1152_v17 = vadd.f32 %v1053_v45, %v431_v12  ;;  %v1373_v12 = vrot.slane %v1241_v47, 5  ;;  %v9493_v45 = vld [vmem:[%s12756_s1 + $0x1b8] sm:$0xff]  ;;  %v864_v28 = vsel %vm9969_vm4, %v859_v15, %v9951_v37  ;;  %v9463_v15 = vld [vmem:[%s12756_s1 + $0x148] sm:$0xff] }
  0xce   : > { %470 = vmatmul.bf16.gmra.mxu0 %v8011_v6  ;;  %v1449_v6 = vpack.c.b16 %v1431_v51, %v1430_v50  ;;  %3400 = vmatpush.bf16.msrb.mxu2 %v9493_v45  ;;  %v951_v38 = vunpack.c.l.b16 %v864_v28  ;;  %v9489_v47 = vld [vmem:[%s12756_s1 + $0x198] sm:$0xff]  ;;  %v8022_v45 = vld [vmem:[%s9915_s26 + $0x88] sm:$0xf]  ;;  %v2817_v28 = vrot.slane %v8396_v20, 5 }
  0xcf   : > { %1092 = vmatmul.bf16.gmra.mxu1 %v966_v7  ;;  %v848_v7 = vor.u32 %v847_v55, %v844_v53  ;;  %v1375_v19 = vrot.slane %v1373_v12, 4  ;;  %v9439_v55 = vld [vmem:[%s9915_s26 + $0x64] sm:$0xff] }
  0xd0   : > { %1574 = vmatmul.bf16.gmra.mxu2 %v1448_v13  ;;  %v1240_v13 = vld [vmem:[%s9915_s26 + $0x80] sm:$0xe] }
  0xd1   : > { %1917 = vmatmul.bf16.gmra.mxu3 %v9437_v14  ;;  %v849_v14 = vrot.slane %v848_v7, 4  ;;  %v8116_v5 = vrot.slane %v1240_v13, 9  ;;  %v1377_v31 = vsel %vm9983_vm5, %v1375_v19, %v1376_v46  ;;  %v9490_v46 = vld [vmem:[%s12756_s1 + $0x1a0] sm:$0xff]  ;;  %v9404_v13 = vld [vmem:[%s9915_s26 + $0x8c] sm:$0xf0] }
  0xd2   : > { %3401 = vmatpush.bf16.msrb.mxu2 %v9492_v21  ;;  %v1433_v40 = vunpack.c.l.b16 %v1377_v31  ;;  %v8394_v19 = vld [vmem:[%s9915_s26 + $0x10] sm:$0xe] }
  0xd3   : > { %v1535_v26 = vpop.f32.mrf.mxu2  ;;  %v433_v33 = vpop.f32.mrf.mxu0  ;;  %v1374_v30 = vsel %vm9983_vm5, %v8116_v5, %v1373_v12  ;;  %v9487_v12 = vld [vmem:[%s12756_s1 + $0x188] sm:$0xff] }
  0xd4   : > { %v10308_v27 = vpop.f32.mrf.mxu3  ;;  %v10316_v32 = vadd.f32 %v1535_v26, %v1152_v17  ;;  %v1055_v35 = vpop.f32.mrf.mxu1  ;;  %v9454_v17 = vld [vmem:[%s12756_s1 + $0x100] sm:$0xff]  ;;  %v854_v26 = vsel %vm9969_vm4, %v849_v14, %v853_v56  ;;  %v1432_v39 = vunpack.c.l.b16 %v1374_v30  ;;  %v8395_v14 = vld [vmem:[%s9915_s26 + $0x14] sm:$0xf] }
  0xd5   : > { %v1153_v41 = vadd.f32 %v1055_v35, %v433_v33  ;;  %2565 = vmatpush.bf16.msrb.mxu0 %v9454_v17  ;;  %v9468_v33 = vld [vmem:[%s12756_s1 + $0x170] sm:$0xff]  ;;  %v9491_v35 = vld [vmem:[%s12756_s1 + $0x1a8] sm:$0xff]  ;;  %v950_v37 = vunpack.c.l.b16 %v854_v26  ;;  %v9486_v17 = vld [vmem:[%s12756_s1 + $0x180] sm:$0xff]  ;;  %v2814_v5 = vrot.slane %v8395_v14, 5 }
  0xd6   : > { %3038 = vmatpush.bf16.msrb.mxu1 %v9468_v33  ;;  %3402 = vmatpush.bf16.msrb.mxu2 %v9491_v35  ;;  %v1450_v53 = vpack.c.b16 %v1433_v40, %v1432_v39  ;;  %v9440_v35 = vld [vmem:[%s9915_s26 + $0x70] sm:$0xff]  ;;  %v9462_v39 = vld [vmem:[%s12756_s1 + $0x140] sm:$0xff] }
  0xd7   : > { %v968_v50 = vpack.c.b16 %v951_v38, %v950_v37  ;;  %v2816_v26 = vrot.slane %v2814_v5, 4  ;;  %v9471_v37 = vld [vmem:[%s9915_s26 + $0x20] sm:$0xff] }
  0xda   : > { %3039 = vmatpush.bf16.msrb.mxu1 %v9467_v8  ;;  %3403 = vmatpush.bf16.msrb.mxu2 %v9490_v46 }
  0xdb   : > { %v1537_v42 = vpop.f32.mrf.mxu2  ;;  %v436_v3 = vpop.f32.mrf.mxu0 }
  0xdc   : > { %v10321_v62 = vpop.f32.mrf.mxu3  ;;  %v10324_v1 = vadd.f32 %v1537_v42, %v1153_v41  ;;  %v1058_v2 = vpop.f32.mrf.mxu1  ;;  %v9465_v42 = vld [vmem:[%s12756_s1 + $0x158] sm:$0xff] }
  0xdd   : > { %v1154_v61 = vadd.f32 %v1058_v2, %v436_v3 }
  0xde   : > { %475 = vmatmul.bf16.gmra.mxu0 %v9402_v63  ;;  %3040 = vmatpush.bf16.msrb.mxu1 %v9466_v57  ;;  %v9488_v63 = vld [vmem:[%s12756_s1 + $0x190] sm:$0xff] }
  0xdf   : > { %1097 = vmatmul.bf16.gmra.mxu1 %v967_v58  ;;  %3404 = vmatpush.bf16.msrb.mxu2 %v9489_v47 }
  0xe0   : > { %1579 = vmatmul.bf16.gmra.mxu2 %v1449_v6 }
  0xe1   : > { %1922 = vmatmul.bf16.gmra.mxu3 %v8245_v0 }
  0xe2   : > { %3041 = vmatpush.bf16.msrb.mxu1 %v9465_v42 }
  0xe3   : > { %v1540_v22 = vpop.f32.mrf.mxu2  ;;  %v438_v24 = vpop.f32.mrf.mxu0  ;;  %3405 = vmatpush.bf16.msrb.mxu2 %v9488_v63 }
  0xe4   : > { %v10339_v16 = vpop.f32.mrf.mxu3  ;;  %v10341_v23 = vadd.f32 %v1540_v22, %v1154_v61  ;;  %v1060_v25 = vpop.f32.mrf.mxu1  ;;  %v9464_v61 = vld [vmem:[%s12756_s1 + $0x150] sm:$0xff] }
  0xe5   : > { %v1155_v29 = vadd.f32 %v1060_v25, %v438_v24  ;;  %v8023_v24 = vor.u32 %v9404_v13, %v8022_v45  ;;  %v8434_v25 = vrot.slane %v8394_v19, 9  ;;  %v8256_v45 = vld [vmem:[%s9915_s26 + $0x78] sm:$0xf]  ;;  %v9441_v13 = vld [vmem:[%s9915_s26 + $0x7c] sm:$0xf0] }
  0xe6   : > { %3042 = vmatpush.bf16.msrb.mxu1 %v9464_v61 }
  0xe7   : > { %3406 = vmatpush.bf16.msrb.mxu2 %v9487_v12  ;;  %v2815_v40 = vsel %vm9983_vm5, %v8434_v25, %v2814_v5  ;;  %v8398_v5 = vld [vmem:[%s9915_s26 + $0x20] sm:$0xe]  ;;  %v9472_v25 = vld [vmem:[%s9915_s26 + $0x2c] sm:$0xf0] }
  0xe8   : > { %v2929_v8 = vunpack.c.l.b16 %v2815_v40 }
  0xea   : > { %3043 = vmatpush.bf16.msrb.mxu1 %v9463_v15 }
  0xeb   : > { %v1542_v41 = vpop.f32.mrf.mxu2  ;;  %v441_v18 = vpop.f32.mrf.mxu0  ;;  %3407 = vmatpush.bf16.msrb.mxu2 %v9486_v17  ;;  %v8397_v17 = vld [vmem:[%s9915_s26 + $0x1c] sm:$0x1] }
  0xec   : > { %v10366_v43 = vpop.f32.mrf.mxu3  ;;  %v10369_v51 = vadd.f32 %v1542_v41, %v1155_v29  ;;  %v1063_v52 = vpop.f32.mrf.mxu1  ;;  %v8306_v41 = vld [vmem:[%s9915_s26 + $0x10] sm:$0xf] }
  0xed   : > { %v1156_v56 = vadd.f32 %v1063_v52, %v441_v18 }
  0xee   : > { %480 = vmatmul.bf16.gmra.mxu0 %v9403_v44  ;;  %v8307_v44 = vld [vmem:[%s9915_s26 + $0x14] sm:$0xf]  ;;  %3044 = vmatpush.bf16.msrb.mxu1 %v9462_v39  ;;  %v8257_v39 = vor.u32 %v9441_v13, %v8256_v45 }
  0xef   : > { %1102 = vmatmul.bf16.gmra.mxu1 %v968_v50  ;;  %v9509_v50 = vld [vmem:[%s12756_s1 + $0x238] sm:$0xff]  ;;  %v2103_v57 = vshll.u32 %v8307_v44, 16  ;;  %v2107_v47 = vshrl.u32 %v8307_v44, 16 }
  0xf0   : > { %1584 = vmatmul.bf16.gmra.mxu2 %v1450_v53  ;;  %4558 = vmatpush.bf16.msra.mxu0 %v9509_v50 }
  0xf1   : > { %1927 = vmatmul.bf16.gmra.mxu3 %v9439_v55  ;;  %v2094_v55 = vshrl.u32 %v8306_v41, 16  ;;  %v2105_v61 = vrot.slane %v2103_v57, 5  ;;  %v2109_v12 = vrot.slane %v2107_v47, 4 }
  0xf3   : > { %v1545_v58 = vpop.f32.mrf.mxu2  ;;  %v443_v6 = vpop.f32.mrf.mxu0 }
  0xf4   : > { %v1888_v0 = vpop.f32.mrf.mxu3  ;;  %v10384_v3 = vadd.f32 %v1545_v58, %v1156_v56  ;;  %v1065_v7 = vpop.f32.mrf.mxu1  ;;  %v2097_v56 = vshll.u32 %v8306_v41, 16 }
  0xf5   : > { %v10387_v2 = vadd.f32 %v1888_v0, %v10263_v54  ;;  %v1157_v10 = vadd.f32 %v1065_v7, %v443_v6  ;;  %v9501_v54 = vld [vmem:[%s12756_s1 + $0x1f8] sm:$0xff]  ;;  %v2096_v7 = vrot.slane %v2094_v55, 4 }
  0xf6   : > { %4079 = vmatpush.bf16.msrb.mxu3 %v9501_v54  ;;  %v8308_v6 = vld [vmem:[%s9915_s26 + $0x18] sm:$0xf] }
  0xf7   : > { %v9405_v54 = vld [vmem:[%s9915_s26 + $0x94] sm:$0xff]  ;;  %v2113_v14 = vshll.u32 %v8308_v6, 16 }
  0xf9   : > { %v2115_v50 = vrot.slane %v2113_v14, 5 }
  0xfb   : > { %v1547_v21 = vpop.f32.mrf.mxu2  ;;  %v446_v31 = vpop.f32.mrf.mxu0 }
  0xfc   : > { %v1890_v22 = vpop.f32.mrf.mxu3  ;;  %v10409_v29 = vadd.f32 %v1547_v21, %v1157_v10  ;;  %v1068_v33 = vpop.f32.mrf.mxu1  ;;  %v2099_v10 = vrot.slane %v2097_v56, 5 }
  0xfd   : > { %v10412_v30 = vadd.f32 %v1890_v22, %v10272_v60  ;;  %v1158_v38 = vadd.f32 %v1068_v33, %v446_v31  ;;  %v2818_v60 = vsel %vm9983_vm5, %v2816_v26, %v2817_v28  ;;  %v2110_v22 = vor.u32 %v2109_v12, %v2105_v61 }
  0xfe   : > { %v2930_v46 = vunpack.c.l.b16 %v2818_v60  ;;  %485 = vmatmul.bf16.gmra.mxu0 %v8023_v24  ;;  %v2100_v21 = vor.u32 %v2099_v10, %v2096_v7  ;;  %v8546_v24 = vld [vmem:[%s9915_s26 + $0x28] sm:$0xf]  ;;  %v2819_v26 = vrot.slane %v2817_v28, 4  ;;  %v2820_v31 = vrot.slane %v8397_v17, 5  ;;  %v8309_v17 = vld [vmem:[%s9915_s26 + $0x1c] sm:$0x1] }
  0xff   : > { %v8547_v40 = vor.u32 %v9472_v25, %v8546_v24  ;;  %v2111_v28 = vrot.slane %v2110_v22, 4  ;;  %v8401_v24 = vld [vmem:[%s9915_s26 + $0x2c] sm:$0x1] }
 0x100   : > { %3408 = vmatmul.bf16.vlgmr.msrb.gmra.mxu2 %v9471_v37  ;;  %v2959_v18 = vpack.c.b16 %v2930_v46, %v2929_v8  ;;  %v2821_v8 = vsel %vm9983_vm5, %v2819_v26, %v2820_v31  ;;  %v8435_v46 = vrot.slane %v8398_v5, 9  ;;  %v2101_v44 = vrot.slane %v2100_v21, 4 }
 0x101   : > { %1932 = vmatmul.bf16.gmra.mxu3 %v9440_v35  ;;  %v2116_v47 = vsel %vm9969_vm4, %v2111_v28, %v2115_v50 }
 0x102   : > { %3045 = vmatmul.bf16.vlgmr.msrb.gmra.mxu1 %v2959_v18  ;;  %v2931_v18 = vunpack.c.l.b16 %v2821_v8  ;;  %v2106_v57 = vsel %vm9969_vm4, %v2101_v44, %v2105_v61  ;;  %v9500_v61 = vld [vmem:[%s12756_s1 + $0x1f0] sm:$0xff]  ;;  %v9442_v44 = vld [vmem:[%s9915_s26 + $0x84] sm:$0xff] }
 0x103   : > { %v1550_v52 = vpop.f32.mrf.mxu2  ;;  %v448_v58 = vpop.f32.mrf.mxu0  ;;  %v2450_v14 = vunpack.c.l.b16 %v2106_v57  ;;  %4080 = vmatpush.bf16.msrb.mxu3 %v9500_v61 }
 0x104   : > { %v1893_v53 = vpop.f32.mrf.mxu3  ;;  %v10428_v42 = vadd.f32 %v1550_v52, %v1158_v38  ;;  %v1070_v0 = vpop.f32.mrf.mxu1  ;;  %v8310_v52 = vld [vmem:[%s9915_s26 + $0x20] sm:$0xf] }
 0x105   : > { %v10431_v63 = vadd.f32 %v1893_v53, %v10281_v34  ;;  %v1159_v15 = vadd.f32 %v1070_v0, %v448_v58  ;;  %v8399_v34 = vld [vmem:[%s9915_s26 + $0x24] sm:$0xf]  ;;  %v2117_v58 = vshrl.u32 %v8308_v6, 16  ;;  %v2128_v45 = vshrl.u32 %v8310_v52, 16 }
 0x106   : > { %v2824_v41 = vrot.slane %v8399_v34, 5  ;;  %v2131_v13 = vshll.u32 %v8310_v52, 16  ;;  %v2451_v6 = vunpack.c.l.b16 %v2116_v47 }
 0x107   : > { %v2130_v5 = vrot.slane %v2128_v45, 4 }
 0x108   : > { %v2133_v34 = vrot.slane %v2131_v13, 5  ;;  %v2480_v22 = vpack.c.b16 %v2451_v6, %v2450_v14 }
 0x10a   : > { %v2134_v28 = vor.u32 %v2133_v34, %v2130_v5 }
 0x10b   : > { %v1552_v19 = vpop.f32.mrf.mxu2  ;;  %v451_v37 = vpop.f32.mrf.mxu0 }
 0x10c   : > { %v1895_v20 = vpop.f32.mrf.mxu3  ;;  %v10442_v33 = vadd.f32 %v1552_v19, %v1159_v15  ;;  %v1073_v38 = vpop.f32.mrf.mxu1  ;;  %v2119_v15 = vrot.slane %v2117_v58, 4  ;;  %v8400_v19 = vld [vmem:[%s9915_s26 + $0x28] sm:$0xf]  ;;  %v2135_v58 = vrot.slane %v2134_v28, 4  ;;  %v10499_v28 = vld [vmem:[%s9915_s26 + $0x38] sm:$0xf] }
 0x10d   : > { %v10445_v35 = vadd.f32 %v1895_v20, %v10300_v11  ;;  %v1160_v60 = vadd.f32 %v1073_v38, %v451_v37  ;;  %v2825_v11 = vsel %vm9983_vm5, %v8435_v46, %v2824_v41  ;;  %v2827_v20 = vrot.slane %v8400_v19, 5 }
 0x10e   : > { %490 = vmatmul.bf16.gmra.mxu0 %v9405_v54  ;;  %v2932_v53 = vunpack.c.l.b16 %v2825_v11  ;;  %v2120_v31 = vor.u32 %v2119_v15, %v2115_v50  ;;  %v2123_v37 = vshll.u32 %v8309_v17, 16  ;;  %v2826_v38 = vrot.slane %v2824_v41, 4  ;;  %v9473_v11 = vld [vmem:[%s9915_s26 + $0x34] sm:$0xff] }
 0x10f   : > { %v9508_v50 = vld [vmem:[%s12756_s1 + $0x230] sm:$0xff] }
 0x110   : > { %3413 = vmatmul.bf16.gmra.mxu2 %v8547_v40  ;;  %v2960_v0 = vpack.c.b16 %v2932_v53, %v2931_v18  ;;  %v2828_v41 = vsel %vm9983_vm5, %v2826_v38, %v2827_v20  ;;  %v2830_v53 = vrot.slane %v8401_v24, 5  ;;  %v2125_v47 = vrot.slane %v2123_v37, 5  ;;  %4559 = vmatpush.bf16.msra.mxu0 %v9508_v50  ;;  %v9498_v50 = vld [vmem:[%s12756_s1 + $0x1e0] sm:$0xff] }
 0x111   : > { %1937 = vmatmul.bf16.gmra.mxu3 %v8257_v39  ;;  %v2829_v39 = vrot.slane %v2827_v20, 4 }
 0x112   : > { %3050 = vmatmul.bf16.gmra.mxu1 %v2960_v0 }
 0x113   : > { %v1555_v55 = vpop.f32.mrf.mxu2  ;;  %v453_v12 = vpop.f32.mrf.mxu0  ;;  %v2831_v57 = vsel %vm9983_vm5, %v2829_v39, %v2830_v53 }
 0x114   : > { %v1898_v56 = vpop.f32.mrf.mxu3  ;;  %v10456_v7 = vadd.f32 %v1555_v55, %v1160_v60  ;;  %v1075_v54 = vpop.f32.mrf.mxu1  ;;  %v2933_v55 = vunpack.c.l.b16 %v2828_v41 }
 0x115   : > { %v10459_v10 = vadd.f32 %v1898_v56, %v10316_v32  ;;  %v8311_v32 = vld [vmem:[%s9915_s26 + $0x24] sm:$0xf]  ;;  %v1161_v21 = vadd.f32 %v1075_v54, %v453_v12  ;;  %v2121_v56 = vrot.slane %v2120_v31, 4  ;;  %v2934_v12 = vunpack.c.l.b16 %v2831_v57  ;;  %v8403_v31 = vld [vmem:[%s9915_s26 + $0x34] sm:$0xf] }
 0x116   : > { %v2137_v18 = vshll.u32 %v8311_v32, 16  ;;  %v2141_v54 = vshrl.u32 %v8311_v32, 16  ;;  %v2834_v38 = vrot.slane %v8403_v31, 5 }
 0x117   : > { %v2961_v61 = vpack.c.b16 %v2934_v12, %v2933_v55  ;;  %v2126_v19 = vsel %vm9969_vm4, %v2121_v56, %v2125_v47  ;;  %v2837_v55 = vrot.slane %v10499_v28, 5 }
 0x118   : > { %v2139_v0 = vrot.slane %v2137_v18, 5  ;;  %v2143_v20 = vrot.slane %v2141_v54, 4  ;;  %v2836_v53 = vrot.slane %v2834_v38, 4 }
 0x11a   : > { %v2140_v32 = vsel %vm9969_vm4, %v2135_v58, %v2139_v0  ;;  %v2144_v37 = vor.u32 %v2143_v20, %v2139_v0  ;;  %v9443_v58 = vld [vmem:[%s9915_s26 + $0x90] sm:$0xff]  ;;  %v9474_v0 = vld [vmem:[%s9915_s26 + $0x40] sm:$0xff] }
 0x11b   : > { %v1557_v25 = vpop.f32.mrf.mxu2  ;;  %v456_v8 = vpop.f32.mrf.mxu0 }
 0x11c   : > { %v1900_v26 = vpop.f32.mrf.mxu3  ;;  %v10468_v40 = vadd.f32 %v1557_v25, %v1161_v21  ;;  %v1078_v46 = vpop.f32.mrf.mxu1  ;;  %v9499_v21 = vld [vmem:[%s12756_s1 + $0x1e8] sm:$0xff]  ;;  %v2453_v25 = vunpack.c.l.b16 %v2140_v32  ;;  %v2145_v54 = vrot.slane %v2144_v37, 4 }
 0x11d   : > { %v10471_v60 = vadd.f32 %v1900_v26, %v10324_v1  ;;  %v1162_v52 = vadd.f32 %v1078_v46, %v456_v8  ;;  %v8312_v1 = vld [vmem:[%s9915_s26 + $0x28] sm:$0xf]  ;;  %v8313_v26 = vld [vmem:[%s9915_s26 + $0x2c] sm:$0x1]  ;;  %4081 = vmatpush.bf16.msrb.mxu3 %v9499_v21 }
 0x11e   : > { %2566 = vmatmul.bf16.vlgmr.msrb.gmra.mxu0 %v2480_v22  ;;  %v2147_v45 = vshll.u32 %v8312_v1, 16  ;;  %v2151_v13 = vshrl.u32 %v8312_v1, 16  ;;  %v2157_v46 = vshll.u32 %v8313_v26, 16 }
 0x120   : > { %3418 = vmatmul.bf16.gmra.mxu2 %v9473_v11  ;;  %v2149_v22 = vrot.slane %v2147_v45, 5  ;;  %v2153_v24 = vrot.slane %v2151_v13, 4  ;;  %v2838_v13 = vsel %vm9983_vm5, %v2836_v53, %v2837_v55 }
 0x121   : > { %1942 = vmatmul.bf16.gmra.mxu3 %v9442_v44  ;;  %v8402_v44 = vld [vmem:[%s9915_s26 + $0x30] sm:$0xe] }
 0x122   : > { %3055 = vmatmul.bf16.gmra.mxu1 %v2961_v61  ;;  %v2154_v8 = vor.u32 %v2153_v24, %v2149_v22  ;;  %v8436_v41 = vrot.slane %v8402_v44, 9  ;;  %4082 = vmatpush.bf16.msrb.mxu3 %v9498_v50  ;;  %v2150_v20 = vsel %vm9969_vm4, %v2145_v54, %v2149_v22  ;;  %v9495_v44 = vld [vmem:[%s12756_s1 + $0x1c8] sm:$0xff]  ;;  %v9444_v50 = vld [vmem:[%s9915_s26 + $0x9c] sm:$0xf0] }
 0x123   : > { %v1560_v14 = vpop.f32.mrf.mxu2  ;;  %v458_v5 = vpop.f32.mrf.mxu0  ;;  %v8406_v54 = vld [vmem:[%s9915_s26 + $0x40] sm:$0xe] }
 0x124   : > { %v1903_v6 = vpop.f32.mrf.mxu3  ;;  %v10483_v15 = vadd.f32 %v1560_v14, %v1162_v52  ;;  %v1080_v34 = vpop.f32.mrf.mxu1  ;;  %v2835_v45 = vsel %vm9983_vm5, %v8436_v41, %v2834_v38  ;;  %v2155_v61 = vrot.slane %v2154_v8, 4  ;;  %v9496_v38 = vld [vmem:[%s12756_s1 + $0x1d0] sm:$0xff] }
 0x125   : > { %v10486_v17 = vadd.f32 %v1903_v6, %v10341_v23  ;;  %v2452_v23 = vunpack.c.l.b16 %v2126_v19  ;;  %v1163_v39 = vadd.f32 %v1080_v34, %v458_v5  ;;  %v2935_v14 = vunpack.c.l.b16 %v2835_v45  ;;  %v9497_v5 = vld [vmem:[%s12756_s1 + $0x1d8] sm:$0xff]  ;;  %v8314_v34 = vld [vmem:[%s9915_s26 + $0x30] sm:$0xf]  ;;  %v8315_v19 = vld [vmem:[%s9915_s26 + $0x34] sm:$0xf] }
 0x126   : > { %v2936_v6 = vunpack.c.l.b16 %v2838_v13  ;;  %4083 = vmatpush.bf16.msrb.mxu3 %v9497_v5  ;;  %v2165_v26 = vshll.u32 %v8314_v34, 16  ;;  %v2171_v31 = vshll.u32 %v8315_v19, 16  ;;  %v2175_v37 = vshrl.u32 %v8315_v19, 16  ;;  %v9494_v5 = vld [vmem:[%s12756_s1 + $0x1c0] sm:$0xff]  ;;  %v9475_v19 = vld [vmem:[%s9915_s26 + $0x4c] sm:$0xf0] }
 0x127   : > { %v2481_v52 = vpack.c.b16 %v2453_v25, %v2452_v23  ;;  %v2162_v25 = vshrl.u32 %v8314_v34, 16  ;;  %v8558_v34 = vld [vmem:[%s9915_s26 + $0x48] sm:$0xf] }
 0x128   : > { %v2962_v32 = vpack.c.b16 %v2936_v6, %v2935_v14  ;;  %v2167_v53 = vrot.slane %v2165_v26, 5  ;;  %v10560_v26 = vld [vmem:[%s9915_s26 + $0x44] sm:$0xf] }
 0x129   : > { %v2164_v41 = vrot.slane %v2162_v25, 4  ;;  %v8559_v25 = vor.u32 %v9475_v19, %v8558_v34 }
 0x12a   : > { %4084 = vmatpush.bf16.msrb.mxu3 %v9496_v38  ;;  %v8318_v38 = vld [vmem:[%s9915_s26 + $0x40] sm:$0xf] }
 0x12b   : > { %v1562_v18 = vpop.f32.mrf.mxu2  ;;  %v461_v57 = vpop.f32.mrf.mxu0 }
 0x12c   : > { %v1905_v11 = vpop.f32.mrf.mxu3  ;;  %v10505_v56 = vadd.f32 %v1562_v18, %v1163_v39  ;;  %v1083_v47 = vpop.f32.mrf.mxu1  ;;  %v8268_v18 = vld [vmem:[%s9915_s26 + $0x98] sm:$0xf] }
 0x12d   : > { %v10508_v1 = vadd.f32 %v1905_v11, %v10369_v51  ;;  %v1164_v12 = vadd.f32 %v1083_v47, %v461_v57  ;;  %v2159_v51 = vrot.slane %v2157_v46, 5  ;;  %v2454_v11 = vunpack.c.l.b16 %v2150_v20  ;;  %v8316_v47 = vld [vmem:[%s9915_s26 + $0x38] sm:$0xf] }
 0x12e   : > { %2571 = vmatmul.bf16.gmra.mxu0 %v2481_v52  ;;  %v10540_v57 = vrot.slane %v2171_v31, 5  ;;  %4085 = vmatpush.bf16.msrb.mxu3 %v9495_v44  ;;  %v2181_v6 = vshll.u32 %v8316_v47, 16  ;;  %v2839_v31 = vrot.slane %v2837_v55, 4  ;;  %v2196_v55 = vshrl.u32 %v8318_v38, 16 }
 0x12f   : > { %v2160_v21 = vsel %vm9969_vm4, %v2155_v61, %v2159_v51  ;;  %v2168_v51 = vor.u32 %v2167_v53, %v2164_v41  ;;  %v8633_v41 = vld [vmem:[%s9915_s26 + $0x24] sm:$0xf]  ;;  %v2199_v53 = vshll.u32 %v8318_v38, 16 }
 0x130   : > { %3423 = vmatmul.bf16.gmra.mxu2 %v9474_v0  ;;  %v2455_v52 = vunpack.c.l.b16 %v2160_v21  ;;  %v8269_v0 = vor.u32 %v9444_v50, %v8268_v18  ;;  %v2183_v18 = vrot.slane %v2181_v6, 5  ;;  %v2185_v50 = vshrl.u32 %v8316_v47, 16 }
 0x131   : > { %1947 = vmatmul.bf16.gmra.mxu3 %v9443_v58 }
 0x132   : > { %3060 = vmatmul.bf16.gmra.mxu1 %v2962_v32  ;;  %v2482_v61 = vpack.c.b16 %v2455_v52, %v2454_v11  ;;  %4086 = vmatpush.bf16.msrb.mxu3 %v9494_v5  ;;  %v8632_v11 = vld [vmem:[%s9915_s26 + $0x20] sm:$0xf]  ;;  %v2844_v52 = vrot.slane %v10560_v26, 5 }
 0x133   : > { %v1565_v24 = vpop.f32.mrf.mxu2  ;;  %v463_v8 = vpop.f32.mrf.mxu0 }
 0x134   : > { %v1908_v23 = vpop.f32.mrf.mxu3  ;;  %v10530_v39 = vadd.f32 %v1565_v24, %v1164_v12  ;;  %v1085_v46 = vpop.f32.mrf.mxu1  ;;  %v8405_v12 = vld [vmem:[%s9915_s26 + $0x3c] sm:$0x1] }
 0x135   : > { %v10533_v22 = vadd.f32 %v1908_v23, %v10384_v3  ;;  %v2177_v3 = vrot.slane %v2175_v37, 4  ;;  %v1165_v58 = vadd.f32 %v1085_v46, %v463_v8  ;;  %v9507_v23 = vld [vmem:[%s12756_s1 + $0x228] sm:$0xff]  ;;  %v8437_v8 = vrot.slane %v8406_v54, 9 }
 0x136   : > { %4560 = vmatpush.bf16.msra.mxu0 %v9507_v23  ;;  %v2169_v46 = vrot.slane %v2168_v51, 4  ;;  %v3618_v54 = vshll.u32 %v8632_v11, 16  ;;  %v3624_v51 = vshll.u32 %v8633_v41, 16  ;;  %v2198_v23 = vrot.slane %v2196_v55, 4 }
 0x137   : > { %v2178_v14 = vor.u32 %v2177_v3, %v10540_v57  ;;  %v2845_v3 = vsel %vm9983_vm5, %v8437_v8, %v2844_v52  ;;  %v10584_v8 = vld [vmem:[%s9915_s26 + $0x44] sm:$0xf] }
 0x138   : > { %v2174_v47 = vsel %vm9969_vm4, %v2169_v46, %v10540_v57  ;;  %v8317_v57 = vld [vmem:[%s9915_s26 + $0x3c] sm:$0x1]  ;;  %v2205_v55 = vshll.u32 %v10584_v8, 16 }
 0x139   : > { %v2179_v44 = vrot.slane %v2178_v14, 4  ;;  %v3628_v14 = vshrl.u32 %v8633_v41, 16  ;;  %v2456_v38 = vunpack.c.l.b16 %v2174_v47 }
 0x13b   : > { %v1567_v45 = vpop.f32.mrf.mxu2  ;;  %v466_v21 = vpop.f32.mrf.mxu0 }
 0x13c   : > { %v1910_v13 = vpop.f32.mrf.mxu3  ;;  %v10551_v32 = vadd.f32 %v1567_v45, %v1165_v58  ;;  %v1088_v24 = vpop.f32.mrf.mxu1  ;;  %v2938_v45 = vunpack.c.l.b16 %v2845_v3 }
 0x13d   : > { %v10554_v20 = vadd.f32 %v1910_v13, %v10409_v29  ;;  %v1166_v37 = vadd.f32 %v1088_v24, %v466_v21  ;;  %v2840_v29 = vrot.slane %v8405_v12, 5  ;;  %v3615_v12 = vshrl.u32 %v8632_v11, 16  ;;  %v8408_v11 = vld [vmem:[%s9915_s26 + $0x48] sm:$0xf] }
 0x13e   : > { %2576 = vmatmul.bf16.gmra.mxu0 %v2482_v61  ;;  %v2187_v21 = vrot.slane %v2185_v50, 4  ;;  %v2191_v50 = vshll.u32 %v8317_v57, 16  ;;  %v2847_v3 = vrot.slane %v8408_v11, 5 }
 0x13f   : > { %v2841_v28 = vsel %vm9983_vm5, %v2839_v31, %v2840_v29  ;;  %v3617_v26 = vrot.slane %v3615_v12, 4  ;;  %v3620_v31 = vrot.slane %v3618_v54, 5 }
 0x140   : > { %3428 = vmatmul.bf16.gmra.mxu2 %v8559_v25  ;;  %v2937_v58 = vunpack.c.l.b16 %v2841_v28  ;;  %v2201_v25 = vrot.slane %v2199_v53, 5  ;;  %v2188_v46 = vor.u32 %v2187_v21, %v2183_v18  ;;  %v9476_v21 = vld [vmem:[%s9915_s26 + $0x54] sm:$0xff] }
 0x141   : > { %1952 = vmatmul.bf16.gmra.mxu3 %v8269_v0  ;;  %v2184_v0 = vsel %vm9969_vm4, %v2179_v44, %v2183_v18  ;;  %v10589_v44 = vld [vmem:[%s9915_s26 + $0x28] sm:$0xf]  ;;  %v3621_v53 = vor.u32 %v3620_v31, %v3617_v26  ;;  %v8409_v18 = vld [vmem:[%s9915_s26 + $0x4c] sm:$0x1]  ;;  %v10605_v26 = vrot.slane %v2205_v55, 5  ;;  %v2849_v31 = vrot.slane %v2847_v3, 4 }
 0x142   : > { %v2963_v24 = vpack.c.b16 %v2938_v45, %v2937_v58  ;;  %v2457_v29 = vunpack.c.l.b16 %v2184_v0  ;;  %v2202_v41 = vor.u32 %v2201_v25, %v2198_v23  ;;  %v2193_v23 = vrot.slane %v2191_v50, 5 }
 0x143   : > { %v1570_v13 = vpop.f32.mrf.mxu2  ;;  %v468_v34 = vpop.f32.mrf.mxu0  ;;  %v2209_v55 = vshrl.u32 %v10584_v8, 16 }
 0x144   : > { %v1913_v61 = vpop.f32.mrf.mxu3  ;;  %v10577_v6 = vadd.f32 %v1570_v13, %v1166_v37  ;;  %v1090_v19 = vpop.f32.mrf.mxu1  ;;  %3065 = vmatmul.bf16.gmra.mxu1 %v2963_v24  ;;  %v10586_v37 = vrot.slane %v3624_v51, 5  ;;  %v2483_v54 = vpack.c.b16 %v2457_v29, %v2456_v38  ;;  %v3634_v13 = vshll.u32 %v10589_v44, 16 }
 0x145   : > { %v10580_v5 = vadd.f32 %v1913_v61, %v10428_v42  ;;  %v3630_v42 = vrot.slane %v3628_v14, 4  ;;  %v1167_v28 = vadd.f32 %v1090_v19, %v468_v34  ;;  %v2846_v61 = vrot.slane %v2844_v52, 4  ;;  %v9445_v34 = vld [vmem:[%s9915_s26 + $0xa4] sm:$0xff] }
 0x146   : > { %v2189_v19 = vrot.slane %v2188_v46, 4  ;;  %v2203_v25 = vrot.slane %v2202_v41, 4  ;;  %v3622_v52 = vrot.slane %v3621_v53, 4  ;;  %v2850_v38 = vrot.slane %v8409_v18, 5  ;;  %v8320_v46 = vld [vmem:[%s9915_s26 + $0x48] sm:$0xf] }
 0x147   : > { %v3631_v45 = vor.u32 %v3630_v42, %v10586_v37  ;;  %v2848_v57 = vsel %vm9983_vm5, %v2846_v61, %v2847_v3  ;;  %v10607_v29 = vrot.slane %v3634_v13, 5  ;;  %v8636_v3 = vld [vmem:[%s9915_s26 + $0x30] sm:$0xf]  ;;  %v2219_v13 = vshrl.u32 %v8320_v46, 16 }
 0x148   : > { %v2939_v42 = vunpack.c.l.b16 %v2848_v57  ;;  %v2851_v11 = vsel %vm9983_vm5, %v2849_v31, %v2850_v38  ;;  %v2194_v41 = vsel %vm9969_vm4, %v2189_v19, %v2193_v23  ;;  %v3627_v53 = vsel %vm9969_vm4, %v3622_v52, %v10586_v37 }
 0x149   : > { %v2940_v50 = vunpack.c.l.b16 %v2851_v11  ;;  %v3638_v37 = vshrl.u32 %v10589_v44, 16  ;;  %v3652_v23 = vshll.u32 %v8636_v3, 16  ;;  %v2211_v52 = vrot.slane %v2209_v55, 4  ;;  %v8635_v44 = vld [vmem:[%s9915_s26 + $0x2c] sm:$0x1] }
 0x14a   : > { %v2221_v38 = vrot.slane %v2219_v13, 4  ;;  %v10640_v11 = vld [vmem:[%s9915_s26 + $0x34] sm:$0xf] }
 0x14b   : > { %v1572_v58 = vpop.f32.mrf.mxu2  ;;  %v471_v51 = vpop.f32.mrf.mxu0  ;;  %v2964_v18 = vpack.c.b16 %v2940_v50, %v2939_v42  ;;  %v8411_v42 = vld [vmem:[%s9915_s26 + $0x54] sm:$0xf]  ;;  %v2212_v55 = vor.u32 %v2211_v52, %v10605_v26  ;;  %v8322_v52 = vld [vmem:[%s9915_s26 + $0x50] sm:$0xf] }
 0x14c   : > { %v1915_v12 = vpop.f32.mrf.mxu3  ;;  %v10596_v47 = vadd.f32 %v1572_v58, %v1167_v28  ;;  %v1093_v14 = vpop.f32.mrf.mxu1  ;;  %v2208_v28 = vsel %vm9969_vm4, %v2203_v25, %v10605_v26  ;;  %v9506_v25 = vld [vmem:[%s12756_s1 + $0x220] sm:$0xff] }
 0x14d   : > { %v10599_v0 = vadd.f32 %v1915_v12, %v10442_v33  ;;  %v1168_v24 = vadd.f32 %v1093_v14, %v471_v51  ;;  %v3632_v33 = vrot.slane %v3631_v45, 4  ;;  %v2215_v45 = vshll.u32 %v8320_v46, 16  ;;  %4561 = vmatpush.bf16.msra.mxu0 %v9506_v25  ;;  %v10654_v25 = vld [vmem:[%s9915_s26 + $0x58] sm:$0xf] }
 0x14e   : > { %2581 = vmatmul.bf16.gmra.mxu0 %v2483_v54  ;;  %v2459_v19 = vunpack.c.l.b16 %v2208_v28 }
 0x14f   : > { %12767 = vst [vmem:[#allocation4_spill] sm:$0xff] %v10599_v0  ;;  %v3637_v54 = vsel %vm9969_vm4, %v3632_v33, %v10607_v29  ;;  %v10635_v31 = vrot.slane %v2215_v45, 5  ;;  %v3640_v33 = vrot.slane %v3638_v37, 4 }
 0x150   : > { %3433 = vmatmul.bf16.gmra.mxu2 %v9476_v21  ;;  %v3649_v21 = vshrl.u32 %v8636_v3, 16  ;;  %v3972_v57 = vunpack.c.l.b16 %v3637_v54 }
 0x151   : > { %1957 = vmatmul.bf16.gmra.mxu3 %v9445_v34  ;;  %v2458_v34 = vunpack.c.l.b16 %v2194_v41  ;;  %v3654_v41 = vrot.slane %v3652_v23, 5  ;;  %v2222_v45 = vor.u32 %v2221_v38, %v10635_v31  ;;  %v3641_v26 = vor.u32 %v3640_v33, %v10607_v29  ;;  %v9477_v23 = vld [vmem:[%s9915_s26 + $0x60] sm:$0xff] }
 0x152   : > { %v3651_v50 = vrot.slane %v3649_v21, 4  ;;  %v3658_v21 = vshll.u32 %v10640_v11, 16  ;;  %v12760_v29 = vrot.slane %v10654_v25, 5 }
 0x153   : > { %v1575_v58 = vpop.f32.mrf.mxu2  ;;  %v473_v8 = vpop.f32.mrf.mxu0  ;;  %v2484_v46 = vpack.c.b16 %v2459_v19, %v2458_v34  ;;  %v3642_v33 = vrot.slane %v3641_v26, 4 }
 0x154   : > { %v1918_v12 = vpop.f32.mrf.mxu3  ;;  %v10625_v61 = vadd.f32 %v1575_v58, %v1168_v24  ;;  %v1095_v14 = vpop.f32.mrf.mxu1  ;;  %v3971_v24 = vunpack.c.l.b16 %v3627_v53  ;;  %3070 = vmatmul.bf16.gmra.mxu1 %v2964_v18  ;;  %v8410_v53 = vld [vmem:[%s9915_s26 + $0x50] sm:$0xe]  ;;  %v2854_v58 = vrot.slane %v8411_v42, 5  ;;  %v3644_v18 = vshll.u32 %v8635_v44, 16 }
 0x155   : > { %v10628_v51 = vadd.f32 %v1918_v12, %v10456_v7  ;;  %v8321_v7 = vld [vmem:[%s9915_s26 + $0x4c] sm:$0x1]  ;;  %v1169_v28 = vadd.f32 %v1095_v14, %v473_v8  ;;  %v8438_v37 = vrot.slane %v8410_v53, 9  ;;  %v2223_v44 = vrot.slane %v2222_v45, 4 }
 0x156   : > { %v4001_v3 = vpack.c.b16 %v3972_v57, %v3971_v24  ;;  %v2225_v13 = vshll.u32 %v8321_v7, 16  ;;  %v3655_v57 = vor.u32 %v3654_v41, %v3651_v50  ;;  %v2856_v38 = vrot.slane %v2854_v58, 4 }
 0x157   : > { %12768 = vst [vmem:[#allocation5_spill] sm:$0xff] %v10628_v51  ;;  %v2855_v7 = vsel %vm9983_vm5, %v8438_v37, %v2854_v58  ;;  %v3646_v53 = vrot.slane %v3644_v18, 5  ;;  %v3662_v37 = vshrl.u32 %v10640_v11, 16 }
 0x158   : > { %v2227_v42 = vrot.slane %v2225_v13, 5  ;;  %v2941_v50 = vunpack.c.l.b16 %v2855_v7  ;;  %v3656_v41 = vrot.slane %v3655_v57, 4 }
 0x15b   : > { %v1577_v12 = vpop.f32.mrf.mxu2  ;;  %v476_v8 = vpop.f32.mrf.mxu0 }
 0x15c   : > { %v1920_v54 = vpop.f32.mrf.mxu3  ;;  %v10645_v34 = vadd.f32 %v1577_v12, %v1169_v28  ;;  %v1098_v14 = vpop.f32.mrf.mxu1  ;;  %v8323_v28 = vld [vmem:[%s9915_s26 + $0x54] sm:$0xf]  ;;  %v10661_v12 = vrot.slane %v3658_v21, 5 }
 0x15d   : > { %v10648_v19 = vadd.f32 %v1920_v54, %v10468_v40  ;;  %v1170_v24 = vadd.f32 %v1098_v14, %v476_v8  ;;  %v2213_v40 = vrot.slane %v2212_v55, 4  ;;  %v8638_v54 = vld [vmem:[%s9915_s26 + $0x38] sm:$0xf]  ;;  %v2230_v8 = vshrl.u32 %v8322_v52, 16 }
 0x15e   : > { %2586 = vmatmul.bf16.gmra.mxu0 %v2484_v46  ;;  %v2233_v14 = vshll.u32 %v8322_v52, 16  ;;  %v2858_v46 = vsel %vm9983_vm5, %v2856_v38, %v12760_v29  ;;  %v2239_v55 = vshll.u32 %v8323_v28, 16  ;;  %v2243_v58 = vshrl.u32 %v8323_v28, 16  ;;  %v8639_v29 = vld [vmem:[%s9915_s26 + $0x3c] sm:$0x1] }
 0x15f   : > { %12769 = vst [vmem:[#allocation6_spill] sm:$0xff] %v10648_v19  ;;  %v2942_v45 = vunpack.c.l.b16 %v2858_v46  ;;  %v2218_v18 = vsel %vm9969_vm4, %v2213_v40, %v10635_v31  ;;  %v3668_v26 = vshll.u32 %v8638_v54, 16  ;;  %v3672_v21 = vshrl.u32 %v8638_v54, 16  ;;  %v10685_v54 = vld [vmem:[%s9915_s26 + $0x58] sm:$0xf] }
 0x160   : > { %3438 = vmatmul.bf16.gmra.mxu2 %v9477_v23  ;;  %v2228_v38 = vsel %vm9969_vm4, %v2223_v44, %v2227_v42  ;;  %v3647_v46 = vsel %vm9969_vm4, %v3642_v33, %v3646_v53  ;;  %v3661_v31 = vsel %vm9969_vm4, %v3656_v41, %v10661_v12  ;;  %v2232_v11 = vrot.slane %v2230_v8, 4 }
 0x161   : > { %4087 = vmatmul.bf16.vlgmr.msrb.gmra.mxu3 %v4001_v3  ;;  %v2965_v28 = vpack.c.b16 %v2942_v45, %v2941_v50  ;;  %v2460_v40 = vunpack.c.l.b16 %v2218_v18  ;;  %v3664_v44 = vrot.slane %v3662_v37, 4  ;;  %v10690_v42 = vrot.slane %v3668_v26, 5 }
 0x162   : > { %v3674_v33 = vrot.slane %v3672_v21, 4  ;;  %v3973_v53 = vunpack.c.l.b16 %v3647_v46  ;;  %v3974_v50 = vunpack.c.l.b16 %v3661_v31  ;;  %v9478_v21 = vld [vmem:[%s9915_s26 + $0x6c] sm:$0xf0]  ;;  %v8413_v46 = vld [vmem:[%s9915_s26 + $0x5c] sm:$0x1] }
 0x163   : > { %v1580_v13 = vpop.f32.mrf.mxu2  ;;  %v478_v52 = vpop.f32.mrf.mxu0  ;;  %v3665_v37 = vor.u32 %v3664_v44, %v10661_v12 }
 0x164   : > { %v1923_v3 = vpop.f32.mrf.mxu3  ;;  %v10672_v23 = vadd.f32 %v1580_v13, %v1170_v24  ;;  %v1100_v7 = vpop.f32.mrf.mxu1  ;;  %v2235_v24 = vrot.slane %v2233_v14, 5  ;;  %v2245_v13 = vrot.slane %v2243_v58, 4  ;;  %3075 = vmatmul.bf16.gmra.mxu1 %v2965_v28  ;;  %v3678_v58 = vshll.u32 %v8639_v29, 16  ;;  %v8570_v28 = vld [vmem:[%s9915_s26 + $0x68] sm:$0xf] }
 0x165   : > { %v10675_v57 = vadd.f32 %v1923_v3, %v10483_v15  ;;  %v10687_v15 = vrot.slane %v2239_v55, 5  ;;  %v2461_v3 = vunpack.c.l.b16 %v2228_v38  ;;  %v1171_v8 = vadd.f32 %v1100_v7, %v478_v52 }
 0x166   : > { %v2236_v41 = vor.u32 %v2235_v24, %v2232_v11  ;;  %v2249_v55 = vshll.u32 %v10685_v54, 16  ;;  %v3675_v26 = vor.u32 %v3674_v33, %v10690_v42  ;;  %v4002_v29 = vpack.c.b16 %v3974_v50, %v3973_v53  ;;  %v8326_v53 = vld [vmem:[%s9915_s26 + $0x60] sm:$0xf] }
 0x167   : > { %12770 = vst [vmem:[#allocation7_spill] sm:$0xff] %v10675_v57  ;;  %v2246_v14 = vor.u32 %v2245_v13, %v10687_v15  ;;  %v2485_v38 = vpack.c.b16 %v2461_v3, %v2460_v40  ;;  %v8571_v24 = vor.u32 %v9478_v21, %v8570_v28  ;;  %v8414_v13 = vld [vmem:[%s9915_s26 + $0x60] sm:$0xe]  ;;  %v10706_v3 = vld [vmem:[%s9915_s26 + $0x64] sm:$0xf]  ;;  %v12772_v33 = vrot.slane %v10654_v25, 5 }
 0x168   : > { %v2237_v40 = vrot.slane %v2236_v41, 4  ;;  %v10708_v44 = vrot.slane %v2249_v55, 5  ;;  %v8439_v50 = vrot.slane %v8414_v13, 9  ;;  %v2253_v41 = vshrl.u32 %v10685_v54, 16  ;;  %v8640_v28 = vld [vmem:[%s9915_s26 + $0x40] sm:$0xf] }
 0x169   : > { %v2247_v12 = vrot.slane %v2246_v14, 4  ;;  %v2864_v55 = vrot.slane %v10706_v3, 5 }
 0x16a   : > { %v2255_v3 = vrot.slane %v2253_v41, 4 }
 0x16b   : > { %v1582_v45 = vpop.f32.mrf.mxu2  ;;  %v481_v7 = vpop.f32.mrf.mxu0  ;;  %v2865_v21 = vsel %vm9983_vm5, %v8439_v50, %v2864_v55  ;;  %v2866_v0 = vrot.slane %v2864_v55, 4 }
 0x16c   : > { %v1925_v18 = vpop.f32.mrf.mxu3  ;;  %v10699_v31 = vadd.f32 %v1582_v45, %v1171_v8  ;;  %v1103_v11 = vpop.f32.mrf.mxu1  ;;  %v2859_v8 = vrot.slane %v12772_v33, 4  ;;  %v2860_v45 = vrot.slane %v8413_v46, 5  ;;  %v3683_v33 = vshrl.u32 %v8640_v28, 16 }
 0x16d   : > { %v10702_v52 = vadd.f32 %v1925_v18, %v10505_v56  ;;  %v1172_v57 = vadd.f32 %v1103_v11, %v481_v7  ;;  %v3666_v56 = vrot.slane %v3665_v37, 4  ;;  %v3676_v18 = vrot.slane %v3675_v26, 4  ;;  %v8641_v26 = vld [vmem:[%s9915_s26 + $0x44] sm:$0xf] }
 0x16e   : > { %2591 = vmatmul.bf16.gmra.mxu0 %v2485_v38  ;;  %v2861_v14 = vsel %vm9983_vm5, %v2859_v8, %v2860_v45  ;;  %v2242_v38 = vsel %vm9969_vm4, %v2237_v40, %v10687_v15  ;;  %v2264_v37 = vshrl.u32 %v8326_v53, 16  ;;  %v2252_v7 = vsel %vm9969_vm4, %v2247_v12, %v10708_v44  ;;  %v8325_v8 = vld [vmem:[%s9915_s26 + $0x5c] sm:$0x1] }
 0x16f   : > { %12771 = vst [vmem:[#allocation8_spill] sm:$0xff] %v10702_v52  ;;  %v3680_v52 = vrot.slane %v3678_v58, 5  ;;  %v2943_v25 = vunpack.c.l.b16 %v2861_v14  ;;  %v2267_v58 = vshll.u32 %v8326_v53, 16  ;;  %v3671_v11 = vsel %vm9969_vm4, %v3666_v56, %v10690_v42  ;;  %v9505_v42 = vld [vmem:[%s12756_s1 + $0x218] sm:$0xff] }
 0x170   : > { %3443 = vmatmul.bf16.gmra.mxu2 %v8571_v24  ;;  %v3686_v45 = vshll.u32 %v8640_v28, 16  ;;  %v3692_v12 = vshll.u32 %v8641_v26, 16  ;;  %v3696_v53 = vshrl.u32 %v8641_v26, 16  ;;  %v3975_v14 = vunpack.c.l.b16 %v3671_v11  ;;  %4562 = vmatpush.bf16.msra.mxu0 %v9505_v42  ;;  %v8417_v11 = vld [vmem:[%s9915_s26 + $0x6c] sm:$0x1] }
 0x171   : > { %4092 = vmatmul.bf16.gmra.mxu3 %v4002_v29  ;;  %v3681_v15 = vsel %vm9969_vm4, %v3676_v18, %v3680_v52  ;;  %v2944_v29 = vunpack.c.l.b16 %v2865_v21  ;;  %v2266_v52 = vrot.slane %v2264_v37, 4  ;;  %v2462_v18 = vunpack.c.l.b16 %v2242_v38  ;;  %v8327_v21 = vld [vmem:[%s9915_s26 + $0x64] sm:$0xf] }
 0x172   : > { %v3976_v41 = vunpack.c.l.b16 %v3681_v15  ;;  %v2256_v28 = vor.u32 %v2255_v3, %v10708_v44  ;;  %v2259_v26 = vshll.u32 %v8325_v8, 16  ;;  %v3698_v37 = vrot.slane %v3696_v53, 4 }
 0x173   : > { %v1585_v54 = vpop.f32.mrf.mxu2  ;;  %v483_v40 = vpop.f32.mrf.mxu0  ;;  %v2966_v50 = vpack.c.b16 %v2944_v29, %v2943_v25  ;;  %v8416_v25 = vld [vmem:[%s9915_s26 + $0x68] sm:$0xf]  ;;  %v10744_v29 = vrot.slane %v3692_v12, 5 }
 0x174   : > { %v1928_v46 = vpop.f32.mrf.mxu3  ;;  %v10732_v24 = vadd.f32 %v1585_v54, %v1172_v57  ;;  %v2269_v57 = vrot.slane %v2267_v58, 5  ;;  %v1105_v56 = vpop.f32.mrf.mxu1  ;;  %v3685_v54 = vrot.slane %v3683_v33, 4  ;;  %v2867_v19 = vrot.slane %v8416_v25, 5 }
 0x175   : > { %v10735_v13 = vadd.f32 %v1928_v46, %v10530_v39  ;;  %v2463_v39 = vunpack.c.l.b16 %v2252_v7  ;;  %3080 = vmatmul.bf16.gmra.mxu1 %v2966_v50  ;;  %v3688_v46 = vrot.slane %v3686_v45, 5  ;;  %v1173_v58 = vadd.f32 %v1105_v56, %v483_v40  ;;  %v9479_v40 = vld [vmem:[%s9915_s26 + $0x74] sm:$0xff] }
 0x176   : > { %v2270_v38 = vor.u32 %v2269_v57, %v2266_v52  ;;  %v2273_v7 = vshll.u32 %v8327_v21, 16  ;;  %v4003_v42 = vpack.c.b16 %v3976_v41, %v3975_v14  ;;  %v2257_v8 = vrot.slane %v2256_v28, 4  ;;  %v8644_v41 = vld [vmem:[%s9915_s26 + $0x50] sm:$0xf] }
 0x177   : > { %12773 = vst [vmem:[#allocation9_spill] sm:$0xff] %v10735_v13  ;;  %v8642_v13 = vld [vmem:[%s9915_s26 + $0x48] sm:$0xf]  ;;  %v2486_v50 = vpack.c.b16 %v2463_v39, %v2462_v18  ;;  %v2870_v45 = vrot.slane %v8417_v11, 5  ;;  %v2261_v12 = vrot.slane %v2259_v26, 5  ;;  %v3689_v53 = vor.u32 %v3688_v46, %v3685_v54 }
 0x178   : > { %v3699_v52 = vor.u32 %v3698_v37, %v10744_v29  ;;  %v3702_v57 = vshll.u32 %v8642_v13, 16  ;;  %v2271_v56 = vrot.slane %v2270_v38, 4  ;;  %v2275_v18 = vrot.slane %v2273_v7, 5 }
 0x179   : > { %v2868_v55 = vsel %vm9983_vm5, %v2866_v0, %v2867_v19  ;;  %v2869_v39 = vrot.slane %v2867_v19, 4  ;;  %v2277_v14 = vshrl.u32 %v8327_v21, 16  ;;  %v3690_v26 = vrot.slane %v3689_v53, 4  ;;  %v8329_v53 = vld [vmem:[%s9915_s26 + $0x6c] sm:$0x1] }
 0x17a   : > { %v3700_v25 = vrot.slane %v3699_v52, 4  ;;  %v3704_v54 = vrot.slane %v3702_v57, 5  ;;  %v2262_v37 = vsel %vm9969_vm4, %v2257_v8, %v2261_v12  ;;  %v2276_v0 = vsel %vm9969_vm4, %v2271_v56, %v2275_v18 }
 0x17b   : > { %v1587_v15 = vpop.f32.mrf.mxu2  ;;  %v10753_v33 = vpop.f32.mrf.mxu0  ;;  %v2871_v28 = vsel %vm9983_vm5, %v2869_v39, %v2870_v45  ;;  %v3706_v38 = vshrl.u32 %v8642_v13, 16  ;;  %v3717_v7 = vshrl.u32 %v8644_v41, 16  ;;  %v3720_v11 = vshll.u32 %v8644_v41, 16  ;;  %v8419_v41 = vld [vmem:[%s9915_s26 + $0x74] sm:$0xf] }
 0x17c   : > { %v1930_v51 = vpop.f32.mrf.mxu3  ;;  %v10748_v44 = vadd.f32 %v1587_v15, %v1173_v58  ;;  %v2946_v46 = vunpack.c.l.b16 %v2871_v28  ;;  %v3695_v8 = vsel %vm9969_vm4, %v3690_v26, %v10744_v29  ;;  %v2279_v45 = vrot.slane %v2277_v14, 4 }
 0x17d   : > { %v10751_v3 = vadd.f32 %v1930_v51, %v10551_v32  ;;  %v8328_v32 = vld [vmem:[%s9915_s26 + $0x68] sm:$0xf]  ;;  %v2945_v51 = vunpack.c.l.b16 %v2868_v55  ;;  %v2464_v12 = vunpack.c.l.b16 %v2262_v37  ;;  %v2465_v13 = vunpack.c.l.b16 %v2276_v0  ;;  %v8418_v0 = vld [vmem:[%s9915_s26 + $0x70] sm:$0xe] }
 0x17e   : > { %2596 = vmatmul.bf16.gmra.mxu0 %v2486_v50  ;;  %v2283_v19 = vshll.u32 %v8328_v32, 16  ;;  %v2287_v58 = vshrl.u32 %v8328_v32, 16  ;;  %v3708_v56 = vrot.slane %v3706_v38, 4  ;;  %v3719_v55 = vrot.slane %v3717_v7, 4  ;;  %v10789_v7 = vld [vmem:[%s9915_s26 + $0x78] sm:$0xf] }
 0x17f   : > { %v2967_v15 = vpack.c.b16 %v2946_v46, %v2945_v51  ;;  %v3722_v39 = vrot.slane %v3720_v11, 5  ;;  %v3977_v32 = vunpack.c.l.b16 %v3695_v8  ;;  %v10782_v51 = vld [vmem:[%s9915_s26 + $0x54] sm:$0xf]  ;;  %v2280_v28 = vor.u32 %v2279_v45, %v2275_v18 }
 0x180   : > { %3448 = vmatmul.bf16.gmra.mxu2 %v9479_v40  ;;  %v3705_v40 = vsel %vm9969_vm4, %v3700_v25, %v3704_v54  ;;  %v10778_v52 = vrot.slane %v2283_v19, 5  ;;  %v2289_v57 = vrot.slane %v2287_v58, 4  ;;  %v2293_v14 = vshll.u32 %v8329_v53, 16  ;;  %v8330_v53 = vld [vmem:[%s9915_s26 + $0x70] sm:$0xf] }
 0x181   : > { %4097 = vmatmul.bf16.gmra.mxu3 %v4003_v42  ;;  %v3978_v29 = vunpack.c.l.b16 %v3705_v40  ;;  %v2874_v26 = vrot.slane %v8419_v41, 5  ;;  %v2487_v25 = vpack.c.b16 %v2465_v13, %v2464_v12  ;;  %v3709_v58 = vor.u32 %v3708_v56, %v3704_v54  ;;  %v9480_v40 = vld [vmem:[%s9915_s26 + $0x80] sm:$0xff]  ;;  %v8331_v41 = vld [vmem:[%s9915_s26 + $0x74] sm:$0xf] }
 0x182   : > { %v2290_v46 = vor.u32 %v2289_v57, %v10778_v52  ;;  %v3726_v38 = vshll.u32 %v10782_v51, 16  ;;  %v8440_v11 = vrot.slane %v8418_v0, 9  ;;  %v2281_v12 = vrot.slane %v2280_v28, 4 }
 0x183   : > { %v10770_v42 = vpop.f32.mrf.mxu0  ;;  %v4004_v8 = vpack.c.b16 %v3978_v29, %v3977_v32  ;;  %v2876_v45 = vrot.slane %v2874_v26, 4  ;;  %v2295_v13 = vrot.slane %v2293_v14, 5  ;;  %v12761_v56 = vrot.slane %v10789_v7, 5 }
 0x184   : > { %v1933_v21 = vpop.f32.mrf.mxu3  ;;  %v2291_v57 = vrot.slane %v2290_v46, 4  ;;  %v2298_v29 = vshrl.u32 %v8330_v53, 16  ;;  %v2301_v28 = vshll.u32 %v8330_v53, 16  ;;  %v3046_v46 = vpop.f32.mrf.mxu1  ;;  %v2311_v0 = vshrl.u32 %v8331_v41, 16 }
 0x185   : > { %v10768_v50 = vadd.f32 %v1933_v21, %v10577_v6  ;;  %v8643_v6 = vld [vmem:[%s9915_s26 + $0x4c] sm:$0x1]  ;;  %3085 = vmatmul.bf16.gmra.mxu1 %v2967_v15  ;;  %v3723_v21 = vor.u32 %v3722_v39, %v3719_v55  ;;  %v10801_v39 = vrot.slane %v3726_v38, 5  ;;  %v2878_v14 = vsel %vm9983_vm5, %v2876_v45, %v12761_v56 }
 0x186   : > { %v3712_v37 = vshll.u32 %v8643_v6, 16  ;;  %v2875_v6 = vsel %vm9983_vm5, %v8440_v11, %v2874_v26  ;;  %v2948_v26 = vunpack.c.l.b16 %v2878_v14  ;;  %v3730_v45 = vshrl.u32 %v10782_v51, 16  ;;  %v8332_v51 = vld [vmem:[%s9915_s26 + $0x78] sm:$0xf] }
 0x187   : > { %12774 = vst [vmem:[#allocation10_spill] sm:$0xff] %v10768_v50  ;;  %v3724_v55 = vrot.slane %v3723_v21, 4  ;;  %v2947_v32 = vunpack.c.l.b16 %v2875_v6  ;;  %v2296_v21 = vsel %vm9969_vm4, %v2291_v57, %v2295_v13  ;;  %v2300_v53 = vrot.slane %v2298_v29, 4 }
 0x188   : > { %v3714_v54 = vrot.slane %v3712_v37, 5  ;;  %v2307_v37 = vshll.u32 %v8331_v41, 16  ;;  %v2303_v6 = vrot.slane %v2301_v28, 5  ;;  %v3732_v28 = vrot.slane %v3730_v45, 4 }
 0x189   : > { %v3729_v11 = vsel %vm9969_vm4, %v3724_v55, %v10801_v39  ;;  %v2313_v55 = vrot.slane %v2311_v0, 4  ;;  %v2317_v56 = vshll.u32 %v8332_v51, 16 }
 0x18a   : > { %v3980_v14 = vunpack.c.l.b16 %v3729_v11  ;;  %v2304_v29 = vor.u32 %v2303_v6, %v2300_v53  ;;  %v8421_v11 = vld [vmem:[%s9915_s26 + $0x7c] sm:$0x1]  ;;  %v3733_v6 = vor.u32 %v3732_v28, %v10801_v39  ;;  %v8334_v39 = vld [vmem:[%s9915_s26 + $0x80] sm:$0xf]  ;;  %v2321_v28 = vshrl.u32 %v8332_v51, 16 }
 0x18b   : > { %v10794_v18 = vpop.f32.mrf.mxu0 }
 0x18c   : > { %v1935_v19 = vpop.f32.mrf.mxu3  ;;  %v3048_v53 = vpop.f32.mrf.mxu1  ;;  %v2305_v45 = vrot.slane %v2304_v29, 4  ;;  %v2880_v29 = vrot.slane %v8421_v11, 5  ;;  %v2335_v11 = vshll.u32 %v8334_v39, 16 }
 0x18d   : > { %v10792_v15 = vadd.f32 %v1935_v19, %v10596_v47  ;;  %v3710_v47 = vrot.slane %v3709_v58, 4  ;;  %v8646_v19 = vld [vmem:[%s9915_s26 + $0x58] sm:$0xf] }
 0x18e   : > { %2601 = vmatmul.bf16.gmra.mxu0 %v2487_v25  ;;  %v2286_v25 = vsel %vm9969_vm4, %v2281_v12, %v10778_v52  ;;  %v3409_v12 = vpop.f32.mrf.mxu2  ;;  %v3736_v13 = vshll.u32 %v8646_v19, 16  ;;  %v3740_v57 = vshrl.u32 %v8646_v19, 16 }
 0x18f   : > { %12775 = vst [vmem:[#allocation11_spill] sm:$0xff] %v10792_v15  ;;  %v3715_v38 = vsel %vm9969_vm4, %v3710_v47, %v3714_v54  ;;  %v9504_v54 = vld [vmem:[%s12756_s1 + $0x210] sm:$0xff]  ;;  %v2309_v47 = vrot.slane %v2307_v37, 5  ;;  %v2466_v41 = vunpack.c.l.b16 %v2286_v25  ;;  %v8647_v37 = vld [vmem:[%s9915_s26 + $0x5c] sm:$0x1] }
 0x190   : > { %3453 = vmatmul.bf16.gmra.mxu2 %v9480_v40  ;;  %4563 = vmatpush.bf16.msra.mxu0 %v9504_v54  ;;  %v3742_v19 = vrot.slane %v3740_v57, 4  ;;  %v8422_v57 = vld [vmem:[%s9915_s26 + $0x80] sm:$0xe] }
 0x191   : > { %4102 = vmatmul.bf16.gmra.mxu3 %v4004_v8  ;;  %v2968_v8 = vpack.c.b16 %v2948_v26, %v2947_v32  ;;  %v2467_v32 = vunpack.c.l.b16 %v2296_v21  ;;  %v10829_v26 = vrot.slane %v3736_v13, 5 }
 0x193   : > { %v10822_v52 = vpop.f32.mrf.mxu0  ;;  %v2488_v25 = vpack.c.b16 %v2467_v32, %v2466_v41  ;;  %v3746_v41 = vshll.u32 %v8647_v37, 16 }
 0x194   : > { %v1938_v58 = vpop.f32.mrf.mxu3 }
 0x195   : > { %v10820_v40 = vadd.f32 %v1938_v58, %v10625_v61  ;;  %v3979_v61 = vunpack.c.l.b16 %v3715_v38  ;;  %3090 = vmatmul.bf16.gmra.mxu1 %v2968_v8  ;;  %v2314_v58 = vor.u32 %v2313_v55, %v2309_v47  ;;  %v9481_v38 = vld [vmem:[%s9915_s26 + $0x8c] sm:$0xf0]  ;;  %v3743_v55 = vor.u32 %v3742_v19, %v10829_v26 }
 0x196   : > { %v3411_v32 = vpop.f32.mrf.mxu2  ;;  %v3734_v19 = vrot.slane %v3733_v6, 4 }
 0x197   : > { %12776 = vst [vmem:[#allocation12_spill] sm:$0xff] %v10820_v40  ;;  %v4005_v21 = vpack.c.b16 %v3980_v14, %v3979_v61  ;;  %v8582_v40 = vld [vmem:[%s9915_s26 + $0x88] sm:$0xf]  ;;  %v2315_v61 = vrot.slane %v2314_v58, 4  ;;  %v10842_v14 = vrot.slane %v2317_v56, 5 }
 0x198   : > { %v8583_v13 = vor.u32 %v9481_v38, %v8582_v40  ;;  %v8441_v40 = vrot.slane %v8422_v57, 9  ;;  %v8648_v56 = vld [vmem:[%s9915_s26 + $0x60] sm:$0xf]  ;;  %v3748_v38 = vrot.slane %v3746_v41, 5  ;;  %v3739_v57 = vsel %vm9969_vm4, %v3734_v19, %v10829_v26 }
 0x199   : > { %v3751_v6 = vshrl.u32 %v8648_v56, 16  ;;  %v3981_v19 = vunpack.c.l.b16 %v3739_v57 }
 0x19b   : > { %v2567_v8 = vpop.f32.mrf.mxu0  ;;  %v3753_v26 = vrot.slane %v3751_v6, 4  ;;  %v8650_v6 = vld [vmem:[%s9915_s26 + $0x68] sm:$0xf] }
 0x19c   : > { %v1940_v0 = vpop.f32.mrf.mxu3  ;;  %v2672_v54 = vadd.f32 %v2567_v8, %v10387_v2  ;;  %v2310_v2 = vsel %vm9969_vm4, %v2305_v45, %v2309_v47  ;;  %v8649_v47 = vld [vmem:[%s9915_s26 + $0x64] sm:$0xf] }
 0x19d   : > { %v10836_v15 = vadd.f32 %v1940_v0, %v10645_v34  ;;  %v10845_v34 = vld [vmem:[%s9915_s26 + $0x84] sm:$0xf]  ;;  %v12778_v0 = vrot.slane %v10789_v7, 5  ;;  %v3744_v7 = vrot.slane %v3743_v55, 4  ;;  %v2468_v45 = vunpack.c.l.b16 %v2310_v2 }
 0x19e   : > { %v3151_v50 = vadd.f32 %v3046_v46, %v2672_v54  ;;  %2606 = vmatmul.bf16.gmra.mxu0 %v2488_v25  ;;  %v2884_v46 = vrot.slane %v10845_v34, 5  ;;  %v2320_v25 = vsel %vm9969_vm4, %v2315_v61, %v10842_v14  ;;  %v2323_v54 = vrot.slane %v2321_v28, 4 }
 0x19f   : > { %12777 = vst [vmem:[#allocation13_spill] sm:$0xff] %v10836_v15  ;;  %v2879_v15 = vrot.slane %v12778_v0, 4  ;;  %v3749_v61 = vsel %vm9969_vm4, %v3744_v7, %v3748_v38  ;;  %v3760_v34 = vshll.u32 %v8649_v47, 16  ;;  %v3764_v0 = vshrl.u32 %v8649_v47, 16  ;;  %v8424_v38 = vld [vmem:[%s9915_s26 + $0x88] sm:$0xf] }
 0x1a0   : > { %3458 = vmatmul.bf16.gmra.mxu2 %v8583_v13  ;;  %v10855_v37 = vadd.f32 %v3409_v12, %v3151_v50  ;;  %v3754_v13 = vshll.u32 %v8648_v56, 16  ;;  %v2885_v50 = vsel %vm9983_vm5, %v8441_v40, %v2884_v46  ;;  %v2337_v40 = vrot.slane %v2335_v11, 5 }
 0x1a1   : > { %4107 = vmatmul.bf16.gmra.mxu3 %v4005_v21  ;;  %v2881_v58 = vsel %vm9983_vm5, %v2879_v15, %v2880_v29  ;;  %v2332_v21 = vshrl.u32 %v8334_v39, 16  ;;  %v2950_v55 = vunpack.c.l.b16 %v2885_v50  ;;  %v3051_v29 = vpop.f32.mrf.mxu1  ;;  %v2469_v39 = vunpack.c.l.b16 %v2320_v25  ;;  %v8335_v50 = vld [vmem:[%s9915_s26 + $0x84] sm:$0xf] }
 0x1a2   : > { %v2949_v51 = vunpack.c.l.b16 %v2881_v58  ;;  %v8333_v58 = vld [vmem:[%s9915_s26 + $0x7c] sm:$0x1]  ;;  %v3756_v28 = vrot.slane %v3754_v13, 5  ;;  %v2324_v7 = vor.u32 %v2323_v54, %v10842_v14  ;;  %v10879_v25 = vrot.slane %v3760_v34, 5 }
 0x1a3   : > { %v2569_v12 = vpop.f32.mrf.mxu0  ;;  %v2327_v11 = vshll.u32 %v8333_v58, 16 }
 0x1a4   : > { %v1943_v8 = vpop.f32.mrf.mxu3  ;;  %v2673_v41 = vadd.f32 %v2569_v12, %v10412_v30  ;;  %v2969_v2 = vpack.c.b16 %v2950_v55, %v2949_v51  ;;  %v3414_v30 = vpop.f32.mrf.mxu2  ;;  %v2341_v12 = vshll.u32 %v8335_v50, 16  ;;  %v3757_v57 = vor.u32 %v3756_v28, %v3753_v26  ;;  %v8425_v55 = vld [vmem:[%s9915_s26 + $0x8c] sm:$0x1] }
 0x1a5   : > { %v10865_v15 = vadd.f32 %v1943_v8, %v10672_v23  ;;  %v2334_v23 = vrot.slane %v2332_v21, 4  ;;  %v3982_v8 = vunpack.c.l.b16 %v3749_v61  ;;  %v3766_v21 = vrot.slane %v3764_v0, 4 }
 0x1a6   : > { %v3152_v56 = vadd.f32 %v3048_v53, %v2673_v41  ;;  %3095 = vmatmul.bf16.gmra.mxu1 %v2969_v2  ;;  %v2489_v53 = vpack.c.b16 %v2469_v39, %v2468_v45  ;;  %v2886_v41 = vrot.slane %v2884_v46, 4  ;;  %v2887_v61 = vrot.slane %v8424_v38, 5  ;;  %v9482_v2 = vld [vmem:[%s9915_s26 + $0x94] sm:$0xff] }
 0x1a7   : > { %v2338_v51 = vor.u32 %v2337_v40, %v2334_v23  ;;  %v4006_v54 = vpack.c.b16 %v3982_v8, %v3981_v19  ;;  %v2325_v34 = vrot.slane %v2324_v7, 4  ;;  %v3767_v0 = vor.u32 %v3766_v21, %v10879_v25  ;;  %v8336_v23 = vld [vmem:[%s9915_s26 + $0x88] sm:$0xf]  ;;  %v8652_v7 = vld [vmem:[%s9915_s26 + $0x70] sm:$0xf] }
 0x1a8   : > { %v10877_v47 = vadd.f32 %v3411_v32, %v3152_v56  ;;  %v3770_v39 = vshll.u32 %v8650_v6, 16  ;;  %v2888_v40 = vsel %vm9983_vm5, %v2886_v41, %v2887_v61  ;;  %v2329_v56 = vrot.slane %v2327_v11, 5 }
 0x1a9   : > { %v2339_v46 = vrot.slane %v2338_v51, 4  ;;  %v2889_v58 = vrot.slane %v2887_v61, 4  ;;  %v2890_v26 = vrot.slane %v8425_v55, 5  ;;  %v2343_v28 = vrot.slane %v2341_v12, 5  ;;  %v3053_v38 = vpop.f32.mrf.mxu1 }
 0x1aa   : > { %v2345_v19 = vshrl.u32 %v8335_v50, 16  ;;  %v3758_v8 = vrot.slane %v3757_v57, 4  ;;  %v2355_v21 = vshrl.u32 %v8336_v23, 16  ;;  %v3768_v11 = vrot.slane %v3767_v0, 4 }
 0x1ab   : > { %v2572_v32 = vpop.f32.mrf.mxu0  ;;  %v3772_v51 = vrot.slane %v3770_v39, 5  ;;  %v3785_v12 = vshrl.u32 %v8652_v7, 16  ;;  %v3788_v50 = vshll.u32 %v8652_v7, 16  ;;  %v2330_v61 = vsel %vm9969_vm4, %v2325_v34, %v2329_v56  ;;  %v8337_v7 = vld [vmem:[%s9915_s26 + $0x8c] sm:$0x1] }
 0x1ac   : > { %v1945_v13 = vpop.f32.mrf.mxu3  ;;  %v2674_v45 = vadd.f32 %v2572_v32, %v10431_v63  ;;  %v2351_v63 = vshll.u32 %v8336_v23, 16  ;;  %v2951_v32 = vunpack.c.l.b16 %v2888_v40  ;;  %v2357_v39 = vrot.slane %v2355_v21, 4  ;;  %v9503_v23 = vld [vmem:[%s12756_s1 + $0x208] sm:$0xff] }
 0x1ad   : > { %v10884_v14 = vadd.f32 %v1945_v13, %v10699_v31  ;;  %v2891_v13 = vsel %vm9983_vm5, %v2889_v58, %v2890_v26  ;;  %v3763_v40 = vsel %vm9969_vm4, %v3758_v8, %v10879_v25  ;;  %v3790_v58 = vrot.slane %v3788_v50, 5  ;;  %4564 = vmatpush.bf16.msra.mxu0 %v9503_v23  ;;  %v8651_v21 = vld [vmem:[%s9915_s26 + $0x6c] sm:$0x1]  ;;  %v8427_v50 = vld [vmem:[%s9915_s26 + $0x94] sm:$0xf] }
 0x1ae   : > { %v3153_v31 = vadd.f32 %v3051_v29, %v2674_v45  ;;  %2611 = vmatmul.bf16.gmra.mxu0 %v2489_v53  ;;  %v2952_v55 = vunpack.c.l.b16 %v2891_v13  ;;  %v3416_v29 = vpop.f32.mrf.mxu2  ;;  %v3774_v53 = vshrl.u32 %v8650_v6, 16  ;;  %v10904_v0 = vrot.slane %v2351_v63, 5 }
 0x1af   : > { %v1174_v25 = vadd.f32 %v10255_v48, %v10753_v33  ;;  %v2894_v23 = vrot.slane %v8427_v50, 5 }
 0x1b0   : > { %3463 = vmatmul.bf16.gmra.mxu2 %v9482_v2  ;;  %v10895_v41 = vadd.f32 %v3414_v30, %v3153_v31  ;;  %v2347_v2 = vrot.slane %v2345_v19, 4  ;;  %v2970_v6 = vpack.c.b16 %v2952_v55, %v2951_v32  ;;  %v3776_v56 = vrot.slane %v3774_v53, 4  ;;  %v10919_v55 = vld [vmem:[%s9915_s26 + $0x74] sm:$0xf] }
 0x1b1   : > { %4112 = vmatmul.bf16.gmra.mxu3 %v4006_v54  ;;  %v2344_v54 = vsel %vm9969_vm4, %v2339_v46, %v2343_v28  ;;  %v3787_v46 = vrot.slane %v3785_v12, 4  ;;  %v2470_v31 = vunpack.c.l.b16 %v2330_v61  ;;  %v2358_v32 = vor.u32 %v2357_v39, %v10904_v0 }
 0x1b2   : > { %v2471_v19 = vunpack.c.l.b16 %v2344_v54  ;;  %v2348_v63 = vor.u32 %v2347_v2, %v2343_v28  ;;  %v3777_v53 = vor.u32 %v3776_v56, %v3772_v51  ;;  %v3780_v12 = vshll.u32 %v8651_v21, 16  ;;  %v8339_v56 = vld [vmem:[%s9915_s26 + $0x94] sm:$0xf] }
 0x1b3   : > { %v2574_v30 = vpop.f32.mrf.mxu0  ;;  %v3791_v28 = vor.u32 %v3790_v58, %v3787_v46  ;;  %v3794_v2 = vshll.u32 %v10919_v55, 16  ;;  %v2359_v39 = vrot.slane %v2358_v32, 4  ;;  %v10937_v46 = vld [vmem:[%s9915_s26 + $0x98] sm:$0xf]  ;;  %v2896_v32 = vrot.slane %v2894_v23, 4 }
 0x1b4   : > { %v1948_v57 = vpop.f32.mrf.mxu3  ;;  %v2675_v34 = vadd.f32 %v2574_v30, %v10445_v35  ;;  %v3983_v35 = vunpack.c.l.b16 %v3763_v40  ;;  %v2490_v61 = vpack.c.b16 %v2471_v19, %v2470_v31  ;;  %v2349_v54 = vrot.slane %v2348_v63, 4 }
 0x1b5   : > { %v10902_v45 = vadd.f32 %v1948_v57, %v10732_v24  ;;  %v3773_v24 = vsel %vm9969_vm4, %v3768_v11, %v3772_v51  ;;  %v2361_v11 = vshll.u32 %v8337_v7, 16  ;;  %v8426_v51 = vld [vmem:[%s9915_s26 + $0x90] sm:$0xe]  ;;  %v1656_v40 = vadd.f32 %v10308_v27, %v1174_v25 }
 0x1b6   : > { %v3154_v26 = vadd.f32 %v3053_v38, %v2675_v34  ;;  %v3984_v13 = vunpack.c.l.b16 %v3773_v24  ;;  %3100 = vmatmul.bf16.gmra.mxu1 %v2970_v6  ;;  %v3056_v38 = vpop.f32.mrf.mxu1  ;;  %v3419_v30 = vpop.f32.mrf.mxu2  ;;  %v8338_v6 = vld [vmem:[%s9915_s26 + $0x90] sm:$0xf]  ;;  %v9483_v24 = vld [vmem:[%s9915_s26 + $0xa0] sm:$0xff]  ;;  %v8442_v58 = vrot.slane %v8426_v51, 9  ;;  %v3782_v31 = vrot.slane %v3780_v12, 5 }
 0x1b7   : > { %v3792_v19 = vrot.slane %v3791_v28, 4  ;;  %v10939_v63 = vrot.slane %v3794_v2, 5  ;;  %v2366_v21 = vshrl.u32 %v8338_v6, 16  ;;  %v2897_v25 = vrot.slane %v10937_v46, 5 }
 0x1b8   : > { %v10923_v8 = vadd.f32 %v3416_v29, %v3154_v26  ;;  %v4007_v29 = vpack.c.b16 %v3984_v13, %v3983_v35  ;;  %v2363_v26 = vrot.slane %v2361_v11, 5  ;;  %v2369_v35 = vshll.u32 %v8338_v6, 16  ;;  %v8654_v13 = vld [vmem:[%s9915_s26 + $0x78] sm:$0xf] }
 0x1b9   : > { %v2895_v27 = vsel %vm9983_vm5, %v8442_v58, %v2894_v23  ;;  %v2354_v28 = vsel %vm9969_vm4, %v2349_v54, %v10904_v0  ;;  %v3804_v50 = vshll.u32 %v8654_v13, 16  ;;  %v2368_v51 = vrot.slane %v2366_v21, 4 }
 0x1ba   : > { %v2953_v12 = vunpack.c.l.b16 %v2895_v27  ;;  %v2371_v23 = vrot.slane %v2369_v35, 5  ;;  %v8655_v35 = vld [vmem:[%s9915_s26 + $0x7c] sm:$0x1] }
 0x1bb   : > { %v2577_v33 = vpop.f32.mrf.mxu0 }
 0x1bc   : > { %v1950_v57 = vpop.f32.mrf.mxu3  ;;  %v2676_v34 = vadd.f32 %v2577_v33, %v10459_v10  ;;  %v2375_v10 = vshll.u32 %v8339_v56, 16  ;;  %v2364_v33 = vsel %vm9969_vm4, %v2359_v39, %v2363_v26  ;;  %v10968_v39 = vld [vmem:[%s9915_s26 + $0x98] sm:$0xf] }
 0x1bd   : > { %v10928_v48 = vadd.f32 %v1950_v57, %v10748_v44  ;;  %v3778_v44 = vrot.slane %v3777_v53, 4  ;;  %v3798_v53 = vshrl.u32 %v10919_v55, 16  ;;  %v3808_v57 = vshrl.u32 %v8654_v13, 16 }
 0x1be   : > { %v3155_v7 = vadd.f32 %v3056_v38, %v2676_v34  ;;  %2616 = vmatmul.bf16.gmra.mxu0 %v2490_v61  ;;  %v2379_v38 = vshrl.u32 %v8339_v56, 16  ;;  %v2898_v61 = vsel %vm9983_vm5, %v2896_v32, %v2897_v25  ;;  %v3058_v6 = vpop.f32.mrf.mxu1  ;;  %v10964_v34 = vrot.slane %v2375_v10, 5 }
 0x1bf   : > { %v3783_v55 = vsel %vm9969_vm4, %v3778_v44, %v3782_v31  ;;  %v2954_v0 = vunpack.c.l.b16 %v2898_v61  ;;  %v3800_v58 = vrot.slane %v3798_v53, 4  ;;  %v1175_v44 = vadd.f32 %v10269_v9, %v10770_v42  ;;  %v3421_v31 = vpop.f32.mrf.mxu2 }
 0x1c0   : > { %3468 = vmatmul.bf16.gmra.mxu2 %v9483_v24  ;;  %v10945_v11 = vadd.f32 %v3419_v30, %v3155_v7  ;;  %v2381_v56 = vrot.slane %v2379_v38, 4  ;;  %v2472_v13 = vunpack.c.l.b16 %v2354_v28  ;;  %v2473_v21 = vunpack.c.l.b16 %v2364_v33 }
 0x1c1   : > { %4117 = vmatmul.bf16.gmra.mxu3 %v4007_v29  ;;  %v3797_v29 = vsel %vm9969_vm4, %v3792_v19, %v10939_v63  ;;  %v2971_v26 = vpack.c.b16 %v2954_v0, %v2953_v12  ;;  %v3810_v19 = vrot.slane %v3808_v57, 4  ;;  %v3985_v10 = vunpack.c.l.b16 %v3783_v55 }
 0x1c2   : > { %v3986_v27 = vunpack.c.l.b16 %v3797_v29  ;;  %v2372_v32 = vor.u32 %v2371_v23, %v2368_v51  ;;  %v2382_v53 = vor.u32 %v2381_v56, %v10964_v34  ;;  %v3801_v9 = vor.u32 %v3800_v58, %v10939_v63  ;;  %v8342_v56 = vld [vmem:[%s9915_s26 + $0xa0] sm:$0xf] }
 0x1c3   : > { %v2579_v30 = vpop.f32.mrf.mxu0  ;;  %v1657_v42 = vadd.f32 %v10321_v62, %v1175_v44  ;;  %v3814_v28 = vshll.u32 %v8655_v35, 16  ;;  %v2491_v61 = vpack.c.b16 %v2473_v21, %v2472_v13  ;;  %v8430_v58 = vld [vmem:[%s9915_s26 + $0xa0] sm:$0xe]  ;;  %v2400_v35 = vshrl.u32 %v8342_v56, 16 }
 0x1c4   : > { %v1953_v2 = vpop.f32.mrf.mxu3  ;;  %v2677_v24 = vadd.f32 %v2579_v30, %v10471_v60  ;;  %v2385_v60 = vshll.u32 %v10968_v39, 16  ;;  %v4008_v55 = vpack.c.b16 %v3986_v27, %v3985_v10  ;;  %v2373_v63 = vrot.slane %v2372_v32, 4 }
 0x1c5   : > { %v10962_v54 = vadd.f32 %v1953_v2, %v1656_v40  ;;  %v10972_v40 = vrot.slane %v3804_v50, 5  ;;  %v1176_v50 = vadd.f32 %v10279_v36, %v10794_v18  ;;  %v2383_v0 = vrot.slane %v2382_v53, 4  ;;  %v8594_v36 = vld [vmem:[%s9915_s26 + $0xa8] sm:$0xf]  ;;  %v9484_v18 = vld [vmem:[%s9915_s26 + $0xac] sm:$0xf0] }
 0x1c6   : > { %v3156_v7 = vadd.f32 %v3058_v6, %v2677_v24  ;;  %3105 = vmatmul.bf16.gmra.mxu1 %v2971_v26  ;;  %v10986_v29 = vrot.slane %v2385_v60, 5  ;;  %v3802_v30 = vrot.slane %v3801_v9, 4  ;;  %v3816_v51 = vrot.slane %v3814_v28, 5  ;;  %v8429_v24 = vld [vmem:[%s9915_s26 + $0x9c] sm:$0x1] }
 0x1c7   : > { %v3811_v12 = vor.u32 %v3810_v19, %v10972_v40  ;;  %v8595_v23 = vor.u32 %v9484_v18, %v8594_v36  ;;  %v10997_v26 = vld [vmem:[%s9915_s26 + $0xa4] sm:$0xf]  ;;  %v1658_v44 = vadd.f32 %v10339_v16, %v1176_v50  ;;  %v2899_v19 = vrot.slane %v2897_v25, 4 }
 0x1c8   : > { %v10976_v38 = vadd.f32 %v3421_v31, %v3156_v7  ;;  %v8656_v31 = vld [vmem:[%s9915_s26 + $0x80] sm:$0xf]  ;;  %v2378_v7 = vsel %vm9969_vm4, %v2373_v63, %v10964_v34  ;;  %v2388_v13 = vsel %vm9969_vm4, %v2383_v0, %v10986_v29  ;;  %v3807_v21 = vsel %vm9969_vm4, %v3802_v30, %v10972_v40  ;;  %v8657_v25 = vld [vmem:[%s9915_s26 + $0x84] sm:$0xf] }
 0x1c9   : > { %v3812_v6 = vrot.slane %v3811_v12, 4  ;;  %v2900_v16 = vrot.slane %v8429_v24, 5  ;;  %v2403_v46 = vshll.u32 %v8342_v56, 16  ;;  %v8443_v10 = vrot.slane %v8430_v58, 9 }
 0x1ca   : > { %v2904_v34 = vrot.slane %v10997_v26, 5  ;;  %v3819_v60 = vshrl.u32 %v8656_v31, 16  ;;  %v3822_v53 = vshll.u32 %v8656_v31, 16  ;;  %v1177_v0 = vadd.f32 %v10298_v4, %v10822_v52 }
 0x1cb   : > { %v2582_v33 = vpop.f32.mrf.mxu0  ;;  %v3817_v32 = vsel %vm9969_vm4, %v3812_v6, %v3816_v51  ;;  %v2901_v40 = vsel %vm9983_vm5, %v2899_v19, %v2900_v16  ;;  %v2402_v30 = vrot.slane %v2400_v35, 4  ;;  %v2405_v36 = vrot.slane %v2403_v46, 5  ;;  %v11033_v51 = vld [vmem:[%s9915_s26 + $0xa4] sm:$0xf] }
 0x1cc   : > { %v1955_v57 = vpop.f32.mrf.mxu3  ;;  %v10989_v62 = vadd.f32 %v2582_v33, %v10486_v17  ;;  %v2389_v17 = vshrl.u32 %v10968_v39, 16  ;;  %v9502_v39 = vld [vmem:[%s12756_s1 + $0x200] sm:$0xff]  ;;  %v2905_v28 = vsel %vm9983_vm5, %v8443_v10, %v2904_v34  ;;  %v2955_v50 = vunpack.c.l.b16 %v2901_v40 }
 0x1cd   : > { %v10984_v2 = vadd.f32 %v1955_v57, %v1657_v42  ;;  %4565 = vmatpush.bf16.msra.mxu0 %v9502_v39  ;;  %v3828_v33 = vshll.u32 %v8657_v25, 16  ;;  %v2956_v63 = vunpack.c.l.b16 %v2905_v28  ;;  %v2474_v18 = vunpack.c.l.b16 %v2378_v7  ;;  %v8658_v7 = vld [vmem:[%s9915_s26 + $0x88] sm:$0xf] }
 0x1ce   : > { %2621 = vmatmul.bf16.gmra.mxu0 %v2491_v61  ;;  %v2391_v12 = vrot.slane %v2389_v17, 4  ;;  %v8341_v61 = vld [vmem:[%s9915_s26 + $0x9c] sm:$0x1]  ;;  %v2475_v6 = vunpack.c.l.b16 %v2388_v13  ;;  %v3987_v24 = vunpack.c.l.b16 %v3807_v21  ;;  %v3988_v56 = vunpack.c.l.b16 %v3817_v32  ;;  %v9485_v32 = vld [vmem:[%s9915_s26 + $0xb4] sm:$0xff]  ;;  %v8344_v28 = vld [vmem:[%s9915_s26 + $0xa8] sm:$0xf] }
 0x1cf   : > { %v2395_v58 = vshll.u32 %v8341_v61, 16  ;;  %v3821_v26 = vrot.slane %v3819_v60, 4  ;;  %v3830_v17 = vrot.slane %v3828_v33, 5  ;;  %v1659_v4 = vadd.f32 %v10366_v43, %v1177_v0  ;;  %v8432_v60 = vld [vmem:[%s9915_s26 + $0xa8] sm:$0xf] }
 0x1d0   : > { %3473 = vmatmul.bf16.gmra.mxu2 %v8595_v23  ;;  %v2972_v23 = vpack.c.b16 %v2956_v63, %v2955_v50  ;;  %v2406_v52 = vor.u32 %v2405_v36, %v2402_v30  ;;  %v2409_v19 = vshll.u32 %v11033_v51, 16  ;;  %v2492_v21 = vpack.c.b16 %v2475_v6, %v2474_v18  ;;  %v8660_v0 = vld [vmem:[%s9915_s26 + $0x90] sm:$0xf] }
 0x1d1   : > { %4122 = vmatmul.bf16.gmra.mxu3 %v4008_v55  ;;  %v3832_v55 = vshrl.u32 %v8657_v25, 16  ;;  %v4009_v39 = vpack.c.b16 %v3988_v56, %v3987_v24  ;;  %v2397_v46 = vrot.slane %v2395_v58, 5  ;;  %v2907_v50 = vrot.slane %v8432_v60, 5 }
 0x1d2   : > { %v2407_v40 = vrot.slane %v2406_v52, 4  ;;  %v2413_v36 = vshrl.u32 %v11033_v51, 16  ;;  %v2419_v24 = vshll.u32 %v8344_v28, 16  ;;  %v2423_v56 = vshrl.u32 %v8344_v28, 16 }
 0x1d3   : > { %v2584_v42 = vpop.f32.mrf.mxu0  ;;  %v3834_v31 = vrot.slane %v3832_v55, 4  ;;  %v2909_v18 = vrot.slane %v2907_v50, 4 }
 0x1d4   : > { %v1958_v27 = vpop.f32.mrf.mxu3  ;;  %v11027_v57 = vadd.f32 %v2584_v42, %v10508_v1  ;;  %v2392_v1 = vor.u32 %v2391_v12, %v10986_v29  ;;  %v2411_v42 = vrot.slane %v2409_v19, 5  ;;  %v2906_v12 = vrot.slane %v2904_v34, 4 }
 0x1d5   : > { %v11022_v9 = vadd.f32 %v1958_v27, %v1658_v44  ;;  %v3824_v44 = vrot.slane %v3822_v53, 5  ;;  %v3835_v43 = vor.u32 %v3834_v31, %v3830_v17  ;;  %v3838_v27 = vshll.u32 %v8658_v7, 16  ;;  %v8433_v53 = vld [vmem:[%s9915_s26 + $0xac] sm:$0x1] }
 0x1d6   : > { %3110 = vmatmul.bf16.gmra.mxu1 %v2972_v23  ;;  %v2393_v35 = vrot.slane %v2392_v1, 4  ;;  %v2910_v61 = vrot.slane %v8433_v53, 5  ;;  %v2412_v30 = vsel %vm9969_vm4, %v2407_v40, %v2411_v42  ;;  %v2908_v34 = vsel %vm9983_vm5, %v2906_v12, %v2907_v50  ;;  %v8661_v53 = vld [vmem:[%s9915_s26 + $0x94] sm:$0xf] }
 0x1d7   : > { %v3825_v10 = vor.u32 %v3824_v44, %v3821_v26  ;;  %v3836_v55 = vrot.slane %v3835_v43, 4  ;;  %v3840_v63 = vrot.slane %v3838_v27, 5  ;;  %v3842_v23 = vshrl.u32 %v8658_v7, 16  ;;  %v8345_v27 = vld [vmem:[%s9915_s26 + $0xac] sm:$0x1] }
 0x1d8   : > { %v2957_v1 = vunpack.c.l.b16 %v2908_v34  ;;  %v3853_v44 = vshrl.u32 %v8660_v0, 16  ;;  %v3856_v31 = vshll.u32 %v8660_v0, 16  ;;  %v3862_v34 = vshll.u32 %v8661_v53, 16 }
 0x1d9   : > { %v3826_v33 = vrot.slane %v3825_v10, 4  ;;  %v3841_v19 = vsel %vm9969_vm4, %v3836_v55, %v3840_v63 }
 0x1da   : > { %v3990_v43 = vunpack.c.l.b16 %v3841_v19  ;;  %v3858_v60 = vrot.slane %v3856_v31, 5 }
 0x1db   : > { %v2587_v29 = vpop.f32.mrf.mxu0  ;;  %v3831_v52 = vsel %vm9969_vm4, %v3826_v33, %v3830_v17  ;;  %v8659_v17 = vld [vmem:[%s9915_s26 + $0x8c] sm:$0x1] }
 0x1dc   : > { %v1960_v13 = vpop.f32.mrf.mxu3  ;;  %v11042_v25 = vadd.f32 %v2587_v29, %v10533_v22  ;;  %v2398_v22 = vsel %vm9969_vm4, %v2393_v35, %v2397_v46  ;;  %v2421_v29 = vrot.slane %v2419_v24, 5  ;;  %v3844_v35 = vrot.slane %v3842_v23, 4 }
 0x1dd   : > { %v11039_v16 = vadd.f32 %v1960_v13, %v1659_v4  ;;  %v2911_v4 = vsel %vm9983_vm5, %v2909_v18, %v2910_v61  ;;  %v2476_v7 = vunpack.c.l.b16 %v2398_v22  ;;  %v2477_v13 = vunpack.c.l.b16 %v2412_v30  ;;  %v9533_v18 = vld [vmem:[%s12757_s2 + $0x78] sm:$0xff] }
 0x1de   : > { %2626 = vmatmul.bf16.gmra.mxu0 %v2492_v21  ;;  %v2415_v21 = vrot.slane %v2413_v36, 4  ;;  %v3989_v10 = vunpack.c.l.b16 %v3831_v52  ;;  %v2429_v61 = vshll.u32 %v8345_v27, 16  ;;  %v3845_v22 = vor.u32 %v3844_v35, %v3840_v63  ;;  %5553 = vmatpush.bf16.msra.mxu1 %v9533_v18 }
 0x1df   : > { %v2493_v40 = vpack.c.b16 %v2477_v13, %v2476_v7  ;;  %v3848_v33 = vshll.u32 %v8659_v17, 16  ;;  %v3866_v52 = vshrl.u32 %v8661_v53, 16 }
 0x1e0   : > { %3478 = vmatmul.bf16.gmra.mxu2 %v9485_v32  ;;  %v3855_v32 = vrot.slane %v3853_v44, 4  ;;  %v2416_v12 = vor.u32 %v2415_v21, %v2411_v42  ;;  %v4010_v30 = vpack.c.b16 %v3990_v43, %v3989_v10  ;;  %v2431_v23 = vrot.slane %v2429_v61, 5 }
 0x1e1   : > { %4127 = vmatmul.bf16.gmra.mxu3 %v4009_v39  ;;  %v2425_v39 = vrot.slane %v2423_v56, 4  ;;  %v3846_v24 = vrot.slane %v3845_v22, 4  ;;  %v3868_v43 = vrot.slane %v3866_v52, 4 }
 0x1e2   : > { %v3859_v36 = vor.u32 %v3858_v60, %v3855_v32  ;;  %v2417_v42 = vrot.slane %v2416_v12, 4  ;;  %v8721_v32 = vld [vmem:[%s9915_s26 + $0x24] sm:$0xf] }
 0x1e3   : > { %v2589_v26 = vpop.f32.mrf.mxu0  ;;  %v2426_v50 = vor.u32 %v2425_v39, %v2421_v29  ;;  %v12779_v39 = vld [vmem:[#allocation4_spill] sm:$0xff] }
 0x1e4   : > { %v4088_v6 = vpop.f32.mrf.mxu3  ;;  %v11062_v51 = vadd.f32 %v2589_v26, %v10554_v20  ;;  %v9525_v20 = vld [vmem:[%s12757_s2 + $0x38] sm:$0xff]  ;;  %v3860_v56 = vrot.slane %v3859_v36, 4  ;;  %v2422_v31 = vsel %vm9969_vm4, %v2417_v42, %v2421_v29 }
 0x1e5   : > { %v11057_v58 = vadd.f32 %v4088_v6, %v10855_v37  ;;  %v2958_v37 = vunpack.c.l.b16 %v2911_v4  ;;  %5698 = vmatpush.bf16.msra.mxu2 %v9525_v20  ;;  %v2427_v63 = vrot.slane %v2426_v50, 4  ;;  %v8662_v26 = vld [vmem:[%s9915_s26 + $0x98] sm:$0xf]  ;;  %v2478_v35 = vunpack.c.l.b16 %v2422_v31 }
 0x1e6   : > { %v3872_v13 = vshll.u32 %v8662_v26, 16  ;;  %v3876_v21 = vshrl.u32 %v8662_v26, 16 }
 0x1e7   : > { %v2973_v46 = vpack.c.b16 %v2958_v37, %v2957_v1  ;;  %v3864_v1 = vrot.slane %v3862_v34, 5  ;;  %v2432_v4 = vsel %vm9969_vm4, %v2427_v63, %v2431_v23  ;;  %v8722_v34 = vld [vmem:[%s9915_s26 + $0x28] sm:$0xf] }
 0x1e8   : > { %v3874_v27 = vrot.slane %v3872_v13, 5  ;;  %v3878_v17 = vrot.slane %v3876_v21, 4 }
 0x1e9   : > { %3115 = vmatmul.bf16.gmra.mxu1 %v2973_v46  ;;  %v3865_v7 = vsel %vm9969_vm4, %v3860_v56, %v3864_v1  ;;  %v2479_v46 = vunpack.c.l.b16 %v2432_v4  ;;  %v3869_v12 = vor.u32 %v3868_v43, %v3864_v1  ;;  %v8665_v56 = vld [vmem:[%s9915_s26 + $0xa4] sm:$0xf] }
 0x1ea   : > { %v3992_v10 = vunpack.c.l.b16 %v3865_v7  ;;  %v3879_v61 = vor.u32 %v3878_v17, %v3874_v27  ;;  %v12781_v7 = vld [vmem:[#allocation6_spill] sm:$0xff] }
 0x1eb   : > { %v2592_v0 = vpop.f32.mrf.mxu0  ;;  %v2494_v53 = vpack.c.b16 %v2479_v46, %v2478_v35  ;;  %v3870_v18 = vrot.slane %v3869_v12, 4  ;;  %v3900_v35 = vshrl.u32 %v8665_v56, 16 }
 0x1ec   : > { %v4090_v28 = vpop.f32.mrf.mxu3  ;;  %v11081_v6 = vadd.f32 %v2592_v0, %v10580_v5  ;;  %v4335_v0 = vrot.slane %v8721_v32, 5  ;;  %v3880_v63 = vrot.slane %v3879_v61, 4 }
 0x1ed   : > { %v11075_v55 = vadd.f32 %v4090_v28, %v10877_v47  ;;  %v3850_v47 = vrot.slane %v3848_v33, 5  ;;  %v8720_v33 = vld [vmem:[%s9915_s26 + $0x20] sm:$0xe]  ;;  %v3875_v26 = vsel %vm9969_vm4, %v3870_v18, %v3874_v27  ;;  %v3902_v32 = vrot.slane %v3900_v35, 4 }
 0x1ee   : > { %2631 = vmatmul.bf16.gmra.mxu0 %v2493_v40  ;;  %v8760_v42 = vrot.slane %v8720_v33, 9  ;;  %v8723_v33 = vld [vmem:[%s9915_s26 + $0x2c] sm:$0x1] }
 0x1ef   : > { %v3851_v5 = vsel %vm9969_vm4, %v3846_v24, %v3850_v47  ;;  %v4337_v24 = vrot.slane %v4335_v0, 4  ;;  %v8664_v47 = vld [vmem:[%s9915_s26 + $0xa0] sm:$0xf] }
 0x1f0   : > { %v3991_v20 = vunpack.c.l.b16 %v3851_v5  ;;  %v3890_v21 = vshll.u32 %v8664_v47, 16 }
 0x1f1   : > { %4132 = vmatmul.bf16.gmra.mxu3 %v4010_v30  ;;  %v12780_v30 = vld [vmem:[#allocation5_spill] sm:$0xff] }
 0x1f2   : > { %v4011_v40 = vpack.c.b16 %v3992_v10, %v3991_v20  ;;  %v3993_v10 = vunpack.c.l.b16 %v3875_v26  ;;  %v3892_v17 = vrot.slane %v3890_v21, 5 }
 0x1f3   : > { %v2594_v37 = vpop.f32.mrf.mxu0 }
 0x1f4   : > { %v4093_v44 = vpop.f32.mrf.mxu3  ;;  %v11096_v29 = vadd.f32 %v2594_v37, %v12779_v39  ;;  %v3887_v37 = vshrl.u32 %v8664_v47, 16  ;;  %v3896_v39 = vshll.u32 %v8665_v56, 16  ;;  %v4341_v47 = vrot.slane %v8723_v33, 5 }
 0x1f5   : > { %v11091_v19 = vadd.f32 %v4093_v44, %v10895_v41  ;;  %v8663_v41 = vld [vmem:[%s9915_s26 + $0x9c] sm:$0x1]  ;;  %v4336_v44 = vsel %vm9983_vm5, %v8760_v42, %v4335_v0  ;;  %v12782_v0 = vld [vmem:[#allocation7_spill] sm:$0xff] }
 0x1f6   : > { %v3882_v22 = vshll.u32 %v8663_v41, 16  ;;  %v4450_v46 = vunpack.c.l.b16 %v4336_v44  ;;  %v3889_v27 = vrot.slane %v3887_v37, 4  ;;  %v3898_v41 = vrot.slane %v3896_v39, 5  ;;  %v12783_v39 = vld [vmem:[#allocation8_spill] sm:$0xff] }
 0x1f8   : > { %v3884_v23 = vrot.slane %v3882_v22, 5  ;;  %v3903_v18 = vor.u32 %v3902_v32, %v3898_v41 }
 0x1fa   : > { %v3885_v5 = vsel %vm9969_vm4, %v3880_v63, %v3884_v23  ;;  %v8724_v63 = vld [vmem:[%s9915_s26 + $0x30] sm:$0xe]  ;;  %v8725_v23 = vld [vmem:[%s9915_s26 + $0x34] sm:$0xf]  ;;  %v3904_v44 = vrot.slane %v3903_v18, 4 }
 0x1fb   : > { %v2597_v50 = vpop.f32.mrf.mxu0  ;;  %v3994_v43 = vunpack.c.l.b16 %v3885_v5  ;;  %v8761_v56 = vrot.slane %v8724_v63, 9  ;;  %v12785_v63 = vld [vmem:[#allocation9_spill] sm:$0xff] }
 0x1fc   : > { %v4095_v60 = vpop.f32.mrf.mxu3  ;;  %v11105_v36 = vadd.f32 %v2597_v50, %v12780_v30 }
 0x1fd   : > { %v11101_v28 = vadd.f32 %v4095_v60, %v10923_v8  ;;  %v4338_v8 = vrot.slane %v8722_v34, 5  ;;  %v9532_v60 = vld [vmem:[%s12757_s2 + $0x70] sm:$0xff]  ;;  %v4012_v22 = vpack.c.b16 %v3994_v43, %v3993_v10  ;;  %v3893_v34 = vor.u32 %v3892_v17, %v3889_v27 }
 0x1fe   : > { %2636 = vmatmul.bf16.gmra.mxu0 %v2494_v53  ;;  %v8666_v53 = vld [vmem:[%s9915_s26 + $0xa8] sm:$0xf]  ;;  %5554 = vmatpush.bf16.msra.mxu1 %v9532_v60 }
 0x1ff   : > { %v4339_v52 = vsel %vm9983_vm5, %v4337_v24, %v4338_v8  ;;  %v3906_v42 = vshll.u32 %v8666_v53, 16  ;;  %v4340_v24 = vrot.slane %v4338_v8, 4  ;;  %v3894_v26 = vrot.slane %v3893_v34, 4 }
 0x200   : > { %v4451_v20 = vunpack.c.l.b16 %v4339_v52  ;;  %v3910_v5 = vshrl.u32 %v8666_v53, 16  ;;  %v8667_v53 = vld [vmem:[%s9915_s26 + $0xac] sm:$0x1] }
 0x201   : > { %4137 = vmatmul.bf16.gmra.mxu3 %v4011_v40  ;;  %v4342_v52 = vsel %vm9983_vm5, %v4340_v24, %v4341_v47  ;;  %v3916_v33 = vshll.u32 %v8667_v53, 16  ;;  %v8727_v24 = vld [vmem:[%s9915_s26 + $0x3c] sm:$0x1] }
 0x202   : > { %v4480_v12 = vpack.c.b16 %v4451_v20, %v4450_v46  ;;  %v4452_v20 = vunpack.c.l.b16 %v4342_v52  ;;  %v3912_v43 = vrot.slane %v3910_v5, 4  ;;  %v8670_v52 = vld [vmem:[%s9915_s26 + $0xb8] sm:$0xf] }
 0x203   : > { %v2599_v4 = vpop.f32.mrf.mxu0 }
 0x204   : > { %v4098_v1 = vpop.f32.mrf.mxu3  ;;  %v11122_v13 = vadd.f32 %v2599_v4, %v12781_v7  ;;  %v3908_v4 = vrot.slane %v3906_v42, 5 }
 0x205   : > { %v11115_v31 = vadd.f32 %v4098_v1, %v10945_v11  ;;  %v9524_v11 = vld [vmem:[%s12757_s2 + $0x30] sm:$0xff]  ;;  %v4345_v1 = vrot.slane %v8725_v23, 5 }
 0x206   : > { %5699 = vmatpush.bf16.msra.mxu2 %v9524_v11  ;;  %v3899_v11 = vsel %vm9969_vm4, %v3894_v26, %v3898_v41  ;;  %v3909_v46 = vsel %vm9969_vm4, %v3904_v44, %v3908_v4 }
 0x207   : > { %v4346_v8 = vsel %vm9983_vm5, %v8761_v56, %v4345_v1  ;;  %v3995_v32 = vunpack.c.l.b16 %v3899_v11  ;;  %v3996_v60 = vunpack.c.l.b16 %v3909_v46  ;;  %v3918_v56 = vrot.slane %v3916_v33, 5 }
 0x208   : > { %v4453_v10 = vunpack.c.l.b16 %v4346_v8  ;;  %v4347_v44 = vrot.slane %v4345_v1, 4  ;;  %v9523_v1 = vld [vmem:[%s12757_s2 + $0x28] sm:$0xff] }
 0x209   : > { %v4013_v34 = vpack.c.b16 %v3996_v60, %v3995_v32 }
 0x20a   : > { %5700 = vmatpush.bf16.msra.mxu2 %v9523_v1 }
 0x20b   : > { %v2602_v61 = vpop.f32.mrf.mxu0 }
 0x20c   : > { %v4100_v40 = vpop.f32.mrf.mxu3  ;;  %v11136_v30 = vadd.f32 %v2602_v61, %v12782_v0  ;;  %v4481_v61 = vpack.c.b16 %v4453_v10, %v4452_v20  ;;  %v3940_v20 = vshll.u32 %v8670_v52, 16  ;;  %v3944_v10 = vshrl.u32 %v8670_v52, 16 }
 0x20d   : > { %v11132_v50 = vadd.f32 %v4100_v40, %v10976_v38  ;;  %v8668_v38 = vld [vmem:[%s9915_s26 + $0xb0] sm:$0xf]  ;;  %v8669_v40 = vld [vmem:[%s9915_s26 + $0xb4] sm:$0xf] }
 0x20e   : > { %4566 = vmatmul.bf16.vlgmr.msra.gmra.mxu0 %v4480_v12  ;;  %v3921_v37 = vshrl.u32 %v8668_v38, 16  ;;  %v3924_v7 = vshll.u32 %v8668_v38, 16  ;;  %v8726_v12 = vld [vmem:[%s9915_s26 + $0x38] sm:$0xf]  ;;  %v3930_v18 = vshll.u32 %v8669_v40, 16  ;;  %v3934_v46 = vshrl.u32 %v8669_v40, 16 }
 0x20f   : > { %v4348_v42 = vrot.slane %v8726_v12, 5  ;;  %v3942_v12 = vrot.slane %v3940_v20, 5 }
 0x210   : > { %v3923_v27 = vrot.slane %v3921_v37, 4  ;;  %v3926_v17 = vrot.slane %v3924_v7, 5  ;;  %v3932_v26 = vrot.slane %v3930_v18, 5  ;;  %v3936_v53 = vrot.slane %v3934_v46, 4 }
 0x211   : > { %4142 = vmatmul.bf16.gmra.mxu3 %v4012_v22  ;;  %v3913_v22 = vor.u32 %v3912_v43, %v3908_v4  ;;  %v4350_v5 = vrot.slane %v4348_v42, 4  ;;  %v4351_v4 = vrot.slane %v8727_v24, 5  ;;  %v4349_v8 = vsel %vm9983_vm5, %v4347_v44, %v4348_v42 }
 0x212   : > { %v3927_v0 = vor.u32 %v3926_v17, %v3923_v27  ;;  %v4454_v43 = vunpack.c.l.b16 %v4349_v8  ;;  %v9531_v17 = vld [vmem:[%s12757_s2 + $0x68] sm:$0xff]  ;;  %v3937_v42 = vor.u32 %v3936_v53, %v3932_v26  ;;  %v12790_v8 = vld [vmem:[#allocation11_spill] sm:$0xff]  ;;  %v12792_v53 = vld [vmem:[#allocation12_spill] sm:$0xff] }
 0x213   : > { %v2604_v21 = vpop.f32.mrf.mxu0  ;;  %v3914_v47 = vrot.slane %v3913_v22, 4  ;;  %v8729_v22 = vld [vmem:[%s9915_s26 + $0x44] sm:$0xf]  ;;  %5555 = vmatpush.bf16.msra.mxu1 %v9531_v17 }
 0x214   : > { %v11146_v35 = vadd.f32 %v2604_v21, %v12783_v39  ;;  %v3928_v38 = vrot.slane %v3927_v0, 4  ;;  %v4352_v39 = vsel %vm9983_vm5, %v4350_v5, %v4351_v4  ;;  %v3938_v4 = vrot.slane %v3937_v42, 4 }
 0x215   : > { %v3919_v7 = vsel %vm9969_vm4, %v3914_v47, %v3918_v56  ;;  %v4455_v27 = vunpack.c.l.b16 %v4352_v39  ;;  %v8728_v47 = vld [vmem:[%s9915_s26 + $0x40] sm:$0xe]  ;;  %v8730_v56 = vld [vmem:[%s9915_s26 + $0x48] sm:$0xf] }
 0x216   : > { %12784 = vst [vmem:[#allocation4_spill] sm:$0xff] %v11146_v35  ;;  %v3933_v21 = vsel %vm9969_vm4, %v3928_v38, %v3932_v26  ;;  %v3997_v32 = vunpack.c.l.b16 %v3919_v7  ;;  %v8762_v38 = vrot.slane %v8728_v47, 9  ;;  %v4358_v5 = vrot.slane %v8730_v56, 5  ;;  %v12794_v47 = vld [vmem:[#allocation13_spill] sm:$0xff] }
 0x217   : > { %v3998_v60 = vunpack.c.l.b16 %v3933_v21  ;;  %v4482_v40 = vpack.c.b16 %v4455_v27, %v4454_v43  ;;  %v3943_v1 = vsel %vm9969_vm4, %v3938_v4, %v3942_v12  ;;  %v8734_v4 = vld [vmem:[%s9915_s26 + $0x58] sm:$0xf] }
 0x218   : > { %v3999_v43 = vunpack.c.l.b16 %v3943_v1 }
 0x219   : > { %v4014_v0 = vpack.c.b16 %v3998_v60, %v3997_v32 }
 0x21b   : > { %v2607_v41 = vpop.f32.mrf.mxu0 }
 0x21c   : > { %v11156_v23 = vadd.f32 %v2607_v41, %v12785_v63  ;;  %v4355_v41 = vrot.slane %v8729_v22, 5  ;;  %v8731_v22 = vld [vmem:[%s9915_s26 + $0x4c] sm:$0x1] }
 0x21e   : > { %12786 = vst [vmem:[#allocation5_spill] sm:$0xff] %v11156_v23  ;;  %4571 = vmatmul.bf16.gmra.mxu0 %v4481_v61  ;;  %v3946_v61 = vrot.slane %v3944_v10, 4  ;;  %v4357_v44 = vrot.slane %v4355_v41, 4  ;;  %v4356_v21 = vsel %vm9983_vm5, %v8762_v38, %v4355_v41  ;;  %v9530_v38 = vld [vmem:[%s12757_s2 + $0x60] sm:$0xff] }
 0x21f   : > { %v4456_v20 = vunpack.c.l.b16 %v4356_v21  ;;  %5556 = vmatpush.bf16.msra.mxu1 %v9530_v38 }
 0x220   : > { %v3947_v63 = vor.u32 %v3946_v61, %v3942_v12  ;;  %v4359_v26 = vsel %vm9983_vm5, %v4357_v44, %v4358_v5  ;;  %v4360_v12 = vrot.slane %v4358_v5, 4 }
 0x221   : > { %4147 = vmatmul.bf16.gmra.mxu3 %v4013_v34  ;;  %v12788_v34 = vld [vmem:[#allocation10_spill] sm:$0xff]  ;;  %v4457_v10 = vunpack.c.l.b16 %v4359_v26  ;;  %v8735_v26 = vld [vmem:[%s9915_s26 + $0x5c] sm:$0x1] }
 0x222   : > { %v3948_v52 = vrot.slane %v3947_v63, 4 }
 0x223   : > { %v2609_v37 = vpop.f32.mrf.mxu0  ;;  %v4483_v17 = vpack.c.b16 %v4457_v10, %v4456_v20 }
 0x224   : > { %v11172_v11 = vadd.f32 %v2609_v37, %v10751_v3  ;;  %v8671_v3 = vld [vmem:[%s9915_s26 + $0xbc] sm:$0x1] }
 0x225   : > { %v3950_v24 = vshll.u32 %v8671_v3, 16  ;;  %v8732_v3 = vld [vmem:[%s9915_s26 + $0x50] sm:$0xe] }
 0x226   : > { %12787 = vst [vmem:[#allocation6_spill] sm:$0xff] %v11172_v11 }
 0x227   : > { %v3952_v37 = vrot.slane %v3950_v24, 5 }
 0x229   : > { %v3953_v46 = vsel %vm9969_vm4, %v3948_v52, %v3952_v37 }
 0x22a   : > { %v4000_v27 = vunpack.c.l.b16 %v3953_v46  ;;  %v4371_v46 = vrot.slane %v8735_v26, 5 }
 0x22b   : > { %v2612_v33 = vpop.f32.mrf.mxu0 }
 0x22c   : > { %v11180_v18 = vadd.f32 %v2612_v33, %v12788_v34  ;;  %v4015_v60 = vpack.c.b16 %v4000_v27, %v3999_v43  ;;  %v4361_v33 = vrot.slane %v8731_v22, 5  ;;  %v9522_v34 = vld [vmem:[%s12757_s2 + $0x20] sm:$0xff]  ;;  %v9541_v27 = vld [vmem:[%s12757_s2 + $0xb8] sm:$0xff]  ;;  %v11232_v22 = vpop.f32.mrf.mxu1 }
 0x22d   : > { %5701 = vmatpush.bf16.msra.mxu2 %v9522_v34  ;;  %5924 = vmatpush.bf16.msra.mxu3 %v9541_v27  ;;  %v11239_v34 = vpop.f32.mrf.mxu3  ;;  %v8741_v27 = vld [vmem:[%s9915_s26 + $0x74] sm:$0xf] }
 0x22e   : > { %12789 = vst [vmem:[#allocation7_spill] sm:$0xff] %v11180_v18  ;;  %4576 = vmatmul.bf16.gmra.mxu0 %v4482_v40  ;;  %v8733_v40 = vld [vmem:[%s9915_s26 + $0x54] sm:$0xf]  ;;  %v4362_v63 = vsel %vm9983_vm5, %v4360_v12, %v4361_v33  ;;  %v8751_v18 = vld [vmem:[%s9915_s26 + $0x9c] sm:$0x1] }
 0x22f   : > { %v4365_v41 = vrot.slane %v8733_v40, 5  ;;  %v4458_v44 = vunpack.c.l.b16 %v4362_v63 }
 0x231   : > { %4152 = vmatmul.bf16.gmra.mxu3 %v4014_v0  ;;  %v8763_v0 = vrot.slane %v8732_v3, 9 }
 0x233   : > { %v2614_v7 = vpop.f32.mrf.mxu0  ;;  %v4366_v24 = vsel %vm9983_vm5, %v8763_v0, %v4365_v41  ;;  %v8736_v0 = vld [vmem:[%s9915_s26 + $0x60] sm:$0xe] }
 0x234   : > { %v11189_v39 = vadd.f32 %v2614_v7, %v12790_v8  ;;  %v4459_v5 = vunpack.c.l.b16 %v4366_v24  ;;  %v4368_v7 = vrot.slane %v8734_v4, 5  ;;  %v4367_v8 = vrot.slane %v4365_v41, 4  ;;  %v8738_v41 = vld [vmem:[%s9915_s26 + $0x68] sm:$0xf]  ;;  %v11246_v38 = vpop.f32.mrf.mxu1  ;;  %v9529_v4 = vld [vmem:[%s12757_s2 + $0x58] sm:$0xff] }
 0x235   : > { %v4378_v24 = vrot.slane %v8738_v41, 5  ;;  %5557 = vmatpush.bf16.msra.mxu1 %v9529_v4  ;;  %v11258_v26 = vpop.f32.mrf.mxu3 }
 0x236   : > { %12791 = vst [vmem:[#allocation8_spill] sm:$0xff] %v11189_v39  ;;  %v4484_v52 = vpack.c.b16 %v4459_v5, %v4458_v44  ;;  %v4370_v1 = vrot.slane %v4368_v7, 4  ;;  %v4369_v10 = vsel %vm9983_vm5, %v4367_v8, %v4368_v7 }
 0x238   : > { %v4372_v43 = vsel %vm9983_vm5, %v4370_v1, %v4371_v46 }
 0x23b   : > { %v2617_v32 = vpop.f32.mrf.mxu0 }
 0x23c   : > { %v11196_v61 = vadd.f32 %v2617_v32, %v12792_v53  ;;  %v4461_v32 = vunpack.c.l.b16 %v4372_v43  ;;  %v8737_v53 = vld [vmem:[%s9915_s26 + $0x64] sm:$0xf]  ;;  %v8740_v43 = vld [vmem:[%s9915_s26 + $0x70] sm:$0xe] }
 0x23d   : > { %v4375_v12 = vrot.slane %v8737_v53, 5  ;;  %v8765_v53 = vrot.slane %v8740_v43, 9 }
 0x23e   : > { %12793 = vst [vmem:[#allocation9_spill] sm:$0xff] %v11196_v61  ;;  %4581 = vmatmul.bf16.gmra.mxu0 %v4483_v17  ;;  %v4460_v17 = vunpack.c.l.b16 %v4369_v10  ;;  %v8739_v10 = vld [vmem:[%s9915_s26 + $0x6c] sm:$0x1] }
 0x23f   : > { %v4377_v63 = vrot.slane %v4375_v12, 4 }
 0x240   : > { %v4485_v3 = vpack.c.b16 %v4461_v32, %v4460_v17  ;;  %v11268_v17 = vpop.f32.mrf.mxu1  ;;  %v4381_v32 = vrot.slane %v8739_v10, 5 }
 0x241   : > { %4157 = vmatmul.bf16.gmra.mxu3 %v4015_v60  ;;  %v11229_v60 = vpop.f32.mrf.mxu2  ;;  %v4379_v5 = vsel %vm9983_vm5, %v4377_v63, %v4378_v24 }
 0x242   : > { %v4463_v7 = vunpack.c.l.b16 %v4379_v5 }
 0x243   : > { %v2619_v42 = vpop.f32.mrf.mxu0 }
 0x244   : > { %v11209_v56 = vadd.f32 %v2619_v42, %v12794_v47  ;;  %v8764_v42 = vrot.slane %v8736_v0, 9 }
 0x246   : > { %12795 = vst [vmem:[#allocation10_spill] sm:$0xff] %v11209_v56  ;;  %v4376_v44 = vsel %vm9983_vm5, %v8764_v42, %v4375_v12 }
 0x249   : > { %v11244_v47 = vpop.f32.mrf.mxu2 }
 0x24b   : > { %v2622_v37 = vpop.f32.mrf.mxu0 }
 0x24c   : > { %v11216_v21 = vadd.f32 %v2622_v37, %v10865_v15  ;;  %v4462_v37 = vunpack.c.l.b16 %v4376_v44  ;;  %v8742_v44 = vld [vmem:[%s9915_s26 + $0x78] sm:$0xf] }
 0x24e   : > { %12796 = vst [vmem:[#allocation11_spill] sm:$0xff] %v11216_v21  ;;  %4586 = vmatmul.bf16.gmra.mxu0 %v4484_v52  ;;  %v4486_v8 = vpack.c.b16 %v4463_v7, %v4462_v37  ;;  %v4388_v7 = vrot.slane %v8742_v44, 5  ;;  %v9528_v44 = vld [vmem:[%s12757_s2 + $0x50] sm:$0xff] }
 0x24f   : > { %5558 = vmatpush.bf16.msra.mxu1 %v9528_v44 }
 0x250   : > { %v4390_v43 = vrot.slane %v4388_v7, 4 }
 0x251   : > { %v11260_v1 = vpop.f32.mrf.mxu2 }
 0x253   : > { %v2624_v20 = vpop.f32.mrf.mxu0 }
 0x254   : > { %v11227_v15 = vadd.f32 %v2624_v20, %v10884_v14  ;;  %v9521_v14 = vld [vmem:[%s12757_s2 + $0x18] sm:$0xff] }
 0x255   : > { %5702 = vmatpush.bf16.msra.mxu2 %v9521_v14  ;;  %v9540_v14 = vld [vmem:[%s12757_s2 + $0xb0] sm:$0xff] }
 0x256   : > { %12797 = vst [vmem:[#allocation12_spill] sm:$0xff] %v11227_v15  ;;  %5925 = vmatpush.bf16.msra.mxu3 %v9540_v14  ;;  %v11375_v15 = vld [vmem:[%s9915_s26 + $0x94] sm:$0xf] }
 0x259   : > { %v11282_v42 = vpop.f32.mrf.mxu2 }
 0x25b   : > { %v2627_v40 = vpop.f32.mrf.mxu0 }
 0x25c   : > { %v11235_v33 = vadd.f32 %v2627_v40, %v10902_v45  ;;  %v11270_v40 = vpop.f32.mrf.mxu3 }
 0x25e   : > { %12798 = vst [vmem:[#allocation13_spill] sm:$0xff] %v11235_v33  ;;  %4591 = vmatmul.bf16.gmra.mxu0 %v4485_v3  ;;  %v4385_v3 = vrot.slane %v8741_v27, 5 }
 0x260   : > { %v4387_v10 = vrot.slane %v4385_v3, 4 }
 0x263   : > { %v2629_v45 = vpop.f32.mrf.mxu0 }
 0x264   : > { %v11256_v52 = vadd.f32 %v2629_v45, %v10928_v48  ;;  %v4380_v48 = vrot.slane %v4378_v24, 4  ;;  %v11284_v45 = vpop.f32.mrf.mxu1  ;;  %v11287_v4 = vpop.f32.mrf.mxu3 }
 0x266   : > { %12799 = vst [vmem:[#allocation14_spill] sm:$0xff] %v11256_v52  ;;  %v4382_v0 = vsel %vm9983_vm5, %v4380_v48, %v4381_v32 }
 0x267   : > { %v4464_v63 = vunpack.c.l.b16 %v4382_v0 }
 0x26b   : > { %v2632_v46 = vpop.f32.mrf.mxu0 }
 0x26c   : > { %v11263_v20 = vadd.f32 %v2632_v46, %v10962_v54  ;;  %v4386_v54 = vsel %vm9983_vm5, %v8765_v53, %v4385_v3  ;;  %v11293_v46 = vpop.f32.mrf.mxu2  ;;  %v11295_v48 = vpop.f32.mrf.mxu1  ;;  %v4389_v53 = vsel %vm9983_vm5, %v4387_v10, %v4388_v7  ;;  %v4856_v3 = vlaneseq }
 0x26d   : > { %v4465_v24 = vunpack.c.l.b16 %v4386_v54  ;;  %v11304_v0 = vpop.f32.mrf.mxu3  ;;  %v4466_v54 = vunpack.c.l.b16 %v4389_v53  ;;  %v8744_v53 = vld [vmem:[%s9915_s26 + $0x80] sm:$0xe] }
 0x26e   : > { %12800 = vst [vmem:[#allocation15_spill] sm:$0xff] %v11263_v20  ;;  %4596 = vmatmul.bf16.gmra.mxu0 %v4486_v8  ;;  %v8743_v8 = vld [vmem:[%s9915_s26 + $0x7c] sm:$0x1] }
 0x26f   : > { %v4487_v5 = vpack.c.b16 %v4465_v24, %v4464_v63  ;;  %v4391_v27 = vrot.slane %v8743_v8, 5  ;;  %v9520_v63 = vld [vmem:[%s12757_s2 + $0x10] sm:$0xff]  ;;  %v8745_v24 = vld [vmem:[%s9915_s26 + $0x84] sm:$0xf]  ;;  %v11318_v8 = vshrl.u32 %v4856_v3, 7 }
 0x270   : > { %5703 = vmatpush.bf16.msra.mxu2 %v9520_v63  ;;  %v4395_v10 = vrot.slane %v8745_v24, 5  ;;  %v8766_v63 = vrot.slane %v8744_v53, 9  ;;  %v9539_v53 = vld [vmem:[%s12757_s2 + $0xa8] sm:$0xff] }
 0x271   : > { %5926 = vmatpush.bf16.msra.mxu3 %v9539_v53  ;;  %v4859_v56 = vadd.s32 16, %v11318_v8  ;;  %v4860_v61 = vadd.s32 24, %v11318_v8 }
 0x272   : > { %v4397_v24 = vrot.slane %v4395_v10, 4 }
 0x273   : > { %v2634_v12 = vpop.f32.mrf.mxu0 }
 0x274   : > { %v11277_v41 = vadd.f32 %v2634_v12, %v10984_v2  ;;  %v4392_v12 = vsel %vm9983_vm5, %v4390_v43, %v4391_v27  ;;  %v9519_v43 = vld [vmem:[%s12757_s2 + $0x8] sm:$0xff] }
 0x275   : > { %v4467_v14 = vunpack.c.l.b16 %v4392_v12  ;;  %v8746_v12 = vld [vmem:[%s9915_s26 + $0x88] sm:$0xf]  ;;  %5704 = vmatpush.bf16.msra.mxu2 %v9519_v43  ;;  %v11334_v3 = vpop.f32.mrf.mxu3 }
 0x276   : > { %12801 = vst [vmem:[#allocation16_spill] sm:$0xff] %v11277_v41  ;;  %v4398_v44 = vrot.slane %v8746_v12, 5 }
 0x278   : > { %v4399_v41 = vsel %vm9983_vm5, %v4397_v24, %v4398_v44 }
 0x279   : > { %v4469_v24 = vunpack.c.l.b16 %v4399_v41 }
 0x27b   : > { %v2637_v37 = vpop.f32.mrf.mxu0 }
 0x27c   : > { %v11290_v2 = vadd.f32 %v2637_v37, %v11022_v9  ;;  %v11316_v37 = vpop.f32.mrf.mxu1 }
 0x27e   : > { %12802 = vst [vmem:[#allocation17_spill] sm:$0xff] %v11290_v2  ;;  %4601 = vmatmul.bf16.gmra.mxu0 %v4487_v5  ;;  %v11313_v5 = vpop.f32.mrf.mxu2 }
 0x283   : > { %v2639_v32 = vpop.f32.mrf.mxu0 }
 0x284   : > { %v11302_v9 = vadd.f32 %v2639_v32, %v11039_v16  ;;  %v4488_v16 = vpack.c.b16 %v4467_v14, %v4466_v54  ;;  %v11327_v32 = vld [vmem:[%s12758_s3] ss:$0 sm:$0xff]  ;;  %v4858_v54 = vadd.s32 8, %v11318_v8  ;;  %v11332_v14 = vstv %s8818_s11 }
 0x285   : > { %v4889_v43 = vadd.s32 %v11332_v14, %v11318_v8 }
 0x286   : > { %12803 = vst [vmem:[#allocation18_spill] sm:$0xff] %v11302_v9  ;;  %v11343_v9 = vld [vmem:[%s12758_s3 + $0x1] ss:$0 sm:$0xff]  ;;  %v11351_v12 = vpop.f32.mrf.mxu2 }
 0x287   : > { %vm4919_vm6 = vcmp.ge.s32.totalorder %v4889_v43, 24  ;;  %vm4949_vm7 = vcmp.lt.s32.totalorder %v4889_v43, 408  ;;  %v9537_v43 = vld [vmem:[%s12757_s2 + $0x98] sm:$0xff] }
 0x288   : > { %vm4979_vm10 = vmand %vm4919_vm6, %vm4949_vm7  ;;  %vm5192_vm7 = vsmask.f32 7938 }
 0x28b   : > { %v4567_v7 = vpop.f32.mrf.mxu0 }
 0x28c   : > { %v4672_v27 = vadd.f32 %v4567_v7, %v11057_v58  ;;  %v9518_v58 = vld [vmem:[%s12757_s2] sm:$0xff] }
 0x28d   : > { %5705 = vmatpush.bf16.msra.mxu2 %v9518_v58  ;;  %v9538_v58 = vld [vmem:[%s12757_s2 + $0xa0] sm:$0xff] }
 0x28e   : > { %4606 = vmatmul.bf16.gmra.mxu0 %v4488_v16  ;;  %v4764_v7 = vmul.f32 %v11327_v32, %v4672_v27  ;;  %v4890_v16 = vadd.s32 %v11332_v14, %v4858_v54  ;;  %v4396_v27 = vsel %vm9983_vm5, %v8766_v63, %v4395_v10  ;;  %v11359_v54 = vpop.f32.mrf.mxu1  ;;  %5927 = vmatpush.bf16.msra.mxu3 %v9538_v58 }
 0x28f   : > { %v4468_v63 = vunpack.c.l.b16 %v4396_v27 }
 0x290   : > { %v4796_v20 = vadd.f32 %v11343_v9, %v4764_v7  ;;  %vm4920_vm8 = vcmp.ge.s32.totalorder %v4890_v16, 24  ;;  %vm4950_vm9 = vcmp.lt.s32.totalorder %v4890_v16, 408  ;;  %v8747_v16 = vld [vmem:[%s9915_s26 + $0x8c] sm:$0x1] }
 0x291   : > { %vm4980_vm11 = vmand %vm4920_vm8, %vm4950_vm9  ;;  %v4489_v33 = vpack.c.b16 %v4469_v24, %v4468_v63  ;;  %v9536_v63 = vld [vmem:[%s12757_s2 + $0x90] sm:$0xff] }
 0x292   : > { %v4826_v7 = vmax.f32 %v4796_v20, 0.0  ;;  %5928 = vmatpush.bf16.msra.mxu3 %v9537_v43  ;;  %v8748_v20 = vld [vmem:[%s9915_s26 + $0x90] sm:$0xe]  ;;  %v4405_v43 = vrot.slane %v11375_v15, 5  ;;  %vm11447_vm8 = vmand %vm5159_vm12, %vm5192_vm7 }
 0x293   : > { %v4569_v2 = vpop.f32.mrf.mxu0 }
 0x294   : > { %v4673_v52 = vadd.f32 %v4569_v2, %v11075_v55  ;;  %v11366_v2 = vpop.f32.mrf.mxu3  ;;  %v5069_v41 = vsel %vm4979_vm10, %v4826_v7, 0.0  ;;  %v4400_v7 = vrot.slane %v4398_v44, 4 }
 0x296   : > { %v4765_v10 = vmul.f32 %v11327_v32, %v4673_v52  ;;  %v11384_v24 = vpop.f32.mrf.mxu1  ;;  %5929 = vmatpush.bf16.msra.mxu3 %v9536_v63 }
 0x298   : > { %v4797_v55 = vadd.f32 %v11343_v9, %v4765_v10  ;;  %v11377_v10 = vpop.f32.mrf.mxu2 }
 0x29a   : > { %v4827_v53 = vmax.f32 %v4797_v55, 0.0  ;;  %v8767_v55 = vrot.slane %v8748_v20, 9  ;;  %v9534_v20 = vld [vmem:[%s12757_s2 + $0x80] sm:$0xff] }
 0x29b   : > { %v4572_v52 = vpop.f32.mrf.mxu0 }
 0x29c   : > { %v5070_v27 = vsel %vm4980_vm11, %v4827_v53, 0.0  ;;  %v4674_v58 = vadd.f32 %v4572_v52, %v11091_v19  ;;  %v4401_v19 = vrot.slane %v8747_v16, 5  ;;  %v4891_v52 = vadd.s32 %v11332_v14, %v4859_v56  ;;  %v9527_v16 = vld [vmem:[%s12757_s2 + $0x48] sm:$0xff] }
 0x29d   : > { %v9609_v21 = vpack.c.bf16 %v5070_v27, %v5069_v41  ;;  %v4892_v41 = vadd.s32 %v11332_v14, %v4860_v61  ;;  %v11393_v27 = vpop.f32.mrf.mxu3  ;;  %v4406_v15 = vsel %vm9983_vm5, %v8767_v55, %v4405_v43  ;;  %5559 = vmatpush.bf16.msra.mxu1 %v9527_v16 }
 0x29e   : > { %4611 = vmatmul.bf16.gmra.mxu0 %v4489_v33  ;;  %v4766_v53 = vmul.f32 %v11327_v32, %v4674_v58  ;;  %v9535_v33 = vld [vmem:[%s12757_s2 + $0x88] sm:$0xff]  ;;  %12804 = vst [vmem:[#allocation19_spill] sm:$0xff] %v11393_v27  ;;  %v4402_v44 = vsel %vm9983_vm5, %v4400_v7, %v4401_v19  ;;  %vm4921_vm15 = vcmp.ge.s32.totalorder %v4891_v52, 24  ;;  %vm4951_vm0 = vcmp.lt.s32.totalorder %v4891_v52, 408 }
 0x29f   : > { %9610 = vst [vmem:[#allocation3] sm:$0xff] %v9609_v21   ;;  %5930 = vmatpush.bf16.msra.mxu3 %v9535_v33  ;;  %vm4922_vm1 = vcmp.ge.s32.totalorder %v4892_v41, 24  ;;  %vm4952_vm2 = vcmp.lt.s32.totalorder %v4892_v41, 408  ;;  %v4470_v19 = vunpack.c.l.b16 %v4402_v44  ;;  %v4471_v55 = vunpack.c.l.b16 %v4406_v15  ;;  %vm4981_vm3 = vmand %vm4921_vm15, %vm4951_vm0  ;;  %v11424_v15 = vpop.f32.mrf.mxu1 }
 0x2a0   : > { %v4798_v56 = vadd.f32 %v11343_v9, %v4766_v53  ;;  %v11413_v33 = vpop.f32.mrf.mxu2  ;;  %v8750_v53 = vld [vmem:[%s9915_s26 + $0x98] sm:$0xf]  ;;  %12808 = vst [vmem:[#allocation21_spill] sm:$0xff] %v11424_v15  ;;  %vm4982_vm6 = vmand %vm4922_vm1, %vm4952_vm2  ;;  %v4407_v41 = vrot.slane %v4405_v43, 4  ;;  %v11491_v15 = vld [vmem:[%s9915_s26 + $0xa8] sm:$0xf] }
 0x2a1   : > { %12807 = vst [vmem:[#allocation20_spill] sm:$0xff] %v11413_v33  ;;  %v4408_v39 = vrot.slane %v8750_v53, 5 }
 0x2a2   : > { %v4828_v16 = vmax.f32 %v4798_v56, 0.0  ;;  %v4861_v56 = vadd.s32 32, %v11318_v8 }
 0x2a3   : > { %v4574_v21 = vpop.f32.mrf.mxu0  ;;  %5931 = vmatpush.bf16.msra.mxu3 %v9534_v20  ;;  %v4410_v33 = vrot.slane %v4408_v39, 4 }
 0x2a4   : > { %v4675_v58 = vadd.f32 %v4574_v21, %v11101_v28  ;;  %v9526_v21 = vld [vmem:[%s12757_s2 + $0x40] sm:$0xff]  ;;  %v5071_v11 = vsel %vm4981_vm3, %v4828_v16, 0.0  ;;  %v4893_v16 = vadd.s32 %v11332_v14, %v4861_v56 }
 0x2a5   : > { %5560 = vmatpush.bf16.msra.mxu1 %v9526_v21  ;;  %v11430_v52 = vpop.f32.mrf.mxu3  ;;  %v4411_v21 = vrot.slane %v8751_v18, 5 }
 0x2a6   : > { %v5162_v63 = vld [vmem:[#allocation3] sm:$0x1]  ;;  %v4767_v7 = vmul.f32 %v11327_v32, %v4675_v58  ;;  %12809 = vst [vmem:[#allocation22_spill] sm:$0xff] %v11430_v52  ;;  %vm4923_vm9 = vcmp.ge.s32.totalorder %v4893_v16, 24  ;;  %vm4953_vm10 = vcmp.lt.s32.totalorder %v4893_v16, 408 }
 0x2a7   : > { %v5163_v28 = vsel %vm11403_vm14, 0, %v5162_v63  ;;  %v4490_v63 = vpack.c.b16 %v4471_v55, %v4470_v19  ;;  %v5747_v56 = vld [vmem:[#allocation3] sm:$0xe]  ;;  %vm11470_vm12 = vmand %vm4923_vm9, %vm4953_vm10 }
 0x2a8   : > { %5164 = vst [vmem:[#allocation3] sm:$0x1] %v5163_v28  ;;  %v4799_v44 = vadd.f32 %v11343_v9, %v4767_v7  ;;  %v4862_v7 = vadd.s32 40, %v11318_v8  ;;  %v8931_v16 = vrot.slane %v5747_v56, 9 }
 0x2aa   : > { %v4829_v58 = vmax.f32 %v4799_v44, 0.0  ;;  %v11437_v44 = vpop.f32.mrf.mxu2 }
 0x2ab   : > { %v4577_v20 = vpop.f32.mrf.mxu0  ;;  %12810 = vst [vmem:[#allocation23_spill] sm:$0xff] %v11437_v44 }
 0x2ac   : > { %v5072_v23 = vsel %vm4982_vm6, %v4829_v58, 0.0  ;;  %v4676_v28 = vadd.f32 %v4577_v20, %v11115_v31  ;;  %v3157_v31 = vadd.f32 %v11232_v22, %v10989_v62  ;;  %v11444_v58 = vpop.f32.mrf.mxu1 }
 0x2ad   : > { %v9614_v35 = vpack.c.bf16 %v5072_v23, %v5071_v11  ;;  %v4894_v23 = vadd.s32 %v11332_v14, %v4862_v7  ;;  %v4409_v11 = vsel %vm9983_vm5, %v4407_v41, %v4408_v39  ;;  %12811 = vst [vmem:[#allocation24_spill] sm:$0xff] %v11444_v58  ;;  %v11453_v39 = vld [vmem:[#allocation3 + $0x4] sm:$0xf]  ;;  %v11457_v44 = vpop.f32.mrf.mxu3 }
 0x2ae   : > { %4616 = vmatmul.bf16.gmra.mxu0 %v4490_v63  ;;  %v4768_v53 = vmul.f32 %v11327_v32, %v4676_v28  ;;  %v3520_v7 = vadd.f32 %v11229_v60, %v3157_v31  ;;  %12814 = vst [vmem:[#allocation25_spill] sm:$0xff] %v11457_v44  ;;  %v8753_v58 = vld [vmem:[%s9915_s26 + $0xa4] sm:$0xf]  ;;  %v3158_v60 = vadd.f32 %v11246_v38, %v11027_v57  ;;  %v8752_v44 = vld [vmem:[%s9915_s26 + $0xa0] sm:$0xe] }
 0x2af   : > { %9681 = vst [vmem:[#allocation3 + $0x8] sm:$0xff] %v9614_v35   ;;  %v9510_v19 = vld [vmem:[#allocation3] sm:$0xff]  ;;  %v4412_v35 = vsel %vm9983_vm5, %v4410_v33, %v4411_v21  ;;  %vm4924_vm11 = vcmp.ge.s32.totalorder %v4894_v23, 24  ;;  %vm4954_vm13 = vcmp.lt.s32.totalorder %v4894_v23, 408  ;;  %v4472_v33 = vunpack.c.l.b16 %v4409_v11 }
 0x2b0   : > { %v5224_v55 = vld [vmem:[#allocation3] sm:$0xf]  ;;  %5706 = vmatmul.bf16.vlgmr.msra.gmra.mxu2 %v9510_v19  ;;  %v4800_v22 = vadd.f32 %v11343_v9, %v4768_v53  ;;  %v4473_v28 = vunpack.c.l.b16 %v4412_v35  ;;  %v5274_v11 = vshll.u32 %v11453_v39, 16  ;;  %v5278_v35 = vshrl.u32 %v11453_v39, 16  ;;  %vm11479_vm15 = vmand %vm4924_vm11, %vm4954_vm13 }
 0x2b1   : > { %v5265_v18 = vshrl.u32 %v5224_v55, 16  ;;  %v5268_v43 = vshll.u32 %v5224_v55, 16  ;;  %v4415_v52 = vrot.slane %v8753_v58, 5  ;;  %v3521_v58 = vadd.f32 %v11244_v47, %v3158_v60 }
 0x2b2   : > { %v4830_v31 = vmax.f32 %v4800_v22, 0.0  ;;  %v4491_v38 = vpack.c.b16 %v4473_v28, %v4472_v33  ;;  %v5773_v22 = vrot.slane %v11453_v39, 5  ;;  %v5280_v27 = vrot.slane %v5278_v35, 4 }
 0x2b3   : > { %v4579_v63 = vpop.f32.mrf.mxu0  ;;  %v5267_v55 = vrot.slane %v5265_v18, 4  ;;  %v5270_v53 = vrot.slane %v5268_v43, 5  ;;  %v12762_v18 = vrot.slane %v11491_v15, 5 }
 0x2b4   : > { %v4677_v20 = vadd.f32 %v4579_v63, %v11132_v50  ;;  %v5073_v33 = vsel %vm11470_vm12, %v4830_v31, 0.0  ;;  %v4417_v31 = vrot.slane %v4415_v52, 4  ;;  %v5775_v57 = vrot.slane %v5773_v22, 4 }
 0x2b6   : > { %v5165_v41 = vld [vmem:[#allocation3 + $0xc] sm:$0x1]  ;;  %v5194_v21 = vld [vmem:[#allocation3 + $0x8] sm:$0x1]  ;;  %v4769_v19 = vmul.f32 %v11327_v32, %v4677_v20  ;;  %v4863_v20 = vadd.s32 48, %v11318_v8 }
 0x2b7   : > { %v5166_v50 = vsel %vm11403_vm14, 0, %v5165_v41  ;;  %v5195_v63 = vsel %vm11447_vm8, 0, %v5194_v21  ;;  %v4199_v41 = vadd.f32 %v11239_v34, %v3520_v7  ;;  %v3159_v34 = vadd.f32 %v11268_v17, %v11042_v25  ;;  %v11488_v7 = vpop.f32.mrf.mxu2 }
 0x2b8   : > { %5167 = vst [vmem:[#allocation3 + $0xc] sm:$0x1] %v5166_v50  ;;  %v4801_v43 = vadd.f32 %v11343_v9, %v4769_v19  ;;  %v4864_v50 = vadd.s32 56, %v11318_v8  ;;  %v5271_v19 = vor.u32 %v5270_v53, %v5267_v55  ;;  %v4895_v56 = vadd.s32 %v11332_v14, %v4863_v20  ;;  %v11499_v55 = vpop.f32.mrf.mxu1 }
 0x2b9   : > { %5196 = vst [vmem:[#allocation3 + $0x8] sm:$0x1] %v5195_v63  ;;  %v5276_v63 = vrot.slane %v5274_v11, 5  ;;  %v5774_v17 = vsel %vm9983_vm5, %v8931_v16, %v5773_v22  ;;  %v8768_v53 = vrot.slane %v8752_v44, 9  ;;  %v4200_v20 = vadd.f32 %v11258_v26, %v3521_v58  ;;  %v11513_v16 = vpop.f32.mrf.mxu3 }
 0x2ba   : > { %v4831_v21 = vmax.f32 %v4801_v43, 0.0  ;;  %v11504_v11 = vadd.s32 %v11332_v14, %v4864_v50  ;;  %v5272_v35 = vrot.slane %v5271_v19, 4  ;;  %v3522_v43 = vadd.f32 %v11260_v1, %v3159_v34 }
 0x2bb   : > { %v4582_v23 = vpop.f32.mrf.mxu0  ;;  %v5281_v47 = vor.u32 %v5280_v27, %v5276_v63  ;;  %vm4925_vm0 = vcmp.ge.s32.totalorder %v4895_v56, 24  ;;  %vm4955_vm1 = vcmp.lt.s32.totalorder %v4895_v56, 408  ;;  %v5844_v50 = vunpack.c.l.b16 %v5774_v17 }
 0x2bc   : > { %v5074_v39 = vsel %vm11479_vm15, %v4831_v21, 0.0  ;;  %v4678_v28 = vadd.f32 %v4582_v23, %v4199_v41  ;;  %v4416_v26 = vsel %vm9983_vm5, %v8768_v53, %v4415_v52  ;;  %vm4926_vm2 = vcmp.ge.s32.totalorder %v11504_v11, 24  ;;  %vm11542_vm6 = vmand %vm4925_vm0, %vm4955_vm1 }
 0x2bd   : > { %v9619_v25 = vpack.c.bf16 %v5074_v39, %v5073_v33  ;;  %v5277_v27 = vsel %vm9969_vm4, %v5272_v35, %v5276_v63  ;;  %v4419_v22 = vsel %vm9983_vm5, %v4417_v31, %v12762_v18  ;;  %v5282_v33 = vrot.slane %v5281_v47, 4 }
 0x2be   : > { %4621 = vmatmul.bf16.gmra.mxu0 %v4491_v38  ;;  %v4770_v41 = vmul.f32 %v11327_v32, %v4678_v28  ;;  %v9589_v38 = vld [vmem:[%s12757_s2 + $0x1b8] sm:$0xff]  ;;  %vm4956_vm3 = vcmp.lt.s32.totalorder %v11504_v11, 408  ;;  %v5473_v35 = vunpack.c.l.b16 %v5277_v27  ;;  %v4474_v31 = vunpack.c.l.b16 %v4416_v26  ;;  %v8755_v11 = vld [vmem:[%s9915_s26 + $0xac] sm:$0x1] }
 0x2bf   : > { %9682 = vst [vmem:[#allocation3 + $0x10] sm:$0xff] %v9619_v25   ;;  %v5226_v60 = vld [vmem:[#allocation3 + $0xc] sm:$0xf]  ;;  %6942 = vmatpush.bf16.msrb.mxu0 %v9589_v38  ;;  %v9588_v25 = vld [vmem:[%s12757_s2 + $0x1b0] sm:$0xff]  ;;  %v11531_v17 = vpop.f32.mrf.mxu2  ;;  %v4475_v47 = vunpack.c.l.b16 %v4419_v22  ;;  %v4201_v56 = vadd.f32 %v11270_v40, %v3522_v43  ;;  %vm11557_vm7 = vmand %vm4926_vm2, %vm4956_vm3  ;;  %v4421_v27 = vrot.slane %v8755_v11, 5 }
 0x2c0   : > { %v5256_v44 = vld [vmem:[#allocation3 + $0x8] sm:$0x1]  ;;  %v5289_v19 = vshrl.u32 %v5226_v60, 16  ;;  %v5292_v28 = vshll.u32 %v5226_v60, 16  ;;  %v4802_v52 = vadd.f32 %v11343_v9, %v4770_v41 }
 0x2c1   : > { %v5776_v21 = vrot.slane %v5256_v44, 5  ;;  %v5284_v1 = vshll.u32 %v5256_v44, 16 }
 0x2c2   : > { %v4832_v26 = vmax.f32 %v4802_v52, 0.0  ;;  %v4865_v52 = vadd.s32 64, %v11318_v8 }
 0x2c3   : > { %v4584_v34 = vpop.f32.mrf.mxu0  ;;  %v5777_v23 = vsel %vm9983_vm5, %v5775_v57, %v5776_v21  ;;  %v5286_v39 = vrot.slane %v5284_v1, 5  ;;  %v5291_v21 = vrot.slane %v5289_v19, 4  ;;  %6943 = vmatpush.bf16.msrb.mxu0 %v9588_v25  ;;  %v11536_v1 = vpop.f32.mrf.mxu1  ;;  %v9587_v19 = vld [vmem:[%s12757_s2 + $0x1a8] sm:$0xff] }
 0x2c4   : > { %v4679_v58 = vadd.f32 %v4584_v34, %v4200_v20  ;;  %v5845_v63 = vunpack.c.l.b16 %v5777_v23  ;;  %v5294_v23 = vrot.slane %v5292_v28, 5  ;;  %v5748_v25 = vld [vmem:[#allocation3 + $0xc] sm:$0xe] }
 0x2c5   : > { %v5287_v53 = vsel %vm9969_vm4, %v5282_v33, %v5286_v39  ;;  %v3160_v39 = vadd.f32 %v11284_v45, %v11062_v51  ;;  %v11562_v45 = vpop.f32.mrf.mxu3 }
 0x2c6   : > { %v5197_v44 = vld [vmem:[#allocation3 + $0x14] sm:$0x1]  ;;  %v4771_v60 = vmul.f32 %v11327_v32, %v4679_v58  ;;  %v5860_v41 = vpack.c.b16 %v5845_v63, %v5844_v50  ;;  %v5474_v20 = vunpack.c.l.b16 %v5287_v53  ;;  %v9511_v57 = vld [vmem:[#allocation3 + $0xc] sm:$0xff]  ;;  %v4492_v63 = vpack.c.b16 %v4475_v47, %v4474_v31 }
 0x2c7   : > { %v5227_v38 = vld [vmem:[#allocation3 + $0x10] sm:$0xf]  ;;  %v5198_v34 = vsel %vm11447_vm8, 0, %v5197_v44  ;;  %5711 = vmatmul.bf16.gmra.mxu2 %v9511_v57  ;;  %6944 = vmatpush.bf16.msrb.mxu0 %v9587_v19  ;;  %v11571_v57 = vld [vmem:[%s9915_s26 + $0xb4] sm:$0xf]  ;;  %v4897_v47 = vadd.s32 %v11332_v14, %v4865_v52 }
 0x2c8   : > { %v5298_v18 = vshll.u32 %v5227_v38, 16  ;;  %v5302_v33 = vshrl.u32 %v5227_v38, 16  ;;  %5199 = vst [vmem:[#allocation3 + $0x14] sm:$0x1] %v5198_v34  ;;  %v4803_v50 = vadd.f32 %v11343_v9, %v4771_v60  ;;  %5932 = vmatmul.bf16.vlgmr.msra.gmra.mxu3 %v5860_v41  ;;  %v5489_v22 = vpack.c.b16 %v5474_v20, %v5473_v35  ;;  %v8756_v44 = vld [vmem:[%s9915_s26 + $0xb0] sm:$0xe] }
 0x2c9   : > { %v5780_v43 = vrot.slane %v5227_v38, 5  ;;  %v5295_v35 = vor.u32 %v5294_v23, %v5291_v21  ;;  %v5075_v60 = vsel %vm11542_vm6, %v4832_v26, 0.0  ;;  %v4866_v38 = vadd.s32 72, %v11318_v8 }
 0x2ca   : > { %v4833_v58 = vmax.f32 %v4803_v50, 0.0  ;;  %5561 = vmatmul.bf16.vlgmr.msra.gmra.mxu1 %v5489_v22  ;;  %v5300_v53 = vrot.slane %v5298_v18, 5  ;;  %v5304_v51 = vrot.slane %v5302_v33, 4  ;;  %v9586_v18 = vld [vmem:[%s12757_s2 + $0x1a0] sm:$0xff]  ;;  %v8932_v21 = vrot.slane %v5748_v25, 9  ;;  %v11581_v50 = vpop.f32.mrf.mxu2 }
 0x2cb   : > { %v4587_v40 = vpop.f32.mrf.mxu0  ;;  %v3523_v34 = vadd.f32 %v11282_v42, %v3160_v39  ;;  %v12823_v33 = vrot.slane %v11491_v15, 5  ;;  %v8769_v28 = vrot.slane %v8756_v44, 9  ;;  %v4425_v52 = vrot.slane %v11571_v57, 5  ;;  %6945 = vmatpush.bf16.msrb.mxu0 %v9586_v18  ;;  %v9585_v15 = vld [vmem:[%s12757_s2 + $0x198] sm:$0xff] }
 0x2cc   : > { %v5076_v41 = vsel %vm11557_vm7, %v4833_v58, 0.0  ;;  %v4680_v20 = vadd.f32 %v4587_v40, %v4201_v56  ;;  %v5305_v23 = vor.u32 %v5304_v51, %v5300_v53  ;;  %v5781_v19 = vsel %vm9983_vm5, %v8932_v21, %v5780_v43  ;;  %v11593_v40 = vpop.f32.mrf.mxu1 }
 0x2cd   : > { %v9624_v31 = vpack.c.bf16 %v5076_v41, %v5075_v60  ;;  %v4420_v26 = vrot.slane %v12823_v33, 4  ;;  %v5296_v56 = vrot.slane %v5295_v35, 4  ;;  %v5782_v39 = vrot.slane %v5780_v43, 4  ;;  %v11612_v21 = vpop.f32.mrf.mxu3 }
 0x2ce   : > { %4626 = vmatmul.bf16.gmra.mxu0 %v4492_v63  ;;  %v4772_v42 = vmul.f32 %v11327_v32, %v4680_v20  ;;  %v3161_v25 = vadd.f32 %v11295_v48, %v11081_v6  ;;  %v4202_v51 = vadd.f32 %v11287_v4, %v3523_v34  ;;  %vm4927_vm9 = vcmp.ge.s32.totalorder %v4897_v47, 24 }
 0x2cf   : > { %9683 = vst [vmem:[#allocation3 + $0x18] sm:$0xff] %v9624_v31   ;;  %v5257_v22 = vld [vmem:[#allocation3 + $0x14] sm:$0x1]  ;;  %v4898_v35 = vadd.s32 %v11332_v14, %v4866_v38  ;;  %v5301_v43 = vsel %vm9969_vm4, %v5296_v56, %v5300_v53  ;;  %v5306_v44 = vrot.slane %v5305_v23, 4  ;;  %v5846_v20 = vunpack.c.l.b16 %v5781_v19  ;;  %6946 = vmatpush.bf16.msrb.mxu0 %v9585_v15 }
 0x2d0   : > { %v5783_v58 = vrot.slane %v5257_v22, 5  ;;  %v5308_v63 = vshll.u32 %v5257_v22, 16  ;;  %v4422_v6 = vsel %vm9983_vm5, %v4420_v26, %v4421_v27  ;;  %v4426_v4 = vsel %vm9983_vm5, %v8769_v28, %v4425_v52  ;;  %v9584_v38 = vld [vmem:[%s12757_s2 + $0x190] sm:$0xff] }
 0x2d1   : > { %v4804_v48 = vadd.f32 %v11343_v9, %v4772_v42  ;;  %vm4957_vm10 = vcmp.lt.s32.totalorder %v4897_v47, 408  ;;  %vm4928_vm11 = vcmp.ge.s32.totalorder %v4898_v35, 24  ;;  %v5475_v23 = vunpack.c.l.b16 %v5301_v43  ;;  %v8758_v42 = vld [vmem:[%s9915_s26 + $0xb8] sm:$0xf] }
 0x2d2   : > { %v5784_v11 = vsel %vm9983_vm5, %v5782_v39, %v5783_v58  ;;  %v5310_v60 = vrot.slane %v5308_v63, 5  ;;  %vm4958_vm13 = vcmp.lt.s32.totalorder %v4898_v35, 408  ;;  %v4476_v27 = vunpack.c.l.b16 %v4422_v6  ;;  %vm11621_vm12 = vmand %vm4927_vm9, %vm4957_vm10 }
 0x2d3   : > { %v4589_v41 = vpop.f32.mrf.mxu0  ;;  %v5847_v18 = vunpack.c.l.b16 %v5784_v11  ;;  %v4477_v22 = vunpack.c.l.b16 %v4426_v4  ;;  %6947 = vmatpush.bf16.msrb.mxu0 %v9584_v38  ;;  %v3524_v39 = vadd.f32 %v11293_v46, %v3161_v25  ;;  %v4834_v58 = vmax.f32 %v4804_v48, 0.0  ;;  %v11629_v11 = vpop.f32.mrf.mxu2  ;;  %vm4988_vm15 = vmand %vm4928_vm11, %vm4958_vm13  ;;  %v8759_v4 = vld [vmem:[%s9915_s26 + $0xbc] sm:$0x1]  ;;  %v9582_v48 = vld [vmem:[%s12757_s2 + $0x180] sm:$0xff] }
 0x2d4   : > { %v4681_v31 = vadd.f32 %v4589_v41, %v4202_v51  ;;  %v5311_v53 = vsel %vm9969_vm4, %v5306_v44, %v5310_v60  ;;  %v9583_v51 = vld [vmem:[%s12757_s2 + $0x188] sm:$0xff]  ;;  %v4428_v43 = vrot.slane %v8758_v42, 5  ;;  %v3162_v44 = vadd.f32 %v11316_v37, %v11096_v29  ;;  %v11636_v60 = vpop.f32.mrf.mxu1 }
 0x2d5   : > { %v5861_v34 = vpack.c.b16 %v5847_v18, %v5846_v20  ;;  %v5476_v33 = vunpack.c.l.b16 %v5311_v53  ;;  %v4203_v46 = vadd.f32 %v11304_v0, %v3524_v39  ;;  %v4493_v25 = vpack.c.b16 %v4477_v22, %v4476_v27  ;;  %v11648_v53 = vpop.f32.mrf.mxu3 }
 0x2d6   : > { %v4773_v26 = vmul.f32 %v11327_v32, %v4681_v31  ;;  %v5168_v19 = vld [vmem:[#allocation3 + $0x18] sm:$0x1]  ;;  %v4867_v20 = vadd.s32 80, %v11318_v8  ;;  %v5077_v35 = vsel %vm11621_vm12, %v4834_v58, 0.0  ;;  %v4868_v0 = vadd.s32 88, %v11318_v8 }
 0x2d7   : > { %v5490_v56 = vpack.c.b16 %v5476_v33, %v5475_v23  ;;  %v5169_v28 = vsel %vm11403_vm14, 0, %v5168_v19  ;;  %6948 = vmatpush.bf16.msrb.mxu0 %v9583_v51  ;;  %v4427_v29 = vrot.slane %v4425_v52, 4  ;;  %v4430_v37 = vrot.slane %v4428_v43, 4  ;;  %v9565_v33 = vld [vmem:[%s12757_s2 + $0x138] sm:$0xff] }
 0x2d8   : > { %v4805_v15 = vadd.f32 %v11343_v9, %v4773_v26  ;;  %5937 = vmatmul.bf16.gmra.mxu3 %v5861_v34  ;;  %5170 = vst [vmem:[#allocation3 + $0x18] sm:$0x1] %v5169_v28  ;;  %v4899_v38 = vadd.s32 %v11332_v14, %v4867_v20  ;;  %v4431_v23 = vrot.slane %v8759_v4, 5  ;;  %v3525_v27 = vadd.f32 %v11313_v5, %v3162_v44  ;;  %v9557_v52 = vld [vmem:[%s12757_s2 + $0xf8] sm:$0xff] }
 0x2d9   : > { %v4900_v57 = vadd.s32 %v11332_v14, %v4868_v0  ;;  %6497 = vmatpush.bf16.msrb.mxu2 %v9565_v33  ;;  %v11663_v28 = vld [vmem:[#allocation3 + $0x1c] sm:$0xf]  ;;  %6119 = vmatpush.bf16.msrb.mxu1 %v9557_v52  ;;  %v3163_v5 = vadd.f32 %v11359_v54, %v11105_v36  ;;  %v6563_v61 = vld [vmem:[#allocation3 + $0x18] sm:$0xe] }
 0x2da   : > { %v4835_v47 = vmax.f32 %v4805_v15, 0.0  ;;  %5566 = vmatmul.bf16.gmra.mxu1 %v5490_v56  ;;  %v4204_v19 = vadd.f32 %v11334_v3, %v3525_v27  ;;  %v4429_v56 = vsel %vm9983_vm5, %v4427_v29, %v4428_v43  ;;  %vm4929_vm0 = vcmp.ge.s32.totalorder %v4899_v38, 24  ;;  %v5749_v29 = vld [vmem:[#allocation3 + $0x18] sm:$0xe] }
 0x2db   : > { %v4592_v41 = vpop.f32.mrf.mxu0  ;;  %6949 = vmatpush.bf16.msrb.mxu0 %v9582_v48  ;;  %v11667_v58 = vpop.f32.mrf.mxu2  ;;  %v4432_v15 = vsel %vm9983_vm5, %v4430_v37, %v4431_v23  ;;  %vm4959_vm1 = vcmp.lt.s32.totalorder %v4899_v38, 408  ;;  %vm4930_vm2 = vcmp.ge.s32.totalorder %v4900_v57, 24  ;;  %vm4960_vm3 = vcmp.lt.s32.totalorder %v4900_v57, 408 }
 0x2dc   : > { %v5078_v18 = vsel %vm4988_vm15, %v4835_v47, 0.0  ;;  %v4682_v6 = vadd.f32 %v4592_v41, %v4203_v46  ;;  %v11672_v46 = vpop.f32.mrf.mxu1  ;;  %v4478_v47 = vunpack.c.l.b16 %v4429_v56  ;;  %v5326_v36 = vshrl.u32 %v11663_v28, 16  ;;  %vm11684_vm6 = vmand %vm4929_vm0, %vm4959_vm1 }
 0x2dd   : > { %v9629_v31 = vpack.c.bf16 %v5078_v18, %v5077_v35  ;;  %v4479_v44 = vunpack.c.l.b16 %v4432_v15  ;;  %v3526_v0 = vadd.f32 %v11351_v12, %v3163_v5  ;;  %v11689_v37 = vpop.f32.mrf.mxu3  ;;  %vm4990_vm7 = vmand %vm4930_vm2, %vm4960_vm3  ;;  %v5787_v56 = vrot.slane %v11663_v28, 5 }
 0x2de   : > { %4631 = vmatmul.bf16.gmra.mxu0 %v4493_v25  ;;  %v4774_v22 = vmul.f32 %v11327_v32, %v4682_v6  ;;  %v5322_v25 = vshll.u32 %v11663_v28, 16  ;;  %v5328_v12 = vrot.slane %v5326_v36, 4  ;;  %v4870_v5 = vadd.s32 104, %v11318_v8 }
 0x2df   : > { %9684 = vst [vmem:[#allocation3 + $0x20] sm:$0xff] %v9629_v31   ;;  %v9512_v34 = vld [vmem:[#allocation3 + $0x18] sm:$0xff]  ;;  %v4205_v33 = vadd.f32 %v11366_v2, %v3526_v0 }
 0x2e0   : > { %v5228_v26 = vld [vmem:[#allocation3 + $0x18] sm:$0xf]  ;;  %5716 = vmatmul.bf16.gmra.mxu2 %v9512_v34  ;;  %v4806_v3 = vadd.f32 %v11343_v9, %v4774_v22  ;;  %v4869_v34 = vadd.s32 96, %v11318_v8  ;;  %v5324_v23 = vrot.slane %v5322_v25, 5  ;;  %v3164_v22 = vadd.f32 %v11384_v24, %v11122_v13 }
 0x2e1   : > { %v5313_v42 = vshrl.u32 %v5228_v26, 16  ;;  %v5316_v39 = vshll.u32 %v5228_v26, 16  ;;  %v4494_v26 = vpack.c.b16 %v4479_v44, %v4478_v47  ;;  %v5789_v25 = vrot.slane %v5787_v56, 4 }
 0x2e2   : > { %v4836_v4 = vmax.f32 %v4806_v3, 0.0  ;;  %v4901_v15 = vadd.s32 %v11332_v14, %v4869_v34  ;;  %v5329_v3 = vor.u32 %v5328_v12, %v5324_v23  ;;  %v3527_v24 = vadd.f32 %v11377_v10, %v3164_v22 }
 0x2e3   : > { %v4594_v63 = vpop.f32.mrf.mxu0  ;;  %v5315_v41 = vrot.slane %v5313_v42, 4  ;;  %v5318_v20 = vrot.slane %v5316_v39, 5  ;;  %v4902_v36 = vadd.s32 %v11332_v14, %v4870_v5 }
 0x2e4   : > { %v4683_v51 = vadd.f32 %v4594_v63, %v4204_v19  ;;  %v8933_v19 = vrot.slane %v5749_v29, 9  ;;  %v5079_v57 = vsel %vm11684_vm6, %v4836_v4, 0.0  ;;  %v11701_v63 = vpop.f32.mrf.mxu2  ;;  %v11706_v28 = vpop.f32.mrf.mxu1  ;;  %vm4931_vm9 = vcmp.ge.s32.totalorder %v4901_v15, 24 }
 0x2e5   : > { %v5319_v27 = vor.u32 %v5318_v20, %v5315_v41  ;;  %v12828_v20 = vld [vmem:[#allocation21_spill] sm:$0xff]  ;;  %v5330_v10 = vrot.slane %v5329_v3, 4  ;;  %v11719_v29 = vpop.f32.mrf.mxu3  ;;  %vm4961_vm10 = vcmp.lt.s32.totalorder %v4901_v15, 408  ;;  %vm4932_vm11 = vcmp.ge.s32.totalorder %v4902_v36, 24  ;;  %v12833_v15 = vld [vmem:[#allocation22_spill] sm:$0xff] }
 0x2e6   : > { %v5200_v54 = vld [vmem:[#allocation3 + $0x20] sm:$0x1]  ;;  %v4775_v43 = vmul.f32 %v11327_v32, %v4683_v51  ;;  %v5171_v35 = vld [vmem:[#allocation3 + $0x24] sm:$0x1]  ;;  %vm4962_vm13 = vcmp.lt.s32.totalorder %v4902_v36, 408  ;;  %vm11731_vm12 = vmand %vm4931_vm9, %vm4961_vm10 }
 0x2e7   : > { %v5201_v18 = vsel %vm11447_vm8, 0, %v5200_v54  ;;  %v5172_v6 = vsel %vm11403_vm14, 0, %v5171_v35  ;;  %v5320_v13 = vrot.slane %v5319_v27, 4  ;;  %v5788_v54 = vsel %vm9983_vm5, %v8933_v19, %v5787_v56  ;;  %vm4992_vm15 = vmand %vm4932_vm11, %vm4962_vm13 }
 0x2e8   : > { %5202 = vst [vmem:[#allocation3 + $0x20] sm:$0x1] %v5201_v18  ;;  %v4807_v31 = vadd.f32 %v11343_v9, %v4775_v43  ;;  %v3165_v35 = vadd.f32 %v12828_v20, %v11136_v30  ;;  %v12829_v18 = vld [vmem:[#allocation19_spill] sm:$0xff]  ;;  %v5848_v12 = vunpack.c.l.b16 %v5788_v54 }
 0x2e9   : > { %5173 = vst [vmem:[#allocation3 + $0x24] sm:$0x1] %v5172_v6  ;;  %v4206_v6 = vadd.f32 %v12829_v18, %v3527_v24  ;;  %v5325_v48 = vsel %vm9969_vm4, %v5320_v13, %v5324_v23  ;;  %v12830_v24 = vld [vmem:[#allocation20_spill] sm:$0xff]  ;;  %v9564_v54 = vld [vmem:[%s12757_s2 + $0x130] sm:$0xff]  ;;  %v5750_v18 = vld [vmem:[#allocation3 + $0x24] sm:$0xe] }
 0x2ea   : > { %v4837_v38 = vmax.f32 %v4807_v31, 0.0  ;;  %6498 = vmatpush.bf16.msrb.mxu2 %v9564_v54  ;;  %v12837_v54 = vld [vmem:[#allocation25_spill] sm:$0xff] }
 0x2eb   : > { %v4597_v52 = vpop.f32.mrf.mxu0 }
 0x2ec   : > { %v5080_v42 = vsel %vm4990_vm7, %v4837_v38, 0.0  ;;  %v4684_v39 = vadd.f32 %v4597_v52, %v4205_v33  ;;  %v5477_v52 = vunpack.c.l.b16 %v5325_v48  ;;  %v11724_v5 = vpop.f32.mrf.mxu2  ;;  %v11742_v20 = vpop.f32.mrf.mxu1 }
 0x2ed   : > { %v9634_v2 = vpack.c.bf16 %v5080_v42, %v5079_v57 }
 0x2ee   : > { %v4776_v51 = vmul.f32 %v11327_v32, %v4684_v39  ;;  %4636 = vmatmul.bf16.gmra.mxu0 %v4494_v26 }
 0x2ef   : > { %9685 = vst [vmem:[#allocation3 + $0x28] sm:$0xff] %v9634_v2   ;;  %v5258_v47 = vld [vmem:[#allocation3 + $0x20] sm:$0x1] }
 0x2f0   : > { %v5790_v43 = vrot.slane %v5258_v47, 5  ;;  %v5332_v44 = vshll.u32 %v5258_v47, 16  ;;  %v5230_v41 = vld [vmem:[#allocation3 + $0x24] sm:$0xf]  ;;  %v4808_v0 = vadd.f32 %v11343_v9, %v4776_v51  ;;  %v3528_v47 = vadd.f32 %v12830_v24, %v3165_v35 }
 0x2f1   : > { %v5337_v38 = vshrl.u32 %v5230_v41, 16  ;;  %v5340_v30 = vshll.u32 %v5230_v41, 16  ;;  %v9556_v41 = vld [vmem:[%s12757_s2 + $0xf0] sm:$0xff] }
 0x2f2   : > { %v5791_v4 = vsel %vm9983_vm5, %v5789_v25, %v5790_v43  ;;  %v5334_v31 = vrot.slane %v5332_v44, 5  ;;  %v4838_v23 = vmax.f32 %v4808_v0, 0.0  ;;  %v4207_v35 = vadd.f32 %v12833_v15, %v3528_v47  ;;  %6120 = vmatpush.bf16.msrb.mxu1 %v9556_v41  ;;  %v12834_v0 = vld [vmem:[#allocation4_spill] sm:$0xff] }
 0x2f3   : > { %v4599_v34 = vpop.f32.mrf.mxu0  ;;  %v5849_v33 = vunpack.c.l.b16 %v5791_v4  ;;  %v5339_v51 = vrot.slane %v5337_v38, 4  ;;  %v5342_v13 = vrot.slane %v5340_v30, 5  ;;  %v12835_v4 = vld [vmem:[#allocation24_spill] sm:$0xff] }
 0x2f4   : > { %v4685_v26 = vadd.f32 %v4599_v34, %v4206_v6  ;;  %v5335_v27 = vsel %vm9969_vm4, %v5330_v10, %v5334_v31  ;;  %v3166_v48 = vadd.f32 %v12835_v4, %v12834_v0  ;;  %v4871_v34 = vadd.s32 112, %v11318_v8  ;;  %v11775_v0 = vpop.f32.mrf.mxu1 }
 0x2f5   : > { %v5862_v22 = vpack.c.b16 %v5849_v33, %v5848_v12  ;;  %v5478_v19 = vunpack.c.l.b16 %v5335_v27  ;;  %v5343_v33 = vor.u32 %v5342_v13, %v5339_v51  ;;  %v5081_v36 = vsel %vm11731_vm12, %v4838_v23, 0.0  ;;  %v11752_v27 = vpop.f32.mrf.mxu3  ;;  %v11762_v51 = vld [vmem:[%s12758_s3] ss:$0 sm:$0xff] }
 0x2f6   : > { %v5203_v56 = vld [vmem:[#allocation3 + $0x2c] sm:$0x1]  ;;  %v4777_v57 = vmul.f32 %v11327_v32, %v4685_v26  ;;  %v9513_v42 = vld [vmem:[#allocation3 + $0x24] sm:$0xff]  ;;  %v9574_v26 = vld [vmem:[#allocation3 + $0x18] sm:$0xff] }
 0x2f7   : > { %v5231_v39 = vld [vmem:[#allocation3 + $0x28] sm:$0xf]  ;;  %v5204_v2 = vsel %vm11447_vm8, 0, %v5203_v56  ;;  %5942 = vmatmul.bf16.gmra.mxu3 %v5862_v22  ;;  %v5491_v3 = vpack.c.b16 %v5478_v19, %v5477_v52  ;;  %5721 = vmatmul.bf16.gmra.mxu2 %v9513_v42  ;;  %v4872_v52 = vadd.s32 120, %v11318_v8  ;;  %v8934_v19 = vrot.slane %v5750_v18, 9  ;;  %v12838_v18 = vld [vmem:[#allocation5_spill] sm:$0xff] }
 0x2f8   : > { %5205 = vst [vmem:[#allocation3 + $0x2c] sm:$0x1] %v5204_v2  ;;  %v4809_v32 = vadd.f32 %v11343_v9, %v4777_v57  ;;  %v5346_v43 = vshll.u32 %v5231_v39, 16  ;;  %v5350_v44 = vshrl.u32 %v5231_v39, 16  ;;  %v5794_v12 = vrot.slane %v5231_v39, 5  ;;  %v12836_v57 = vld [vmem:[#allocation23_spill] sm:$0xff] }
 0x2f9   : > { %5571 = vmatmul.bf16.gmra.mxu1 %v5491_v3  ;;  %v3529_v42 = vadd.f32 %v12836_v57, %v3166_v48  ;;  %v4903_v39 = vadd.s32 %v11332_v14, %v4871_v34  ;;  %v5344_v3 = vrot.slane %v5343_v33, 4  ;;  %v11780_v34 = vld [vmem:[%s12758_s3 + $0x1] ss:$0 sm:$0xff] }
 0x2fa   : > { %v4839_v9 = vmax.f32 %v4809_v32, 0.0  ;;  %v5348_v6 = vrot.slane %v5346_v43, 5  ;;  %v5352_v10 = vrot.slane %v5350_v44, 4  ;;  %v5795_v23 = vsel %vm9983_vm5, %v8934_v19, %v5794_v12  ;;  %v11765_v32 = vpop.f32.mrf.mxu2 }
 0x2fb   : > { %v4602_v31 = vpop.f32.mrf.mxu0  ;;  %v5796_v24 = vrot.slane %v5794_v12, 4  ;;  %v4208_v43 = vadd.f32 %v12837_v54, %v3529_v42  ;;  %v4904_v44 = vadd.s32 %v11332_v14, %v4872_v52  ;;  %v5850_v48 = vunpack.c.l.b16 %v5795_v23  ;;  %v9555_v23 = vld [vmem:[%s12757_s2 + $0xe8] sm:$0xff] }
 0x2fc   : > { %v5082_v38 = vsel %vm4992_vm15, %v4839_v9, 0.0  ;;  %v4686_v30 = vadd.f32 %v4602_v31, %v4207_v35  ;;  %v5353_v56 = vor.u32 %v5352_v10, %v5348_v6  ;;  %v5349_v15 = vsel %vm9969_vm4, %v5344_v3, %v5348_v6  ;;  %6121 = vmatpush.bf16.msrb.mxu1 %v9555_v23 }
 0x2fd   : > { %v9639_v22 = vpack.c.bf16 %v5082_v38, %v5081_v36  ;;  %v3167_v10 = vadd.f32 %v11499_v55, %v12838_v18  ;;  %vm4933_vm0 = vcmp.ge.s32.totalorder %v4903_v39, 24  ;;  %vm4963_vm1 = vcmp.lt.s32.totalorder %v4903_v39, 408 }
 0x2fe   : > { %6950 = vmatmul.bf16.vlgmr.msrb.gmra.mxu0 %v9574_v26  ;;  %v4778_v13 = vmul.f32 %v11762_v51, %v4686_v30  ;;  %v5354_v35 = vrot.slane %v5353_v56, 4  ;;  %v5479_v55 = vunpack.c.l.b16 %v5349_v15  ;;  %vm4934_vm2 = vcmp.ge.s32.totalorder %v4904_v44, 24  ;;  %vm4993_vm6 = vmand %vm4933_vm0, %vm4963_vm1  ;;  %v11805_v15 = vpop.f32.mrf.mxu1 }
 0x2ff   : > { %9686 = vst [vmem:[#allocation3 + $0x30] sm:$0xff] %v9639_v22   ;;  %v5259_v2 = vld [vmem:[#allocation3 + $0x2c] sm:$0x1]  ;;  %vm4964_vm3 = vcmp.lt.s32.totalorder %v4904_v44, 408  ;;  %v11786_v22 = vpop.f32.mrf.mxu3  ;;  %v3530_v56 = vadd.f32 %v11488_v7, %v3167_v10  ;;  %v4873_v44 = vadd.s32 128, %v11318_v8 }
 0x300   : > { %v5797_v47 = vrot.slane %v5259_v2, 5  ;;  %v5356_v25 = vshll.u32 %v5259_v2, 16  ;;  %v4810_v12 = vadd.f32 %v11780_v34, %v4778_v13  ;;  %v9563_v2 = vld [vmem:[%s12757_s2 + $0x128] sm:$0xff]  ;;  %vm4994_vm7 = vmand %vm4934_vm2, %vm4964_vm3 }
 0x301   : > { %v4209_v3 = vadd.f32 %v11513_v16, %v3530_v56  ;;  %6499 = vmatpush.bf16.msrb.mxu2 %v9563_v2  ;;  %v12839_v7 = vld [vmem:[#allocation6_spill] sm:$0xff]  ;;  %v4874_v16 = vadd.s32 136, %v11318_v8 }
 0x302   : > { %v5798_v41 = vsel %vm9983_vm5, %v5796_v24, %v5797_v47  ;;  %v5358_v9 = vrot.slane %v5356_v25, 5  ;;  %v4840_v57 = vmax.f32 %v4810_v12, 0.0  ;;  %v3168_v39 = vadd.f32 %v11536_v1, %v12839_v7  ;;  %v11802_v24 = vpop.f32.mrf.mxu2  ;;  %v9562_v1 = vld [vmem:[%s12757_s2 + $0x120] sm:$0xff] }
 0x303   : > { %v4604_v4 = vpop.f32.mrf.mxu0  ;;  %v5851_v31 = vunpack.c.l.b16 %v5798_v41  ;;  %v9575_v41 = vld [vmem:[#allocation3 + $0x24] sm:$0xff] }
 0x304   : > { %v4687_v33 = vadd.f32 %v4604_v4, %v4208_v43  ;;  %v5359_v6 = vsel %vm9969_vm4, %v5354_v35, %v5358_v9  ;;  %v5083_v25 = vsel %vm4993_vm6, %v4840_v57, 0.0  ;;  %v3531_v18 = vadd.f32 %v11531_v17, %v3168_v39 }
 0x305   : > { %v5863_v36 = vpack.c.b16 %v5851_v31, %v5850_v48  ;;  %v5480_v38 = vunpack.c.l.b16 %v5359_v6  ;;  %v4905_v4 = vadd.s32 %v11332_v14, %v4873_v44  ;;  %v9554_v31 = vld [vmem:[%s12757_s2 + $0xe0] sm:$0xff]  ;;  %6500 = vmatpush.bf16.msrb.mxu2 %v9562_v1 }
 0x306   : > { %v4779_v30 = vmul.f32 %v11762_v51, %v4687_v33  ;;  %v5174_v26 = vld [vmem:[#allocation3 + $0x30] sm:$0x1]  ;;  %v4906_v33 = vadd.s32 %v11332_v14, %v4874_v16  ;;  %v4210_v6 = vadd.f32 %v11562_v45, %v3531_v18  ;;  %6122 = vmatpush.bf16.msrb.mxu1 %v9554_v31  ;;  %v11828_v7 = vpop.f32.mrf.mxu1 }
 0x307   : > { %5947 = vmatmul.bf16.gmra.mxu3 %v5863_v36  ;;  %v5492_v52 = vpack.c.b16 %v5480_v38, %v5479_v55  ;;  %v5175_v19 = vsel %vm11403_vm14, 0, %v5174_v26  ;;  %v11817_v12 = vpop.f32.mrf.mxu3  ;;  %v5233_v36 = vld [vmem:[#allocation3 + $0x34] sm:$0xf]  ;;  %vm4935_vm9 = vcmp.ge.s32.totalorder %v4905_v4, 24  ;;  %vm4965_vm10 = vcmp.lt.s32.totalorder %v4905_v4, 408 }
 0x308   : > { %v4811_v42 = vadd.f32 %v11780_v34, %v4779_v30  ;;  %5176 = vst [vmem:[#allocation3 + $0x30] sm:$0x1] %v5175_v19  ;;  %v12840_v38 = vld [vmem:[#allocation7_spill] sm:$0xff]  ;;  %vm4936_vm11 = vcmp.ge.s32.totalorder %v4906_v33, 24  ;;  %vm4966_vm13 = vcmp.lt.s32.totalorder %v4906_v33, 408  ;;  %v5370_v57 = vshll.u32 %v5233_v36, 16  ;;  %vm4995_vm12 = vmand %vm4935_vm9, %vm4965_vm10 }
 0x309   : > { %5576 = vmatmul.bf16.gmra.mxu1 %v5492_v52  ;;  %v3169_v30 = vadd.f32 %v11593_v40, %v12840_v38  ;;  %v5374_v45 = vshrl.u32 %v5233_v36, 16  ;;  %vm4996_vm15 = vmand %vm4936_vm11, %vm4966_vm13  ;;  %v4875_v4 = vadd.s32 144, %v11318_v8  ;;  %v4876_v38 = vadd.s32 152, %v11318_v8 }
 0x30a   : > { %v4841_v13 = vmax.f32 %v4811_v42, 0.0  ;;  %v11824_v56 = vpop.f32.mrf.mxu2 }
 0x30b   : > { %v4607_v47 = vpop.f32.mrf.mxu0  ;;  %v3532_v40 = vadd.f32 %v11581_v50, %v3169_v30  ;;  %v5751_v50 = vld [vmem:[#allocation3 + $0x30] sm:$0xe]  ;;  %v5376_v16 = vrot.slane %v5374_v45, 4 }
 0x30c   : > { %v5084_v54 = vsel %vm4994_vm7, %v4841_v13, 0.0  ;;  %v4688_v43 = vadd.f32 %v4607_v47, %v4209_v3 }
 0x30d   : > { %v9644_v35 = vpack.c.bf16 %v5084_v54, %v5083_v25 }
 0x30e   : > { %6955 = vmatmul.bf16.gmra.mxu0 %v9575_v41  ;;  %v4780_v10 = vmul.f32 %v11762_v51, %v4688_v43  ;;  %v4211_v43 = vadd.f32 %v11612_v21, %v3532_v40 }
 0x30f   : > { %9687 = vst [vmem:[#allocation3 + $0x38] sm:$0xff] %v9644_v35   ;;  %v9514_v9 = vld [vmem:[#allocation3 + $0x30] sm:$0xff]  ;;  %v5372_v35 = vrot.slane %v5370_v57, 5  ;;  %v11842_v18 = vpop.f32.mrf.mxu3 }
 0x310   : > { %v5232_v48 = vld [vmem:[#allocation3 + $0x30] sm:$0xf]  ;;  %5726 = vmatmul.bf16.gmra.mxu2 %v9514_v9  ;;  %v4812_v52 = vadd.f32 %v11780_v34, %v4780_v10  ;;  %v12841_v9 = vld [vmem:[#allocation8_spill] sm:$0xff] }
 0x311   : > { %v5361_v55 = vshrl.u32 %v5232_v48, 16  ;;  %v5364_v17 = vshll.u32 %v5232_v48, 16  ;;  %v3170_v1 = vadd.f32 %v11636_v60, %v12841_v9  ;;  %v5801_v48 = vrot.slane %v5233_v36, 5  ;;  %v9576_v33 = vld [vmem:[#allocation3 + $0x30] sm:$0xff] }
 0x312   : > { %v4842_v25 = vmax.f32 %v4812_v52, 0.0  ;;  %v11847_v60 = vpop.f32.mrf.mxu2 }
 0x313   : > { %v4609_v26 = vpop.f32.mrf.mxu0  ;;  %v5363_v23 = vrot.slane %v5361_v55, 4  ;;  %v5366_v3 = vrot.slane %v5364_v17, 5  ;;  %v8935_v55 = vrot.slane %v5751_v50, 9  ;;  %v3533_v52 = vadd.f32 %v11629_v11, %v3170_v1 }
 0x314   : > { %v4689_v19 = vadd.f32 %v4609_v26, %v4210_v6  ;;  %v5085_v31 = vsel %vm4995_vm12, %v4842_v25, 0.0  ;;  %v5377_v26 = vor.u32 %v5376_v16, %v5372_v35  ;;  %v5803_v36 = vrot.slane %v5801_v48, 4 }
 0x315   : > { %v5367_v41 = vor.u32 %v5366_v3, %v5363_v23  ;;  %v4212_v11 = vadd.f32 %v11648_v53, %v3533_v52 }
 0x316   : > { %v5206_v42 = vld [vmem:[#allocation3 + $0x38] sm:$0x1]  ;;  %v4781_v2 = vmul.f32 %v11762_v51, %v4689_v19  ;;  %v5177_v13 = vld [vmem:[#allocation3 + $0x3c] sm:$0x1]  ;;  %v4907_v19 = vadd.s32 %v11332_v14, %v4875_v4 }
 0x317   : > { %v5207_v39 = vsel %vm11447_vm8, 0, %v5206_v42  ;;  %v5178_v47 = vsel %vm11403_vm14, 0, %v5177_v13  ;;  %v5368_v30 = vrot.slane %v5367_v41, 4  ;;  %v5802_v42 = vsel %vm9983_vm5, %v8935_v55, %v5801_v48  ;;  %v12842_v13 = vld [vmem:[#allocation9_spill] sm:$0xff]  ;;  %v11866_v4 = vpop.f32.mrf.mxu3 }
 0x318   : > { %5208 = vst [vmem:[#allocation3 + $0x38] sm:$0x1] %v5207_v39  ;;  %v4813_v54 = vadd.f32 %v11780_v34, %v4781_v2  ;;  %v3171_v40 = vadd.f32 %v11672_v46, %v12842_v13  ;;  %v11855_v39 = vpop.f32.mrf.mxu1  ;;  %v5852_v41 = vunpack.c.l.b16 %v5802_v42  ;;  %vm4937_vm0 = vcmp.ge.s32.totalorder %v4907_v19, 24  ;;  %v12847_v13 = vld [vmem:[#allocation10_spill] sm:$0xff] }
 0x319   : > { %5179 = vst [vmem:[#allocation3 + $0x3c] sm:$0x1] %v5178_v47  ;;  %v4908_v47 = vadd.s32 %v11332_v14, %v4876_v38  ;;  %vm4967_vm1 = vcmp.lt.s32.totalorder %v4907_v19, 408  ;;  %v9553_v19 = vld [vmem:[%s12757_s2 + $0xd8] sm:$0xff] }
 0x31a   : > { %v4843_v44 = vmax.f32 %v4813_v54, 0.0  ;;  %v5373_v54 = vsel %vm9969_vm4, %v5368_v30, %v5372_v35  ;;  %vm11874_vm6 = vmand %vm4937_vm0, %vm4967_vm1  ;;  %6123 = vmatpush.bf16.msrb.mxu1 %v9553_v19 }
 0x31b   : > { %v4612_v10 = vpop.f32.mrf.mxu0  ;;  %vm4938_vm2 = vcmp.ge.s32.totalorder %v4908_v47, 24  ;;  %vm4968_vm3 = vcmp.lt.s32.totalorder %v4908_v47, 408 }
 0x31c   : > { %v5086_v21 = vsel %vm4996_vm15, %v4843_v44, 0.0  ;;  %v4690_v6 = vadd.f32 %v4612_v10, %v4211_v43  ;;  %v5378_v43 = vrot.slane %v5377_v26, 4  ;;  %vm11886_vm7 = vmand %vm4938_vm2, %vm4968_vm3 }
 0x31d   : > { %v9649_v17 = vpack.c.bf16 %v5086_v21, %v5085_v31  ;;  %v5481_v31 = vunpack.c.l.b16 %v5373_v54  ;;  %v3534_v21 = vadd.f32 %v11667_v58, %v3171_v40  ;;  %v3172_v40 = vadd.f32 %v11706_v28, %v12847_v13  ;;  %v5752_v54 = vld [vmem:[#allocation3 + $0x3c] sm:$0xe] }
 0x31e   : > { %6960 = vmatmul.bf16.gmra.mxu0 %v9576_v33  ;;  %v4782_v45 = vmul.f32 %v11762_v51, %v4690_v6 }
 0x31f   : > { %9688 = vst [vmem:[#allocation3 + $0x40] sm:$0xff] %v9649_v17   ;;  %v5260_v57 = vld [vmem:[#allocation3 + $0x38] sm:$0x1] }
 0x320   : > { %v5804_v2 = vrot.slane %v5260_v57, 5  ;;  %v5380_v23 = vshll.u32 %v5260_v57, 16  ;;  %v5234_v3 = vld [vmem:[#allocation3 + $0x3c] sm:$0xf]  ;;  %v4814_v46 = vadd.f32 %v11780_v34, %v4782_v45 }
 0x321   : > { %v5385_v9 = vshrl.u32 %v5234_v3, 16  ;;  %v5388_v1 = vshll.u32 %v5234_v3, 16  ;;  %v9561_v45 = vld [vmem:[%s12757_s2 + $0x118] sm:$0xff] }
 0x322   : > { %v5805_v25 = vsel %vm9983_vm5, %v5803_v36, %v5804_v2  ;;  %v5382_v50 = vrot.slane %v5380_v23, 5  ;;  %v4844_v57 = vmax.f32 %v4814_v46, 0.0  ;;  %v11882_v23 = vpop.f32.mrf.mxu2  ;;  %6501 = vmatpush.bf16.msrb.mxu2 %v9561_v45 }
 0x323   : > { %v4614_v44 = vpop.f32.mrf.mxu0  ;;  %v5853_v16 = vunpack.c.l.b16 %v5805_v25  ;;  %v5387_v26 = vrot.slane %v5385_v9, 4  ;;  %v5390_v52 = vrot.slane %v5388_v1, 5 }
 0x324   : > { %v4691_v10 = vadd.f32 %v4614_v44, %v4212_v11  ;;  %v5383_v53 = vsel %vm9969_vm4, %v5378_v43, %v5382_v50  ;;  %v4213_v11 = vadd.f32 %v11689_v37, %v3534_v21  ;;  %v11896_v50 = vpop.f32.mrf.mxu1  ;;  %v4877_v44 = vadd.s32 160, %v11318_v8  ;;  %v11905_v21 = vpop.f32.mrf.mxu3 }
 0x325   : > { %v5864_v48 = vpack.c.b16 %v5853_v16, %v5852_v41  ;;  %v5482_v35 = vunpack.c.l.b16 %v5383_v53  ;;  %v5391_v16 = vor.u32 %v5390_v52, %v5387_v26  ;;  %v5087_v1 = vsel %vm11874_vm6, %v4844_v57, 0.0 }
 0x326   : > { %v5209_v6 = vld [vmem:[#allocation3 + $0x44] sm:$0x1]  ;;  %v4783_v33 = vmul.f32 %v11762_v51, %v4691_v10  ;;  %v9515_v55 = vld [vmem:[#allocation3 + $0x3c] sm:$0xff]  ;;  %v4878_v53 = vadd.s32 168, %v11318_v8 }
 0x327   : > { %v5210_v17 = vsel %vm11447_vm8, 0, %v5209_v6  ;;  %5952 = vmatmul.bf16.gmra.mxu3 %v5864_v48  ;;  %v5493_v38 = vpack.c.b16 %v5482_v35, %v5481_v31  ;;  %v5235_v30 = vld [vmem:[#allocation3 + $0x40] sm:$0xf]  ;;  %5731 = vmatmul.bf16.gmra.mxu2 %v9515_v55  ;;  %v8936_v48 = vrot.slane %v5752_v54, 9  ;;  %v3535_v35 = vadd.f32 %v11701_v63, %v3172_v40 }
 0x328   : > { %5211 = vst [vmem:[#allocation3 + $0x44] sm:$0x1] %v5210_v17  ;;  %v4815_v36 = vadd.f32 %v11780_v34, %v4783_v33  ;;  %v5394_v42 = vshll.u32 %v5235_v30, 16  ;;  %v5398_v2 = vshrl.u32 %v5235_v30, 16  ;;  %v5808_v41 = vrot.slane %v5235_v30, 5  ;;  %v9577_v46 = vld [vmem:[#allocation3 + $0x3c] sm:$0xff] }
 0x329   : > { %5581 = vmatmul.bf16.gmra.mxu1 %v5493_v38  ;;  %v4909_v6 = vadd.s32 %v11332_v14, %v4877_v44  ;;  %v5392_v17 = vrot.slane %v5391_v16, 4  ;;  %v4214_v57 = vadd.f32 %v11719_v29, %v3535_v35  ;;  %v4910_v58 = vadd.s32 %v11332_v14, %v4878_v53  ;;  %v9560_v53 = vld [vmem:[%s12757_s2 + $0x110] sm:$0xff] }
 0x32a   : > { %v4845_v25 = vmax.f32 %v4815_v36, 0.0  ;;  %v5396_v43 = vrot.slane %v5394_v42, 5  ;;  %v5400_v9 = vrot.slane %v5398_v2, 4  ;;  %v5809_v55 = vsel %vm9983_vm5, %v8936_v48, %v5808_v41  ;;  %v12848_v2 = vld [vmem:[#allocation11_spill] sm:$0xff]  ;;  %v11919_v19 = vpop.f32.mrf.mxu2  ;;  %6502 = vmatpush.bf16.msrb.mxu2 %v9560_v53 }
 0x32b   : > { %v4617_v47 = vpop.f32.mrf.mxu0  ;;  %v5810_v30 = vrot.slane %v5808_v41, 4  ;;  %v3173_v3 = vadd.f32 %v11742_v20, %v12848_v2  ;;  %v5854_v40 = vunpack.c.l.b16 %v5809_v55  ;;  %vm4939_vm9 = vcmp.ge.s32.totalorder %v4909_v6, 24  ;;  %v9552_v48 = vld [vmem:[%s12757_s2 + $0xd0] sm:$0xff] }
 0x32c   : > { %v5088_v28 = vsel %vm11886_vm7, %v4845_v25, 0.0  ;;  %v4692_v37 = vadd.f32 %v4617_v47, %v4213_v11  ;;  %v5401_v31 = vor.u32 %v5400_v9, %v5396_v43  ;;  %v5397_v36 = vsel %vm9969_vm4, %v5392_v17, %v5396_v43  ;;  %v11924_v47 = vpop.f32.mrf.mxu1  ;;  %6124 = vmatpush.bf16.msrb.mxu1 %v9552_v48 }
 0x32d   : > { %v9654_v10 = vpack.c.bf16 %v5088_v28, %v5087_v1  ;;  %vm4969_vm10 = vcmp.lt.s32.totalorder %v4909_v6, 408  ;;  %v5483_v44 = vunpack.c.l.b16 %v5397_v36  ;;  %vm4940_vm11 = vcmp.ge.s32.totalorder %v4910_v58, 24  ;;  %v12852_v36 = vld [vmem:[#allocation13_spill] sm:$0xff] }
 0x32e   : > { %6965 = vmatmul.bf16.gmra.mxu0 %v9577_v46  ;;  %v4784_v38 = vmul.f32 %v11762_v51, %v4692_v37  ;;  %v5402_v45 = vrot.slane %v5401_v31, 4  ;;  %vm4970_vm13 = vcmp.lt.s32.totalorder %v4910_v58, 408  ;;  %v3536_v28 = vadd.f32 %v11724_v5, %v3173_v3  ;;  %vm11931_vm12 = vmand %vm4939_vm9, %vm4969_vm10  ;;  %v11942_v31 = vpop.f32.mrf.mxu3  ;;  %v9573_v5 = vld [vmem:[%s12757_s2 + $0x178] sm:$0xff] }
 0x32f   : > { %9689 = vst [vmem:[#allocation3 + $0x48] sm:$0xff] %v9654_v10   ;;  %v5261_v33 = vld [vmem:[#allocation3 + $0x44] sm:$0x1]  ;;  %vm5000_vm15 = vmand %vm4940_vm11, %vm4970_vm13  ;;  %6747 = vmatpush.bf16.msrb.mxu3 %v9573_v5  ;;  %v11990_v5 = vld [vmem:[#allocation3 + $0x10] sm:$0xf] }
 0x330   : > { %v5811_v26 = vrot.slane %v5261_v33, 5  ;;  %v5404_v52 = vshll.u32 %v5261_v33, 16  ;;  %v4816_v29 = vadd.f32 %v11780_v34, %v4784_v38  ;;  %v4215_v35 = vadd.f32 %v11752_v27, %v3536_v28  ;;  %v12851_v33 = vld [vmem:[#allocation12_spill] sm:$0xff] }
 0x331   : > { %v3174_v55 = vadd.f32 %v11775_v0, %v12851_v33  ;;  %v4880_v27 = vadd.s32 184, %v11318_v8  ;;  %v3175_v0 = vadd.f32 %v11805_v15, %v12852_v36 }
 0x332   : > { %v5812_v63 = vsel %vm9983_vm5, %v5810_v30, %v5811_v26  ;;  %v5406_v42 = vrot.slane %v5404_v52, 5  ;;  %v4846_v37 = vmax.f32 %v4816_v29, 0.0  ;;  %v4879_v52 = vadd.s32 176, %v11318_v8 }
 0x333   : > { %v4619_v13 = vpop.f32.mrf.mxu0  ;;  %v5855_v11 = vunpack.c.l.b16 %v5812_v63  ;;  %v9572_v63 = vld [vmem:[%s12757_s2 + $0x170] sm:$0xff]  ;;  %v3538_v28 = vadd.f32 %v11802_v24, %v3175_v0  ;;  %v12855_v0 = vld [vmem:[#allocation16_spill] sm:$0xff] }
 0x334   : > { %v4693_v25 = vadd.f32 %v4619_v13, %v4214_v57  ;;  %v5407_v54 = vsel %vm9969_vm4, %v5402_v45, %v5406_v42  ;;  %v5089_v38 = vsel %vm11931_vm12, %v4846_v37, 0.0  ;;  %v11953_v57 = vpop.f32.mrf.mxu2  ;;  %v12853_v45 = vld [vmem:[#allocation14_spill] sm:$0xff]  ;;  %v11963_v2 = vpop.f32.mrf.mxu1  ;;  %6748 = vmatpush.bf16.msrb.mxu3 %v9572_v63  ;;  %v9558_v63 = vld [vmem:[%s12757_s2 + $0x100] sm:$0xff] }
 0x335   : > { %v5865_v43 = vpack.c.b16 %v5855_v11, %v5854_v40  ;;  %v5484_v41 = vunpack.c.l.b16 %v5407_v54  ;;  %v3176_v42 = vadd.f32 %v11828_v7, %v12853_v45  ;;  %v9559_v40 = vld [vmem:[%s12757_s2 + $0x108] sm:$0xff]  ;;  %v3537_v11 = vadd.f32 %v11765_v32, %v3174_v55 }
 0x336   : > { %v4785_v20 = vmul.f32 %v11762_v51, %v4693_v25  ;;  %v5180_v16 = vld [vmem:[#allocation3 + $0x48] sm:$0x1]  ;;  %v4911_v25 = vadd.s32 %v11332_v14, %v4879_v52  ;;  %v6184_v54 = vld [vmem:[#allocation3 + $0xc] sm:$0xf]  ;;  %6503 = vmatpush.bf16.msrb.mxu2 %v9559_v40  ;;  %v11987_v46 = vpop.f32.mrf.mxu3  ;;  %v3178_v45 = vadd.f32 %v11896_v50, %v12855_v0 }
 0x337   : > { %5957 = vmatmul.bf16.gmra.mxu3 %v5865_v43  ;;  %v5494_v9 = vpack.c.b16 %v5484_v41, %v5483_v44  ;;  %v5181_v1 = vsel %vm11403_vm14, 0, %v5180_v16  ;;  %v9551_v7 = vld [vmem:[%s12757_s2 + $0xc8] sm:$0xff]  ;;  %v4912_v43 = vadd.s32 %v11332_v14, %v4880_v27  ;;  %v12854_v41 = vld [vmem:[#allocation15_spill] sm:$0xff]  ;;  %v11985_v37 = vadd.f32 %v11824_v56, %v3176_v42 }
 0x338   : > { %v4817_v10 = vadd.f32 %v11780_v34, %v4785_v20  ;;  %5182 = vst [vmem:[#allocation3 + $0x48] sm:$0x1] %v5181_v1  ;;  %v9571_v44 = vld [vmem:[%s12757_s2 + $0x168] sm:$0xff]  ;;  %v3177_v32 = vadd.f32 %v11855_v39, %v12854_v41  ;;  %v4216_v20 = vadd.f32 %v11786_v22, %v3537_v11  ;;  %6125 = vmatpush.bf16.msrb.mxu1 %v9551_v7  ;;  %v6209_v53 = vshrl.u32 %v6184_v54, 16 }
 0x339   : > { %5586 = vmatmul.bf16.gmra.mxu1 %v5494_v9  ;;  %v11981_v16 = vld [vmem:[#allocation3 + $0x4c] sm:$0xf]  ;;  %6749 = vmatpush.bf16.msrb.mxu3 %v9571_v44  ;;  %v6212_v48 = vshll.u32 %v6184_v54, 16  ;;  %vm4941_vm0 = vcmp.ge.s32.totalorder %v4911_v25, 24  ;;  %vm4971_vm1 = vcmp.lt.s32.totalorder %v4911_v25, 408  ;;  %vm4942_vm2 = vcmp.ge.s32.totalorder %v4912_v43, 24 }
 0x33a   : > { %v4847_v6 = vmax.f32 %v4817_v10, 0.0  ;;  %vm4972_vm3 = vcmp.lt.s32.totalorder %v4912_v43, 408  ;;  %v5418_v24 = vshll.u32 %v11981_v16, 16  ;;  %v5422_v56 = vshrl.u32 %v11981_v16, 16  ;;  %vm12010_vm6 = vmand %vm4941_vm0, %vm4971_vm1  ;;  %v5753_v11 = vld [vmem:[#allocation3 + $0x48] sm:$0xe]  ;;  %6504 = vmatpush.bf16.msrb.mxu2 %v9558_v63 }
 0x33b   : > { %v4622_v17 = vpop.f32.mrf.mxu0  ;;  %v3540_v33 = vadd.f32 %v11847_v60, %v3177_v32  ;;  %v6211_v36 = vrot.slane %v6209_v53, 4  ;;  %v6214_v60 = vrot.slane %v6212_v48, 5  ;;  %v4217_v7 = vadd.f32 %v11817_v12, %v3538_v28  ;;  %vm12020_vm7 = vmand %vm4942_vm2, %vm4972_vm3  ;;  %v9569_v25 = vld [vmem:[%s12757_s2 + $0x158] sm:$0xff] }
 0x33c   : > { %v5090_v30 = vsel %vm5000_vm15, %v4847_v6, 0.0  ;;  %v4694_v26 = vadd.f32 %v4622_v17, %v4215_v35  ;;  %v5707_v35 = vpop.f32.mrf.mxu2  ;;  %v9570_v6 = vld [vmem:[%s12757_s2 + $0x160] sm:$0xff]  ;;  %v6218_v54 = vshll.u32 %v11990_v5, 16  ;;  %v6222_v44 = vshrl.u32 %v11990_v5, 16 }
 0x33d   : > { %v9659_v58 = vpack.c.bf16 %v5090_v30, %v5089_v38  ;;  %6750 = vmatpush.bf16.msrb.mxu3 %v9570_v6  ;;  %v5420_v32 = vrot.slane %v5418_v24, 5  ;;  %v5424_v12 = vrot.slane %v5422_v56, 4  ;;  %v5815_v28 = vrot.slane %v11981_v16, 5 }
 0x33e   : > { %v4786_v29 = vmul.f32 %v11762_v51, %v4694_v26  ;;  %v4882_v24 = vadd.s32 200, %v11318_v8  ;;  %v12038_v56 = vrot.slane %v6218_v54, 5  ;;  %v12040_v6 = vrot.slane %v6222_v44, 4 }
 0x33f   : > { %9690 = vst [vmem:[#allocation3 + $0x50] sm:$0xff] %v9659_v58   ;;  %v9516_v3 = vld [vmem:[#allocation3 + $0x48] sm:$0xff]  ;;  %v12043_v16 = vadd.f32 %v11882_v23, %v3178_v45 }
 0x340   : > { %v9578_v13 = vld [vmem:[#allocation3 + $0x48] sm:$0xff]  ;;  %5736 = vmatmul.bf16.gmra.mxu2 %v9516_v3  ;;  %v4818_v39 = vadd.f32 %v11780_v34, %v4786_v29  ;;  %v12858_v29 = vld [vmem:[#allocation17_spill] sm:$0xff] }
 0x341   : > { %v5236_v15 = vld [vmem:[#allocation3 + $0x48] sm:$0xf]  ;;  %6970 = vmatmul.bf16.gmra.mxu0 %v9578_v13  ;;  %6751 = vmatpush.bf16.msrb.mxu3 %v9569_v25 }
 0x342   : > { %v5409_v9 = vshrl.u32 %v5236_v15, 16  ;;  %v5412_v1 = vshll.u32 %v5236_v15, 16  ;;  %v4848_v42 = vmax.f32 %v4818_v39, 0.0  ;;  %v3179_v15 = vadd.f32 %v11924_v47, %v12858_v29 }
 0x343   : > { %v4624_v10 = vpop.f32.mrf.mxu0 }
 0x344   : > { %v4695_v22 = vadd.f32 %v4624_v10, %v4216_v20  ;;  %v5411_v38 = vrot.slane %v5409_v9, 4  ;;  %v5414_v30 = vrot.slane %v5412_v1, 5  ;;  %v4881_v9 = vadd.s32 192, %v11318_v8 }
 0x345   : > { %v8937_v1 = vrot.slane %v5753_v11, 9  ;;  %v6215_v10 = vor.u32 %v6214_v60, %v6211_v36  ;;  %v5091_v53 = vsel %vm12010_vm6, %v4848_v42, 0.0 }
 0x346   : > { %v5212_v55 = vld [vmem:[#allocation3 + $0x50] sm:$0x1]  ;;  %v4787_v17 = vmul.f32 %v11762_v51, %v4695_v22  ;;  %v5183_v26 = vld [vmem:[#allocation3 + $0x54] sm:$0x1]  ;;  %v5415_v47 = vor.u32 %v5414_v30, %v5411_v38  ;;  %v5425_v38 = vor.u32 %v5424_v12, %v5420_v32 }
 0x347   : > { %v5213_v52 = vsel %vm11447_vm8, 0, %v5212_v55  ;;  %v5562_v58 = vpop.f32.mrf.mxu1  ;;  %v5184_v27 = vsel %vm11403_vm14, 0, %v5183_v26  ;;  %v12046_v55 = vadd.f32 %v11919_v19, %v3179_v15  ;;  %v12048_v30 = vld [vmem:[#allocation3 + $0x14] sm:$0x1]  ;;  %v4218_v26 = vadd.f32 %v11842_v18, %v11985_v37 }
 0x348   : > { %5214 = vst [vmem:[#allocation3 + $0x50] sm:$0x1] %v5213_v52  ;;  %v4819_v13 = vadd.f32 %v11780_v34, %v4787_v17  ;;  %v5708_v40 = vadd.f32 %v5707_v35, %v5562_v58  ;;  %v5416_v17 = vrot.slane %v5415_v47, 4  ;;  %v12053_v52 = vadd.f32 %v11866_v4, %v3540_v33  ;;  %v12055_v58 = vpop.f32.mrf.mxu2 }
 0x349   : > { %5185 = vst [vmem:[#allocation3 + $0x54] sm:$0x1] %v5184_v27  ;;  %v4913_v27 = vadd.s32 %v11332_v14, %v4881_v9  ;;  %v5817_v19 = vrot.slane %v5815_v28, 4  ;;  %v5816_v60 = vsel %vm9983_vm5, %v8937_v1, %v5815_v28  ;;  %v4914_v4 = vadd.s32 %v11332_v14, %v4882_v24 }
 0x34a   : > { %v4849_v41 = vmax.f32 %v4819_v13, 0.0  ;;  %v6216_v37 = vrot.slane %v6215_v10, 4  ;;  %v6225_v33 = vor.u32 %v12040_v6, %v12038_v56  ;;  %v6228_v42 = vshll.u32 %v12048_v30, 16 }
 0x34b   : > { %v5933_v20 = vpop.f32.mrf.mxu3  ;;  %v4627_v43 = vpop.f32.mrf.mxu0  ;;  %v5421_v13 = vsel %vm9969_vm4, %v5416_v17, %v5420_v32  ;;  %vm4943_vm9 = vcmp.ge.s32.totalorder %v4913_v27, 24  ;;  %vm4973_vm10 = vcmp.lt.s32.totalorder %v4913_v27, 408  ;;  %vm4944_vm11 = vcmp.ge.s32.totalorder %v4914_v4, 24 }
 0x34c   : > { %v5092_v48 = vsel %vm12020_vm7, %v4849_v41, 0.0  ;;  %v12035_v39 = vadd.f32 %v5933_v20, %v5708_v40  ;;  %v4696_v22 = vadd.f32 %v4627_v43, %v4217_v7  ;;  %v5426_v40 = vrot.slane %v5425_v38, 4  ;;  %v12076_v43 = vld [vmem:[#allocation3 + $0x18] sm:$0xf]  ;;  %vm12089_vm12 = vmand %vm4943_vm9, %vm4973_vm10 }
 0x34d   : > { %v9664_v35 = vpack.c.bf16 %v5092_v48, %v5091_v53  ;;  %v5856_v7 = vunpack.c.l.b16 %v5816_v60  ;;  %v5485_v20 = vunpack.c.l.b16 %v5421_v13  ;;  %vm4974_vm13 = vcmp.lt.s32.totalorder %v4914_v4, 408 }
 0x34e   : > { %v4788_v36 = vmul.f32 %v11762_v51, %v4696_v22  ;;  %v6221_v53 = vsel %vm9969_vm4, %v6216_v37, %v12038_v56  ;;  %vm12103_vm15 = vmand %vm4944_vm11, %vm4974_vm13  ;;  %v6226_v37 = vrot.slane %v6225_v33, 4 }
 0x34f   : > { %9691 = vst [vmem:[#allocation3 + $0x58] sm:$0xff] %v9664_v35   ;;  %v12058_v23 = vpop.f32.mrf.mxu1  ;;  %v5262_v63 = vld [vmem:[#allocation3 + $0x50] sm:$0x1] }
 0x350   : > { %v5818_v0 = vrot.slane %v5262_v63, 5  ;;  %v5428_v45 = vshll.u32 %v5262_v63, 16  ;;  %v5238_v18 = vld [vmem:[#allocation3 + $0x54] sm:$0xf]  ;;  %v4820_v44 = vadd.f32 %v11780_v34, %v4788_v36  ;;  %v5712_v22 = vpop.f32.mrf.mxu2 }
 0x351   : > { %v5433_v25 = vshrl.u32 %v5238_v18, 16  ;;  %v5436_v54 = vshll.u32 %v5238_v18, 16 }
 0x352   : > { %v5819_v3 = vsel %vm9983_vm5, %v5817_v19, %v5818_v0  ;;  %v5430_v11 = vrot.slane %v5428_v45, 5  ;;  %v4850_v63 = vmax.f32 %v4820_v44, 0.0  ;;  %v9568_v0 = vld [vmem:[%s12757_s2 + $0x150] sm:$0xff]  ;;  %v12099_v45 = vadd.f32 %v11905_v21, %v12043_v16  ;;  %v9567_v21 = vld [vmem:[%s12757_s2 + $0x148] sm:$0xff] }
 0x353   : > { %v12071_v29 = vpop.f32.mrf.mxu3  ;;  %v4629_v15 = vpop.f32.mrf.mxu0  ;;  %v5857_v50 = vunpack.c.l.b16 %v5819_v3  ;;  %v5435_v17 = vrot.slane %v5433_v25, 4  ;;  %v5438_v38 = vrot.slane %v5436_v54, 5  ;;  %v6230_v3 = vrot.slane %v6228_v42, 5  ;;  %6752 = vmatpush.bf16.msrb.mxu3 %v9568_v0  ;;  %v12114_v54 = vld [vmem:[#allocation3 + $0x1c] sm:$0xf] }
 0x354   : > { %v4697_v41 = vadd.f32 %v4629_v15, %v4218_v26  ;;  %v5431_v47 = vsel %vm9969_vm4, %v5426_v40, %v5430_v11  ;;  %v9550_v26 = vld [vmem:[%s12757_s2 + $0xc0] sm:$0xff]  ;;  %v5754_v40 = vld [vmem:[#allocation3 + $0x54] sm:$0xe]  ;;  %v12107_v15 = vunpack.c.l.b16 %v6221_v53  ;;  %v6233_v16 = vshrl.u32 %v12076_v43, 16 }
 0x355   : > { %v5866_v12 = vpack.c.b16 %v5857_v50, %v5856_v7  ;;  %v5486_v32 = vunpack.c.l.b16 %v5431_v47  ;;  %6126 = vmatpush.bf16.msrb.mxu1 %v9550_v26  ;;  %v4883_v50 = vadd.s32 208, %v11318_v8  ;;  %v5439_v33 = vor.u32 %v5438_v38, %v5435_v17 }
 0x356   : > { %v5215_v9 = vld [vmem:[#allocation3 + $0x5c] sm:$0x1]  ;;  %v4789_v1 = vmul.f32 %v11762_v51, %v4697_v41  ;;  %v9517_v28 = vld [vmem:[#allocation3 + $0x54] sm:$0xff]  ;;  %v5093_v44 = vsel %vm12089_vm12, %v4850_v63, 0.0  ;;  %v6596_v53 = vrot.slane %v11990_v5, 5  ;;  %v9566_v63 = vld [vmem:[%s12757_s2 + $0x140] sm:$0xff] }
 0x357   : > { %v9579_v10 = vld [vmem:[#allocation3 + $0x54] sm:$0xff]  ;;  %v5216_v48 = vsel %vm11447_vm8, 0, %v5215_v9  ;;  %v5567_v35 = vpop.f32.mrf.mxu1  ;;  %5962 = vmatmul.bf16.gmra.mxu3 %v5866_v12  ;;  %v5495_v24 = vpack.c.b16 %v5486_v32, %v5485_v20  ;;  %5741 = vmatmul.bf16.gmra.mxu2 %v9517_v28  ;;  %v4884_v32 = vadd.s32 216, %v11318_v8  ;;  %v8938_v9 = vrot.slane %v5754_v40, 9 }
 0x358   : > { %v5239_v6 = vld [vmem:[#allocation3 + $0x58] sm:$0xf]  ;;  %5217 = vst [vmem:[#allocation3 + $0x5c] sm:$0x1] %v5216_v48  ;;  %v4821_v19 = vadd.f32 %v11780_v34, %v4789_v1  ;;  %v5713_v36 = vadd.f32 %v5712_v22, %v5567_v35  ;;  %6975 = vmatmul.bf16.gmra.mxu0 %v9579_v10  ;;  %v6236_v1 = vshll.u32 %v12076_v43, 16  ;;  %v6231_v10 = vsel %vm9969_vm4, %v6226_v37, %v6230_v3 }
 0x359   : > { %v5442_v60 = vshll.u32 %v5239_v6, 16  ;;  %5591 = vmatmul.bf16.gmra.mxu1 %v5495_v24  ;;  %v5446_v18 = vshrl.u32 %v5239_v6, 16  ;;  %v5822_v25 = vrot.slane %v5239_v6, 5  ;;  %6753 = vmatpush.bf16.msrb.mxu3 %v9567_v21  ;;  %v6242_v48 = vshll.u32 %v12114_v54, 16 }
 0x35a   : > { %v4851_v13 = vmax.f32 %v4821_v19, 0.0  ;;  %v4915_v22 = vadd.s32 %v11332_v14, %v4883_v50  ;;  %v5440_v24 = vrot.slane %v5439_v33, 4  ;;  %v6246_v6 = vshrl.u32 %v12114_v54, 16 }
 0x35b   : > { %v5444_v11 = vrot.slane %v5442_v60, 5  ;;  %v5938_v4 = vpop.f32.mrf.mxu3  ;;  %v4632_v7 = vpop.f32.mrf.mxu0  ;;  %v5448_v42 = vrot.slane %v5446_v18, 4  ;;  %v5824_v17 = vrot.slane %v5822_v25, 4  ;;  %v4916_v56 = vadd.s32 %v11332_v14, %v4884_v32 }
 0x35c   : > { %v5094_v41 = vsel %vm12103_vm15, %v4851_v13, 0.0  ;;  %v12120_v47 = vadd.f32 %v5938_v4, %v5713_v36  ;;  %v4698_v12 = vadd.f32 %v4632_v7, %v12053_v52  ;;  %v5823_v52 = vsel %vm9983_vm5, %v8938_v9, %v5822_v25  ;;  %v12153_v25 = vld [vmem:[#allocation3 + $0x20] sm:$0x1]  ;;  %v6562_v9 = vld [vmem:[#allocation3 + $0xc] sm:$0xe] }
 0x35d   : > { %v9669_v20 = vpack.c.bf16 %v5094_v41, %v5093_v44  ;;  %v5449_v28 = vor.u32 %v5448_v42, %v5444_v11  ;;  %v6418_v19 = vunpack.c.l.b16 %v6231_v10  ;;  %v12138_v36 = vrot.slane %v6233_v16, 4  ;;  %6754 = vmatpush.bf16.msrb.mxu3 %v9566_v63  ;;  %v9766_v16 = vld [vmem:[%s12757_s2 + $0x1b8] sm:$0xff] }
 0x35e   : > { %v4790_v43 = vmul.f32 %v11762_v51, %v4698_v12  ;;  %v6238_v60 = vrot.slane %v6236_v1, 5  ;;  %v5445_v27 = vsel %vm9969_vm4, %v5440_v24, %v5444_v11  ;;  %v5858_v13 = vunpack.c.l.b16 %v5823_v52 }
 0x35f   : > { %9692 = vst [vmem:[#allocation3 + $0x60] sm:$0xff] %v9669_v20   ;;  %v5263_v35 = vld [vmem:[#allocation3 + $0x5c] sm:$0x1]  ;;  %v5450_v18 = vrot.slane %v5449_v28, 4  ;;  %v12144_v21 = vrot.slane %v6242_v48, 5  ;;  %v6248_v4 = vrot.slane %v6246_v6, 4  ;;  %v5487_v42 = vunpack.c.l.b16 %v5445_v27 }
 0x360   : > { %v5825_v38 = vrot.slane %v5263_v35, 5  ;;  %v5452_v26 = vshll.u32 %v5263_v35, 16  ;;  %v4822_v7 = vadd.f32 %v11780_v34, %v4790_v43  ;;  %vm4945_vm0 = vcmp.ge.s32.totalorder %v4915_v22, 24  ;;  %v9605_v48 = vld [vmem:[%s12757_s2 + $0x238] sm:$0xff] }
 0x361   : > { %9711 = vmatpush.bf16.msra.mxu3 %v9766_v16  ;;  %vm4975_vm1 = vcmp.lt.s32.totalorder %v4915_v22, 408  ;;  %vm4946_vm2 = vcmp.ge.s32.totalorder %v4916_v56, 24  ;;  %vm4976_vm3 = vcmp.lt.s32.totalorder %v4916_v56, 408  ;;  %v6433_v12 = vpack.c.b16 %v6418_v19, %v12107_v15  ;;  %v9767_v22 = vld [vmem:[%s12757_s2 + $0x1b0] sm:$0xff]  ;;  %7570 = vmatpush.bf16.msra.mxu2 %v9605_v48 }
 0x362   : > { %v5826_v0 = vsel %vm9983_vm5, %v5824_v17, %v5825_v38  ;;  %v5454_v37 = vrot.slane %v5452_v26, 5  ;;  %v6599_v1 = vrot.slane %v12048_v30, 5  ;;  %v6252_v28 = vshll.u32 %v12153_v25, 16  ;;  %vm12163_vm6 = vmand %vm4945_vm0, %vm4975_vm1  ;;  %v9597_v30 = vld [vmem:[%s12757_s2 + $0x1f8] sm:$0xff]  ;;  %v9604_v17 = vld [vmem:[%s12757_s2 + $0x230] sm:$0xff] }
 0x363   : > { %v4634_v3 = vpop.f32.mrf.mxu0  ;;  %v5859_v40 = vunpack.c.l.b16 %v5826_v0  ;;  %v4852_v10 = vmax.f32 %v4822_v7, 0.0  ;;  %v6239_v35 = vor.u32 %v6238_v60, %v12138_v36  ;;  %vm12180_vm7 = vmand %vm4946_vm2, %vm4976_vm3  ;;  %v6598_v52 = vrot.slane %v6596_v53, 4  ;;  %7320 = vmatpush.bf16.msra.mxu1 %v9597_v30  ;;  %v9596_v38 = vld [vmem:[%s12757_s2 + $0x1f0] sm:$0xff]  ;;  %v12869_v26 = vld [vmem:[#allocation18_spill] sm:$0xff] }
 0x364   : > { %v4699_v50 = vadd.f32 %v4634_v3, %v12099_v45  ;;  %v5455_v11 = vsel %vm9969_vm4, %v5450_v18, %v5454_v37  ;;  %v6249_v24 = vor.u32 %v6248_v4, %v12144_v21  ;;  %v4221_v6 = vadd.f32 %v11942_v31, %v12046_v55  ;;  %v12199_v55 = vpop.f32.mrf.mxu2  ;;  %v12209_v4 = vpop.f32.mrf.mxu1 }
 0x365   : > { %v5867_v33 = vpack.c.b16 %v5859_v40, %v5858_v13  ;;  %v5488_v44 = vunpack.c.l.b16 %v5455_v11  ;;  %9712 = vmatpush.bf16.msra.mxu3 %v9767_v22  ;;  %v3180_v63 = vadd.f32 %v11963_v2, %v12869_v26  ;;  %v9115_v19 = vrot.slane %v6562_v9, 9  ;;  %v9768_v2 = vld [vmem:[%s12757_s2 + $0x1a8] sm:$0xff]  ;;  %v6190_v40 = vld [vmem:[#allocation3 + $0x24] sm:$0xf]  ;;  %7571 = vmatpush.bf16.msra.mxu2 %v9604_v17  ;;  %v9771_v22 = vld [vmem:[%s12758_s3 + $0x1] ss:$0 sm:$0xff] }
 0x366   : > { %v4791_v41 = vmul.f32 %v11762_v51, %v4699_v50  ;;  %v5186_v20 = vld [vmem:[#allocation3 + $0x60] sm:$0x1]  ;;  %v6600_v36 = vsel %vm9983_vm5, %v6598_v52, %v6599_v1  ;;  %v6254_v31 = vrot.slane %v6252_v28, 5  ;;  %v5095_v60 = vsel %vm12163_vm6, %v4852_v10, 0.0  ;;  %v12216_v50 = vld [vmem:[#allocation3 + $0x28] sm:$0xf]  ;;  %v12234_v28 = vpop.f32.mrf.mxu3 }
 0x367   : > { %5967 = vmatmul.bf16.gmra.mxu3 %v5867_v33  ;;  %v5496_v32 = vpack.c.b16 %v5488_v44, %v5487_v42  ;;  %v5187_v45 = vsel %vm11403_vm14, 0, %v5186_v20  ;;  %6505 = vmatmul.bf16.vlgmr.msrb.gmra.mxu2 %v6433_v12  ;;  %v6240_v18 = vrot.slane %v6239_v35, 4  ;;  %v4885_v3 = vadd.s32 224, %v11318_v8 }
 0x368   : > { %v4823_v15 = vadd.f32 %v11780_v34, %v4791_v41  ;;  %5188 = vst [vmem:[#allocation3 + $0x60] sm:$0x1] %v5187_v45  ;;  %v6250_v13 = vrot.slane %v6249_v24, 4  ;;  %v4886_v16 = vadd.s32 232, %v11318_v8  ;;  %v6597_v7 = vsel %vm9983_vm5, %v9115_v19, %v6596_v53  ;;  %7321 = vmatpush.bf16.msra.mxu1 %v9596_v38  ;;  %v9769_v8 = vld [vmem:[%s12758_s3] ss:$0 sm:$0xff] }
 0x369   : > { %5596 = vmatmul.bf16.gmra.mxu1 %v5496_v32  ;;  %9713 = vmatpush.bf16.msra.mxu3 %v9768_v2  ;;  %v3543_v11 = vadd.f32 %v11953_v57, %v3180_v63  ;;  %v6668_v42 = vunpack.c.l.b16 %v6600_v36  ;;  %v6245_v53 = vsel %vm9969_vm4, %v6240_v18, %v12144_v21  ;;  %v6257_v41 = vshrl.u32 %v6190_v40, 16  ;;  %v9770_v57 = vld [vmem:[%s12757_s2 + $0x1a0] sm:$0xff]  ;;  %v12241_v24 = vld [vmem:[#allocation3 + $0x2c] sm:$0x1] }
 0x36a   : > { %v4853_v43 = vmax.f32 %v4823_v15, 0.0  ;;  %v6255_v44 = vsel %vm9969_vm4, %v6250_v13, %v6254_v31  ;;  %v6260_v12 = vshll.u32 %v6190_v40, 16  ;;  %v4917_v20 = vadd.s32 %v11332_v14, %v4885_v3  ;;  %v9773_v13 = vld [vmem:[%s12757_s2 + $0x190] sm:$0xff] }
 0x36b   : > { %v4637_v56 = vpop.f32.mrf.mxu0  ;;  %v6667_v32 = vunpack.c.l.b16 %v6597_v7  ;;  %v6266_v45 = vshll.u32 %v12216_v50, 16  ;;  %v6270_v9 = vshrl.u32 %v12216_v50, 16  ;;  %v4222_v1 = vadd.f32 %v11987_v46, %v3543_v11  ;;  %v9595_v7 = vld [vmem:[%s12757_s2 + $0x1e8] sm:$0xff] }
 0x36c   : > { %v5096_v0 = vsel %vm12180_vm7, %v4853_v43, 0.0  ;;  %v4700_v27 = vadd.f32 %v4637_v56, %v4221_v6  ;;  %v4918_v21 = vadd.s32 %v11332_v14, %v4886_v16  ;;  %v6420_v10 = vunpack.c.l.b16 %v6255_v44  ;;  %v5717_v30 = vpop.f32.mrf.mxu2  ;;  %v9603_v14 = vld [vmem:[%s12757_s2 + $0x228] sm:$0xff]  ;;  %v9772_v43 = vld [vmem:[%s12757_s2 + $0x198] sm:$0xff]  ;;  %7322 = vmatpush.bf16.msra.mxu1 %v9595_v7 }
 0x36d   : > { %v9674_v37 = vpack.c.bf16 %v5096_v0, %v5095_v60  ;;  %9714 = vmatpush.bf16.msra.mxu3 %v9770_v57  ;;  %v6683_v15 = vpack.c.b16 %v6668_v42, %v6667_v32  ;;  %v6419_v48 = vunpack.c.l.b16 %v6245_v53  ;;  %v6603_v35 = vrot.slane %v12114_v54, 5  ;;  %7572 = vmatpush.bf16.msra.mxu2 %v9603_v14 }
 0x36e   : > { %v4792_v5 = vmul.f32 %v9769_v8, %v4700_v27  ;;  %v6259_v46 = vrot.slane %v6257_v41, 4  ;;  %v6262_v6 = vrot.slane %v6260_v12, 5  ;;  %vm4947_vm9 = vcmp.ge.s32.totalorder %v4917_v20, 24  ;;  %v9542_v27 = vld [vmem:[#allocation3 + $0xc] sm:$0xff] }
 0x36f   : > { %9693 = vst [vmem:[#allocation3 + $0x68] sm:$0xff] %v9674_v37   ;;  %v9580_v33 = vld [vmem:[#allocation3 + $0x60] sm:$0xff]  ;;  %vm4977_vm10 = vcmp.lt.s32.totalorder %v4917_v20, 408  ;;  %v12249_v17 = vrot.slane %v6266_v45, 5  ;;  %v6272_v38 = vrot.slane %v6270_v9, 4  ;;  %vm4948_vm11 = vcmp.ge.s32.totalorder %v4918_v21, 24 }
 0x370   : > { %6980 = vmatmul.bf16.gmra.mxu0 %v9580_v33  ;;  %v4824_v34 = vadd.f32 %v9771_v22, %v4792_v5  ;;  %vm4978_vm13 = vcmp.lt.s32.totalorder %v4918_v21, 408  ;;  %v6434_v36 = vpack.c.b16 %v6420_v10, %v6419_v48  ;;  %v6276_v18 = vshll.u32 %v12241_v24, 16  ;;  %vm12258_vm12 = vmand %vm4947_vm9, %vm4977_vm10  ;;  %v9774_v12 = vld [vmem:[%s12757_s2 + $0x188] sm:$0xff]  ;;  %v6193_v21 = vld [vmem:[#allocation3 + $0x30] sm:$0xf] }
 0x371   : > { %9715 = vmatpush.bf16.msra.mxu3 %v9772_v43  ;;  %v6606_v40 = vrot.slane %v12153_v25, 5  ;;  %v6273_v16 = vor.u32 %v6272_v38, %v12249_v17  ;;  %v6263_v42 = vor.u32 %v6262_v6, %v6259_v46  ;;  %v6605_v5 = vrot.slane %v6603_v35, 4  ;;  %v12287_v10 = vld [vmem:[#allocation3 + $0x34] sm:$0xf]  ;;  %v9602_v43 = vld [vmem:[%s12757_s2 + $0x220] sm:$0xff]  ;;  %v9543_v37 = vld [vmem:[#allocation3 + $0x18] sm:$0xff] }
 0x372   : > { %v4854_v2 = vmax.f32 %v4824_v34, 0.0  ;;  %v6278_v53 = vrot.slane %v6276_v18, 5  ;;  %v6281_v34 = vshrl.u32 %v6193_v21, 16  ;;  %v6290_v54 = vshll.u32 %v12287_v10, 16  ;;  %7573 = vmatpush.bf16.msra.mxu2 %v9602_v43 }
 0x373   : > { %v4639_v51 = vpop.f32.mrf.mxu0  ;;  %v6607_v20 = vsel %vm9983_vm5, %v6605_v5, %v6606_v40  ;;  %v6274_v32 = vrot.slane %v6273_v16, 4  ;;  %v6294_v46 = vshrl.u32 %v12287_v10, 16  ;;  %v9594_v16 = vld [vmem:[%s12757_s2 + $0x1e0] sm:$0xff]  ;;  %v6613_v62 = vrot.slane %v12241_v24, 5 }
 0x374   : > { %v4701_v52 = vadd.f32 %v4639_v51, %v4222_v1  ;;  %v5097_v25 = vsel %vm12258_vm12, %v4854_v2, 0.0  ;;  %v12283_v45 = vpop.f32.mrf.mxu2  ;;  %v6264_v1 = vrot.slane %v6263_v42, 4  ;;  %v6670_v48 = vunpack.c.l.b16 %v6607_v20  ;;  %7323 = vmatpush.bf16.msra.mxu1 %v9594_v16 }
 0x375   : > { %9716 = vmatpush.bf16.msra.mxu3 %v9773_v13 }
 0x376   : > { %v5189_v26 = vld [vmem:[#allocation3 + $0x6c] sm:$0x1]  ;;  %v5218_v63 = vld [vmem:[#allocation3 + $0x68] sm:$0x1]  ;;  %v4793_v56 = vmul.f32 %v9769_v8, %v4701_v52  ;;  %v5572_v19 = vpop.f32.mrf.mxu1  ;;  %v9116_v8 = vrot.slane %v6563_v61, 9  ;;  %v6284_v52 = vshll.u32 %v6193_v21, 16 }
 0x377   : > { %v5190_v31 = vsel %vm11403_vm14, 0, %v5189_v26  ;;  %v5219_v60 = vsel %vm11447_vm8, 0, %v5218_v63  ;;  %v5718_v0 = vadd.f32 %v5717_v30, %v5572_v19  ;;  %6755 = vmatmul.bf16.vlgmr.msrb.gmra.mxu3 %v6683_v15  ;;  %6510 = vmatmul.bf16.gmra.mxu2 %v6434_v36  ;;  %vm5008_vm14 = vmand %vm4948_vm11, %vm4978_vm13  ;;  %v6279_v15 = vsel %vm9969_vm4, %v6274_v32, %v6278_v53  ;;  %v12308_v26 = vld [vmem:[#allocation3 + $0x38] sm:$0x1] }
 0x378   : > { %5191 = vst [vmem:[#allocation3 + $0x6c] sm:$0x1] %v5190_v31  ;;  %v4825_v3 = vadd.f32 %v9771_v22, %v4793_v56  ;;  %v6604_v51 = vsel %vm9983_vm5, %v9116_v8, %v6603_v35  ;;  %v6269_v30 = vsel %vm9969_vm4, %v6264_v1, %v12249_v17  ;;  %v9775_v22 = vld [vmem:[%s12757_s2 + $0x180] sm:$0xff]  ;;  %v6422_v14 = vunpack.c.l.b16 %v6279_v15 }
 0x379   : > { %5220 = vst [vmem:[#allocation3 + $0x68] sm:$0x1] %v5219_v60  ;;  %6127 = vmatmul.bf16.vlgmr.msrb.gmra.mxu1 %v9542_v27  ;;  %9717 = vmatpush.bf16.msra.mxu3 %v9774_v12  ;;  %v6669_v6 = vunpack.c.l.b16 %v6604_v51  ;;  %v6421_v38 = vunpack.c.l.b16 %v6269_v30  ;;  %v6283_v63 = vrot.slane %v6281_v34, 4  ;;  %v6286_v56 = vrot.slane %v6284_v52, 5  ;;  %v12335_v52 = vld [vmem:[#allocation3 + $0x44] sm:$0x1] }
 0x37a   : > { %v4855_v11 = vmax.f32 %v4825_v3, 0.0  ;;  %v5943_v33 = vpop.f32.mrf.mxu3  ;;  %v6292_v19 = vrot.slane %v6290_v54, 5  ;;  %v6296_v36 = vrot.slane %v6294_v46, 4  ;;  %v6300_v3 = vshll.u32 %v12308_v26, 16 }
 0x37b   : > { %v12272_v44 = vadd.f32 %v5943_v33, %v5718_v0  ;;  %v6684_v17 = vpack.c.b16 %v6670_v48, %v6669_v6  ;;  %v6435_v27 = vpack.c.b16 %v6422_v14, %v6421_v38  ;;  %v6610_v61 = vrot.slane %v12216_v50, 5  ;;  %v6564_v33 = vld [vmem:[#allocation3 + $0x24] sm:$0xe] }
 0x37c   : > { %v5098_v41 = vsel %vm5008_vm14, %v4855_v11, 0.0  ;;  %v5722_v60 = vpop.f32.mrf.mxu2  ;;  %v6287_v13 = vor.u32 %v6286_v56, %v6283_v63  ;;  %v6297_v40 = vor.u32 %v6296_v36, %v6292_v19  ;;  %v6302_v42 = vrot.slane %v6300_v3, 5  ;;  %v9544_v38 = vld [vmem:[#allocation3 + $0x24] sm:$0xff] }
 0x37d   : > { %v9679_v57 = vpack.c.bf16 %v5098_v41, %v5097_v25  ;;  %9718 = vmatpush.bf16.msra.mxu3 %v9775_v22  ;;  %v6612_v8 = vrot.slane %v6610_v61, 4  ;;  %v9117_v25 = vrot.slane %v6564_v33, 9  ;;  %v12322_v41 = vld [vmem:[#allocation3 + $0x40] sm:$0xf]  ;;  %v9601_v22 = vld [vmem:[%s12757_s2 + $0x218] sm:$0xff]  ;;  %v6617_v63 = vrot.slane %v12287_v10, 5 }
 0x37e   : > { %v12285_v9 = vpop.f32.mrf.mxu1  ;;  %v6288_v5 = vrot.slane %v6287_v13, 4  ;;  %v6298_v53 = vrot.slane %v6297_v40, 4  ;;  %v6314_v1 = vshll.u32 %v12322_v41, 16  ;;  %v6318_v21 = vshrl.u32 %v12322_v41, 16  ;;  %7574 = vmatpush.bf16.msra.mxu2 %v9601_v22  ;;  %v12349_v40 = vld [vmem:[#allocation3 + $0x4c] sm:$0xf] }
 0x37f   : > { %9694 = vst [vmem:[#allocation3 + $0x70] sm:$0xff] %v9679_v57   ;;  %v6614_v50 = vsel %vm9983_vm5, %v6612_v8, %v6613_v62  ;;  %v6196_v57 = vld [vmem:[#allocation3 + $0x3c] sm:$0xf]  ;;  %v6611_v24 = vsel %vm9983_vm5, %v9117_v25, %v6610_v61  ;;  %v6324_v56 = vshll.u32 %v12335_v52, 16  ;;  %v6620_v36 = vrot.slane %v12308_v26, 5 }
 0x380   : > { %v6303_v12 = vsel %vm9969_vm4, %v6298_v53, %v6302_v42  ;;  %v6672_v20 = vunpack.c.l.b16 %v6614_v50  ;;  %v6293_v32 = vsel %vm9969_vm4, %v6288_v5, %v6292_v19  ;;  %v6305_v15 = vshrl.u32 %v6196_v57, 16  ;;  %v6565_v19 = vld [vmem:[#allocation3 + $0x30] sm:$0xe]  ;;  %v6199_v26 = vld [vmem:[#allocation3 + $0x48] sm:$0xf] }
 0x381   : > { %v6424_v51 = vunpack.c.l.b16 %v6303_v12  ;;  %v6308_v48 = vshll.u32 %v6196_v57, 16  ;;  %v6671_v30 = vunpack.c.l.b16 %v6611_v24  ;;  %v6423_v34 = vunpack.c.l.b16 %v6293_v32  ;;  %v12361_v32 = vld [vmem:[#allocation3 + $0x50] sm:$0x1] }
 0x382   : > { %v12303_v35 = vpop.f32.mrf.mxu3  ;;  %v6316_v46 = vrot.slane %v6314_v1, 5  ;;  %v6320_v6 = vrot.slane %v6318_v21, 4  ;;  %v6307_v43 = vrot.slane %v6305_v15, 4  ;;  %v6329_v42 = vshrl.u32 %v6199_v26, 16  ;;  %v9600_v1 = vld [vmem:[%s12757_s2 + $0x210] sm:$0xff] }
 0x383   : > { %v6685_v54 = vpack.c.b16 %v6672_v20, %v6671_v30  ;;  %v6436_v14 = vpack.c.b16 %v6424_v51, %v6423_v34  ;;  %v6332_v8 = vshll.u32 %v6199_v26, 16  ;;  %v6338_v5 = vshll.u32 %v12349_v40, 16  ;;  %7575 = vmatpush.bf16.msra.mxu2 %v9600_v1 }
 0x384   : > { %v6342_v53 = vshrl.u32 %v12349_v40, 16  ;;  %v6331_v21 = vrot.slane %v6329_v42, 4 }
 0x385   : > { %v6334_v51 = vrot.slane %v6332_v8, 5  ;;  %v6340_v15 = vrot.slane %v6338_v5, 5 }
 0x386   : > { %v5221_v31 = vld [vmem:[#allocation3 + $0x74] sm:$0x1]  ;;  %v5577_v0 = vpop.f32.mrf.mxu1 }
 0x387   : > { %v5222_v18 = vsel %vm11447_vm8, 0, %v5221_v31  ;;  %v5723_v2 = vadd.f32 %v5722_v60, %v5577_v0  ;;  %6760 = vmatmul.bf16.gmra.mxu3 %v6684_v17  ;;  %6515 = vmatmul.bf16.gmra.mxu2 %v6435_v27  ;;  %v6310_v17 = vrot.slane %v6308_v48, 5  ;;  %v6321_v31 = vor.u32 %v6320_v6, %v6316_v46  ;;  %v9593_v60 = vld [vmem:[%s12757_s2 + $0x1d8] sm:$0xff] }
 0x388   : > { %5223 = vst [vmem:[#allocation3 + $0x74] sm:$0x1] %v5222_v18  ;;  %v9118_v27 = vrot.slane %v6565_v19, 9  ;;  %v6619_v18 = vrot.slane %v6617_v63, 4  ;;  %7324 = vmatpush.bf16.msra.mxu1 %v9593_v60  ;;  %v6344_v48 = vrot.slane %v6342_v53, 4  ;;  %v6624_v6 = vrot.slane %v12322_v41, 5 }
 0x389   : > { %6132 = vmatmul.bf16.gmra.mxu1 %v9543_v37  ;;  %v6311_v0 = vor.u32 %v6310_v17, %v6307_v43  ;;  %v12343_v37 = vpop.f32.mrf.mxu2  ;;  %v6322_v3 = vrot.slane %v6321_v31, 4  ;;  %v9592_v17 = vld [vmem:[%s12757_s2 + $0x1d0] sm:$0xff]  ;;  %v6566_v19 = vld [vmem:[#allocation3 + $0x3c] sm:$0xe]  ;;  %v9599_v41 = vld [vmem:[%s12757_s2 + $0x208] sm:$0xff] }
 0x38a   : > { %v5948_v7 = vpop.f32.mrf.mxu3  ;;  %v6621_v10 = vsel %vm9983_vm5, %v6619_v18, %v6620_v36  ;;  %v6618_v16 = vsel %vm9983_vm5, %v9118_v27, %v6617_v63  ;;  %v6345_v43 = vor.u32 %v6344_v48, %v6340_v15  ;;  %v6627_v63 = vrot.slane %v12335_v52, 5  ;;  %7576 = vmatpush.bf16.msra.mxu2 %v9599_v41 }
 0x38b   : > { %v12318_v11 = vadd.f32 %v5948_v7, %v5723_v2  ;;  %v6326_v2 = vrot.slane %v6324_v56, 5  ;;  %v6312_v13 = vrot.slane %v6311_v0, 4  ;;  %v6674_v62 = vunpack.c.l.b16 %v6621_v10  ;;  %v12383_v10 = vld [vmem:[#allocation3 + $0x58] sm:$0xf] }
 0x38c   : > { %v6673_v50 = vunpack.c.l.b16 %v6618_v16  ;;  %7325 = vmatpush.bf16.msra.mxu1 %v9592_v17  ;;  %v6626_v31 = vrot.slane %v6624_v6, 4  ;;  %v6346_v0 = vrot.slane %v6345_v43, 4  ;;  %v9591_v17 = vld [vmem:[%s12757_s2 + $0x1c8] sm:$0xff] }
 0x38d   : > { %v6327_v7 = vsel %vm9969_vm4, %v6322_v3, %v6326_v2  ;;  %v6317_v33 = vsel %vm9969_vm4, %v6312_v13, %v6316_v46  ;;  %v6348_v46 = vshll.u32 %v12361_v32, 16  ;;  %v9119_v2 = vrot.slane %v6566_v19, 9  ;;  %v6202_v13 = vld [vmem:[#allocation3 + $0x54] sm:$0xf] }
 0x38e   : > { %v12347_v61 = vpop.f32.mrf.mxu1  ;;  %v6426_v12 = vunpack.c.l.b16 %v6327_v7  ;;  %v6686_v24 = vpack.c.b16 %v6674_v62, %v6673_v50  ;;  %v6425_v20 = vunpack.c.l.b16 %v6317_v33  ;;  %v6628_v52 = vsel %vm9983_vm5, %v6626_v31, %v6627_v63 }
 0x38f   : > { %v6350_v36 = vrot.slane %v6348_v46, 5  ;;  %v6625_v26 = vsel %vm9983_vm5, %v9119_v2, %v6624_v6  ;;  %v6676_v16 = vunpack.c.l.b16 %v6628_v52  ;;  %v6362_v62 = vshll.u32 %v12383_v10, 16  ;;  %v6567_v6 = vld [vmem:[#allocation3 + $0x48] sm:$0xe]  ;;  %v6205_v52 = vld [vmem:[#allocation3 + $0x60] sm:$0xf] }
 0x390   : > { %v6437_v22 = vpack.c.b16 %v6426_v12, %v6425_v20  ;;  %v6366_v33 = vshrl.u32 %v12383_v10, 16  ;;  %v6353_v5 = vshrl.u32 %v6202_v13, 16  ;;  %v6356_v53 = vshll.u32 %v6202_v13, 16  ;;  %7326 = vmatpush.bf16.msra.mxu1 %v9591_v17 }
 0x391   : > { %v6351_v3 = vsel %vm9969_vm4, %v6346_v0, %v6350_v36  ;;  %v6675_v50 = vunpack.c.l.b16 %v6625_v26  ;;  %v6364_v20 = vrot.slane %v6362_v62, 5  ;;  %v9120_v36 = vrot.slane %v6567_v6, 9  ;;  %v12407_v0 = vld [vmem:[#allocation3 + $0x64] sm:$0xf] }
 0x392   : > { %v12359_v25 = vpop.f32.mrf.mxu3  ;;  %v6428_v8 = vunpack.c.l.b16 %v6351_v3  ;;  %v6368_v1 = vrot.slane %v6366_v33, 4  ;;  %v6386_v62 = vshll.u32 %v12407_v0, 16 }
 0x393   : > { %v5727_v57 = vpop.f32.mrf.mxu2 }
 0x394   : > { %v6369_v43 = vor.u32 %v6368_v1, %v6364_v20 }
 0x397   : > { %6765 = vmatmul.bf16.gmra.mxu3 %v6685_v54  ;;  %6520 = vmatmul.bf16.gmra.mxu2 %v6436_v14  ;;  %v9545_v54 = vld [vmem:[#allocation3 + $0x30] sm:$0xff]  ;;  %v6335_v14 = vor.u32 %v6334_v51, %v6331_v21 }
 0x399   : > { %6137 = vmatmul.bf16.gmra.mxu1 %v9544_v38  ;;  %v6336_v60 = vrot.slane %v6335_v14, 4  ;;  %v6634_v14 = vrot.slane %v12361_v32, 5 }
 0x39b   : > { %v12377_v27 = vpop.f32.mrf.mxu2  ;;  %v6341_v7 = vsel %vm9969_vm4, %v6336_v60, %v6340_v15  ;;  %v6355_v15 = vrot.slane %v6353_v5, 4  ;;  %v6370_v60 = vrot.slane %v6369_v43, 4  ;;  %v6380_v5 = vshll.u32 %v6205_v52, 16 }
 0x39c   : > { %v6427_v12 = vunpack.c.l.b16 %v6341_v7 }
 0x39e   : > { %v6438_v48 = vpack.c.b16 %v6428_v8, %v6427_v12  ;;  %v6377_v8 = vshrl.u32 %v6205_v52, 16 }
 0x3a6   : > { %v5582_v30 = vpop.f32.mrf.mxu1 }
 0x3a7   : > { %v5728_v34 = vadd.f32 %v5727_v57, %v5582_v30  ;;  %6770 = vmatmul.bf16.gmra.mxu3 %v6686_v24  ;;  %6525 = vmatmul.bf16.gmra.mxu2 %v6437_v22  ;;  %v12395_v57 = vld [vmem:[#allocation3 + $0x5c] sm:$0x1]  ;;  %v6687_v24 = vpack.c.b16 %v6676_v16, %v6675_v50  ;;  %v6358_v30 = vrot.slane %v6356_v53, 5  ;;  %v6390_v53 = vshrl.u32 %v12407_v0, 16 }
 0x3a8   : > { %v6372_v46 = vshll.u32 %v12395_v57, 16 }
 0x3a9   : > { %6142 = vmatmul.bf16.gmra.mxu1 %v9545_v54  ;;  %v6631_v54 = vrot.slane %v12349_v40, 5  ;;  %v6359_v63 = vor.u32 %v6358_v30, %v6355_v15  ;;  %v6207_v15 = vld [vmem:[#allocation3 + $0x68] sm:$0x1]  ;;  %v6382_v30 = vrot.slane %v6380_v5, 5 }
 0x3aa   : > { %v5953_v38 = vpop.f32.mrf.mxu3  ;;  %v5732_v21 = vpop.f32.mrf.mxu2  ;;  %v6374_v41 = vrot.slane %v6372_v46, 5  ;;  %v9547_v46 = vld [vmem:[#allocation3 + $0x48] sm:$0xff]  ;;  %v6396_v6 = vshll.u32 %v6207_v15, 16 }
 0x3ab   : > { %v12372_v56 = vadd.f32 %v5953_v38, %v5728_v34  ;;  %v9546_v34 = vld [vmem:[#allocation3 + $0x3c] sm:$0xff]  ;;  %v6633_v31 = vrot.slane %v6631_v54, 4  ;;  %v6360_v2 = vrot.slane %v6359_v63, 4  ;;  %v6632_v3 = vsel %vm9983_vm5, %v9120_v36, %v6631_v54 }
 0x3ac   : > { %v6375_v13 = vsel %vm9969_vm4, %v6370_v60, %v6374_v41  ;;  %v6677_v12 = vunpack.c.l.b16 %v6632_v3  ;;  %v9590_v63 = vld [vmem:[%s12757_s2 + $0x1c0] sm:$0xff]  ;;  %v6641_v36 = vrot.slane %v12395_v57, 5  ;;  %v6398_v41 = vrot.slane %v6396_v6, 5 }
 0x3ad   : > { %v6635_v40 = vsel %vm9983_vm5, %v6633_v31, %v6634_v14  ;;  %v6365_v7 = vsel %vm9969_vm4, %v6360_v2, %v6364_v20  ;;  %v6379_v20 = vrot.slane %v6377_v8, 4  ;;  %v6638_v14 = vrot.slane %v12383_v10, 5  ;;  %v6568_v31 = vld [vmem:[#allocation3 + $0x54] sm:$0xe]  ;;  %7327 = vmatpush.bf16.msra.mxu1 %v9590_v63 }
 0x3ae   : > { %v12379_v18 = vpop.f32.mrf.mxu1  ;;  %v6678_v16 = vunpack.c.l.b16 %v6635_v40  ;;  %v9121_v2 = vrot.slane %v6568_v31, 9 }
 0x3af   : > { %v6383_v17 = vor.u32 %v6382_v30, %v6379_v20  ;;  %v6640_v40 = vrot.slane %v6638_v14, 4  ;;  %v6648_v30 = vrot.slane %v6207_v15, 5 }
 0x3b0   : > { %v6639_v3 = vsel %vm9983_vm5, %v9121_v2, %v6638_v14 }
 0x3b1   : > { %v6384_v60 = vrot.slane %v6383_v17, 4  ;;  %v6642_v10 = vsel %vm9983_vm5, %v6640_v40, %v6641_v36 }
 0x3b2   : > { %v12393_v42 = vpop.f32.mrf.mxu3  ;;  %v5734_v26 = vpop.f32.mrf.mxu2 }
 0x3b6   : > { %v5587_v51 = vpop.f32.mrf.mxu1 }
 0x3b7   : > { %v5733_v22 = vadd.f32 %v5732_v21, %v5587_v51  ;;  %6775 = vmatmul.bf16.gmra.mxu3 %v6687_v24  ;;  %6530 = vmatmul.bf16.gmra.mxu2 %v6438_v48  ;;  %v6430_v24 = vunpack.c.l.b16 %v6375_v13  ;;  %v9598_v21 = vld [vmem:[%s12757_s2 + $0x200] sm:$0xff]  ;;  %v6688_v51 = vpack.c.b16 %v6678_v16, %v6677_v12  ;;  %v6429_v48 = vunpack.c.l.b16 %v6365_v7  ;;  %v9548_v12 = vld [vmem:[#allocation3 + $0x54] sm:$0xff] }
 0x3b8   : > { %7577 = vmatpush.bf16.msra.mxu2 %v9598_v21  ;;  %v6680_v13 = vunpack.c.l.b16 %v6642_v10  ;;  %v6679_v7 = vunpack.c.l.b16 %v6639_v3  ;;  %v7009_v21 = vld [vmem:[#allocation3 + $0x20] sm:$0x1] }
 0x3b9   : > { %6147 = vmatmul.bf16.gmra.mxu1 %v9546_v34  ;;  %v6392_v34 = vrot.slane %v6390_v53, 4  ;;  %v6439_v54 = vpack.c.b16 %v6430_v24, %v6429_v48  ;;  %v7008_v53 = vld [vmem:[#allocation3 + $0x1c] sm:$0xf]  ;;  %v6645_v24 = vrot.slane %v12407_v0, 5  ;;  %v7007_v0 = vld [vmem:[#allocation3 + $0x18] sm:$0xf] }
 0x3ba   : > { %v5958_v38 = vpop.f32.mrf.mxu3  ;;  %v7419_v48 = vrot.slane %v7008_v53, 5  ;;  %v7035_v10 = vshll.u32 %v7007_v0, 16  ;;  %v7045_v3 = vshrl.u32 %v7008_v53, 16 }
 0x3bb   : > { %v12403_v19 = vadd.f32 %v5958_v38, %v5733_v22  ;;  %v6388_v22 = vrot.slane %v6386_v62, 5  ;;  %v6647_v14 = vrot.slane %v6645_v24, 4 }
 0x3bd   : > { %v6393_v38 = vor.u32 %v6392_v34, %v6388_v22  ;;  %v6389_v57 = vsel %vm9969_vm4, %v6384_v60, %v6388_v22  ;;  %v7385_v22 = vld [vmem:[#allocation3 + $0x18] sm:$0xe]  ;;  %v6649_v63 = vsel %vm9983_vm5, %v6647_v14, %v6648_v30  ;;  %v7032_v60 = vshrl.u32 %v7007_v0, 16  ;;  %v7012_v30 = vld [vmem:[#allocation3 + $0x2c] sm:$0x1] }
 0x3be   : > { %v5589_v32 = vpop.f32.mrf.mxu1  ;;  %v6431_v62 = vunpack.c.l.b16 %v6389_v57  ;;  %v9299_v17 = vrot.slane %v7385_v22, 9 }
 0x3bf   : > { %v5735_v33 = vadd.f32 %v5734_v26, %v5589_v32  ;;  %v6394_v32 = vrot.slane %v6393_v38, 4 }
 0x3c0   : > { %v7420_v40 = vsel %vm9983_vm5, %v9299_v17, %v7419_v48 }
 0x3c1   : > { %v6399_v52 = vsel %vm9969_vm4, %v6394_v32, %v6398_v41  ;;  %v6682_v41 = vunpack.c.l.b16 %v6649_v63  ;;  %v7386_v63 = vld [vmem:[#allocation3 + $0x24] sm:$0xe] }
 0x3c2   : > { %v5960_v50 = vpop.f32.mrf.mxu3  ;;  %v6432_v26 = vunpack.c.l.b16 %v6399_v52  ;;  %v7041_v52 = vshll.u32 %v7008_v53, 16 }
 0x3c3   : > { %v12417_v1 = vadd.f32 %v5960_v50, %v5735_v33  ;;  %v5737_v43 = vpop.f32.mrf.mxu2  ;;  %v6689_v33 = vpack.c.b16 %v6680_v13, %v6679_v7 }
 0x3c4   : > { %v6440_v5 = vpack.c.b16 %v6432_v26, %v6431_v62  ;;  %v7034_v62 = vrot.slane %v7032_v60, 4  ;;  %v7010_v60 = vld [vmem:[#allocation3 + $0x24] sm:$0xf] }
 0x3c7   : > { %6780 = vmatmul.bf16.gmra.mxu3 %v6688_v51  ;;  %6535 = vmatmul.bf16.gmra.mxu2 %v6439_v54  ;;  %v6569_v51 = vld [vmem:[#allocation3 + $0x60] sm:$0xe] }
 0x3c8   : > { %v9122_v6 = vrot.slane %v6569_v51, 9 }
 0x3c9   : > { %6152 = vmatmul.bf16.gmra.mxu1 %v9547_v46  ;;  %v7422_v46 = vrot.slane %v7009_v21, 5 }
 0x3ca   : > { %v6646_v15 = vsel %vm9983_vm5, %v9122_v6, %v6645_v24  ;;  %v7011_v24 = vld [vmem:[#allocation3 + $0x28] sm:$0xf] }
 0x3cb   : > { %v5739_v16 = vpop.f32.mrf.mxu2  ;;  %v6681_v26 = vunpack.c.l.b16 %v6646_v15  ;;  %v7426_v53 = vrot.slane %v7011_v24, 5 }
 0x3cd   : > { %v6690_v7 = vpack.c.b16 %v6682_v41, %v6681_v26  ;;  %v7428_v0 = vrot.slane %v7426_v53, 4  ;;  %v9300_v41 = vrot.slane %v7386_v63, 9  ;;  %v7069_v26 = vshrl.u32 %v7011_v24, 16 }
 0x3d6   : > { %v5592_v8 = vpop.f32.mrf.mxu1 }
 0x3d7   : > { %v5738_v50 = vadd.f32 %v5737_v43, %v5592_v8  ;;  %6785 = vmatmul.bf16.gmra.mxu3 %v6689_v33  ;;  %6540 = vmatmul.bf16.gmra.mxu2 %v6440_v5  ;;  %v7421_v43 = vrot.slane %v7419_v48, 4  ;;  %v7037_v5 = vrot.slane %v7035_v10, 5  ;;  %v9549_v48 = vld [vmem:[#allocation3 + $0x60] sm:$0xff] }
 0x3d9   : > { %6157 = vmatmul.bf16.gmra.mxu1 %v9548_v12  ;;  %v7423_v31 = vsel %vm9983_vm5, %v7421_v43, %v7422_v46  ;;  %v7047_v12 = vrot.slane %v7045_v3, 4  ;;  %v7038_v46 = vor.u32 %v7037_v5, %v7034_v62  ;;  %v7429_v43 = vrot.slane %v7012_v30, 5  ;;  %v9581_v5 = vld [vmem:[#allocation3 + $0x6c] sm:$0xff] }
 0x3da   : > { %v5963_v20 = vpop.f32.mrf.mxu3  ;;  %v5742_v54 = vpop.f32.mrf.mxu2  ;;  %v7491_v2 = vunpack.c.l.b16 %v7423_v31  ;;  %v7065_v3 = vshll.u32 %v7011_v24, 16  ;;  %v7056_v62 = vshrl.u32 %v7010_v60, 16 }
 0x3db   : > { %v12436_v34 = vadd.f32 %v5963_v20, %v5738_v50  ;;  %v7043_v50 = vrot.slane %v7041_v52, 5  ;;  %v7051_v20 = vshll.u32 %v7009_v21, 16  ;;  %v7039_v31 = vrot.slane %v7038_v46, 4 }
 0x3dc   : > { %v7430_v21 = vsel %vm9983_vm5, %v7428_v0, %v7429_v43  ;;  %v7075_v43 = vshll.u32 %v7012_v30, 16 }
 0x3dd   : > { %v7048_v6 = vor.u32 %v7047_v12, %v7043_v50  ;;  %v7044_v10 = vsel %vm9969_vm4, %v7039_v31, %v7043_v50  ;;  %v7493_v52 = vunpack.c.l.b16 %v7430_v21  ;;  %v7387_v31 = vld [vmem:[#allocation3 + $0x30] sm:$0xe] }
 0x3de   : > { %v5594_v38 = vpop.f32.mrf.mxu1  ;;  %v7240_v12 = vunpack.c.l.b16 %v7044_v10 }
 0x3df   : > { %v5740_v36 = vadd.f32 %v5739_v16, %v5594_v38  ;;  %v7490_v16 = vunpack.c.l.b16 %v7420_v40  ;;  %v7053_v38 = vrot.slane %v7051_v20, 5  ;;  %v7067_v20 = vrot.slane %v7065_v3, 5  ;;  %v7013_v3 = vld [vmem:[#allocation3 + $0x30] sm:$0xf] }
 0x3e1   : > { %v7506_v8 = vpack.c.b16 %v7491_v2, %v7490_v16 }
 0x3e2   : > { %v5965_v32 = vpop.f32.mrf.mxu3  ;;  %v5744_v57 = vpop.f32.mrf.mxu2 }
 0x3e3   : > { %v12446_v13 = vadd.f32 %v5965_v32, %v5740_v36  ;;  %v7427_v32 = vsel %vm9983_vm5, %v9300_v41, %v7426_v53  ;;  %v7071_v53 = vrot.slane %v7069_v26, 4 }
 0x3e6   : > { %v5597_v33 = vpop.f32.mrf.mxu1 }
 0x3e7   : > { %v5743_v51 = vadd.f32 %v5742_v54, %v5597_v33  ;;  %6790 = vmatmul.bf16.gmra.mxu3 %v6690_v7  ;;  %7578 = vmatmul.bf16.vlgmr.msra.gmra.mxu2 %v7506_v8  ;;  %v7049_v54 = vrot.slane %v7048_v6, 4  ;;  %v7059_v33 = vshll.u32 %v7010_v60, 16  ;;  %v7492_v8 = vunpack.c.l.b16 %v7427_v32 }
 0x3e8   : > { %v7058_v6 = vrot.slane %v7056_v62, 4  ;;  %v9301_v60 = vrot.slane %v7387_v31, 9 }
 0x3e9   : > { %6162 = vmatmul.bf16.gmra.mxu1 %v9549_v48  ;;  %v7054_v40 = vsel %vm9969_vm4, %v7049_v54, %v7053_v38  ;;  %v7507_v48 = vpack.c.b16 %v7493_v52, %v7492_v8  ;;  %v7061_v24 = vrot.slane %v7059_v33, 5  ;;  %v7015_v38 = vld [vmem:[#allocation3 + $0x38] sm:$0x1]  ;;  %v5710_v54 = vadd.f32 %v12055_v58, %v12058_v23 }
 0x3ea   : > { %v5968_v22 = vpop.f32.mrf.mxu3  ;;  %v6506_v17 = vpop.f32.mrf.mxu2  ;;  %v7241_v7 = vunpack.c.l.b16 %v7054_v40  ;;  %v7436_v21 = vrot.slane %v7015_v38, 5  ;;  %v7080_v33 = vshrl.u32 %v7013_v3, 16  ;;  %v7083_v8 = vshll.u32 %v7013_v3, 16 }
 0x3eb   : > { %v12448_v14 = vadd.f32 %v5968_v22, %v5743_v51  ;;  %v7014_v22 = vld [vmem:[#allocation3 + $0x34] sm:$0xf]  ;;  %v7062_v41 = vor.u32 %v7061_v24, %v7058_v6  ;;  %v5974_v40 = vadd.f32 %v12071_v29, %v5710_v54  ;;  %v7018_v54 = vld [vmem:[#allocation3 + $0x44] sm:$0x1] }
 0x3ec   : > { %v7256_v50 = vpack.c.b16 %v7241_v7, %v7240_v12  ;;  %v7433_v0 = vrot.slane %v7014_v22, 5  ;;  %v7089_v7 = vshll.u32 %v7014_v22, 16  ;;  %v7085_v24 = vrot.slane %v7083_v8, 5 }
 0x3ed   : > { %v7063_v52 = vrot.slane %v7062_v41, 4 }
 0x3ee   : > { %v5599_v36 = vpop.f32.mrf.mxu1  ;;  %v7435_v32 = vrot.slane %v7433_v0, 4  ;;  %v7434_v29 = vsel %vm9983_vm5, %v9301_v60, %v7433_v0  ;;  %v7099_v0 = vshll.u32 %v7015_v38, 16 }
 0x3ef   : > { %v5745_v15 = vadd.f32 %v5744_v57, %v5599_v36  ;;  %v7072_v36 = vor.u32 %v7071_v53, %v7067_v20  ;;  %v7068_v23 = vsel %vm9969_vm4, %v7063_v52, %v7067_v20 }
 0x3f0   : > { %v7242_v53 = vunpack.c.l.b16 %v7068_v23 }
 0x3f1   : > { %v7073_v30 = vrot.slane %v7072_v36, 4  ;;  %v7017_v36 = vld [vmem:[#allocation3 + $0x40] sm:$0xf] }
 0x3f2   : > { %v5970_v2 = vpop.f32.mrf.mxu3  ;;  %v6508_v57 = vpop.f32.mrf.mxu2 }
 0x3f3   : > { %v12458_v16 = vadd.f32 %v5970_v2, %v5745_v15 }
 0x3f6   : > { %v6128_v51 = vpop.f32.mrf.mxu1 }
 0x3f7   : > { %v6168_v46 = vadd.f32 %v6128_v51, %v12035_v39  ;;  %6985 = vmatmul.bf16.vlgmr.msra.gmra.mxu3 %v9581_v5  ;;  %7583 = vmatmul.bf16.gmra.mxu2 %v7507_v48  ;;  %v7077_v39 = vrot.slane %v7075_v43, 5  ;;  %v7093_v5 = vshrl.u32 %v7014_v22, 16  ;;  %v7494_v48 = vunpack.c.l.b16 %v7434_v29  ;;  %v7016_v29 = vld [vmem:[#allocation3 + $0x3c] sm:$0xf] }
 0x3f8   : > { %v7440_v22 = vrot.slane %v7017_v36, 5 }
 0x3f9   : > { %7328 = vmatmul.bf16.vlgmr.msra.gmra.mxu1 %v7256_v50  ;;  %v12461_v63 = vadd.f32 %v6506_v17, %v6168_v46  ;;  %v7437_v17 = vsel %vm9983_vm5, %v7435_v32, %v7436_v21  ;;  %v7078_v26 = vsel %vm9969_vm4, %v7073_v30, %v7077_v39  ;;  %v7091_v46 = vrot.slane %v7089_v7, 5  ;;  %v7388_v30 = vld [vmem:[#allocation3 + $0x3c] sm:$0xe] }
 0x3fa   : > { %v6511_v15 = vpop.f32.mrf.mxu2  ;;  %v7495_v62 = vunpack.c.l.b16 %v7437_v17  ;;  %v7243_v51 = vunpack.c.l.b16 %v7078_v26  ;;  %v7095_v43 = vrot.slane %v7093_v5, 4  ;;  %v7443_v32 = vrot.slane %v7018_v54, 5 }
 0x3fb   : > { %v9302_v26 = vrot.slane %v7388_v30, 9 }
 0x3fc   : > { %v7508_v6 = vpack.c.b16 %v7495_v62, %v7494_v48  ;;  %v7257_v31 = vpack.c.b16 %v7243_v51, %v7242_v53  ;;  %v7096_v39 = vor.u32 %v7095_v43, %v7091_v46  ;;  %v7113_v62 = vshll.u32 %v7017_v36, 16  ;;  %v7020_v43 = vld [vmem:[#allocation3 + $0x4c] sm:$0xf] }
 0x3fd   : > { %v7104_v51 = vshrl.u32 %v7016_v29, 16  ;;  %v7107_v48 = vshll.u32 %v7016_v29, 16 }
 0x3fe   : > { %v6130_v2 = vpop.f32.mrf.mxu1  ;;  %v7097_v38 = vrot.slane %v7096_v39, 4  ;;  %v7447_v39 = vrot.slane %v7020_v43, 5 }
 0x3ff   : > { %v6169_v10 = vadd.f32 %v6130_v2, %v5974_v40  ;;  %v5715_v40 = vadd.f32 %v12199_v55, %v12209_v4  ;;  %v7101_v2 = vrot.slane %v7099_v0, 5  ;;  %v7441_v4 = vsel %vm9983_vm5, %v9302_v26, %v7440_v22 }
 0x400   : > { %v7496_v53 = vunpack.c.l.b16 %v7441_v4  ;;  %v7106_v0 = vrot.slane %v7104_v51, 4  ;;  %v7137_v4 = vshll.u32 %v7020_v43, 16 }
 0x401   : > { %v12470_v58 = vadd.f32 %v6508_v57, %v6169_v10  ;;  %v7082_v57 = vrot.slane %v7080_v33, 4  ;;  %v5976_v10 = vadd.f32 %v12234_v28, %v5715_v40  ;;  %v7102_v23 = vsel %vm9969_vm4, %v7097_v38, %v7101_v2 }
 0x402   : > { %v6513_v12 = vpop.f32.mrf.mxu2  ;;  %v7117_v33 = vshrl.u32 %v7017_v36, 16  ;;  %v7245_v5 = vunpack.c.l.b16 %v7102_v23  ;;  %v5720_v2 = vadd.f32 %v12283_v45, %v12285_v9  ;;  %v7449_v38 = vrot.slane %v7447_v39, 4  ;;  %v7019_v23 = vld [vmem:[#allocation3 + $0x48] sm:$0xf] }
 0x403   : > { %v7086_v21 = vor.u32 %v7085_v24, %v7082_v57  ;;  %v7115_v24 = vrot.slane %v7113_v62, 5  ;;  %v7131_v62 = vshll.u32 %v7019_v23, 16 }
 0x405   : > { %v7087_v17 = vrot.slane %v7086_v21, 4  ;;  %v7021_v21 = vld [vmem:[#allocation3 + $0x50] sm:$0x1] }
 0x406   : > { %v6133_v50 = vpop.f32.mrf.mxu1 }
 0x407   : > { %v6170_v20 = vadd.f32 %v6133_v50, %v12120_v47  ;;  %7588 = vmatmul.bf16.gmra.mxu2 %v7508_v6  ;;  %v7442_v47 = vrot.slane %v7440_v22, 4  ;;  %v7092_v28 = vsel %vm9969_vm4, %v7087_v17, %v7091_v46  ;;  %v7109_v22 = vrot.slane %v7107_v48, 5 }
 0x408   : > { %v7244_v50 = vunpack.c.l.b16 %v7092_v28  ;;  %v7123_v46 = vshll.u32 %v7018_v54, 16 }
 0x409   : > { %7333 = vmatmul.bf16.gmra.mxu1 %v7257_v31  ;;  %v12477_v41 = vadd.f32 %v6511_v15, %v6170_v20  ;;  %v7444_v15 = vsel %vm9983_vm5, %v7442_v47, %v7443_v32  ;;  %v7389_v32 = vld [vmem:[#allocation3 + $0x48] sm:$0xe]  ;;  %v7450_v47 = vrot.slane %v7021_v21, 5 }
 0x40a   : > { %v6516_v60 = vpop.f32.mrf.mxu2  ;;  %v7497_v7 = vunpack.c.l.b16 %v7444_v15  ;;  %v7258_v31 = vpack.c.b16 %v7245_v5, %v7244_v50  ;;  %v9303_v17 = vrot.slane %v7389_v32, 9  ;;  %v7139_v50 = vrot.slane %v7137_v4, 5 }
 0x40c   : > { %v7509_v57 = vpack.c.b16 %v7497_v7, %v7496_v53  ;;  %v7128_v7 = vshrl.u32 %v7019_v23, 16 }
 0x40e   : > { %v6135_v52 = vpop.f32.mrf.mxu1 }
 0x40f   : > { %v6171_v3 = vadd.f32 %v6135_v52, %v5976_v10  ;;  %v7110_v10 = vor.u32 %v7109_v22, %v7106_v0  ;;  %v7125_v52 = vrot.slane %v7123_v46, 5  ;;  %v7147_v22 = vshll.u32 %v7021_v21, 16  ;;  %v7024_v46 = vld [vmem:[#allocation3 + $0x5c] sm:$0x1] }
 0x411   : > { %v12486_v55 = vadd.f32 %v6513_v12, %v6171_v3  ;;  %v7119_v12 = vrot.slane %v7117_v33, 4  ;;  %v7111_v15 = vrot.slane %v7110_v10, 4  ;;  %v7141_v33 = vshrl.u32 %v7020_v43, 16 }
 0x412   : > { %v6518_v8 = vpop.f32.mrf.mxu2 }
 0x413   : > { %v7120_v40 = vor.u32 %v7119_v12, %v7115_v24  ;;  %v7116_v9 = vsel %vm9969_vm4, %v7111_v15, %v7115_v24  ;;  %v7133_v12 = vrot.slane %v7131_v62, 5 }
 0x414   : > { %v7246_v53 = vunpack.c.l.b16 %v7116_v9 }
 0x415   : > { %v7121_v54 = vrot.slane %v7120_v40, 4 }
 0x416   : > { %v6138_v6 = vpop.f32.mrf.mxu1 }
 0x417   : > { %v6172_v20 = vadd.f32 %v6138_v6, %v12272_v44  ;;  %7593 = vmatmul.bf16.gmra.mxu2 %v7509_v57  ;;  %v5978_v44 = vadd.f32 %v12303_v35, %v5720_v2  ;;  %v7126_v29 = vsel %vm9969_vm4, %v7121_v54, %v7125_v52  ;;  %v7448_v35 = vsel %vm9983_vm5, %v9303_v17, %v7447_v39 }
 0x418   : > { %v7247_v51 = vunpack.c.l.b16 %v7126_v29  ;;  %v7498_v48 = vunpack.c.l.b16 %v7448_v35  ;;  %v5725_v2 = vadd.f32 %v12343_v37, %v12347_v61  ;;  %v7149_v52 = vrot.slane %v7147_v22, 5 }
 0x419   : > { %7338 = vmatmul.bf16.gmra.mxu1 %v7258_v31  ;;  %v12493_v36 = vadd.f32 %v6516_v60, %v6172_v20  ;;  %v7451_v60 = vsel %vm9983_vm5, %v7449_v38, %v7450_v47  ;;  %v7143_v20 = vrot.slane %v7141_v33, 4  ;;  %v7023_v31 = vld [vmem:[#allocation3 + $0x58] sm:$0xf]  ;;  %v7457_v47 = vrot.slane %v7024_v46, 5 }
 0x41a   : > { %v6521_v30 = vpop.f32.mrf.mxu2  ;;  %v7499_v28 = vunpack.c.l.b16 %v7451_v60  ;;  %v7259_v0 = vpack.c.b16 %v7247_v51, %v7246_v53  ;;  %v7454_v43 = vrot.slane %v7023_v31, 5  ;;  %v5980_v17 = vadd.f32 %v12359_v25, %v5725_v2  ;;  %v7022_v60 = vld [vmem:[#allocation3 + $0x54] sm:$0xf] }
 0x41b   : > { %v7144_v32 = vor.u32 %v7143_v20, %v7139_v50  ;;  %v7161_v29 = vshll.u32 %v7023_v31, 16  ;;  %v7165_v9 = vshrl.u32 %v7023_v31, 16 }
 0x41c   : > { %v7510_v57 = vpack.c.b16 %v7499_v28, %v7498_v48  ;;  %v7152_v28 = vshrl.u32 %v7022_v60, 16 }
 0x41d   : > { %v7145_v21 = vrot.slane %v7144_v32, 4  ;;  %v7163_v53 = vrot.slane %v7161_v29, 5 }
 0x41e   : > { %v6140_v3 = vpop.f32.mrf.mxu1 }
 0x41f   : > { %v6173_v26 = vadd.f32 %v6140_v3, %v5978_v44  ;;  %v7390_v44 = vld [vmem:[#allocation3 + $0x54] sm:$0xe]  ;;  %v7150_v15 = vsel %vm9969_vm4, %v7145_v21, %v7149_v52  ;;  %v7025_v21 = vld [vmem:[#allocation3 + $0x60] sm:$0xf] }
 0x420   : > { %v7249_v4 = vunpack.c.l.b16 %v7150_v15 }
 0x421   : > { %v12502_v45 = vadd.f32 %v6518_v8, %v6173_v26  ;;  %v7130_v8 = vrot.slane %v7128_v7, 4  ;;  %v9304_v26 = vrot.slane %v7390_v44, 9  ;;  %v7155_v7 = vshll.u32 %v7022_v60, 16 }
 0x422   : > { %v6523_v5 = vpop.f32.mrf.mxu2  ;;  %v7176_v60 = vshrl.u32 %v7025_v21, 16 }
 0x423   : > { %v7134_v40 = vor.u32 %v7133_v12, %v7130_v8  ;;  %v7455_v61 = vsel %vm9983_vm5, %v9304_v26, %v7454_v43  ;;  %v7154_v12 = vrot.slane %v7152_v28, 4  ;;  %v7157_v20 = vrot.slane %v7155_v7, 5 }
 0x424   : > { %v7500_v62 = vunpack.c.l.b16 %v7455_v61  ;;  %v7179_v61 = vshll.u32 %v7025_v21, 16 }
 0x425   : > { %v7135_v3 = vrot.slane %v7134_v40, 4  ;;  %v5730_v40 = vadd.f32 %v12377_v27, %v12379_v18  ;;  %v7158_v2 = vor.u32 %v7157_v20, %v7154_v12 }
 0x426   : > { %v6143_v6 = vpop.f32.mrf.mxu1 }
 0x427   : > { %v6174_v24 = vadd.f32 %v6143_v6, %v12318_v11  ;;  %7598 = vmatmul.bf16.gmra.mxu2 %v7510_v57  ;;  %v7456_v11 = vrot.slane %v7454_v43, 4  ;;  %v7140_v25 = vsel %vm9969_vm4, %v7135_v3, %v7139_v50  ;;  %v7026_v6 = vld [vmem:[#allocation3 + $0x64] sm:$0xf]  ;;  %v7171_v50 = vshll.u32 %v7024_v46, 16  ;;  %v7391_v43 = vld [vmem:[#allocation3 + $0x60] sm:$0xe] }
 0x428   : > { %v7248_v33 = vunpack.c.l.b16 %v7140_v25  ;;  %v9305_v44 = vrot.slane %v7391_v43, 9  ;;  %v7159_v3 = vrot.slane %v7158_v2, 4  ;;  %v7189_v25 = vshrl.u32 %v7026_v6, 16  ;;  %v7392_v2 = vld [vmem:[#allocation3 + $0x6c] sm:$0xe] }
 0x429   : > { %7343 = vmatmul.bf16.gmra.mxu1 %v7259_v0  ;;  %v12509_v39 = vadd.f32 %v6521_v30, %v6174_v24  ;;  %v7458_v30 = vsel %vm9983_vm5, %v7456_v11, %v7457_v47  ;;  %v7027_v24 = vld [vmem:[#allocation3 + $0x68] sm:$0x1]  ;;  %v7461_v0 = vrot.slane %v7026_v6, 5  ;;  %v7173_v52 = vrot.slane %v7171_v50, 5 }
 0x42a   : > { %v6526_v10 = vpop.f32.mrf.mxu2  ;;  %v7501_v23 = vunpack.c.l.b16 %v7458_v30  ;;  %v7260_v8 = vpack.c.b16 %v7249_v4, %v7248_v33  ;;  %v7464_v47 = vrot.slane %v7027_v24, 5  ;;  %v7185_v30 = vshll.u32 %v7026_v6, 16 }
 0x42b   : > { %v7462_v26 = vsel %vm9983_vm5, %v9305_v44, %v7461_v0  ;;  %v7181_v33 = vrot.slane %v7179_v61, 5 }
 0x42c   : > { %v7511_v48 = vpack.c.b16 %v7501_v23, %v7500_v62  ;;  %v7187_v28 = vrot.slane %v7185_v30, 5 }
 0x42e   : > { %v6145_v38 = vpop.f32.mrf.mxu1 }
 0x42f   : > { %v6175_v54 = vadd.f32 %v6145_v38, %v5980_v17  ;;  %v7463_v17 = vrot.slane %v7461_v0, 4 }
 0x431   : > { %v12518_v37 = vadd.f32 %v6523_v5, %v6175_v54  ;;  %v7167_v5 = vrot.slane %v7165_v9, 4  ;;  %v12532_v54 = vpop.f32.mrf.mxu3  ;;  %v7502_v9 = vunpack.c.l.b16 %v7462_v26 }
 0x432   : > { %v6528_v35 = vpop.f32.mrf.mxu2 }
 0x433   : > { %v7168_v22 = vor.u32 %v7167_v5, %v7163_v53 }
 0x435   : > { %v7169_v46 = vrot.slane %v7168_v22, 4 }
 0x436   : > { %v6148_v51 = vpop.f32.mrf.mxu1 }
 0x437   : > { %v6176_v57 = vadd.f32 %v6148_v51, %v12372_v56  ;;  %7603 = vmatmul.bf16.gmra.mxu2 %v7511_v48  ;;  %v5982_v56 = vadd.f32 %v12393_v42, %v5730_v40  ;;  %v7174_v27 = vsel %vm9969_vm4, %v7169_v46, %v7173_v52  ;;  %v7164_v42 = vsel %vm9969_vm4, %v7159_v3, %v7163_v53  ;;  %v7029_v48 = vld [vmem:[#allocation3 + $0x70] sm:$0xf] }
 0x438   : > { %v7251_v29 = vunpack.c.l.b16 %v7174_v27  ;;  %v7250_v4 = vunpack.c.l.b16 %v7164_v42  ;;  %v7191_v51 = vrot.slane %v7189_v25, 4  ;;  %v7468_v6 = vrot.slane %v7029_v48, 5 }
 0x439   : > { %7348 = vmatmul.bf16.gmra.mxu1 %v7260_v8  ;;  %v12525_v31 = vadd.f32 %v6526_v10, %v6176_v57  ;;  %v7465_v10 = vsel %vm9983_vm5, %v7463_v17, %v7464_v47  ;;  %v7195_v57 = vshll.u32 %v7027_v24, 16  ;;  %v7030_v8 = vld [vmem:[#allocation3 + $0x74] sm:$0x1]  ;;  %v12545_v20 = vpop.f32.mrf.mxu3  ;;  %v9306_v24 = vrot.slane %v7392_v2, 9 }
 0x43a   : > { %v6531_v32 = vpop.f32.mrf.mxu2  ;;  %v7503_v15 = vunpack.c.l.b16 %v7465_v10  ;;  %v7261_v5 = vpack.c.b16 %v7251_v29, %v7250_v4  ;;  %v7192_v0 = vor.u32 %v7191_v51, %v7187_v28  ;;  %v7471_v43 = vrot.slane %v7030_v8, 5 }
 0x43b   : > { %v7197_v40 = vrot.slane %v7195_v57, 5  ;;  %v7470_v47 = vrot.slane %v7468_v6, 4  ;;  %v7469_v46 = vsel %vm9983_vm5, %v9306_v24, %v7468_v6  ;;  %v7209_v21 = vshll.u32 %v7029_v48, 16 }
 0x43c   : > { %v7512_v62 = vpack.c.b16 %v7503_v15, %v7502_v9  ;;  %v7213_v27 = vshrl.u32 %v7029_v48, 16  ;;  %v7504_v30 = vunpack.c.l.b16 %v7469_v46 }
 0x43d   : > { %v7211_v29 = vrot.slane %v7209_v21, 5 }
 0x43e   : > { %v6150_v11 = vpop.f32.mrf.mxu1  ;;  %v7215_v9 = vrot.slane %v7213_v27, 4 }
 0x43f   : > { %v6177_v38 = vadd.f32 %v6150_v11, %v5982_v56 }
 0x440   : > { %v7216_v51 = vor.u32 %v7215_v9, %v7211_v29 }
 0x441   : > { %v12536_v18 = vadd.f32 %v6528_v35, %v6177_v38  ;;  %v7178_v35 = vrot.slane %v7176_v60, 4  ;;  %v7028_v38 = vld [vmem:[#allocation3 + $0x6c] sm:$0xf]  ;;  %v12558_v26 = vpop.f32.mrf.mxu3 }
 0x442   : > { %v6533_v23 = vpop.f32.mrf.mxu2  ;;  %v7200_v15 = vshrl.u32 %v7028_v38, 16  ;;  %v7203_v60 = vshll.u32 %v7028_v38, 16  ;;  %v6796_v38 = vadd.f32 %v12532_v54, %v12461_v63  ;;  %v12591_v63 = vld [vmem:[%s12758_s3 + $0x2] ss:$0 sm:$0xff] }
 0x443   : > { %v7182_v50 = vor.u32 %v7181_v33, %v7178_v35  ;;  %v7219_v35 = vshll.u32 %v7030_v8, 16 }
 0x445   : > { %v7183_v56 = vrot.slane %v7182_v50, 4  ;;  %v7217_v50 = vrot.slane %v7216_v51, 4 }
 0x446   : > { %v6153_v7 = vpop.f32.mrf.mxu1 }
 0x447   : > { %v6178_v53 = vadd.f32 %v6153_v7, %v12403_v19  ;;  %7608 = vmatmul.bf16.gmra.mxu2 %v7512_v62  ;;  %v7193_v19 = vrot.slane %v7192_v0, 4  ;;  %v7188_v3 = vsel %vm9969_vm4, %v7183_v56, %v7187_v28  ;;  %v7202_v28 = vrot.slane %v7200_v15, 4  ;;  %v6951_v0 = vpop.f32.mrf.mxu0 }
 0x448   : > { %v7252_v61 = vunpack.c.l.b16 %v7188_v3  ;;  %v7205_v62 = vrot.slane %v7203_v60, 5  ;;  %v6991_v15 = vadd.f32 %v6951_v0, %v6796_v38 }
 0x449   : > { %7353 = vmatmul.bf16.gmra.mxu1 %v7261_v5  ;;  %v12543_v12 = vadd.f32 %v6531_v32, %v6178_v53  ;;  %v7472_v32 = vsel %vm9983_vm5, %v7470_v47, %v7471_v43  ;;  %v7198_v17 = vsel %vm9969_vm4, %v7193_v19, %v7197_v40  ;;  %v7221_v5 = vrot.slane %v7219_v35, 5  ;;  %v12563_v57 = vpop.f32.mrf.mxu3 }
 0x44a   : > { %v6536_v22 = vpop.f32.mrf.mxu2  ;;  %v7505_v10 = vunpack.c.l.b16 %v7472_v32  ;;  %v7253_v42 = vunpack.c.l.b16 %v7198_v17  ;;  %v7206_v53 = vor.u32 %v7205_v62, %v7202_v28  ;;  %v6799_v38 = vadd.f32 %v12563_v57, %v12486_v55 }
 0x44b   : > { %v7222_v40 = vsel %vm9969_vm4, %v7217_v50, %v7221_v5  ;;  %v6798_v50 = vadd.f32 %v12558_v26, %v12477_v41 }
 0x44c   : > { %v7262_v7 = vpack.c.b16 %v7253_v42, %v7252_v61  ;;  %v7255_v47 = vunpack.c.l.b16 %v7222_v40  ;;  %v6797_v61 = vadd.f32 %v12545_v20, %v12470_v58  ;;  %v9359_v40 = vld [vmem:[%s9915_s26 + $0x34] sm:$0xf] }
 0x44e   : > { %v6155_v52 = vpop.f32.mrf.mxu1 }
 0x44f   : > { %v6179_v44 = vadd.f32 %v6155_v52, %v12417_v1  ;;  %v6953_v24 = vpop.f32.mrf.mxu0 }
 0x450   : > { %v6992_v20 = vadd.f32 %v6953_v24, %v6797_v61 }
 0x451   : > { %v12552_v11 = vadd.f32 %v6533_v23, %v6179_v44  ;;  %v7513_v23 = vpack.c.b16 %v7505_v10, %v7504_v30  ;;  %v9356_v10 = vld [vmem:[%s9915_s26 + $0x24] sm:$0xf] }
 0x452   : > { %v6538_v1 = vpop.f32.mrf.mxu2  ;;  %v7721_v30 = vrot.slane %v9356_v10, 5 }
 0x454   : > { %v7723_v62 = vrot.slane %v7721_v30, 4 }
 0x456   : > { %v6158_v25 = vpop.f32.mrf.mxu1 }
 0x457   : > { %v6180_v4 = vadd.f32 %v6158_v25, %v12436_v34  ;;  %7613 = vmatmul.bf16.gmra.mxu2 %v7513_v23  ;;  %v7207_v34 = vrot.slane %v7206_v53, 4  ;;  %v6956_v27 = vpop.f32.mrf.mxu0  ;;  %v12600_v23 = vld [vmem:[%s12758_s3 + $0x3] ss:$0 sm:$0xff] }
 0x459   : > { %7358 = vmatmul.bf16.gmra.mxu1 %v7262_v7  ;;  %v12561_v33 = vadd.f32 %v6536_v22, %v6180_v4  ;;  %v7212_v22 = vsel %vm9969_vm4, %v7207_v34, %v7211_v29  ;;  %v9357_v29 = vld [vmem:[%s9915_s26 + $0x28] sm:$0x1]  ;;  %v9358_v34 = vld [vmem:[%s9915_s26 + $0x30] sm:$0xe] }
 0x45a   : > { %v6541_v48 = vpop.f32.mrf.mxu2  ;;  %v7254_v52 = vunpack.c.l.b16 %v7212_v22  ;;  %v7724_v35 = vrot.slane %v9357_v29, 5 }
 0x45c   : > { %v7263_v44 = vpack.c.b16 %v7255_v47, %v7254_v52  ;;  %v9380_v52 = vrot.slane %v9358_v34, 9 }
 0x45e   : > { %v6160_v6 = vpop.f32.mrf.mxu1 }
 0x45f   : > { %v6181_v43 = vadd.f32 %v6160_v6, %v12446_v13  ;;  %v12573_v13 = vpop.f32.mrf.mxu3  ;;  %v6958_v51 = vpop.f32.mrf.mxu0  ;;  %v7725_v6 = vsel %vm9983_vm5, %v7723_v62, %v7724_v35  ;;  %v9361_v35 = vld [vmem:[%s9915_s26 + $0x40] sm:$0xe] }
 0x461   : > { %v12568_v8 = vadd.f32 %v6538_v1, %v6181_v43 }
 0x462   : > { %v6543_v2 = vpop.f32.mrf.mxu2 }
 0x466   : > { %v6163_v56 = vpop.f32.mrf.mxu1 }
 0x467   : > { %v6182_v19 = vadd.f32 %v6163_v56, %v12448_v14  ;;  %v9355_v14 = vld [vmem:[%s9915_s26 + $0x20] sm:$0xe]  ;;  %v12585_v21 = vpop.f32.mrf.mxu3  ;;  %v7728_v56 = vrot.slane %v9359_v40, 5  ;;  %v6961_v41 = vpop.f32.mrf.mxu0 }
 0x468   : > { %v9379_v42 = vrot.slane %v9355_v14, 9 }
 0x469   : > { %7363 = vmatmul.bf16.gmra.mxu1 %v7263_v44  ;;  %v12575_v32 = vadd.f32 %v6541_v48, %v6182_v19  ;;  %v6993_v44 = vadd.f32 %v6956_v27, %v6798_v50 }
 0x46a   : > { %v7579_v17 = vpop.f32.mrf.mxu2  ;;  %v7722_v54 = vsel %vm9983_vm5, %v9379_v42, %v7721_v30 }
 0x46b   : > { %v7791_v4 = vunpack.c.l.bf16 %v7722_v54  ;;  %v6994_v54 = vadd.f32 %v6958_v51, %v6799_v38 }
 0x46e   : > { %v6165_v46 = vpop.f32.mrf.mxu1 }
 0x46f   : > { %v6183_v49 = vadd.f32 %v6165_v46, %v12458_v16  ;;  %v12604_v28 = vpop.f32.mrf.mxu3 }
 0x471   : > { %v12581_v3 = vadd.f32 %v6543_v2, %v6183_v49  ;;  %v7792_v2 = vunpack.c.l.bf16 %v7725_v6  ;;  %v7729_v49 = vsel %vm9983_vm5, %v9380_v52, %v7728_v56 }
 0x472   : > { %v7581_v1 = vpop.f32.mrf.mxu2  ;;  %v7793_v27 = vunpack.c.l.bf16 %v7729_v49 }
 0x476   : > { %v7329_v60 = vpop.f32.mrf.mxu1 }
 0x477   : > { %v7369_v16 = vadd.f32 %v7329_v60, %v6991_v15  ;;  %v12621_v24 = vpop.f32.mrf.mxu3  ;;  %v7730_v15 = vrot.slane %v7728_v56, 4 }
 0x479   : > { %v7619_v25 = vadd.f32 %v7579_v17, %v7369_v16 }
 0x47a   : > { %v7584_v7 = vpop.f32.mrf.mxu2 }
 0x47b   : > { %v7637_v9 = vmul.f32 %v12591_v63, %v7619_v25 }
 0x47d   : > { %v7655_v58 = vadd.f32 %v12600_v23, %v7637_v9  ;;  %v6963_v9 = vpop.f32.mrf.mxu0 }
 0x47e   : > { %v7331_v48 = vpop.f32.mrf.mxu1 }
 0x47f   : > { %v7807_v53 = vadd.f32 %v7791_v4, %v7655_v58  ;;  %v7370_v5 = vadd.f32 %v7331_v48, %v6992_v20  ;;  %v12631_v55 = vpop.f32.mrf.mxu3  ;;  %v6800_v4 = vadd.f32 %v12573_v13, %v12493_v36  ;;  %v9362_v58 = vld [vmem:[%s9915_s26 + $0x44] sm:$0xf]  ;;  %v6801_v13 = vadd.f32 %v12585_v21, %v12502_v45 }
 0x481   : > { %v7823_v0 = vmax.f32 %v7807_v53, 0.0  ;;  %v7620_v43 = vadd.f32 %v7581_v1, %v7370_v5  ;;  %v9360_v1 = vld [vmem:[%s9915_s26 + $0x38] sm:$0x1]  ;;  %v9381_v53 = vrot.slane %v9361_v35, 9  ;;  %v7735_v5 = vrot.slane %v9362_v58, 5 }
 0x482   : > { %v7586_v47 = vpop.f32.mrf.mxu2  ;;  %v7731_v60 = vrot.slane %v9360_v1, 5  ;;  %v6995_v50 = vadd.f32 %v6961_v41, %v6800_v4  ;;  %v9366_v58 = vld [vmem:[%s9915_s26 + $0x58] sm:$0x1] }
 0x483   : > { %7839 = vst [vmem:[%s12610_s29] sm:$0xff] %v7823_v0  ;;  %v7638_v22 = vmul.f32 %v12591_v63, %v7620_v43  ;;  %v7736_v36 = vsel %vm9983_vm5, %v9381_v53, %v7735_v5 }
 0x484   : > { %v7732_v57 = vsel %vm9983_vm5, %v7730_v15, %v7731_v60 }
 0x485   : > { %v7656_v19 = vadd.f32 %v12600_v23, %v7638_v22  ;;  %v7794_v20 = vunpack.c.l.bf16 %v7732_v57  ;;  %v6966_v52 = vpop.f32.mrf.mxu0 }
 0x486   : > { %v7334_v17 = vpop.f32.mrf.mxu1 }
 0x487   : > { %v7808_v26 = vadd.f32 %v7792_v2, %v7656_v19  ;;  %v7371_v46 = vadd.f32 %v7334_v17, %v6993_v44  ;;  %v9363_v2 = vld [vmem:[%s9915_s26 + $0x48] sm:$0x1]  ;;  %v7795_v19 = vunpack.c.l.bf16 %v7736_v36  ;;  %v7737_v17 = vrot.slane %v7735_v5, 4 }
 0x488   : > { %v7738_v41 = vrot.slane %v9363_v2, 5  ;;  %v7745_v5 = vrot.slane %v9366_v58, 5  ;;  %v9367_v2 = vld [vmem:[%s9915_s26 + $0x60] sm:$0xe] }
 0x489   : > { %v7824_v14 = vmax.f32 %v7808_v26, 0.0  ;;  %v7621_v10 = vadd.f32 %v7584_v7, %v7371_v46  ;;  %v6996_v46 = vadd.f32 %v6963_v9, %v6801_v13  ;;  %v6804_v13 = vadd.f32 %v12631_v55, %v12525_v31 }
 0x48a   : > { %v7589_v30 = vpop.f32.mrf.mxu2  ;;  %v7739_v38 = vsel %vm9983_vm5, %v7737_v17, %v7738_v41  ;;  %v9383_v17 = vrot.slane %v9367_v2, 9 }
 0x48b   : > { %7840 = vst [vmem:[%s12610_s29 + $0x8] sm:$0xff] %v7824_v14  ;;  %v7639_v42 = vmul.f32 %v12591_v63, %v7621_v10  ;;  %v6802_v14 = vadd.f32 %v12604_v28, %v12509_v39  ;;  %v7796_v15 = vunpack.c.l.bf16 %v7739_v38 }
 0x48d   : > { %v7657_v16 = vadd.f32 %v12600_v23, %v7639_v42  ;;  %v9364_v42 = vld [vmem:[%s9915_s26 + $0x50] sm:$0xe]  ;;  %v6997_v57 = vadd.f32 %v6966_v52, %v6802_v14  ;;  %v9368_v52 = vld [vmem:[%s9915_s26 + $0x64] sm:$0xf] }
 0x48e   : > { %v7336_v61 = vpop.f32.mrf.mxu1  ;;  %v7749_v41 = vrot.slane %v9368_v52, 5 }
 0x48f   : > { %v7809_v25 = vadd.f32 %v7793_v27, %v7657_v16  ;;  %v7372_v29 = vadd.f32 %v7336_v61, %v6994_v54  ;;  %v9365_v27 = vld [vmem:[%s9915_s26 + $0x54] sm:$0xf]  ;;  %v9382_v54 = vrot.slane %v9364_v42, 9  ;;  %v9369_v42 = vld [vmem:[%s9915_s26 + $0x68] sm:$0x1] }
 0x490   : > { %v7742_v61 = vrot.slane %v9365_v27, 5  ;;  %v7750_v38 = vsel %vm9983_vm5, %v9383_v17, %v7749_v41 }
 0x491   : > { %v7825_v7 = vmax.f32 %v7809_v25, 0.0  ;;  %v7622_v62 = vadd.f32 %v7586_v47, %v7372_v29  ;;  %v12647_v47 = vpop.f32.mrf.mxu3  ;;  %v6968_v25 = vpop.f32.mrf.mxu0 }
 0x492   : > { %v7591_v48 = vpop.f32.mrf.mxu2  ;;  %v7743_v4 = vsel %vm9983_vm5, %v9382_v54, %v7742_v61  ;;  %v7744_v53 = vrot.slane %v7742_v61, 4  ;;  %v6805_v14 = vadd.f32 %v12647_v47, %v12536_v18 }
 0x493   : > { %7841 = vst [vmem:[%s12610_s29 + $0x10] sm:$0xff] %v7825_v7  ;;  %v7640_v51 = vmul.f32 %v12591_v63, %v7622_v62  ;;  %v6803_v7 = vadd.f32 %v12621_v24, %v12518_v37 }
 0x494   : > { %v7746_v36 = vsel %vm9983_vm5, %v7744_v53, %v7745_v5 }
 0x495   : > { %v7658_v6 = vadd.f32 %v12600_v23, %v7640_v51 }
 0x496   : > { %v7339_v0 = vpop.f32.mrf.mxu1 }
 0x497   : > { %v7810_v43 = vadd.f32 %v7794_v20, %v7658_v6  ;;  %v7373_v34 = vadd.f32 %v7339_v0, %v6995_v50  ;;  %v7797_v20 = vunpack.c.l.bf16 %v7743_v4  ;;  %v6998_v0 = vadd.f32 %v6968_v25, %v6803_v7  ;;  %v9370_v7 = vld [vmem:[%s9915_s26 + $0x70] sm:$0xe] }
 0x499   : > { %v7826_v40 = vmax.f32 %v7810_v43, 0.0  ;;  %v7623_v22 = vadd.f32 %v7589_v30, %v7373_v34  ;;  %v12660_v16 = vpop.f32.mrf.mxu3  ;;  %v6971_v6 = vpop.f32.mrf.mxu0 }
 0x49a   : > { %v7594_v44 = vpop.f32.mrf.mxu2 }
 0x49b   : > { %7842 = vst [vmem:[%s12610_s29 + $0x18] sm:$0xff] %v7826_v40  ;;  %v7641_v56 = vmul.f32 %v12591_v63, %v7623_v22 }
 0x49d   : > { %v7659_v26 = vadd.f32 %v12600_v23, %v7641_v56 }
 0x49e   : > { %v7341_v45 = vpop.f32.mrf.mxu1 }
 0x49f   : > { %v7811_v21 = vadd.f32 %v7795_v19, %v7659_v26  ;;  %v7374_v49 = vadd.f32 %v7341_v45, %v6996_v46  ;;  %v7798_v19 = vunpack.c.l.bf16 %v7746_v36  ;;  %v6999_v46 = vadd.f32 %v6971_v6, %v6804_v13  ;;  %v9372_v36 = vld [vmem:[%s9915_s26 + $0x78] sm:$0x1] }
 0x4a1   : > { %v7827_v10 = vmax.f32 %v7811_v21, 0.0  ;;  %v7624_v1 = vadd.f32 %v7591_v48, %v7374_v49  ;;  %v6783_v43 = vpop.f32.mrf.mxu3  ;;  %v6973_v31 = vpop.f32.mrf.mxu0 }
 0x4a2   : > { %v7596_v60 = vpop.f32.mrf.mxu2  ;;  %v7000_v61 = vadd.f32 %v6973_v31, %v6805_v14 }
 0x4a3   : > { %7843 = vst [vmem:[%s12610_s29 + $0x20] sm:$0xff] %v7827_v10  ;;  %v7642_v30 = vmul.f32 %v12591_v63, %v7624_v1 }
 0x4a5   : > { %v7660_v29 = vadd.f32 %v12600_v23, %v7642_v30  ;;  %v7799_v30 = vunpack.c.l.bf16 %v7750_v38 }
 0x4a6   : > { %v7344_v39 = vpop.f32.mrf.mxu1 }
 0x4a7   : > { %v7812_v28 = vadd.f32 %v7796_v15, %v7660_v29  ;;  %v7375_v9 = vadd.f32 %v7344_v39, %v6997_v57  ;;  %v7751_v15 = vrot.slane %v7749_v41, 4 }
 0x4a9   : > { %v7828_v62 = vmax.f32 %v7812_v28, 0.0  ;;  %v7625_v35 = vadd.f32 %v7594_v44, %v7375_v9  ;;  %v6786_v55 = vpop.f32.mrf.mxu3  ;;  %v6976_v18 = vpop.f32.mrf.mxu0  ;;  %v6806_v28 = vadd.f32 %v12660_v16, %v12543_v12 }
 0x4aa   : > { %v7599_v48 = vpop.f32.mrf.mxu2 }
 0x4ab   : > { %7844 = vst [vmem:[%s12610_s29 + $0x28] sm:$0xff] %v7828_v62  ;;  %v7643_v51 = vmul.f32 %v12591_v63, %v7625_v35  ;;  %v9371_v62 = vld [vmem:[%s9915_s26 + $0x74] sm:$0xf]  ;;  %v7001_v5 = vadd.f32 %v6976_v18, %v6806_v28 }
 0x4ad   : > { %v7661_v50 = vadd.f32 %v12600_v23, %v7643_v51 }
 0x4ae   : > { %v7346_v34 = vpop.f32.mrf.mxu1 }
 0x4af   : > { %v7813_v37 = vadd.f32 %v7797_v20, %v7661_v50  ;;  %v7376_v24 = vadd.f32 %v7346_v34, %v6998_v0  ;;  %v9384_v20 = vrot.slane %v9370_v7, 9  ;;  %v6807_v34 = vadd.f32 %v6783_v43, %v12552_v11 }
 0x4b1   : > { %v7829_v40 = vmax.f32 %v7813_v37, 0.0  ;;  %v7626_v22 = vadd.f32 %v7596_v60, %v7376_v24  ;;  %v7752_v60 = vrot.slane %v9369_v42, 5  ;;  %v6788_v35 = vpop.f32.mrf.mxu3  ;;  %v6978_v13 = vpop.f32.mrf.mxu0 }
 0x4b2   : > { %v7601_v44 = vpop.f32.mrf.mxu2 }
 0x4b3   : > { %7845 = vst [vmem:[%s12610_s29 + $0x30] sm:$0xff] %v7829_v40  ;;  %v7644_v56 = vmul.f32 %v12591_v63, %v7626_v22  ;;  %v7753_v47 = vsel %vm9983_vm5, %v7751_v15, %v7752_v60 }
 0x4b4   : > { %v7800_v51 = vunpack.c.l.bf16 %v7753_v47 }
 0x4b5   : > { %v7662_v26 = vadd.f32 %v12600_v23, %v7644_v56  ;;  %v7759_v56 = vrot.slane %v9372_v36, 5 }
 0x4b6   : > { %v7349_v45 = vpop.f32.mrf.mxu1 }
 0x4b7   : > { %v7814_v21 = vadd.f32 %v7798_v19, %v7662_v26  ;;  %v7377_v49 = vadd.f32 %v7349_v45, %v6999_v46  ;;  %v6808_v26 = vadd.f32 %v6786_v55, %v12561_v33 }
 0x4b9   : > { %v7830_v10 = vmax.f32 %v7814_v21, 0.0  ;;  %v7627_v1 = vadd.f32 %v7599_v48, %v7377_v49  ;;  %v7756_v48 = vrot.slane %v9371_v62, 5  ;;  %v6791_v2 = vpop.f32.mrf.mxu3  ;;  %v9373_v21 = vld [vmem:[%s9915_s26 + $0x80] sm:$0xe]  ;;  %v9374_v49 = vld [vmem:[%s9915_s26 + $0x84] sm:$0xf]  ;;  %v6981_v31 = vpop.f32.mrf.mxu0 }
 0x4ba   : > { %v7604_v25 = vpop.f32.mrf.mxu2  ;;  %v7763_v42 = vrot.slane %v9374_v49, 5 }
 0x4bb   : > { %7846 = vst [vmem:[%s12610_s29 + $0x38] sm:$0xff] %v7830_v10  ;;  %v7645_v27 = vmul.f32 %v12591_v63, %v7627_v1  ;;  %v7757_v16 = vsel %vm9983_vm5, %v9384_v20, %v7756_v48  ;;  %v7758_v52 = vrot.slane %v7756_v48, 4  ;;  %v9385_v1 = vrot.slane %v9373_v21, 9 }
 0x4bc   : > { %v7801_v22 = vunpack.c.l.bf16 %v7757_v16 }
 0x4bd   : > { %v7663_v54 = vadd.f32 %v12600_v23, %v7645_v27  ;;  %v7760_v43 = vsel %vm9983_vm5, %v7758_v52, %v7759_v56 }
 0x4be   : > { %v7351_v29 = vpop.f32.mrf.mxu1  ;;  %v7802_v10 = vunpack.c.l.bf16 %v7760_v43 }
 0x4bf   : > { %v7815_v57 = vadd.f32 %v7799_v30, %v7663_v54  ;;  %v7378_v39 = vadd.f32 %v7351_v29, %v7000_v61  ;;  %v7003_v30 = vadd.f32 %v6981_v31, %v6808_v26  ;;  %v7764_v54 = vsel %vm9983_vm5, %v9385_v1, %v7763_v42 }
 0x4c0   : > { %v6809_v61 = vadd.f32 %v6788_v35, %v12568_v8  ;;  %v7803_v18 = vunpack.c.l.bf16 %v7764_v54 }
 0x4c1   : > { %v7831_v9 = vmax.f32 %v7815_v57, 0.0  ;;  %v7628_v4 = vadd.f32 %v7601_v44, %v7378_v39  ;;  %v7002_v44 = vadd.f32 %v6978_v13, %v6807_v34  ;;  %v6793_v15 = vpop.f32.mrf.mxu3  ;;  %v9375_v57 = vld [vmem:[%s9915_s26 + $0x88] sm:$0x1]  ;;  %v6983_v47 = vpop.f32.mrf.mxu0 }
 0x4c2   : > { %v7606_v12 = vpop.f32.mrf.mxu2  ;;  %v7004_v62 = vadd.f32 %v6983_v47, %v6809_v61 }
 0x4c3   : > { %7847 = vst [vmem:[%s12610_s29 + $0x40] sm:$0xff] %v7831_v9  ;;  %v7646_v58 = vmul.f32 %v12591_v63, %v7628_v4  ;;  %v7765_v9 = vrot.slane %v7763_v42, 4  ;;  %v7766_v4 = vrot.slane %v9375_v57, 5 }
 0x4c5   : > { %v7664_v53 = vadd.f32 %v12600_v23, %v7646_v58  ;;  %v7767_v20 = vsel %vm9983_vm5, %v7765_v9, %v7766_v4 }
 0x4c6   : > { %v7354_v6 = vpop.f32.mrf.mxu1 }
 0x4c7   : > { %v7816_v50 = vadd.f32 %v7800_v51, %v7664_v53  ;;  %v7379_v0 = vadd.f32 %v7354_v6, %v7001_v5  ;;  %v9376_v5 = vld [vmem:[%s9915_s26 + $0x90] sm:$0xe]  ;;  %v9377_v6 = vld [vmem:[%s9915_s26 + $0x94] sm:$0xf] }
 0x4c8   : > { %v9386_v16 = vrot.slane %v9376_v5, 9  ;;  %v7770_v34 = vrot.slane %v9377_v6, 5 }
 0x4c9   : > { %v7832_v37 = vmax.f32 %v7816_v50, 0.0  ;;  %v7629_v24 = vadd.f32 %v7604_v25, %v7379_v0  ;;  %v6986_v35 = vpop.f32.mrf.mxu3  ;;  %v6810_v50 = vadd.f32 %v6791_v2, %v12575_v32  ;;  %v9378_v32 = vld [vmem:[%s9915_s26 + $0x98] sm:$0x1] }
 0x4ca   : > { %v7609_v38 = vpop.f32.mrf.mxu2  ;;  %v7771_v52 = vsel %vm9983_vm5, %v9386_v16, %v7770_v34  ;;  %v7773_v43 = vrot.slane %v9378_v32, 5 }
 0x4cb   : > { %7848 = vst [vmem:[%s12610_s29 + $0x48] sm:$0xff] %v7832_v37  ;;  %v7647_v40 = vmul.f32 %v12591_v63, %v7629_v24  ;;  %v7005_v37 = vadd.f32 %v6986_v35, %v6810_v50 }
 0x4cd   : > { %v7665_v19 = vadd.f32 %v12600_v23, %v7647_v40 }
 0x4ce   : > { %v7356_v17 = vpop.f32.mrf.mxu1 }
 0x4cf   : > { %v7817_v41 = vadd.f32 %v7801_v22, %v7665_v19  ;;  %v7380_v11 = vadd.f32 %v7356_v17, %v7002_v44  ;;  %v6811_v44 = vadd.f32 %v6793_v15, %v12581_v3 }
 0x4d1   : > { %v7833_v46 = vmax.f32 %v7817_v41, 0.0  ;;  %v7630_v45 = vadd.f32 %v7606_v12, %v7380_v11  ;;  %v7804_v12 = vunpack.c.l.bf16 %v7767_v20  ;;  %v6988_v2 = vpop.f32.mrf.mxu3  ;;  %v7805_v41 = vunpack.c.l.bf16 %v7771_v52 }
 0x4d2   : > { %v7611_v28 = vpop.f32.mrf.mxu2  ;;  %v7772_v11 = vrot.slane %v7770_v34, 4  ;;  %v7006_v26 = vadd.f32 %v6988_v2, %v6811_v44 }
 0x4d3   : > { %7849 = vst [vmem:[%s12610_s29 + $0x50] sm:$0xff] %v7833_v46  ;;  %v7648_v14 = vmul.f32 %v12591_v63, %v7630_v45 }
 0x4d5   : > { %v7666_v27 = vadd.f32 %v12600_v23, %v7648_v14 }
 0x4d6   : > { %v7359_v60 = vpop.f32.mrf.mxu1 }
 0x4d7   : > { %v7818_v33 = vadd.f32 %v7802_v10, %v7666_v27  ;;  %v7381_v55 = vadd.f32 %v7359_v60, %v7003_v30 }
 0x4d9   : > { %v7834_v25 = vmax.f32 %v7818_v33, 0.0  ;;  %v7631_v29 = vadd.f32 %v7609_v38, %v7381_v55  ;;  %v7774_v38 = vsel %vm9983_vm5, %v7772_v11, %v7773_v43 }
 0x4da   : > { %v7614_v36 = vpop.f32.mrf.mxu2  ;;  %v7806_v1 = vunpack.c.l.bf16 %v7774_v38 }
 0x4db   : > { %7850 = vst [vmem:[%s12610_s29 + $0x58] sm:$0xff] %v7834_v25  ;;  %v7649_v39 = vmul.f32 %v12591_v63, %v7631_v29 }
 0x4dd   : > { %v7667_v7 = vadd.f32 %v12600_v23, %v7649_v39 }
 0x4de   : > { %v7361_v58 = vpop.f32.mrf.mxu1 }
 0x4df   : > { %v7819_v51 = vadd.f32 %v7803_v18, %v7667_v7  ;;  %v7382_v8 = vadd.f32 %v7361_v58, %v7004_v62 }
 0x4e1   : > { %v7835_v48 = vmax.f32 %v7819_v51, 0.0  ;;  %v7632_v53 = vadd.f32 %v7611_v28, %v7382_v8 }
 0x4e2   : > { %v7616_v31 = vpop.f32.mrf.mxu2 }
 0x4e3   : > { %7851 = vst [vmem:[%s12610_s29 + $0x60] sm:$0xff] %v7835_v48  ;;  %v7650_v0 = vmul.f32 %v12591_v63, %v7632_v53 }
 0x4e5   : > { %v7668_v24 = vadd.f32 %v12600_v23, %v7650_v0 }
 0x4e6   : > { %v7364_v13 = vpop.f32.mrf.mxu1 }
 0x4e7   : > { %v7820_v40 = vadd.f32 %v7804_v12, %v7668_v24  ;;  %v7383_v22 = vadd.f32 %v7364_v13, %v7005_v37 }
 0x4e9   : > { %v7836_v56 = vmax.f32 %v7820_v40, 0.0  ;;  %v7633_v19 = vadd.f32 %v7614_v36, %v7383_v22 }
 0x4eb   : > { %7852 = vst [vmem:[%s12610_s29 + $0x68] sm:$0xff] %v7836_v56  ;;  %v7651_v17 = vmul.f32 %v12591_v63, %v7633_v19 }
 0x4ed   : > { %v7669_v46 = vadd.f32 %v12600_v23, %v7651_v17 }
 0x4ee   : > { %v7366_v45 = vpop.f32.mrf.mxu1 }
 0x4ef   : > { %v7821_v21 = vadd.f32 %v7805_v41, %v7669_v46  ;;  %v7384_v49 = vadd.f32 %v7366_v45, %v7006_v26 }
 0x4f1   : > { %v7837_v14 = vmax.f32 %v7821_v21, 0.0  ;;  %v7634_v10 = vadd.f32 %v7616_v31, %v7384_v49 }
 0x4f3   : > { %7853 = vst [vmem:[%s12610_s29 + $0x70] sm:$0xff] %v7837_v14  ;;  %v7652_v3 = vmul.f32 %v12591_v63, %v7634_v10 }
 0x4f5   : > { %v7670_v42 = vadd.f32 %v12600_v23, %v7652_v3 }
 0x4f7   : > { %v7822_v27 = vadd.f32 %v7806_v1, %v7670_v42 }
 0x4f9   : > { %v7838_v30 = vmax.f32 %v7822_v27, 0.0 }
 0x4fb   : > { %7854 = vst [vmem:[%s12610_s29 + $0x78] sm:$0xff] %v7838_v30 }
 0x4fc PF: > { %s14_s19 = sadd.s32 1, %s9814_s19   ;;  %s12872_s15 = smov %s9806_s17 }
 0x4fd   : > { %p11_p7 = scmp.ge.s32.totalorder %s14_s19, 6   ;;  %s12873_s16 = smov %s9810_s18 }
 0x4fe   : > { %s12874_s17 = smov %s12877_s20  ;;  %s12875_s18 = smov %s12881_s21 }
 0x4ff   :  { %13 = sbr.rel (!%p11_p7) target bundleno = 3 (0x3), region = 87 }

</bundles_post_ra>
